<compile_context>
chip_gen: v6e
topology: v6e:2x2x1
jax: 0.10.0
libtpu: 0.0.40
codegen_flags: <defaults>
</compile_context>

<pallas_src>
import functools

import jax
import jax.numpy as jnp
from jax import lax
from jax.experimental import pallas as pl
from jax.experimental.pallas import tpu as pltpu


_VMEM_LIMIT = 48 * 1024 * 1024        # explicit budget; leaves headroom on v7x (64 MiB)


# ----------------------------------------------------------------------------
# tiling helpers
# ----------------------------------------------------------------------------
def _pick_tile(dim, preferred, align):
    """Largest tile <= preferred that divides dim and is a multiple of align,
    falling back to the full dimension (always a legal block)."""
    if dim <= preferred:
        return dim
    t = (preferred // align) * align
    while t >= align:
        if dim % t == 0:
            return t
        t -= align
    return dim


def _pick_time_tile(T, target=16):
    t = min(target, T)
    while T % t != 0:
        t -= 1
    return t


# ----------------------------------------------------------------------------
# fused multi-input tiled matmul:  out = (sum_k x_k @ w_k) + bias
# ----------------------------------------------------------------------------
def _fused_matmul_bias_kernel(*refs, n_pairs):
    xw = refs[: 2 * n_pairs]
    b_ref = refs[2 * n_pairs]
    o_ref = refs[2 * n_pairs + 1]
    acc = jnp.dot(xw[0][...], xw[1][...], preferred_element_type=jnp.float32)
    for k in range(1, n_pairs):
        acc = acc + jnp.dot(xw[2 * k][...], xw[2 * k + 1][...],
                            preferred_element_type=jnp.float32)
    o_ref[...] = (acc + b_ref[...]).astype(o_ref.dtype)


def fused_matmul_bias(pairs, bias, *, out_dtype=jnp.float32,
                      tm_target=256, tn_target=512):
    """pairs: list of (x_k (M, K_k), w_k (K_k, N)); bias: (1, N) -> (M, N).

    Operands are cast to bf16 (MXU-native), accumulation is f32.  Tiled over
    (M, N), both grid axes parallel; each K_k is kept whole per block."""
    M = pairs[0][0].shape[0]
    N = pairs[0][1].shape[1]
    tm = _pick_tile(M, tm_target, 16)       # 16-row align: bf16 sublane packing
    tn = _pick_tile(N, tn_target, 128)
    grid = (M // tm, N // tn)

    in_specs, args = [], []
    for x, w in pairs:
        K = x.shape[1]
        in_specs.append(pl.BlockSpec((tm, K), lambda m, n: (m, 0)))
        in_specs.append(pl.BlockSpec((K, tn), lambda m, n: (0, n)))
        args.extend([x.astype(jnp.bfloat16), w.astype(jnp.bfloat16)])
    in_specs.append(pl.BlockSpec((1, tn), lambda m, n: (0, n)))
    args.append(bias.astype(jnp.float32))

    kernel = functools.partial(_fused_matmul_bias_kernel, n_pairs=len(pairs))
    return pl.pallas_call(
        kernel,
        out_shape=jax.ShapeDtypeStruct((M, N), out_dtype),
        grid=grid,
        in_specs=in_specs,
        out_specs=pl.BlockSpec((tm, tn), lambda m, n: (m, n)),
        compiler_params=pltpu.CompilerParams(
            dimension_semantics=("parallel", "parallel"),
            vmem_limit_bytes=_VMEM_LIMIT),
    )(*args)


# ----------------------------------------------------------------------------
# fused bidirectional LSTM recurrence (both directions, one dot per timestep)
# ----------------------------------------------------------------------------
def _bilstm_recurrence_kernel(gxf_ref, gxb_ref, mf_ref, mb_ref, wbd_ref,
                              of_ref, ob_ref, h_ref, c_ref, *, time_tile, H):
    @pl.when(pl.program_id(0) == 0)
    def _():
        h_ref[...] = jnp.zeros_like(h_ref)
        c_ref[...] = jnp.zeros_like(c_ref)

    wbd = wbd_ref[...]                      # (2H, 8H) bf16 block-diagonal, hoisted

    def cell_dir(g4, c_d, m, keep):
        # g4: (B, 4H) pre-activations, gate order [i | f | o | g]
        s = jax.nn.sigmoid(g4[:, : 3 * H])          # one contiguous sigmoid slab
        g = jnp.tanh(g4[:, 3 * H:])
        i = s[:, :H]
        f = s[:, H:2 * H]
        o = s[:, 2 * H:3 * H]
        c_new = f * c_d + i * g
        h_new = o * jnp.tanh(c_new)
        h_out = m * h_new                           # pad_packed_sequence zero-pads
        c_keep = m * c_new + keep * c_d             # freeze state past length
        return h_out, c_keep

    def body(j, carry):
        jb = time_tile - 1 - j
        h = h_ref[...]                              # (B, 2H) = [h_fwd | h_bwd]
        c = c_ref[...]
        # single fused recurrence dot (block-diagonal W_hh), f32 accumulate
        gh = jnp.dot(h.astype(jnp.bfloat16), wbd,
                     preferred_element_type=jnp.float32)         # (B, 8H)
        mf = mf_ref[j]
        mb = mb_ref[jb]
        keep_f = 1.0 - mf
        keep_b = 1.0 - mb
        gf = gxf_ref[j].astype(jnp.float32) + gh[:, : 4 * H]      # (B, 4H)
        gb = gxb_ref[jb].astype(jnp.float32) + gh[:, 4 * H:]
        hf_out, cf_new = cell_dir(gf, c[:, :H], mf, keep_f)
        hb_out, cb_new = cell_dir(gb, c[:, H:], mb, keep_b)
        of_ref[j] = hf_out.astype(of_ref.dtype)
        ob_ref[jb] = hb_out.astype(ob_ref.dtype)
        h_ref[...] = jnp.concatenate(
            [hf_out + keep_f * h[:, :H], hb_out + keep_b * h[:, H:]], axis=1)
        c_ref[...] = jnp.concatenate([cf_new, cb_new], axis=1)
        return carry

    lax.fori_loop(0, time_tile, body, 0, unroll=True)


def bilstm_recurrence(gx, mask3, w_bd, H, time_tile):
    """gx: (T, B, 8H) bf16 fused x-gates [fwd i,f,o,g | bwd i,f,o,g];
    mask3: (T, B, 1) f32; w_bd: (2H, 8H) bf16 block-diagonal W_hh.
    Returns (out_fwd, out_bwd), each (T, B, H) bf16."""
    T, B, G8 = gx.shape
    assert G8 == 8 * H
    assert (4 * H) % 128 == 0, "hidden_dim must be a multiple of 32"
    assert T % time_tile == 0
    nT = T // time_tile

    kernel = functools.partial(_bilstm_recurrence_kernel,
                               time_tile=time_tile, H=H)
    return pl.pallas_call(
        kernel,
        out_shape=(jax.ShapeDtypeStruct((T, B, H), jnp.bfloat16),
                   jax.ShapeDtypeStruct((T, B, H), jnp.bfloat16)),
        grid=(nT,),
        in_specs=[
            # fwd gates: time block i, first 4H lanes of the 8H axis
            pl.BlockSpec((time_tile, B, 4 * H), lambda i: (i, 0, 0)),
            # bwd gates: time block nT-1-i, second 4H lanes
            pl.BlockSpec((time_tile, B, 4 * H), lambda i: (nT - 1 - i, 0, 1)),
            pl.BlockSpec((time_tile, B, 1), lambda i: (i, 0, 0)),
            pl.BlockSpec((time_tile, B, 1), lambda i: (nT - 1 - i, 0, 0)),
            pl.BlockSpec((2 * H, 8 * H), lambda i: (0, 0)),
        ],
        out_specs=(
            pl.BlockSpec((time_tile, B, H), lambda i: (i, 0, 0)),
            pl.BlockSpec((time_tile, B, H), lambda i: (nT - 1 - i, 0, 0)),
        ),
        scratch_shapes=[pltpu.VMEM((B, 2 * H), jnp.float32),   # [h_fwd | h_bwd]
                        pltpu.VMEM((B, 2 * H), jnp.float32)],  # [c_fwd | c_bwd]
        compiler_params=pltpu.CompilerParams(
            dimension_semantics=("arbitrary",),
            vmem_limit_bytes=_VMEM_LIMIT),
    )(gx, gx, mask3, mask3, w_bd)


# ----------------------------------------------------------------------------
# length-masked softmax attention + Linear + Sigmoid head (fully fused, VPU/XLU)
# ----------------------------------------------------------------------------
def _attention_head_kernel(*refs, n_comps):
    comp_refs = refs[:n_comps]
    m_ref, w_ref, b_ref, o_ref = refs[n_comps:n_comps + 4]
    w = w_ref[...].astype(jnp.float32)                 # (2, A): [w_att; w_out]
    score = None
    val = None
    off = 0
    for r in comp_refs:
        x = r[...].astype(jnp.float32)                 # (T, B, K)
        k = x.shape[-1]
        wa = w[0:1, off:off + k][:, None, :]           # (1, 1, K)
        wo = w[1:2, off:off + k][:, None, :]
        s_k = jnp.sum(x * wa, axis=-1)                 # (T, B) lane reduce
        v_k = jnp.sum(x * wo, axis=-1)
        score = s_k if score is None else score + s_k
        val = v_k if val is None else val + v_k
        off += k
    m = m_ref[...]                                     # (T, B)
    score = jnp.where(m > 0.0, score, jnp.float32(-1e30))      # mask padding
    mx = jnp.max(score, axis=0, keepdims=True)                 # (1, B)
    e = jnp.exp(score - mx) * m                                # hard-zero pads
    den = jnp.maximum(jnp.sum(e, axis=0, keepdims=True), jnp.float32(1e-20))
    wgt = e / den                                              # softmax over T
    ctx = jnp.sum(wgt * val, axis=0, keepdims=True)            # (1, B)
    o_ref[...] = jax.nn.sigmoid(ctx + b_ref[...])


def attention_output_head(comps, mask2, w_att, w_out, b_out):
    """comps: list of (T, B, K_k) time-major features in torch.cat order.
    Returns sigmoid(attention(concat(comps)) @ w_out + b) of shape (B,)."""
    T, B = comps[0].shape[:2]
    A = sum(c.shape[-1] for c in comps)
    assert w_att.shape == (A,)
    # TODO(synk): only output_dim == 1 (the module default) is fused here.
    assert w_out.shape == (A, 1)
    w_head = jnp.stack([w_att, w_out[:, 0]], axis=0).astype(jnp.float32)  # (2, A)
    b = jnp.reshape(b_out, (1, 1)).astype(jnp.float32)

    in_specs = ([pl.BlockSpec(c.shape, lambda i: (0, 0, 0)) for c in comps]
                + [pl.BlockSpec((T, B), lambda i: (0, 0)),
                   pl.BlockSpec((2, A), lambda i: (0, 0)),
                   pl.BlockSpec((1, 1), lambda i: (0, 0))])
    kernel = functools.partial(_attention_head_kernel, n_comps=len(comps))
    out = pl.pallas_call(
        kernel,
        out_shape=jax.ShapeDtypeStruct((1, B), jnp.float32),
        grid=(1,),
        in_specs=in_specs,
        out_specs=pl.BlockSpec((1, B), lambda i: (0, 0)),
        compiler_params=pltpu.CompilerParams(
            dimension_semantics=("arbitrary",),
            vmem_limit_bytes=_VMEM_LIMIT),
    )(*comps, mask2, w_head, b)
    return out[0]                                      # (B,)


# ----------------------------------------------------------------------------
# weight packing (plain JAX, done once)
# ----------------------------------------------------------------------------
def _reorder_ifgo_to_ifog(w):
    """torch nn.LSTM packs gate rows as [i, f, g, o]; kernel wants [i, f, o, g]."""
    H = w.shape[0] // 4
    return jnp.concatenate([w[: 2 * H], w[3 * H:], w[2 * H: 3 * H]], axis=0)


def pack_bilstm_weights(layer_params, H):
    """-> (w_in (K, 8H) bf16, bias (1, 8H) f32, w_bd (2H, 8H) bf16)."""
    Wf, Whf, bif, bhf = layer_params["fwd"]
    Wb, Whb, bib, bhb = layer_params["bwd"]
    wi_f = _reorder_ifgo_to_ifog(Wf).T                 # (K, 4H) cols [i,f,o,g]
    wi_b = _reorder_ifgo_to_ifog(Wb).T
    w_in = jnp.concatenate([wi_f, wi_b], axis=1)       # (K, 8H) = [fwd | bwd]
    bias = jnp.concatenate([_reorder_ifgo_to_ifog(bif + bhf),
                            _reorder_ifgo_to_ifog(bib + bhb)])[None, :]
    wh_f = _reorder_ifgo_to_ifog(Whf).T                # (H, 4H)
    wh_b = _reorder_ifgo_to_ifog(Whb).T
    z = jnp.zeros((H, 4 * H), jnp.float32)
    w_bd = jnp.concatenate(                            # block-diagonal (2H, 8H)
        [jnp.concatenate([wh_f, z], axis=1),
         jnp.concatenate([z, wh_b], axis=1)], axis=0)
    return (w_in.astype(jnp.bfloat16), bias.astype(jnp.float32),
            w_bd.astype(jnp.bfloat16))


def bidir_lstm_layer(inputs, mask3, layer_params, H, time_tile):
    """inputs: list of time-major (T, B, K_k) arrays whose feature concat is the
    layer input (the concat is never materialized in HBM)."""
    T, B = inputs[0].shape[:2]
    w_in, bias, w_bd = pack_bilstm_weights(layer_params, H)
    pairs, off = [], 0
    for x in inputs:
        k = x.shape[-1]
        pairs.append((x.reshape(T * B, k), w_in[off:off + k, :]))
        off += k
    gx = fused_matmul_bias(pairs, bias, out_dtype=jnp.bfloat16)
    gx = gx.reshape(T, B, 8 * H)                       # lane-dense, bf16
    return bilstm_recurrence(gx, mask3, w_bd, H, time_tile)


def init_lstm_params(key, input_dim, H):
    scale = 1.0 / float(H) ** 0.5
    out = {}
    for direction in ("fwd", "bwd"):
        key, k1, k2, k3, k4 = jax.random.split(key, 5)
        out[direction] = (
            jax.random.uniform(k1, (4 * H, input_dim), jnp.float32, -scale, scale),
            jax.random.uniform(k2, (4 * H, H), jnp.float32, -scale, scale),
            jax.random.uniform(k3, (4 * H,), jnp.float32, -scale, scale),
            jax.random.uniform(k4, (4 * H,), jnp.float32, -scale, scale),
        )
    return out, key


def init_model_params(key, embedding_dim, hidden_dim, output_dim=1):
    A = hidden_dim * 4 + embedding_dim
    lstm1, key = init_lstm_params(key, embedding_dim, hidden_dim)
    lstm2, key = init_lstm_params(key, 2 * hidden_dim, hidden_dim)
    key, k1, k2, k3 = jax.random.split(key, 4)
    scale = 1.0 / float(A) ** 0.5
    return dict(
        lstm1=lstm1, lstm2=lstm2,
        w_att=jax.random.uniform(k1, (A,), jnp.float32, -0.1, 0.1),
        w_out=jax.random.uniform(k2, (A, output_dim), jnp.float32, -scale, scale),
        b_out=jax.random.uniform(k3, (1, output_dim), jnp.float32, -scale, scale),
    )


def lstm_model_forward(params, embeddings, embeddings_lengths, hidden_dim,
                       time_tile_target=16):
    H = hidden_dim
    B, T, E = embeddings.shape
    time_tile = _pick_time_tile(T, time_tile_target)

    # dropout_1(p=0) -> identity; single transpose to time-major for the pipeline
    emb_tm = jnp.transpose(embeddings, (1, 0, 2))                    # (T, B, E)
    mask2 = (jnp.arange(T, dtype=jnp.int32)[:, None]
             < embeddings_lengths.astype(jnp.int32)[None, :]
             ).astype(jnp.float32)                                   # (T, B)
    mask3 = mask2[:, :, None]                                        # (T, B, 1)

    # lstm_1: E -> 2H (bidirectional), packed-sequence semantics via mask
    of1, ob1 = bidir_lstm_layer([emb_tm], mask3, params["lstm1"], H, time_tile)
    # lstm_2: 2H -> 2H, consuming [fwd | bwd] of layer 1 without an HBM concat
    of2, ob2 = bidir_lstm_layer([of1, ob1], mask3, params["lstm2"], H, time_tile)

    # attention + Linear + Sigmoid fused; feature order matches
    # torch.cat((lstm1_out, lstm2_out, embeddings), dim=2)
    probs = attention_output_head([of1, ob1, of2, ob2, emb_tm], mask2,
                                  params["w_att"], params["w_out"],
                                  params["b_out"])
    return probs                      # (B,), matches torch .squeeze() for O == 1


# ----------------------------------------------------------------------------
if __name__ == "__main__":
    B, T = 4, 16
    embedding_dim, hidden_dim = 64, 32      # 4H = 128 (lane-aligned), A = 192

    key = jax.random.PRNGKey(0)
    key, kx = jax.random.split(key)
    embeddings = jax.random.normal(kx, (B, T, embedding_dim), jnp.float32)
    # pack_padded_sequence expects decreasing lengths; max length == T
    embeddings_lengths = jnp.array([16, 13, 9, 4], dtype=jnp.int32)

    params = init_model_params(key, embedding_dim, hidden_dim)

    run = jax.jit(lambda p, e, l: lstm_model_forward(p, e, l, hidden_dim))
    out = jax.block_until_ready(run(params, embeddings, embeddings_lengths))

    assert out.shape == (B,), out.shape
    assert bool(jnp.all(jnp.isfinite(out)))
    assert bool(jnp.all((out >= 0.0) & (out <= 1.0)))
    print("KERNEL_OK")
</pallas_src>

<mosaic_0001>
module attributes {stable_mosaic.version = 11 : i64} {
  func.func @_fused_matmul_bias_kernel(%arg0: i32, %arg1: i32, %arg2: memref<64x64xbf16, #tpu.memory_space<vmem>>, %arg3: memref<64x256xbf16, #tpu.memory_space<vmem>>, %arg4: memref<1x256xf32, #tpu.memory_space<vmem>>, %arg5: memref<64x256xbf16, #tpu.memory_space<vmem>>) attributes {dimension_semantics = [#tpu.dimension_semantics<parallel>, #tpu.dimension_semantics<parallel>], iteration_bounds = array<i64: 1, 1>, scalar_prefetch = 0 : i64, scratch_operands = 0 : i64, tpu.core_type = #tpu.core_type<tc>, window_params = [{transform_indices = @transform_0, window_bounds = array<i64: 64, 64>}, {transform_indices = @transform_1, window_bounds = array<i64: 64, 256>}, {transform_indices = @transform_2, window_bounds = array<i64: 1, 256>}, {transform_indices = @transform_3, window_bounds = array<i64: 64, 256>}]} {
    %c0 = arith.constant 0 : index
    %c0_0 = arith.constant 0 : index
    %0 = vector.load %arg2[%c0, %c0_0] : memref<64x64xbf16, #tpu.memory_space<vmem>>, vector<64x64xbf16>
    %c0_1 = arith.constant 0 : index
    %c0_2 = arith.constant 0 : index
    %1 = vector.load %arg3[%c0_1, %c0_2] : memref<64x256xbf16, #tpu.memory_space<vmem>>, vector<64x256xbf16>
    %cst = arith.constant dense<0.000000e+00> : vector<64x256xf32>
    %2 = tpu.matmul %0, %1, %cst {dimension_numbers = #tpu.dot_dimension_numbers<[1], [0], [0], [1], [0, 0, 1, 1], [], []>} : vector<64x64xbf16>, vector<64x256xbf16>, vector<64x256xf32> -> vector<64x256xf32>
    %c0_3 = arith.constant 0 : index
    %c0_4 = arith.constant 0 : index
    %3 = vector.load %arg4[%c0_3, %c0_4] : memref<1x256xf32, #tpu.memory_space<vmem>>, vector<1x256xf32>
    %4 = vector.broadcast %3 : vector<1x256xf32> to vector<64x256xf32>
    %5 = arith.addf %2, %4 : vector<64x256xf32>
    %6 = arith.truncf %5 : vector<64x256xf32> to vector<64x256xbf16>
    %c0_5 = arith.constant 0 : index
    %c0_6 = arith.constant 0 : index
    %7 = vector.load %arg5[%c0_5, %c0_6] : memref<64x256xbf16, #tpu.memory_space<vmem>>, vector<64x256xbf16>
    tpu.vector_store %arg5[%c0_5, %c0_6], %6 {strides = array<i32>} : memref<64x256xbf16, #tpu.memory_space<vmem>>, vector<64x256xbf16>,
    return
  }
  func.func @transform_0(%arg0: i32, %arg1: i32) -> (i32, i32) {
    %c0_i32 = arith.constant 0 : i32
    %c0_i32_0 = arith.constant 0 : i32
    return %arg0, %c0_i32 : i32, i32
  }
  func.func @transform_1(%arg0: i32, %arg1: i32) -> (i32, i32) {
    %c0_i32 = arith.constant 0 : i32
    %c0_i32_0 = arith.constant 0 : i32
    return %c0_i32, %arg1 : i32, i32
  }
  func.func @transform_2(%arg0: i32, %arg1: i32) -> (i32, i32) {
    %c0_i32 = arith.constant 0 : i32
    %c0_i32_0 = arith.constant 0 : i32
    return %c0_i32, %arg1 : i32, i32
  }
  func.func @transform_3(%arg0: i32, %arg1: i32) -> (i32, i32) {
    %c0_i32 = arith.constant 0 : i32
    return %arg0, %arg1 : i32, i32
  }
}

module attributes {stable_mosaic.version = 11 : i64} {
  func.func @_fused_matmul_bias_kernel(%arg0: i32, %arg1: i32, %arg2: memref<64x32xbf16, #tpu.memory_space<vmem>>, %arg3: memref<32x256xbf16, #tpu.memory_space<vmem>>, %arg4: memref<64x32xbf16, #tpu.memory_space<vmem>>, %arg5: memref<32x256xbf16, #tpu.memory_space<vmem>>, %arg6: memref<1x256xf32, #tpu.memory_space<vmem>>, %arg7: memref<64x256xbf16, #tpu.memory_space<vmem>>) attributes {dimension_semantics = [#tpu.dimension_semantics<parallel>, #tpu.dimension_semantics<parallel>], iteration_bounds = array<i64: 1, 1>, scalar_prefetch = 0 : i64, scratch_operands = 0 : i64, tpu.core_type = #tpu.core_type<tc>, window_params = [{transform_indices = @transform_0, window_bounds = array<i64: 64, 32>}, {transform_indices = @transform_1, window_bounds = array<i64: 32, 256>}, {transform_indices = @transform_2, window_bounds = array<i64: 64, 32>}, {transform_indices = @transform_3, window_bounds = array<i64: 32, 256>}, {transform_indices = @transform_4, window_bounds = array<i64: 1, 256>}, {transform_indices = @transform_5, window_bounds = array<i64: 64, 256>}]} {
    %c0 = arith.constant 0 : index
    %c0_0 = arith.constant 0 : index
    %0 = vector.load %arg2[%c0, %c0_0] : memref<64x32xbf16, #tpu.memory_space<vmem>>, vector<64x32xbf16>
    %c0_1 = arith.constant 0 : index
    %c0_2 = arith.constant 0 : index
    %1 = vector.load %arg3[%c0_1, %c0_2] : memref<32x256xbf16, #tpu.memory_space<vmem>>, vector<32x256xbf16>
    %cst = arith.constant dense<0.000000e+00> : vector<64x256xf32>
    %2 = tpu.matmul %0, %1, %cst {dimension_numbers = #tpu.dot_dimension_numbers<[1], [0], [0], [1], [0, 0, 1, 1], [], []>} : vector<64x32xbf16>, vector<32x256xbf16>, vector<64x256xf32> -> vector<64x256xf32>
    %c0_3 = arith.constant 0 : index
    %c0_4 = arith.constant 0 : index
    %3 = vector.load %arg4[%c0_3, %c0_4] : memref<64x32xbf16, #tpu.memory_space<vmem>>, vector<64x32xbf16>
    %c0_5 = arith.constant 0 : index
    %c0_6 = arith.constant 0 : index
    %4 = vector.load %arg5[%c0_5, %c0_6] : memref<32x256xbf16, #tpu.memory_space<vmem>>, vector<32x256xbf16>
    %cst_7 = arith.constant dense<0.000000e+00> : vector<64x256xf32>
    %5 = tpu.matmul %3, %4, %cst_7 {dimension_numbers = #tpu.dot_dimension_numbers<[1], [0], [0], [1], [0, 0, 1, 1], [], []>} : vector<64x32xbf16>, vector<32x256xbf16>, vector<64x256xf32> -> vector<64x256xf32>
    %6 = arith.addf %2, %5 : vector<64x256xf32>
    %c0_8 = arith.constant 0 : index
    %c0_9 = arith.constant 0 : index
    %7 = vector.load %arg6[%c0_8, %c0_9] : memref<1x256xf32, #tpu.memory_space<vmem>>, vector<1x256xf32>
    %8 = vector.broadcast %7 : vector<1x256xf32> to vector<64x256xf32>
    %9 = arith.addf %6, %8 : vector<64x256xf32>
    %10 = arith.truncf %9 : vector<64x256xf32> to vector<64x256xbf16>
    %c0_10 = arith.constant 0 : index
    %c0_11 = arith.constant 0 : index
    %11 = vector.load %arg7[%c0_10, %c0_11] : memref<64x256xbf16, #tpu.memory_space<vmem>>, vector<64x256xbf16>
    tpu.vector_store %arg7[%c0_10, %c0_11], %10 {strides = array<i32>} : memref<64x256xbf16, #tpu.memory_space<vmem>>, vector<64x256xbf16>,
    return
  }
  func.func @transform_0(%arg0: i32, %arg1: i32) -> (i32, i32) {
    %c0_i32 = arith.constant 0 : i32
    %c0_i32_0 = arith.constant 0 : i32
    return %arg0, %c0_i32 : i32, i32
  }
  func.func @transform_1(%arg0: i32, %arg1: i32) -> (i32, i32) {
    %c0_i32 = arith.constant 0 : i32
    %c0_i32_0 = arith.constant 0 : i32
    return %c0_i32, %arg1 : i32, i32
  }
  func.func @transform_2(%arg0: i32, %arg1: i32) -> (i32, i32) {
    %c0_i32 = arith.constant 0 : i32
    %c0_i32_0 = arith.constant 0 : i32
    return %arg0, %c0_i32 : i32, i32
  }
  func.func @transform_3(%arg0: i32, %arg1: i32) -> (i32, i32) {
    %c0_i32 = arith.constant 0 : i32
    %c0_i32_0 = arith.constant 0 : i32
    return %c0_i32, %arg1 : i32, i32
  }
  func.func @transform_4(%arg0: i32, %arg1: i32) -> (i32, i32) {
    %c0_i32 = arith.constant 0 : i32
    %c0_i32_0 = arith.constant 0 : i32
    return %c0_i32, %arg1 : i32, i32
  }
  func.func @transform_5(%arg0: i32, %arg1: i32) -> (i32, i32) {
    %c0_i32 = arith.constant 0 : i32
    return %arg0, %arg1 : i32, i32
  }
}

module attributes {stable_mosaic.version = 11 : i64} {
  func.func @_bilstm_recurrence_kernel(%arg0: i32, %arg1: memref<16x4x128xbf16, #tpu.memory_space<vmem>>, %arg2: memref<16x4x128xbf16, #tpu.memory_space<vmem>>, %arg3: memref<16x4x1xf32, #tpu.memory_space<vmem>>, %arg4: memref<16x4x1xf32, #tpu.memory_space<vmem>>, %arg5: memref<64x256xbf16, #tpu.memory_space<vmem>>, %arg6: memref<16x4x32xbf16, #tpu.memory_space<vmem>>, %arg7: memref<16x4x32xbf16, #tpu.memory_space<vmem>>, %arg8: memref<4x64xf32, #tpu.memory_space<vmem>>, %arg9: memref<4x64xf32, #tpu.memory_space<vmem>>) attributes {dimension_semantics = [#tpu.dimension_semantics<arbitrary>], iteration_bounds = array<i64: 1>, scalar_prefetch = 0 : i64, scratch_operands = 2 : i64, tpu.core_type = #tpu.core_type<tc>, window_params = [{transform_indices = @transform_0, window_bounds = array<i64: 16, 4, 128>}, {transform_indices = @transform_1, window_bounds = array<i64: 16, 4, 128>}, {transform_indices = @transform_2, window_bounds = array<i64: 16, 4, 1>}, {transform_indices = @transform_3, window_bounds = array<i64: 16, 4, 1>}, {pipeline_mode = #tpu.pipeline_mode<synchronous>, transform_indices = @transform_4, window_bounds = array<i64: 64, 256>}, {transform_indices = @transform_5, window_bounds = array<i64: 16, 4, 32>}, {transform_indices = @transform_6, window_bounds = array<i64: 16, 4, 32>}]} {
    %c0_i32 = arith.constant 0 : i32
    %0 = arith.cmpi eq, %arg0, %c0_i32 : i32
    %1 = arith.extui %0 : i1 to i32
    %c0_i32_0 = arith.constant 0 : i32
    %2 = arith.cmpi ne, %1, %c0_i32_0 : i32
    scf.if %2 {
      %cst_418 = arith.constant 0.000000e+00 : f32
      %1556 = vector.broadcast %cst_418 : f32 to vector<4x64xf32>
      %c0_419 = arith.constant 0 : index
      %c0_420 = arith.constant 0 : index
      %1557 = vector.load %arg8[%c0_419, %c0_420] : memref<4x64xf32, #tpu.memory_space<vmem>>, vector<4x64xf32>
      tpu.vector_store %arg8[%c0_419, %c0_420], %1556 {strides = array<i32>} : memref<4x64xf32, #tpu.memory_space<vmem>>, vector<4x64xf32>,
      %cst_421 = arith.constant 0.000000e+00 : f32
      %1558 = vector.broadcast %cst_421 : f32 to vector<4x64xf32>
      %c0_422 = arith.constant 0 : index
      %c0_423 = arith.constant 0 : index
      %1559 = vector.load %arg9[%c0_422, %c0_423] : memref<4x64xf32, #tpu.memory_space<vmem>>, vector<4x64xf32>
      tpu.vector_store %arg9[%c0_422, %c0_423], %1558 {strides = array<i32>} : memref<4x64xf32, #tpu.memory_space<vmem>>, vector<4x64xf32>,
    } else {
    }
    %c0 = arith.constant 0 : index
    %c0_1 = arith.constant 0 : index
    %3 = vector.load %arg5[%c0, %c0_1] : memref<64x256xbf16, #tpu.memory_space<vmem>>, vector<64x256xbf16>
    %c0_i32_2 = arith.constant 0 : i32
    %c15_i32 = arith.constant 15 : i32
    %4 = arith.subi %c15_i32, %c0_i32_2 : i32
    %c0_3 = arith.constant 0 : index
    %c0_4 = arith.constant 0 : index
    %5 = vector.load %arg8[%c0_3, %c0_4] : memref<4x64xf32, #tpu.memory_space<vmem>>, vector<4x64xf32>
    %c0_5 = arith.constant 0 : index
    %c0_6 = arith.constant 0 : index
    %6 = vector.load %arg9[%c0_5, %c0_6] : memref<4x64xf32, #tpu.memory_space<vmem>>, vector<4x64xf32>
    %7 = arith.truncf %5 : vector<4x64xf32> to vector<4x64xbf16>
    %cst = arith.constant dense<0.000000e+00> : vector<4x256xf32>
    %8 = tpu.matmul %7, %3, %cst {dimension_numbers = #tpu.dot_dimension_numbers<[1], [0], [0], [1], [0, 0, 1, 1], [], []>} : vector<4x64xbf16>, vector<64x256xbf16>, vector<4x256xf32> -> vector<4x256xf32>
    %9 = arith.index_cast %c0_i32_2 : i32 to index
    %c0_7 = arith.constant 0 : index
    %c0_8 = arith.constant 0 : index
    %10 = vector.load %arg3[%9, %c0_7, %c0_8] : memref<16x4x1xf32, #tpu.memory_space<vmem>>, vector<1x4x1xf32>
    %11 = vector.shape_cast %10 : vector<1x4x1xf32> to vector<4x1xf32>
    %12 = arith.index_cast %4 : i32 to index
    %c0_9 = arith.constant 0 : index
    %c0_10 = arith.constant 0 : index
    %13 = vector.load %arg4[%12, %c0_9, %c0_10] : memref<16x4x1xf32, #tpu.memory_space<vmem>>, vector<1x4x1xf32>
    %14 = vector.shape_cast %13 : vector<1x4x1xf32> to vector<4x1xf32>
    %cst_11 = arith.constant 1.000000e+00 : f32
    %15 = vector.broadcast %cst_11 : f32 to vector<4x1xf32>
    %16 = arith.subf %15, %11 : vector<4x1xf32>
    %cst_12 = arith.constant 1.000000e+00 : f32
    %17 = vector.broadcast %cst_12 : f32 to vector<4x1xf32>
    %18 = arith.subf %17, %14 : vector<4x1xf32>
    %19 = arith.index_cast %c0_i32_2 : i32 to index
    %c0_13 = arith.constant 0 : index
    %c0_14 = arith.constant 0 : index
    %20 = vector.load %arg1[%19, %c0_13, %c0_14] : memref<16x4x128xbf16, #tpu.memory_space<vmem>>, vector<1x4x128xbf16>
    %21 = vector.shape_cast %20 : vector<1x4x128xbf16> to vector<4x128xbf16>
    %22 = arith.extf %21 : vector<4x128xbf16> to vector<4x128xf32>
    %23 = vector.extract_strided_slice %8 {offsets = [0, 0], sizes = [4, 128], strides = [1, 1]} : vector<4x256xf32> to vector<4x128xf32>
    %24 = arith.addf %22, %23 : vector<4x128xf32>
    %25 = arith.index_cast %4 : i32 to index
    %c0_15 = arith.constant 0 : index
    %c0_16 = arith.constant 0 : index
    %26 = vector.load %arg2[%25, %c0_15, %c0_16] : memref<16x4x128xbf16, #tpu.memory_space<vmem>>, vector<1x4x128xbf16>
    %27 = vector.shape_cast %26 : vector<1x4x128xbf16> to vector<4x128xbf16>
    %28 = arith.extf %27 : vector<4x128xbf16> to vector<4x128xf32>
    %29 = vector.extract_strided_slice %8 {offsets = [0, 128], sizes = [4, 128], strides = [1, 1]} : vector<4x256xf32> to vector<4x128xf32>
    %30 = arith.addf %28, %29 : vector<4x128xf32>
    %31 = vector.extract_strided_slice %6 {offsets = [0, 0], sizes = [4, 32], strides = [1, 1]} : vector<4x64xf32> to vector<4x32xf32>
    %32 = vector.extract_strided_slice %24 {offsets = [0, 0], sizes = [4, 96], strides = [1, 1]} : vector<4x128xf32> to vector<4x96xf32>
    %33 = arith.negf %32 : vector<4x96xf32>
    %34 = math.exp %33 : vector<4x96xf32>
    %cst_17 = arith.constant 1.000000e+00 : f32
    %35 = vector.broadcast %cst_17 : f32 to vector<4x96xf32>
    %36 = arith.addf %35, %34 : vector<4x96xf32>
    %37 = arith.divf %35, %36 : vector<4x96xf32>
    %38 = vector.extract_strided_slice %24 {offsets = [0, 96], sizes = [4, 32], strides = [1, 1]} : vector<4x128xf32> to vector<4x32xf32>
    %39 = math.tanh %38 : vector<4x32xf32>
    %40 = vector.extract_strided_slice %37 {offsets = [0, 0], sizes = [4, 32], strides = [1, 1]} : vector<4x96xf32> to vector<4x32xf32>
    %41 = vector.extract_strided_slice %37 {offsets = [0, 32], sizes = [4, 32], strides = [1, 1]} : vector<4x96xf32> to vector<4x32xf32>
    %42 = vector.extract_strided_slice %37 {offsets = [0, 64], sizes = [4, 32], strides = [1, 1]} : vector<4x96xf32> to vector<4x32xf32>
    %43 = arith.mulf %41, %31 : vector<4x32xf32>
    %44 = arith.mulf %40, %39 : vector<4x32xf32>
    %45 = arith.addf %43, %44 : vector<4x32xf32>
    %46 = math.tanh %45 : vector<4x32xf32>
    %47 = arith.mulf %42, %46 : vector<4x32xf32>
    %48 = vector.broadcast %11 : vector<4x1xf32> to vector<4x32xf32>
    %49 = arith.mulf %48, %47 : vector<4x32xf32>
    %50 = vector.broadcast %11 : vector<4x1xf32> to vector<4x32xf32>
    %51 = arith.mulf %50, %45 : vector<4x32xf32>
    %52 = vector.broadcast %16 : vector<4x1xf32> to vector<4x32xf32>
    %53 = arith.mulf %52, %31 : vector<4x32xf32>
    %54 = arith.addf %51, %53 : vector<4x32xf32>
    %55 = vector.extract_strided_slice %6 {offsets = [0, 32], sizes = [4, 32], strides = [1, 1]} : vector<4x64xf32> to vector<4x32xf32>
    %56 = vector.extract_strided_slice %30 {offsets = [0, 0], sizes = [4, 96], strides = [1, 1]} : vector<4x128xf32> to vector<4x96xf32>
    %57 = arith.negf %56 : vector<4x96xf32>
    %58 = math.exp %57 : vector<4x96xf32>
    %cst_18 = arith.constant 1.000000e+00 : f32
    %59 = vector.broadcast %cst_18 : f32 to vector<4x96xf32>
    %60 = arith.addf %59, %58 : vector<4x96xf32>
    %61 = arith.divf %59, %60 : vector<4x96xf32>
    %62 = vector.extract_strided_slice %30 {offsets = [0, 96], sizes = [4, 32], strides = [1, 1]} : vector<4x128xf32> to vector<4x32xf32>
    %63 = math.tanh %62 : vector<4x32xf32>
    %64 = vector.extract_strided_slice %61 {offsets = [0, 0], sizes = [4, 32], strides = [1, 1]} : vector<4x96xf32> to vector<4x32xf32>
    %65 = vector.extract_strided_slice %61 {offsets = [0, 32], sizes = [4, 32], strides = [1, 1]} : vector<4x96xf32> to vector<4x32xf32>
    %66 = vector.extract_strided_slice %61 {offsets = [0, 64], sizes = [4, 32], strides = [1, 1]} : vector<4x96xf32> to vector<4x32xf32>
    %67 = arith.mulf %65, %55 : vector<4x32xf32>
    %68 = arith.mulf %64, %63 : vector<4x32xf32>
    %69 = arith.addf %67, %68 : vector<4x32xf32>
    %70 = math.tanh %69 : vector<4x32xf32>
    %71 = arith.mulf %66, %70 : vector<4x32xf32>
    %72 = vector.broadcast %14 : vector<4x1xf32> to vector<4x32xf32>
    %73 = arith.mulf %72, %71 : vector<4x32xf32>
    %74 = vector.broadcast %14 : vector<4x1xf32> to vector<4x32xf32>
    %75 = arith.mulf %74, %69 : vector<4x32xf32>
    %76 = vector.broadcast %18 : vector<4x1xf32> to vector<4x32xf32>
    %77 = arith.mulf %76, %55 : vector<4x32xf32>
    %78 = arith.addf %75, %77 : vector<4x32xf32>
    %79 = arith.truncf %49 : vector<4x32xf32> to vector<4x32xbf16>
    %80 = arith.index_cast %c0_i32_2 : i32 to index
    %c0_19 = arith.constant 0 : index
    %c0_20 = arith.constant 0 : index
    %81 = vector.load %arg6[%80, %c0_19, %c0_20] : memref<16x4x32xbf16, #tpu.memory_space<vmem>>, vector<1x4x32xbf16>
    %82 = vector.shape_cast %81 : vector<1x4x32xbf16> to vector<4x32xbf16>
    %83 = vector.shape_cast %79 : vector<4x32xbf16> to vector<1x4x32xbf16>
    tpu.vector_store %arg6[%80, %c0_19, %c0_20], %83 {strides = array<i32>} : memref<16x4x32xbf16, #tpu.memory_space<vmem>>, vector<1x4x32xbf16>,
    %84 = arith.truncf %73 : vector<4x32xf32> to vector<4x32xbf16>
    %85 = arith.index_cast %4 : i32 to index
    %c0_21 = arith.constant 0 : index
    %c0_22 = arith.constant 0 : index
    %86 = vector.load %arg7[%85, %c0_21, %c0_22] : memref<16x4x32xbf16, #tpu.memory_space<vmem>>, vector<1x4x32xbf16>
    %87 = vector.shape_cast %86 : vector<1x4x32xbf16> to vector<4x32xbf16>
    %88 = vector.shape_cast %84 : vector<4x32xbf16> to vector<1x4x32xbf16>
    tpu.vector_store %arg7[%85, %c0_21, %c0_22], %88 {strides = array<i32>} : memref<16x4x32xbf16, #tpu.memory_space<vmem>>, vector<1x4x32xbf16>,
    %89 = vector.extract_strided_slice %5 {offsets = [0, 0], sizes = [4, 32], strides = [1, 1]} : vector<4x64xf32> to vector<4x32xf32>
    %90 = vector.broadcast %16 : vector<4x1xf32> to vector<4x32xf32>
    %91 = arith.mulf %90, %89 : vector<4x32xf32>
    %92 = arith.addf %49, %91 : vector<4x32xf32>
    %93 = vector.extract_strided_slice %5 {offsets = [0, 32], sizes = [4, 32], strides = [1, 1]} : vector<4x64xf32> to vector<4x32xf32>
    %94 = vector.broadcast %18 : vector<4x1xf32> to vector<4x32xf32>
    %95 = arith.mulf %94, %93 : vector<4x32xf32>
    %96 = arith.addf %73, %95 : vector<4x32xf32>
    %97 = tpu.concatenate %92, %96 in 1 : vector<4x32xf32>, vector<4x32xf32> -> vector<4x64xf32>
    %c0_23 = arith.constant 0 : index
    %c0_24 = arith.constant 0 : index
    %98 = vector.load %arg8[%c0_23, %c0_24] : memref<4x64xf32, #tpu.memory_space<vmem>>, vector<4x64xf32>
    tpu.vector_store %arg8[%c0_23, %c0_24], %97 {strides = array<i32>} : memref<4x64xf32, #tpu.memory_space<vmem>>, vector<4x64xf32>,
    %99 = tpu.concatenate %54, %78 in 1 : vector<4x32xf32>, vector<4x32xf32> -> vector<4x64xf32>
    %c0_25 = arith.constant 0 : index
    %c0_26 = arith.constant 0 : index
    %100 = vector.load %arg9[%c0_25, %c0_26] : memref<4x64xf32, #tpu.memory_space<vmem>>, vector<4x64xf32>
    tpu.vector_store %arg9[%c0_25, %c0_26], %99 {strides = array<i32>} : memref<4x64xf32, #tpu.memory_space<vmem>>, vector<4x64xf32>,
    %c1_i32 = arith.constant 1 : i32
    %c15_i32_27 = arith.constant 15 : i32
    %101 = arith.subi %c15_i32_27, %c1_i32 : i32
    %c0_28 = arith.constant 0 : index
    %c0_29 = arith.constant 0 : index
    %102 = vector.load %arg8[%c0_28, %c0_29] : memref<4x64xf32, #tpu.memory_space<vmem>>, vector<4x64xf32>
    %c0_30 = arith.constant 0 : index
    %c0_31 = arith.constant 0 : index
    %103 = vector.load %arg9[%c0_30, %c0_31] : memref<4x64xf32, #tpu.memory_space<vmem>>, vector<4x64xf32>
    %104 = arith.truncf %102 : vector<4x64xf32> to vector<4x64xbf16>
    %cst_32 = arith.constant dense<0.000000e+00> : vector<4x256xf32>
    %105 = tpu.matmul %104, %3, %cst_32 {dimension_numbers = #tpu.dot_dimension_numbers<[1], [0], [0], [1], [0, 0, 1, 1], [], []>} : vector<4x64xbf16>, vector<64x256xbf16>, vector<4x256xf32> -> vector<4x256xf32>
    %106 = arith.index_cast %c1_i32 : i32 to index
    %c0_33 = arith.constant 0 : index
    %c0_34 = arith.constant 0 : index
    %107 = vector.load %arg3[%106, %c0_33, %c0_34] : memref<16x4x1xf32, #tpu.memory_space<vmem>>, vector<1x4x1xf32>
    %108 = vector.shape_cast %107 : vector<1x4x1xf32> to vector<4x1xf32>
    %109 = arith.index_cast %101 : i32 to index
    %c0_35 = arith.constant 0 : index
    %c0_36 = arith.constant 0 : index
    %110 = vector.load %arg4[%109, %c0_35, %c0_36] : memref<16x4x1xf32, #tpu.memory_space<vmem>>, vector<1x4x1xf32>
    %111 = vector.shape_cast %110 : vector<1x4x1xf32> to vector<4x1xf32>
    %cst_37 = arith.constant 1.000000e+00 : f32
    %112 = vector.broadcast %cst_37 : f32 to vector<4x1xf32>
    %113 = arith.subf %112, %108 : vector<4x1xf32>
    %cst_38 = arith.constant 1.000000e+00 : f32
    %114 = vector.broadcast %cst_38 : f32 to vector<4x1xf32>
    %115 = arith.subf %114, %111 : vector<4x1xf32>
    %116 = arith.index_cast %c1_i32 : i32 to index
    %c0_39 = arith.constant 0 : index
    %c0_40 = arith.constant 0 : index
    %117 = vector.load %arg1[%116, %c0_39, %c0_40] : memref<16x4x128xbf16, #tpu.memory_space<vmem>>, vector<1x4x128xbf16>
    %118 = vector.shape_cast %117 : vector<1x4x128xbf16> to vector<4x128xbf16>
    %119 = arith.extf %118 : vector<4x128xbf16> to vector<4x128xf32>
    %120 = vector.extract_strided_slice %105 {offsets = [0, 0], sizes = [4, 128], strides = [1, 1]} : vector<4x256xf32> to vector<4x128xf32>
    %121 = arith.addf %119, %120 : vector<4x128xf32>
    %122 = arith.index_cast %101 : i32 to index
    %c0_41 = arith.constant 0 : index
    %c0_42 = arith.constant 0 : index
    %123 = vector.load %arg2[%122, %c0_41, %c0_42] : memref<16x4x128xbf16, #tpu.memory_space<vmem>>, vector<1x4x128xbf16>
    %124 = vector.shape_cast %123 : vector<1x4x128xbf16> to vector<4x128xbf16>
    %125 = arith.extf %124 : vector<4x128xbf16> to vector<4x128xf32>
    %126 = vector.extract_strided_slice %105 {offsets = [0, 128], sizes = [4, 128], strides = [1, 1]} : vector<4x256xf32> to vector<4x128xf32>
    %127 = arith.addf %125, %126 : vector<4x128xf32>
    %128 = vector.extract_strided_slice %103 {offsets = [0, 0], sizes = [4, 32], strides = [1, 1]} : vector<4x64xf32> to vector<4x32xf32>
    %129 = vector.extract_strided_slice %121 {offsets = [0, 0], sizes = [4, 96], strides = [1, 1]} : vector<4x128xf32> to vector<4x96xf32>
    %130 = arith.negf %129 : vector<4x96xf32>
    %131 = math.exp %130 : vector<4x96xf32>
    %cst_43 = arith.constant 1.000000e+00 : f32
    %132 = vector.broadcast %cst_43 : f32 to vector<4x96xf32>
    %133 = arith.addf %132, %131 : vector<4x96xf32>
    %134 = arith.divf %132, %133 : vector<4x96xf32>
    %135 = vector.extract_strided_slice %121 {offsets = [0, 96], sizes = [4, 32], strides = [1, 1]} : vector<4x128xf32> to vector<4x32xf32>
    %136 = math.tanh %135 : vector<4x32xf32>
    %137 = vector.extract_strided_slice %134 {offsets = [0, 0], sizes = [4, 32], strides = [1, 1]} : vector<4x96xf32> to vector<4x32xf32>
    %138 = vector.extract_strided_slice %134 {offsets = [0, 32], sizes = [4, 32], strides = [1, 1]} : vector<4x96xf32> to vector<4x32xf32>
    %139 = vector.extract_strided_slice %134 {offsets = [0, 64], sizes = [4, 32], strides = [1, 1]} : vector<4x96xf32> to vector<4x32xf32>
    %140 = arith.mulf %138, %128 : vector<4x32xf32>
    %141 = arith.mulf %137, %136 : vector<4x32xf32>
    %142 = arith.addf %140, %141 : vector<4x32xf32>
    %143 = math.tanh %142 : vector<4x32xf32>
    %144 = arith.mulf %139, %143 : vector<4x32xf32>
    %145 = vector.broadcast %108 : vector<4x1xf32> to vector<4x32xf32>
    %146 = arith.mulf %145, %144 : vector<4x32xf32>
    %147 = vector.broadcast %108 : vector<4x1xf32> to vector<4x32xf32>
    %148 = arith.mulf %147, %142 : vector<4x32xf32>
    %149 = vector.broadcast %113 : vector<4x1xf32> to vector<4x32xf32>
    %150 = arith.mulf %149, %128 : vector<4x32xf32>
    %151 = arith.addf %148, %150 : vector<4x32xf32>
    %152 = vector.extract_strided_slice %103 {offsets = [0, 32], sizes = [4, 32], strides = [1, 1]} : vector<4x64xf32> to vector<4x32xf32>
    %153 = vector.extract_strided_slice %127 {offsets = [0, 0], sizes = [4, 96], strides = [1, 1]} : vector<4x128xf32> to vector<4x96xf32>
    %154 = arith.negf %153 : vector<4x96xf32>
    %155 = math.exp %154 : vector<4x96xf32>
    %cst_44 = arith.constant 1.000000e+00 : f32
    %156 = vector.broadcast %cst_44 : f32 to vector<4x96xf32>
    %157 = arith.addf %156, %155 : vector<4x96xf32>
    %158 = arith.divf %156, %157 : vector<4x96xf32>
    %159 = vector.extract_strided_slice %127 {offsets = [0, 96], sizes = [4, 32], strides = [1, 1]} : vector<4x128xf32> to vector<4x32xf32>
    %160 = math.tanh %159 : vector<4x32xf32>
    %161 = vector.extract_strided_slice %158 {offsets = [0, 0], sizes = [4, 32], strides = [1, 1]} : vector<4x96xf32> to vector<4x32xf32>
    %162 = vector.extract_strided_slice %158 {offsets = [0, 32], sizes = [4, 32], strides = [1, 1]} : vector<4x96xf32> to vector<4x32xf32>
    %163 = vector.extract_strided_slice %158 {offsets = [0, 64], sizes = [4, 32], strides = [1, 1]} : vector<4x96xf32> to vector<4x32xf32>
    %164 = arith.mulf %162, %152 : vector<4x32xf32>
    %165 = arith.mulf %161, %160 : vector<4x32xf32>
    %166 = arith.addf %164, %165 : vector<4x32xf32>
    %167 = math.tanh %166 : vector<4x32xf32>
    %168 = arith.mulf %163, %167 : vector<4x32xf32>
    %169 = vector.broadcast %111 : vector<4x1xf32> to vector<4x32xf32>
    %170 = arith.mulf %169, %168 : vector<4x32xf32>
    %171 = vector.broadcast %111 : vector<4x1xf32> to vector<4x32xf32>
    %172 = arith.mulf %171, %166 : vector<4x32xf32>
    %173 = vector.broadcast %115 : vector<4x1xf32> to vector<4x32xf32>
    %174 = arith.mulf %173, %152 : vector<4x32xf32>
    %175 = arith.addf %172, %174 : vector<4x32xf32>
    %176 = arith.truncf %146 : vector<4x32xf32> to vector<4x32xbf16>
    %177 = arith.index_cast %c1_i32 : i32 to index
    %c0_45 = arith.constant 0 : index
    %c0_46 = arith.constant 0 : index
    %178 = vector.load %arg6[%177, %c0_45, %c0_46] : memref<16x4x32xbf16, #tpu.memory_space<vmem>>, vector<1x4x32xbf16>
    %179 = vector.shape_cast %178 : vector<1x4x32xbf16> to vector<4x32xbf16>
    %180 = vector.shape_cast %176 : vector<4x32xbf16> to vector<1x4x32xbf16>
    tpu.vector_store %arg6[%177, %c0_45, %c0_46], %180 {strides = array<i32>} : memref<16x4x32xbf16, #tpu.memory_space<vmem>>, vector<1x4x32xbf16>,
    %181 = arith.truncf %170 : vector<4x32xf32> to vector<4x32xbf16>
    %182 = arith.index_cast %101 : i32 to index
    %c0_47 = arith.constant 0 : index
    %c0_48 = arith.constant 0 : index
    %183 = vector.load %arg7[%182, %c0_47, %c0_48] : memref<16x4x32xbf16, #tpu.memory_space<vmem>>, vector<1x4x32xbf16>
    %184 = vector.shape_cast %183 : vector<1x4x32xbf16> to vector<4x32xbf16>
    %185 = vector.shape_cast %181 : vector<4x32xbf16> to vector<1x4x32xbf16>
    tpu.vector_store %arg7[%182, %c0_47, %c0_48], %185 {strides = array<i32>} : memref<16x4x32xbf16, #tpu.memory_space<vmem>>, vector<1x4x32xbf16>,
    %186 = vector.extract_strided_slice %102 {offsets = [0, 0], sizes = [4, 32], strides = [1, 1]} : vector<4x64xf32> to vector<4x32xf32>
    %187 = vector.broadcast %113 : vector<4x1xf32> to vector<4x32xf32>
    %188 = arith.mulf %187, %186 : vector<4x32xf32>
    %189 = arith.addf %146, %188 : vector<4x32xf32>
    %190 = vector.extract_strided_slice %102 {offsets = [0, 32], sizes = [4, 32], strides = [1, 1]} : vector<4x64xf32> to vector<4x32xf32>
    %191 = vector.broadcast %115 : vector<4x1xf32> to vector<4x32xf32>
    %192 = arith.mulf %191, %190 : vector<4x32xf32>
    %193 = arith.addf %170, %192 : vector<4x32xf32>
    %194 = tpu.concatenate %189, %193 in 1 : vector<4x32xf32>, vector<4x32xf32> -> vector<4x64xf32>
    %c0_49 = arith.constant 0 : index
    %c0_50 = arith.constant 0 : index
    %195 = vector.load %arg8[%c0_49, %c0_50] : memref<4x64xf32, #tpu.memory_space<vmem>>, vector<4x64xf32>
    tpu.vector_store %arg8[%c0_49, %c0_50], %194 {strides = array<i32>} : memref<4x64xf32, #tpu.memory_space<vmem>>, vector<4x64xf32>,
    %196 = tpu.concatenate %151, %175 in 1 : vector<4x32xf32>, vector<4x32xf32> -> vector<4x64xf32>
    %c0_51 = arith.constant 0 : index
    %c0_52 = arith.constant 0 : index
    %197 = vector.load %arg9[%c0_51, %c0_52] : memref<4x64xf32, #tpu.memory_space<vmem>>, vector<4x64xf32>
    tpu.vector_store %arg9[%c0_51, %c0_52], %196 {strides = array<i32>} : memref<4x64xf32, #tpu.memory_space<vmem>>, vector<4x64xf32>,
    %c2_i32 = arith.constant 2 : i32
    %c15_i32_53 = arith.constant 15 : i32
    %198 = arith.subi %c15_i32_53, %c2_i32 : i32
    %c0_54 = arith.constant 0 : index
    %c0_55 = arith.constant 0 : index
    %199 = vector.load %arg8[%c0_54, %c0_55] : memref<4x64xf32, #tpu.memory_space<vmem>>, vector<4x64xf32>
    %c0_56 = arith.constant 0 : index
    %c0_57 = arith.constant 0 : index
    %200 = vector.load %arg9[%c0_56, %c0_57] : memref<4x64xf32, #tpu.memory_space<vmem>>, vector<4x64xf32>
    %201 = arith.truncf %199 : vector<4x64xf32> to vector<4x64xbf16>
    %cst_58 = arith.constant dense<0.000000e+00> : vector<4x256xf32>
    %202 = tpu.matmul %201, %3, %cst_58 {dimension_numbers = #tpu.dot_dimension_numbers<[1], [0], [0], [1], [0, 0, 1, 1], [], []>} : vector<4x64xbf16>, vector<64x256xbf16>, vector<4x256xf32> -> vector<4x256xf32>
    %203 = arith.index_cast %c2_i32 : i32 to index
    %c0_59 = arith.constant 0 : index
    %c0_60 = arith.constant 0 : index
    %204 = vector.load %arg3[%203, %c0_59, %c0_60] : memref<16x4x1xf32, #tpu.memory_space<vmem>>, vector<1x4x1xf32>
    %205 = vector.shape_cast %204 : vector<1x4x1xf32> to vector<4x1xf32>
    %206 = arith.index_cast %198 : i32 to index
    %c0_61 = arith.constant 0 : index
    %c0_62 = arith.constant 0 : index
    %207 = vector.load %arg4[%206, %c0_61, %c0_62] : memref<16x4x1xf32, #tpu.memory_space<vmem>>, vector<1x4x1xf32>
    %208 = vector.shape_cast %207 : vector<1x4x1xf32> to vector<4x1xf32>
    %cst_63 = arith.constant 1.000000e+00 : f32
    %209 = vector.broadcast %cst_63 : f32 to vector<4x1xf32>
    %210 = arith.subf %209, %205 : vector<4x1xf32>
    %cst_64 = arith.constant 1.000000e+00 : f32
    %211 = vector.broadcast %cst_64 : f32 to vector<4x1xf32>
    %212 = arith.subf %211, %208 : vector<4x1xf32>
    %213 = arith.index_cast %c2_i32 : i32 to index
    %c0_65 = arith.constant 0 : index
    %c0_66 = arith.constant 0 : index
    %214 = vector.load %arg1[%213, %c0_65, %c0_66] : memref<16x4x128xbf16, #tpu.memory_space<vmem>>, vector<1x4x128xbf16>
    %215 = vector.shape_cast %214 : vector<1x4x128xbf16> to vector<4x128xbf16>
    %216 = arith.extf %215 : vector<4x128xbf16> to vector<4x128xf32>
    %217 = vector.extract_strided_slice %202 {offsets = [0, 0], sizes = [4, 128], strides = [1, 1]} : vector<4x256xf32> to vector<4x128xf32>
    %218 = arith.addf %216, %217 : vector<4x128xf32>
    %219 = arith.index_cast %198 : i32 to index
    %c0_67 = arith.constant 0 : index
    %c0_68 = arith.constant 0 : index
    %220 = vector.load %arg2[%219, %c0_67, %c0_68] : memref<16x4x128xbf16, #tpu.memory_space<vmem>>, vector<1x4x128xbf16>
    %221 = vector.shape_cast %220 : vector<1x4x128xbf16> to vector<4x128xbf16>
    %222 = arith.extf %221 : vector<4x128xbf16> to vector<4x128xf32>
    %223 = vector.extract_strided_slice %202 {offsets = [0, 128], sizes = [4, 128], strides = [1, 1]} : vector<4x256xf32> to vector<4x128xf32>
    %224 = arith.addf %222, %223 : vector<4x128xf32>
    %225 = vector.extract_strided_slice %200 {offsets = [0, 0], sizes = [4, 32], strides = [1, 1]} : vector<4x64xf32> to vector<4x32xf32>
    %226 = vector.extract_strided_slice %218 {offsets = [0, 0], sizes = [4, 96], strides = [1, 1]} : vector<4x128xf32> to vector<4x96xf32>
    %227 = arith.negf %226 : vector<4x96xf32>
    %228 = math.exp %227 : vector<4x96xf32>
    %cst_69 = arith.constant 1.000000e+00 : f32
    %229 = vector.broadcast %cst_69 : f32 to vector<4x96xf32>
    %230 = arith.addf %229, %228 : vector<4x96xf32>
    %231 = arith.divf %229, %230 : vector<4x96xf32>
    %232 = vector.extract_strided_slice %218 {offsets = [0, 96], sizes = [4, 32], strides = [1, 1]} : vector<4x128xf32> to vector<4x32xf32>
    %233 = math.tanh %232 : vector<4x32xf32>
    %234 = vector.extract_strided_slice %231 {offsets = [0, 0], sizes = [4, 32], strides = [1, 1]} : vector<4x96xf32> to vector<4x32xf32>
    %235 = vector.extract_strided_slice %231 {offsets = [0, 32], sizes = [4, 32], strides = [1, 1]} : vector<4x96xf32> to vector<4x32xf32>
    %236 = vector.extract_strided_slice %231 {offsets = [0, 64], sizes = [4, 32], strides = [1, 1]} : vector<4x96xf32> to vector<4x32xf32>
    %237 = arith.mulf %235, %225 : vector<4x32xf32>
    %238 = arith.mulf %234, %233 : vector<4x32xf32>
    %239 = arith.addf %237, %238 : vector<4x32xf32>
    %240 = math.tanh %239 : vector<4x32xf32>
    %241 = arith.mulf %236, %240 : vector<4x32xf32>
    %242 = vector.broadcast %205 : vector<4x1xf32> to vector<4x32xf32>
    %243 = arith.mulf %242, %241 : vector<4x32xf32>
    %244 = vector.broadcast %205 : vector<4x1xf32> to vector<4x32xf32>
    %245 = arith.mulf %244, %239 : vector<4x32xf32>
    %246 = vector.broadcast %210 : vector<4x1xf32> to vector<4x32xf32>
    %247 = arith.mulf %246, %225 : vector<4x32xf32>
    %248 = arith.addf %245, %247 : vector<4x32xf32>
    %249 = vector.extract_strided_slice %200 {offsets = [0, 32], sizes = [4, 32], strides = [1, 1]} : vector<4x64xf32> to vector<4x32xf32>
    %250 = vector.extract_strided_slice %224 {offsets = [0, 0], sizes = [4, 96], strides = [1, 1]} : vector<4x128xf32> to vector<4x96xf32>
    %251 = arith.negf %250 : vector<4x96xf32>
    %252 = math.exp %251 : vector<4x96xf32>
    %cst_70 = arith.constant 1.000000e+00 : f32
    %253 = vector.broadcast %cst_70 : f32 to vector<4x96xf32>
    %254 = arith.addf %253, %252 : vector<4x96xf32>
    %255 = arith.divf %253, %254 : vector<4x96xf32>
    %256 = vector.extract_strided_slice %224 {offsets = [0, 96], sizes = [4, 32], strides = [1, 1]} : vector<4x128xf32> to vector<4x32xf32>
    %257 = math.tanh %256 : vector<4x32xf32>
    %258 = vector.extract_strided_slice %255 {offsets = [0, 0], sizes = [4, 32], strides = [1, 1]} : vector<4x96xf32> to vector<4x32xf32>
    %259 = vector.extract_strided_slice %255 {offsets = [0, 32], sizes = [4, 32], strides = [1, 1]} : vector<4x96xf32> to vector<4x32xf32>
    %260 = vector.extract_strided_slice %255 {offsets = [0, 64], sizes = [4, 32], strides = [1, 1]} : vector<4x96xf32> to vector<4x32xf32>
    %261 = arith.mulf %259, %249 : vector<4x32xf32>
    %262 = arith.mulf %258, %257 : vector<4x32xf32>
    %263 = arith.addf %261, %262 : vector<4x32xf32>
    %264 = math.tanh %263 : vector<4x32xf32>
    %265 = arith.mulf %260, %264 : vector<4x32xf32>
    %266 = vector.broadcast %208 : vector<4x1xf32> to vector<4x32xf32>
    %267 = arith.mulf %266, %265 : vector<4x32xf32>
    %268 = vector.broadcast %208 : vector<4x1xf32> to vector<4x32xf32>
    %269 = arith.mulf %268, %263 : vector<4x32xf32>
    %270 = vector.broadcast %212 : vector<4x1xf32> to vector<4x32xf32>
    %271 = arith.mulf %270, %249 : vector<4x32xf32>
    %272 = arith.addf %269, %271 : vector<4x32xf32>
    %273 = arith.truncf %243 : vector<4x32xf32> to vector<4x32xbf16>
    %274 = arith.index_cast %c2_i32 : i32 to index
    %c0_71 = arith.constant 0 : index
    %c0_72 = arith.constant 0 : index
    %275 = vector.load %arg6[%274, %c0_71, %c0_72] : memref<16x4x32xbf16, #tpu.memory_space<vmem>>, vector<1x4x32xbf16>
    %276 = vector.shape_cast %275 : vector<1x4x32xbf16> to vector<4x32xbf16>
    %277 = vector.shape_cast %273 : vector<4x32xbf16> to vector<1x4x32xbf16>
    tpu.vector_store %arg6[%274, %c0_71, %c0_72], %277 {strides = array<i32>} : memref<16x4x32xbf16, #tpu.memory_space<vmem>>, vector<1x4x32xbf16>,
    %278 = arith.truncf %267 : vector<4x32xf32> to vector<4x32xbf16>
    %279 = arith.index_cast %198 : i32 to index
    %c0_73 = arith.constant 0 : index
    %c0_74 = arith.constant 0 : index
    %280 = vector.load %arg7[%279, %c0_73, %c0_74] : memref<16x4x32xbf16, #tpu.memory_space<vmem>>, vector<1x4x32xbf16>
    %281 = vector.shape_cast %280 : vector<1x4x32xbf16> to vector<4x32xbf16>
    %282 = vector.shape_cast %278 : vector<4x32xbf16> to vector<1x4x32xbf16>
    tpu.vector_store %arg7[%279, %c0_73, %c0_74], %282 {strides = array<i32>} : memref<16x4x32xbf16, #tpu.memory_space<vmem>>, vector<1x4x32xbf16>,
    %283 = vector.extract_strided_slice %199 {offsets = [0, 0], sizes = [4, 32], strides = [1, 1]} : vector<4x64xf32> to vector<4x32xf32>
    %284 = vector.broadcast %210 : vector<4x1xf32> to vector<4x32xf32>
    %285 = arith.mulf %284, %283 : vector<4x32xf32>
    %286 = arith.addf %243, %285 : vector<4x32xf32>
    %287 = vector.extract_strided_slice %199 {offsets = [0, 32], sizes = [4, 32], strides = [1, 1]} : vector<4x64xf32> to vector<4x32xf32>
    %288 = vector.broadcast %212 : vector<4x1xf32> to vector<4x32xf32>
    %289 = arith.mulf %288, %287 : vector<4x32xf32>
    %290 = arith.addf %267, %289 : vector<4x32xf32>
    %291 = tpu.concatenate %286, %290 in 1 : vector<4x32xf32>, vector<4x32xf32> -> vector<4x64xf32>
    %c0_75 = arith.constant 0 : index
    %c0_76 = arith.constant 0 : index
    %292 = vector.load %arg8[%c0_75, %c0_76] : memref<4x64xf32, #tpu.memory_space<vmem>>, vector<4x64xf32>
    tpu.vector_store %arg8[%c0_75, %c0_76], %291 {strides = array<i32>} : memref<4x64xf32, #tpu.memory_space<vmem>>, vector<4x64xf32>,
    %293 = tpu.concatenate %248, %272 in 1 : vector<4x32xf32>, vector<4x32xf32> -> vector<4x64xf32>
    %c0_77 = arith.constant 0 : index
    %c0_78 = arith.constant 0 : index
    %294 = vector.load %arg9[%c0_77, %c0_78] : memref<4x64xf32, #tpu.memory_space<vmem>>, vector<4x64xf32>
    tpu.vector_store %arg9[%c0_77, %c0_78], %293 {strides = array<i32>} : memref<4x64xf32, #tpu.memory_space<vmem>>, vector<4x64xf32>,
    %c3_i32 = arith.constant 3 : i32
    %c15_i32_79 = arith.constant 15 : i32
    %295 = arith.subi %c15_i32_79, %c3_i32 : i32
    %c0_80 = arith.constant 0 : index
    %c0_81 = arith.constant 0 : index
    %296 = vector.load %arg8[%c0_80, %c0_81] : memref<4x64xf32, #tpu.memory_space<vmem>>, vector<4x64xf32>
    %c0_82 = arith.constant 0 : index
    %c0_83 = arith.constant 0 : index
    %297 = vector.load %arg9[%c0_82, %c0_83] : memref<4x64xf32, #tpu.memory_space<vmem>>, vector<4x64xf32>
    %298 = arith.truncf %296 : vector<4x64xf32> to vector<4x64xbf16>
    %cst_84 = arith.constant dense<0.000000e+00> : vector<4x256xf32>
    %299 = tpu.matmul %298, %3, %cst_84 {dimension_numbers = #tpu.dot_dimension_numbers<[1], [0], [0], [1], [0, 0, 1, 1], [], []>} : vector<4x64xbf16>, vector<64x256xbf16>, vector<4x256xf32> -> vector<4x256xf32>
    %300 = arith.index_cast %c3_i32 : i32 to index
    %c0_85 = arith.constant 0 : index
    %c0_86 = arith.constant 0 : index
    %301 = vector.load %arg3[%300, %c0_85, %c0_86] : memref<16x4x1xf32, #tpu.memory_space<vmem>>, vector<1x4x1xf32>
    %302 = vector.shape_cast %301 : vector<1x4x1xf32> to vector<4x1xf32>
    %303 = arith.index_cast %295 : i32 to index
    %c0_87 = arith.constant 0 : index
    %c0_88 = arith.constant 0 : index
    %304 = vector.load %arg4[%303, %c0_87, %c0_88] : memref<16x4x1xf32, #tpu.memory_space<vmem>>, vector<1x4x1xf32>
    %305 = vector.shape_cast %304 : vector<1x4x1xf32> to vector<4x1xf32>
    %cst_89 = arith.constant 1.000000e+00 : f32
    %306 = vector.broadcast %cst_89 : f32 to vector<4x1xf32>
    %307 = arith.subf %306, %302 : vector<4x1xf32>
    %cst_90 = arith.constant 1.000000e+00 : f32
    %308 = vector.broadcast %cst_90 : f32 to vector<4x1xf32>
    %309 = arith.subf %308, %305 : vector<4x1xf32>
    %310 = arith.index_cast %c3_i32 : i32 to index
    %c0_91 = arith.constant 0 : index
    %c0_92 = arith.constant 0 : index
    %311 = vector.load %arg1[%310, %c0_91, %c0_92] : memref<16x4x128xbf16, #tpu.memory_space<vmem>>, vector<1x4x128xbf16>
    %312 = vector.shape_cast %311 : vector<1x4x128xbf16> to vector<4x128xbf16>
    %313 = arith.extf %312 : vector<4x128xbf16> to vector<4x128xf32>
    %314 = vector.extract_strided_slice %299 {offsets = [0, 0], sizes = [4, 128], strides = [1, 1]} : vector<4x256xf32> to vector<4x128xf32>
    %315 = arith.addf %313, %314 : vector<4x128xf32>
    %316 = arith.index_cast %295 : i32 to index
    %c0_93 = arith.constant 0 : index
    %c0_94 = arith.constant 0 : index
    %317 = vector.load %arg2[%316, %c0_93, %c0_94] : memref<16x4x128xbf16, #tpu.memory_space<vmem>>, vector<1x4x128xbf16>
    %318 = vector.shape_cast %317 : vector<1x4x128xbf16> to vector<4x128xbf16>
    %319 = arith.extf %318 : vector<4x128xbf16> to vector<4x128xf32>
    %320 = vector.extract_strided_slice %299 {offsets = [0, 128], sizes = [4, 128], strides = [1, 1]} : vector<4x256xf32> to vector<4x128xf32>
    %321 = arith.addf %319, %320 : vector<4x128xf32>
    %322 = vector.extract_strided_slice %297 {offsets = [0, 0], sizes = [4, 32], strides = [1, 1]} : vector<4x64xf32> to vector<4x32xf32>
    %323 = vector.extract_strided_slice %315 {offsets = [0, 0], sizes = [4, 96], strides = [1, 1]} : vector<4x128xf32> to vector<4x96xf32>
    %324 = arith.negf %323 : vector<4x96xf32>
    %325 = math.exp %324 : vector<4x96xf32>
    %cst_95 = arith.constant 1.000000e+00 : f32
    %326 = vector.broadcast %cst_95 : f32 to vector<4x96xf32>
    %327 = arith.addf %326, %325 : vector<4x96xf32>
    %328 = arith.divf %326, %327 : vector<4x96xf32>
    %329 = vector.extract_strided_slice %315 {offsets = [0, 96], sizes = [4, 32], strides = [1, 1]} : vector<4x128xf32> to vector<4x32xf32>
    %330 = math.tanh %329 : vector<4x32xf32>
    %331 = vector.extract_strided_slice %328 {offsets = [0, 0], sizes = [4, 32], strides = [1, 1]} : vector<4x96xf32> to vector<4x32xf32>
    %332 = vector.extract_strided_slice %328 {offsets = [0, 32], sizes = [4, 32], strides = [1, 1]} : vector<4x96xf32> to vector<4x32xf32>
    %333 = vector.extract_strided_slice %328 {offsets = [0, 64], sizes = [4, 32], strides = [1, 1]} : vector<4x96xf32> to vector<4x32xf32>
    %334 = arith.mulf %332, %322 : vector<4x32xf32>
    %335 = arith.mulf %331, %330 : vector<4x32xf32>
    %336 = arith.addf %334, %335 : vector<4x32xf32>
    %337 = math.tanh %336 : vector<4x32xf32>
    %338 = arith.mulf %333, %337 : vector<4x32xf32>
    %339 = vector.broadcast %302 : vector<4x1xf32> to vector<4x32xf32>
    %340 = arith.mulf %339, %338 : vector<4x32xf32>
    %341 = vector.broadcast %302 : vector<4x1xf32> to vector<4x32xf32>
    %342 = arith.mulf %341, %336 : vector<4x32xf32>
    %343 = vector.broadcast %307 : vector<4x1xf32> to vector<4x32xf32>
    %344 = arith.mulf %343, %322 : vector<4x32xf32>
    %345 = arith.addf %342, %344 : vector<4x32xf32>
    %346 = vector.extract_strided_slice %297 {offsets = [0, 32], sizes = [4, 32], strides = [1, 1]} : vector<4x64xf32> to vector<4x32xf32>
    %347 = vector.extract_strided_slice %321 {offsets = [0, 0], sizes = [4, 96], strides = [1, 1]} : vector<4x128xf32> to vector<4x96xf32>
    %348 = arith.negf %347 : vector<4x96xf32>
    %349 = math.exp %348 : vector<4x96xf32>
    %cst_96 = arith.constant 1.000000e+00 : f32
    %350 = vector.broadcast %cst_96 : f32 to vector<4x96xf32>
    %351 = arith.addf %350, %349 : vector<4x96xf32>
    %352 = arith.divf %350, %351 : vector<4x96xf32>
    %353 = vector.extract_strided_slice %321 {offsets = [0, 96], sizes = [4, 32], strides = [1, 1]} : vector<4x128xf32> to vector<4x32xf32>
    %354 = math.tanh %353 : vector<4x32xf32>
    %355 = vector.extract_strided_slice %352 {offsets = [0, 0], sizes = [4, 32], strides = [1, 1]} : vector<4x96xf32> to vector<4x32xf32>
    %356 = vector.extract_strided_slice %352 {offsets = [0, 32], sizes = [4, 32], strides = [1, 1]} : vector<4x96xf32> to vector<4x32xf32>
    %357 = vector.extract_strided_slice %352 {offsets = [0, 64], sizes = [4, 32], strides = [1, 1]} : vector<4x96xf32> to vector<4x32xf32>
    %358 = arith.mulf %356, %346 : vector<4x32xf32>
    %359 = arith.mulf %355, %354 : vector<4x32xf32>
    %360 = arith.addf %358, %359 : vector<4x32xf32>
    %361 = math.tanh %360 : vector<4x32xf32>
    %362 = arith.mulf %357, %361 : vector<4x32xf32>
    %363 = vector.broadcast %305 : vector<4x1xf32> to vector<4x32xf32>
    %364 = arith.mulf %363, %362 : vector<4x32xf32>
    %365 = vector.broadcast %305 : vector<4x1xf32> to vector<4x32xf32>
    %366 = arith.mulf %365, %360 : vector<4x32xf32>
    %367 = vector.broadcast %309 : vector<4x1xf32> to vector<4x32xf32>
    %368 = arith.mulf %367, %346 : vector<4x32xf32>
    %369 = arith.addf %366, %368 : vector<4x32xf32>
    %370 = arith.truncf %340 : vector<4x32xf32> to vector<4x32xbf16>
    %371 = arith.index_cast %c3_i32 : i32 to index
    %c0_97 = arith.constant 0 : index
    %c0_98 = arith.constant 0 : index
    %372 = vector.load %arg6[%371, %c0_97, %c0_98] : memref<16x4x32xbf16, #tpu.memory_space<vmem>>, vector<1x4x32xbf16>
    %373 = vector.shape_cast %372 : vector<1x4x32xbf16> to vector<4x32xbf16>
    %374 = vector.shape_cast %370 : vector<4x32xbf16> to vector<1x4x32xbf16>
    tpu.vector_store %arg6[%371, %c0_97, %c0_98], %374 {strides = array<i32>} : memref<16x4x32xbf16, #tpu.memory_space<vmem>>, vector<1x4x32xbf16>,
    %375 = arith.truncf %364 : vector<4x32xf32> to vector<4x32xbf16>
    %376 = arith.index_cast %295 : i32 to index
    %c0_99 = arith.constant 0 : index
    %c0_100 = arith.constant 0 : index
    %377 = vector.load %arg7[%376, %c0_99, %c0_100] : memref<16x4x32xbf16, #tpu.memory_space<vmem>>, vector<1x4x32xbf16>
    %378 = vector.shape_cast %377 : vector<1x4x32xbf16> to vector<4x32xbf16>
    %379 = vector.shape_cast %375 : vector<4x32xbf16> to vector<1x4x32xbf16>
    tpu.vector_store %arg7[%376, %c0_99, %c0_100], %379 {strides = array<i32>} : memref<16x4x32xbf16, #tpu.memory_space<vmem>>, vector<1x4x32xbf16>,
    %380 = vector.extract_strided_slice %296 {offsets = [0, 0], sizes = [4, 32], strides = [1, 1]} : vector<4x64xf32> to vector<4x32xf32>
    %381 = vector.broadcast %307 : vector<4x1xf32> to vector<4x32xf32>
    %382 = arith.mulf %381, %380 : vector<4x32xf32>
    %383 = arith.addf %340, %382 : vector<4x32xf32>
    %384 = vector.extract_strided_slice %296 {offsets = [0, 32], sizes = [4, 32], strides = [1, 1]} : vector<4x64xf32> to vector<4x32xf32>
    %385 = vector.broadcast %309 : vector<4x1xf32> to vector<4x32xf32>
    %386 = arith.mulf %385, %384 : vector<4x32xf32>
    %387 = arith.addf %364, %386 : vector<4x32xf32>
    %388 = tpu.concatenate %383, %387 in 1 : vector<4x32xf32>, vector<4x32xf32> -> vector<4x64xf32>
    %c0_101 = arith.constant 0 : index
    %c0_102 = arith.constant 0 : index
    %389 = vector.load %arg8[%c0_101, %c0_102] : memref<4x64xf32, #tpu.memory_space<vmem>>, vector<4x64xf32>
    tpu.vector_store %arg8[%c0_101, %c0_102], %388 {strides = array<i32>} : memref<4x64xf32, #tpu.memory_space<vmem>>, vector<4x64xf32>,
    %390 = tpu.concatenate %345, %369 in 1 : vector<4x32xf32>, vector<4x32xf32> -> vector<4x64xf32>
    %c0_103 = arith.constant 0 : index
    %c0_104 = arith.constant 0 : index
    %391 = vector.load %arg9[%c0_103, %c0_104] : memref<4x64xf32, #tpu.memory_space<vmem>>, vector<4x64xf32>
    tpu.vector_store %arg9[%c0_103, %c0_104], %390 {strides = array<i32>} : memref<4x64xf32, #tpu.memory_space<vmem>>, vector<4x64xf32>,
    %c4_i32 = arith.constant 4 : i32
    %c15_i32_105 = arith.constant 15 : i32
    %392 = arith.subi %c15_i32_105, %c4_i32 : i32
    %c0_106 = arith.constant 0 : index
    %c0_107 = arith.constant 0 : index
    %393 = vector.load %arg8[%c0_106, %c0_107] : memref<4x64xf32, #tpu.memory_space<vmem>>, vector<4x64xf32>
    %c0_108 = arith.constant 0 : index
    %c0_109 = arith.constant 0 : index
    %394 = vector.load %arg9[%c0_108, %c0_109] : memref<4x64xf32, #tpu.memory_space<vmem>>, vector<4x64xf32>
    %395 = arith.truncf %393 : vector<4x64xf32> to vector<4x64xbf16>
    %cst_110 = arith.constant dense<0.000000e+00> : vector<4x256xf32>
    %396 = tpu.matmul %395, %3, %cst_110 {dimension_numbers = #tpu.dot_dimension_numbers<[1], [0], [0], [1], [0, 0, 1, 1], [], []>} : vector<4x64xbf16>, vector<64x256xbf16>, vector<4x256xf32> -> vector<4x256xf32>
    %397 = arith.index_cast %c4_i32 : i32 to index
    %c0_111 = arith.constant 0 : index
    %c0_112 = arith.constant 0 : index
    %398 = vector.load %arg3[%397, %c0_111, %c0_112] : memref<16x4x1xf32, #tpu.memory_space<vmem>>, vector<1x4x1xf32>
    %399 = vector.shape_cast %398 : vector<1x4x1xf32> to vector<4x1xf32>
    %400 = arith.index_cast %392 : i32 to index
    %c0_113 = arith.constant 0 : index
    %c0_114 = arith.constant 0 : index
    %401 = vector.load %arg4[%400, %c0_113, %c0_114] : memref<16x4x1xf32, #tpu.memory_space<vmem>>, vector<1x4x1xf32>
    %402 = vector.shape_cast %401 : vector<1x4x1xf32> to vector<4x1xf32>
    %cst_115 = arith.constant 1.000000e+00 : f32
    %403 = vector.broadcast %cst_115 : f32 to vector<4x1xf32>
    %404 = arith.subf %403, %399 : vector<4x1xf32>
    %cst_116 = arith.constant 1.000000e+00 : f32
    %405 = vector.broadcast %cst_116 : f32 to vector<4x1xf32>
    %406 = arith.subf %405, %402 : vector<4x1xf32>
    %407 = arith.index_cast %c4_i32 : i32 to index
    %c0_117 = arith.constant 0 : index
    %c0_118 = arith.constant 0 : index
    %408 = vector.load %arg1[%407, %c0_117, %c0_118] : memref<16x4x128xbf16, #tpu.memory_space<vmem>>, vector<1x4x128xbf16>
    %409 = vector.shape_cast %408 : vector<1x4x128xbf16> to vector<4x128xbf16>
    %410 = arith.extf %409 : vector<4x128xbf16> to vector<4x128xf32>
    %411 = vector.extract_strided_slice %396 {offsets = [0, 0], sizes = [4, 128], strides = [1, 1]} : vector<4x256xf32> to vector<4x128xf32>
    %412 = arith.addf %410, %411 : vector<4x128xf32>
    %413 = arith.index_cast %392 : i32 to index
    %c0_119 = arith.constant 0 : index
    %c0_120 = arith.constant 0 : index
    %414 = vector.load %arg2[%413, %c0_119, %c0_120] : memref<16x4x128xbf16, #tpu.memory_space<vmem>>, vector<1x4x128xbf16>
    %415 = vector.shape_cast %414 : vector<1x4x128xbf16> to vector<4x128xbf16>
    %416 = arith.extf %415 : vector<4x128xbf16> to vector<4x128xf32>
    %417 = vector.extract_strided_slice %396 {offsets = [0, 128], sizes = [4, 128], strides = [1, 1]} : vector<4x256xf32> to vector<4x128xf32>
    %418 = arith.addf %416, %417 : vector<4x128xf32>
    %419 = vector.extract_strided_slice %394 {offsets = [0, 0], sizes = [4, 32], strides = [1, 1]} : vector<4x64xf32> to vector<4x32xf32>
    %420 = vector.extract_strided_slice %412 {offsets = [0, 0], sizes = [4, 96], strides = [1, 1]} : vector<4x128xf32> to vector<4x96xf32>
    %421 = arith.negf %420 : vector<4x96xf32>
    %422 = math.exp %421 : vector<4x96xf32>
    %cst_121 = arith.constant 1.000000e+00 : f32
    %423 = vector.broadcast %cst_121 : f32 to vector<4x96xf32>
    %424 = arith.addf %423, %422 : vector<4x96xf32>
    %425 = arith.divf %423, %424 : vector<4x96xf32>
    %426 = vector.extract_strided_slice %412 {offsets = [0, 96], sizes = [4, 32], strides = [1, 1]} : vector<4x128xf32> to vector<4x32xf32>
    %427 = math.tanh %426 : vector<4x32xf32>
    %428 = vector.extract_strided_slice %425 {offsets = [0, 0], sizes = [4, 32], strides = [1, 1]} : vector<4x96xf32> to vector<4x32xf32>
    %429 = vector.extract_strided_slice %425 {offsets = [0, 32], sizes = [4, 32], strides = [1, 1]} : vector<4x96xf32> to vector<4x32xf32>
    %430 = vector.extract_strided_slice %425 {offsets = [0, 64], sizes = [4, 32], strides = [1, 1]} : vector<4x96xf32> to vector<4x32xf32>
    %431 = arith.mulf %429, %419 : vector<4x32xf32>
    %432 = arith.mulf %428, %427 : vector<4x32xf32>
    %433 = arith.addf %431, %432 : vector<4x32xf32>
    %434 = math.tanh %433 : vector<4x32xf32>
    %435 = arith.mulf %430, %434 : vector<4x32xf32>
    %436 = vector.broadcast %399 : vector<4x1xf32> to vector<4x32xf32>
    %437 = arith.mulf %436, %435 : vector<4x32xf32>
    %438 = vector.broadcast %399 : vector<4x1xf32> to vector<4x32xf32>
    %439 = arith.mulf %438, %433 : vector<4x32xf32>
    %440 = vector.broadcast %404 : vector<4x1xf32> to vector<4x32xf32>
    %441 = arith.mulf %440, %419 : vector<4x32xf32>
    %442 = arith.addf %439, %441 : vector<4x32xf32>
    %443 = vector.extract_strided_slice %394 {offsets = [0, 32], sizes = [4, 32], strides = [1, 1]} : vector<4x64xf32> to vector<4x32xf32>
    %444 = vector.extract_strided_slice %418 {offsets = [0, 0], sizes = [4, 96], strides = [1, 1]} : vector<4x128xf32> to vector<4x96xf32>
    %445 = arith.negf %444 : vector<4x96xf32>
    %446 = math.exp %445 : vector<4x96xf32>
    %cst_122 = arith.constant 1.000000e+00 : f32
    %447 = vector.broadcast %cst_122 : f32 to vector<4x96xf32>
    %448 = arith.addf %447, %446 : vector<4x96xf32>
    %449 = arith.divf %447, %448 : vector<4x96xf32>
    %450 = vector.extract_strided_slice %418 {offsets = [0, 96], sizes = [4, 32], strides = [1, 1]} : vector<4x128xf32> to vector<4x32xf32>
    %451 = math.tanh %450 : vector<4x32xf32>
    %452 = vector.extract_strided_slice %449 {offsets = [0, 0], sizes = [4, 32], strides = [1, 1]} : vector<4x96xf32> to vector<4x32xf32>
    %453 = vector.extract_strided_slice %449 {offsets = [0, 32], sizes = [4, 32], strides = [1, 1]} : vector<4x96xf32> to vector<4x32xf32>
    %454 = vector.extract_strided_slice %449 {offsets = [0, 64], sizes = [4, 32], strides = [1, 1]} : vector<4x96xf32> to vector<4x32xf32>
    %455 = arith.mulf %453, %443 : vector<4x32xf32>
    %456 = arith.mulf %452, %451 : vector<4x32xf32>
    %457 = arith.addf %455, %456 : vector<4x32xf32>
    %458 = math.tanh %457 : vector<4x32xf32>
    %459 = arith.mulf %454, %458 : vector<4x32xf32>
    %460 = vector.broadcast %402 : vector<4x1xf32> to vector<4x32xf32>
    %461 = arith.mulf %460, %459 : vector<4x32xf32>
    %462 = vector.broadcast %402 : vector<4x1xf32> to vector<4x32xf32>
    %463 = arith.mulf %462, %457 : vector<4x32xf32>
    %464 = vector.broadcast %406 : vector<4x1xf32> to vector<4x32xf32>
    %465 = arith.mulf %464, %443 : vector<4x32xf32>
    %466 = arith.addf %463, %465 : vector<4x32xf32>
    %467 = arith.truncf %437 : vector<4x32xf32> to vector<4x32xbf16>
    %468 = arith.index_cast %c4_i32 : i32 to index
    %c0_123 = arith.constant 0 : index
    %c0_124 = arith.constant 0 : index
    %469 = vector.load %arg6[%468, %c0_123, %c0_124] : memref<16x4x32xbf16, #tpu.memory_space<vmem>>, vector<1x4x32xbf16>
    %470 = vector.shape_cast %469 : vector<1x4x32xbf16> to vector<4x32xbf16>
    %471 = vector.shape_cast %467 : vector<4x32xbf16> to vector<1x4x32xbf16>
    tpu.vector_store %arg6[%468, %c0_123, %c0_124], %471 {strides = array<i32>} : memref<16x4x32xbf16, #tpu.memory_space<vmem>>, vector<1x4x32xbf16>,
    %472 = arith.truncf %461 : vector<4x32xf32> to vector<4x32xbf16>
    %473 = arith.index_cast %392 : i32 to index
    %c0_125 = arith.constant 0 : index
    %c0_126 = arith.constant 0 : index
    %474 = vector.load %arg7[%473, %c0_125, %c0_126] : memref<16x4x32xbf16, #tpu.memory_space<vmem>>, vector<1x4x32xbf16>
    %475 = vector.shape_cast %474 : vector<1x4x32xbf16> to vector<4x32xbf16>
    %476 = vector.shape_cast %472 : vector<4x32xbf16> to vector<1x4x32xbf16>
    tpu.vector_store %arg7[%473, %c0_125, %c0_126], %476 {strides = array<i32>} : memref<16x4x32xbf16, #tpu.memory_space<vmem>>, vector<1x4x32xbf16>,
    %477 = vector.extract_strided_slice %393 {offsets = [0, 0], sizes = [4, 32], strides = [1, 1]} : vector<4x64xf32> to vector<4x32xf32>
    %478 = vector.broadcast %404 : vector<4x1xf32> to vector<4x32xf32>
    %479 = arith.mulf %478, %477 : vector<4x32xf32>
    %480 = arith.addf %437, %479 : vector<4x32xf32>
    %481 = vector.extract_strided_slice %393 {offsets = [0, 32], sizes = [4, 32], strides = [1, 1]} : vector<4x64xf32> to vector<4x32xf32>
    %482 = vector.broadcast %406 : vector<4x1xf32> to vector<4x32xf32>
    %483 = arith.mulf %482, %481 : vector<4x32xf32>
    %484 = arith.addf %461, %483 : vector<4x32xf32>
    %485 = tpu.concatenate %480, %484 in 1 : vector<4x32xf32>, vector<4x32xf32> -> vector<4x64xf32>
    %c0_127 = arith.constant 0 : index
    %c0_128 = arith.constant 0 : index
    %486 = vector.load %arg8[%c0_127, %c0_128] : memref<4x64xf32, #tpu.memory_space<vmem>>, vector<4x64xf32>
    tpu.vector_store %arg8[%c0_127, %c0_128], %485 {strides = array<i32>} : memref<4x64xf32, #tpu.memory_space<vmem>>, vector<4x64xf32>,
    %487 = tpu.concatenate %442, %466 in 1 : vector<4x32xf32>, vector<4x32xf32> -> vector<4x64xf32>
    %c0_129 = arith.constant 0 : index
    %c0_130 = arith.constant 0 : index
    %488 = vector.load %arg9[%c0_129, %c0_130] : memref<4x64xf32, #tpu.memory_space<vmem>>, vector<4x64xf32>
    tpu.vector_store %arg9[%c0_129, %c0_130], %487 {strides = array<i32>} : memref<4x64xf32, #tpu.memory_space<vmem>>, vector<4x64xf32>,
    %c5_i32 = arith.constant 5 : i32
    %c15_i32_131 = arith.constant 15 : i32
    %489 = arith.subi %c15_i32_131, %c5_i32 : i32
    %c0_132 = arith.constant 0 : index
    %c0_133 = arith.constant 0 : index
    %490 = vector.load %arg8[%c0_132, %c0_133] : memref<4x64xf32, #tpu.memory_space<vmem>>, vector<4x64xf32>
    %c0_134 = arith.constant 0 : index
    %c0_135 = arith.constant 0 : index
    %491 = vector.load %arg9[%c0_134, %c0_135] : memref<4x64xf32, #tpu.memory_space<vmem>>, vector<4x64xf32>
    %492 = arith.truncf %490 : vector<4x64xf32> to vector<4x64xbf16>
    %cst_136 = arith.constant dense<0.000000e+00> : vector<4x256xf32>
    %493 = tpu.matmul %492, %3, %cst_136 {dimension_numbers = #tpu.dot_dimension_numbers<[1], [0], [0], [1], [0, 0, 1, 1], [], []>} : vector<4x64xbf16>, vector<64x256xbf16>, vector<4x256xf32> -> vector<4x256xf32>
    %494 = arith.index_cast %c5_i32 : i32 to index
    %c0_137 = arith.constant 0 : index
    %c0_138 = arith.constant 0 : index
    %495 = vector.load %arg3[%494, %c0_137, %c0_138] : memref<16x4x1xf32, #tpu.memory_space<vmem>>, vector<1x4x1xf32>
    %496 = vector.shape_cast %495 : vector<1x4x1xf32> to vector<4x1xf32>
    %497 = arith.index_cast %489 : i32 to index
    %c0_139 = arith.constant 0 : index
    %c0_140 = arith.constant 0 : index
    %498 = vector.load %arg4[%497, %c0_139, %c0_140] : memref<16x4x1xf32, #tpu.memory_space<vmem>>, vector<1x4x1xf32>
    %499 = vector.shape_cast %498 : vector<1x4x1xf32> to vector<4x1xf32>
    %cst_141 = arith.constant 1.000000e+00 : f32
    %500 = vector.broadcast %cst_141 : f32 to vector<4x1xf32>
    %501 = arith.subf %500, %496 : vector<4x1xf32>
    %cst_142 = arith.constant 1.000000e+00 : f32
    %502 = vector.broadcast %cst_142 : f32 to vector<4x1xf32>
    %503 = arith.subf %502, %499 : vector<4x1xf32>
    %504 = arith.index_cast %c5_i32 : i32 to index
    %c0_143 = arith.constant 0 : index
    %c0_144 = arith.constant 0 : index
    %505 = vector.load %arg1[%504, %c0_143, %c0_144] : memref<16x4x128xbf16, #tpu.memory_space<vmem>>, vector<1x4x128xbf16>
    %506 = vector.shape_cast %505 : vector<1x4x128xbf16> to vector<4x128xbf16>
    %507 = arith.extf %506 : vector<4x128xbf16> to vector<4x128xf32>
    %508 = vector.extract_strided_slice %493 {offsets = [0, 0], sizes = [4, 128], strides = [1, 1]} : vector<4x256xf32> to vector<4x128xf32>
    %509 = arith.addf %507, %508 : vector<4x128xf32>
    %510 = arith.index_cast %489 : i32 to index
    %c0_145 = arith.constant 0 : index
    %c0_146 = arith.constant 0 : index
    %511 = vector.load %arg2[%510, %c0_145, %c0_146] : memref<16x4x128xbf16, #tpu.memory_space<vmem>>, vector<1x4x128xbf16>
    %512 = vector.shape_cast %511 : vector<1x4x128xbf16> to vector<4x128xbf16>
    %513 = arith.extf %512 : vector<4x128xbf16> to vector<4x128xf32>
    %514 = vector.extract_strided_slice %493 {offsets = [0, 128], sizes = [4, 128], strides = [1, 1]} : vector<4x256xf32> to vector<4x128xf32>
    %515 = arith.addf %513, %514 : vector<4x128xf32>
    %516 = vector.extract_strided_slice %491 {offsets = [0, 0], sizes = [4, 32], strides = [1, 1]} : vector<4x64xf32> to vector<4x32xf32>
    %517 = vector.extract_strided_slice %509 {offsets = [0, 0], sizes = [4, 96], strides = [1, 1]} : vector<4x128xf32> to vector<4x96xf32>
    %518 = arith.negf %517 : vector<4x96xf32>
    %519 = math.exp %518 : vector<4x96xf32>
    %cst_147 = arith.constant 1.000000e+00 : f32
    %520 = vector.broadcast %cst_147 : f32 to vector<4x96xf32>
    %521 = arith.addf %520, %519 : vector<4x96xf32>
    %522 = arith.divf %520, %521 : vector<4x96xf32>
    %523 = vector.extract_strided_slice %509 {offsets = [0, 96], sizes = [4, 32], strides = [1, 1]} : vector<4x128xf32> to vector<4x32xf32>
    %524 = math.tanh %523 : vector<4x32xf32>
    %525 = vector.extract_strided_slice %522 {offsets = [0, 0], sizes = [4, 32], strides = [1, 1]} : vector<4x96xf32> to vector<4x32xf32>
    %526 = vector.extract_strided_slice %522 {offsets = [0, 32], sizes = [4, 32], strides = [1, 1]} : vector<4x96xf32> to vector<4x32xf32>
    %527 = vector.extract_strided_slice %522 {offsets = [0, 64], sizes = [4, 32], strides = [1, 1]} : vector<4x96xf32> to vector<4x32xf32>
    %528 = arith.mulf %526, %516 : vector<4x32xf32>
    %529 = arith.mulf %525, %524 : vector<4x32xf32>
    %530 = arith.addf %528, %529 : vector<4x32xf32>
    %531 = math.tanh %530 : vector<4x32xf32>
    %532 = arith.mulf %527, %531 : vector<4x32xf32>
    %533 = vector.broadcast %496 : vector<4x1xf32> to vector<4x32xf32>
    %534 = arith.mulf %533, %532 : vector<4x32xf32>
    %535 = vector.broadcast %496 : vector<4x1xf32> to vector<4x32xf32>
    %536 = arith.mulf %535, %530 : vector<4x32xf32>
    %537 = vector.broadcast %501 : vector<4x1xf32> to vector<4x32xf32>
    %538 = arith.mulf %537, %516 : vector<4x32xf32>
    %539 = arith.addf %536, %538 : vector<4x32xf32>
    %540 = vector.extract_strided_slice %491 {offsets = [0, 32], sizes = [4, 32], strides = [1, 1]} : vector<4x64xf32> to vector<4x32xf32>
    %541 = vector.extract_strided_slice %515 {offsets = [0, 0], sizes = [4, 96], strides = [1, 1]} : vector<4x128xf32> to vector<4x96xf32>
    %542 = arith.negf %541 : vector<4x96xf32>
    %543 = math.exp %542 : vector<4x96xf32>
    %cst_148 = arith.constant 1.000000e+00 : f32
    %544 = vector.broadcast %cst_148 : f32 to vector<4x96xf32>
    %545 = arith.addf %544, %543 : vector<4x96xf32>
    %546 = arith.divf %544, %545 : vector<4x96xf32>
    %547 = vector.extract_strided_slice %515 {offsets = [0, 96], sizes = [4, 32], strides = [1, 1]} : vector<4x128xf32> to vector<4x32xf32>
    %548 = math.tanh %547 : vector<4x32xf32>
    %549 = vector.extract_strided_slice %546 {offsets = [0, 0], sizes = [4, 32], strides = [1, 1]} : vector<4x96xf32> to vector<4x32xf32>
    %550 = vector.extract_strided_slice %546 {offsets = [0, 32], sizes = [4, 32], strides = [1, 1]} : vector<4x96xf32> to vector<4x32xf32>
    %551 = vector.extract_strided_slice %546 {offsets = [0, 64], sizes = [4, 32], strides = [1, 1]} : vector<4x96xf32> to vector<4x32xf32>
    %552 = arith.mulf %550, %540 : vector<4x32xf32>
    %553 = arith.mulf %549, %548 : vector<4x32xf32>
    %554 = arith.addf %552, %553 : vector<4x32xf32>
    %555 = math.tanh %554 : vector<4x32xf32>
    %556 = arith.mulf %551, %555 : vector<4x32xf32>
    %557 = vector.broadcast %499 : vector<4x1xf32> to vector<4x32xf32>
    %558 = arith.mulf %557, %556 : vector<4x32xf32>
    %559 = vector.broadcast %499 : vector<4x1xf32> to vector<4x32xf32>
    %560 = arith.mulf %559, %554 : vector<4x32xf32>
    %561 = vector.broadcast %503 : vector<4x1xf32> to vector<4x32xf32>
    %562 = arith.mulf %561, %540 : vector<4x32xf32>
    %563 = arith.addf %560, %562 : vector<4x32xf32>
    %564 = arith.truncf %534 : vector<4x32xf32> to vector<4x32xbf16>
    %565 = arith.index_cast %c5_i32 : i32 to index
    %c0_149 = arith.constant 0 : index
    %c0_150 = arith.constant 0 : index
    %566 = vector.load %arg6[%565, %c0_149, %c0_150] : memref<16x4x32xbf16, #tpu.memory_space<vmem>>, vector<1x4x32xbf16>
    %567 = vector.shape_cast %566 : vector<1x4x32xbf16> to vector<4x32xbf16>
    %568 = vector.shape_cast %564 : vector<4x32xbf16> to vector<1x4x32xbf16>
    tpu.vector_store %arg6[%565, %c0_149, %c0_150], %568 {strides = array<i32>} : memref<16x4x32xbf16, #tpu.memory_space<vmem>>, vector<1x4x32xbf16>,
    %569 = arith.truncf %558 : vector<4x32xf32> to vector<4x32xbf16>
    %570 = arith.index_cast %489 : i32 to index
    %c0_151 = arith.constant 0 : index
    %c0_152 = arith.constant 0 : index
    %571 = vector.load %arg7[%570, %c0_151, %c0_152] : memref<16x4x32xbf16, #tpu.memory_space<vmem>>, vector<1x4x32xbf16>
    %572 = vector.shape_cast %571 : vector<1x4x32xbf16> to vector<4x32xbf16>
    %573 = vector.shape_cast %569 : vector<4x32xbf16> to vector<1x4x32xbf16>
    tpu.vector_store %arg7[%570, %c0_151, %c0_152], %573 {strides = array<i32>} : memref<16x4x32xbf16, #tpu.memory_space<vmem>>, vector<1x4x32xbf16>,
    %574 = vector.extract_strided_slice %490 {offsets = [0, 0], sizes = [4, 32], strides = [1, 1]} : vector<4x64xf32> to vector<4x32xf32>
    %575 = vector.broadcast %501 : vector<4x1xf32> to vector<4x32xf32>
    %576 = arith.mulf %575, %574 : vector<4x32xf32>
    %577 = arith.addf %534, %576 : vector<4x32xf32>
    %578 = vector.extract_strided_slice %490 {offsets = [0, 32], sizes = [4, 32], strides = [1, 1]} : vector<4x64xf32> to vector<4x32xf32>
    %579 = vector.broadcast %503 : vector<4x1xf32> to vector<4x32xf32>
    %580 = arith.mulf %579, %578 : vector<4x32xf32>
    %581 = arith.addf %558, %580 : vector<4x32xf32>
    %582 = tpu.concatenate %577, %581 in 1 : vector<4x32xf32>, vector<4x32xf32> -> vector<4x64xf32>
    %c0_153 = arith.constant 0 : index
    %c0_154 = arith.constant 0 : index
    %583 = vector.load %arg8[%c0_153, %c0_154] : memref<4x64xf32, #tpu.memory_space<vmem>>, vector<4x64xf32>
    tpu.vector_store %arg8[%c0_153, %c0_154], %582 {strides = array<i32>} : memref<4x64xf32, #tpu.memory_space<vmem>>, vector<4x64xf32>,
    %584 = tpu.concatenate %539, %563 in 1 : vector<4x32xf32>, vector<4x32xf32> -> vector<4x64xf32>
    %c0_155 = arith.constant 0 : index
    %c0_156 = arith.constant 0 : index
    %585 = vector.load %arg9[%c0_155, %c0_156] : memref<4x64xf32, #tpu.memory_space<vmem>>, vector<4x64xf32>
    tpu.vector_store %arg9[%c0_155, %c0_156], %584 {strides = array<i32>} : memref<4x64xf32, #tpu.memory_space<vmem>>, vector<4x64xf32>,
    %c6_i32 = arith.constant 6 : i32
    %c15_i32_157 = arith.constant 15 : i32
    %586 = arith.subi %c15_i32_157, %c6_i32 : i32
    %c0_158 = arith.constant 0 : index
    %c0_159 = arith.constant 0 : index
    %587 = vector.load %arg8[%c0_158, %c0_159] : memref<4x64xf32, #tpu.memory_space<vmem>>, vector<4x64xf32>
    %c0_160 = arith.constant 0 : index
    %c0_161 = arith.constant 0 : index
    %588 = vector.load %arg9[%c0_160, %c0_161] : memref<4x64xf32, #tpu.memory_space<vmem>>, vector<4x64xf32>
    %589 = arith.truncf %587 : vector<4x64xf32> to vector<4x64xbf16>
    %cst_162 = arith.constant dense<0.000000e+00> : vector<4x256xf32>
    %590 = tpu.matmul %589, %3, %cst_162 {dimension_numbers = #tpu.dot_dimension_numbers<[1], [0], [0], [1], [0, 0, 1, 1], [], []>} : vector<4x64xbf16>, vector<64x256xbf16>, vector<4x256xf32> -> vector<4x256xf32>
    %591 = arith.index_cast %c6_i32 : i32 to index
    %c0_163 = arith.constant 0 : index
    %c0_164 = arith.constant 0 : index
    %592 = vector.load %arg3[%591, %c0_163, %c0_164] : memref<16x4x1xf32, #tpu.memory_space<vmem>>, vector<1x4x1xf32>
    %593 = vector.shape_cast %592 : vector<1x4x1xf32> to vector<4x1xf32>
    %594 = arith.index_cast %586 : i32 to index
    %c0_165 = arith.constant 0 : index
    %c0_166 = arith.constant 0 : index
    %595 = vector.load %arg4[%594, %c0_165, %c0_166] : memref<16x4x1xf32, #tpu.memory_space<vmem>>, vector<1x4x1xf32>
    %596 = vector.shape_cast %595 : vector<1x4x1xf32> to vector<4x1xf32>
    %cst_167 = arith.constant 1.000000e+00 : f32
    %597 = vector.broadcast %cst_167 : f32 to vector<4x1xf32>
    %598 = arith.subf %597, %593 : vector<4x1xf32>
    %cst_168 = arith.constant 1.000000e+00 : f32
    %599 = vector.broadcast %cst_168 : f32 to vector<4x1xf32>
    %600 = arith.subf %599, %596 : vector<4x1xf32>
    %601 = arith.index_cast %c6_i32 : i32 to index
    %c0_169 = arith.constant 0 : index
    %c0_170 = arith.constant 0 : index
    %602 = vector.load %arg1[%601, %c0_169, %c0_170] : memref<16x4x128xbf16, #tpu.memory_space<vmem>>, vector<1x4x128xbf16>
    %603 = vector.shape_cast %602 : vector<1x4x128xbf16> to vector<4x128xbf16>
    %604 = arith.extf %603 : vector<4x128xbf16> to vector<4x128xf32>
    %605 = vector.extract_strided_slice %590 {offsets = [0, 0], sizes = [4, 128], strides = [1, 1]} : vector<4x256xf32> to vector<4x128xf32>
    %606 = arith.addf %604, %605 : vector<4x128xf32>
    %607 = arith.index_cast %586 : i32 to index
    %c0_171 = arith.constant 0 : index
    %c0_172 = arith.constant 0 : index
    %608 = vector.load %arg2[%607, %c0_171, %c0_172] : memref<16x4x128xbf16, #tpu.memory_space<vmem>>, vector<1x4x128xbf16>
    %609 = vector.shape_cast %608 : vector<1x4x128xbf16> to vector<4x128xbf16>
    %610 = arith.extf %609 : vector<4x128xbf16> to vector<4x128xf32>
    %611 = vector.extract_strided_slice %590 {offsets = [0, 128], sizes = [4, 128], strides = [1, 1]} : vector<4x256xf32> to vector<4x128xf32>
    %612 = arith.addf %610, %611 : vector<4x128xf32>
    %613 = vector.extract_strided_slice %588 {offsets = [0, 0], sizes = [4, 32], strides = [1, 1]} : vector<4x64xf32> to vector<4x32xf32>
    %614 = vector.extract_strided_slice %606 {offsets = [0, 0], sizes = [4, 96], strides = [1, 1]} : vector<4x128xf32> to vector<4x96xf32>
    %615 = arith.negf %614 : vector<4x96xf32>
    %616 = math.exp %615 : vector<4x96xf32>
    %cst_173 = arith.constant 1.000000e+00 : f32
    %617 = vector.broadcast %cst_173 : f32 to vector<4x96xf32>
    %618 = arith.addf %617, %616 : vector<4x96xf32>
    %619 = arith.divf %617, %618 : vector<4x96xf32>
    %620 = vector.extract_strided_slice %606 {offsets = [0, 96], sizes = [4, 32], strides = [1, 1]} : vector<4x128xf32> to vector<4x32xf32>
    %621 = math.tanh %620 : vector<4x32xf32>
    %622 = vector.extract_strided_slice %619 {offsets = [0, 0], sizes = [4, 32], strides = [1, 1]} : vector<4x96xf32> to vector<4x32xf32>
    %623 = vector.extract_strided_slice %619 {offsets = [0, 32], sizes = [4, 32], strides = [1, 1]} : vector<4x96xf32> to vector<4x32xf32>
    %624 = vector.extract_strided_slice %619 {offsets = [0, 64], sizes = [4, 32], strides = [1, 1]} : vector<4x96xf32> to vector<4x32xf32>
    %625 = arith.mulf %623, %613 : vector<4x32xf32>
    %626 = arith.mulf %622, %621 : vector<4x32xf32>
    %627 = arith.addf %625, %626 : vector<4x32xf32>
    %628 = math.tanh %627 : vector<4x32xf32>
    %629 = arith.mulf %624, %628 : vector<4x32xf32>
    %630 = vector.broadcast %593 : vector<4x1xf32> to vector<4x32xf32>
    %631 = arith.mulf %630, %629 : vector<4x32xf32>
    %632 = vector.broadcast %593 : vector<4x1xf32> to vector<4x32xf32>
    %633 = arith.mulf %632, %627 : vector<4x32xf32>
    %634 = vector.broadcast %598 : vector<4x1xf32> to vector<4x32xf32>
    %635 = arith.mulf %634, %613 : vector<4x32xf32>
    %636 = arith.addf %633, %635 : vector<4x32xf32>
    %637 = vector.extract_strided_slice %588 {offsets = [0, 32], sizes = [4, 32], strides = [1, 1]} : vector<4x64xf32> to vector<4x32xf32>
    %638 = vector.extract_strided_slice %612 {offsets = [0, 0], sizes = [4, 96], strides = [1, 1]} : vector<4x128xf32> to vector<4x96xf32>
    %639 = arith.negf %638 : vector<4x96xf32>
    %640 = math.exp %639 : vector<4x96xf32>
    %cst_174 = arith.constant 1.000000e+00 : f32
    %641 = vector.broadcast %cst_174 : f32 to vector<4x96xf32>
    %642 = arith.addf %641, %640 : vector<4x96xf32>
    %643 = arith.divf %641, %642 : vector<4x96xf32>
    %644 = vector.extract_strided_slice %612 {offsets = [0, 96], sizes = [4, 32], strides = [1, 1]} : vector<4x128xf32> to vector<4x32xf32>
    %645 = math.tanh %644 : vector<4x32xf32>
    %646 = vector.extract_strided_slice %643 {offsets = [0, 0], sizes = [4, 32], strides = [1, 1]} : vector<4x96xf32> to vector<4x32xf32>
    %647 = vector.extract_strided_slice %643 {offsets = [0, 32], sizes = [4, 32], strides = [1, 1]} : vector<4x96xf32> to vector<4x32xf32>
    %648 = vector.extract_strided_slice %643 {offsets = [0, 64], sizes = [4, 32], strides = [1, 1]} : vector<4x96xf32> to vector<4x32xf32>
    %649 = arith.mulf %647, %637 : vector<4x32xf32>
    %650 = arith.mulf %646, %645 : vector<4x32xf32>
    %651 = arith.addf %649, %650 : vector<4x32xf32>
    %652 = math.tanh %651 : vector<4x32xf32>
    %653 = arith.mulf %648, %652 : vector<4x32xf32>
    %654 = vector.broadcast %596 : vector<4x1xf32> to vector<4x32xf32>
    %655 = arith.mulf %654, %653 : vector<4x32xf32>
    %656 = vector.broadcast %596 : vector<4x1xf32> to vector<4x32xf32>
    %657 = arith.mulf %656, %651 : vector<4x32xf32>
    %658 = vector.broadcast %600 : vector<4x1xf32> to vector<4x32xf32>
    %659 = arith.mulf %658, %637 : vector<4x32xf32>
    %660 = arith.addf %657, %659 : vector<4x32xf32>
    %661 = arith.truncf %631 : vector<4x32xf32> to vector<4x32xbf16>
    %662 = arith.index_cast %c6_i32 : i32 to index
    %c0_175 = arith.constant 0 : index
    %c0_176 = arith.constant 0 : index
    %663 = vector.load %arg6[%662, %c0_175, %c0_176] : memref<16x4x32xbf16, #tpu.memory_space<vmem>>, vector<1x4x32xbf16>
    %664 = vector.shape_cast %663 : vector<1x4x32xbf16> to vector<4x32xbf16>
    %665 = vector.shape_cast %661 : vector<4x32xbf16> to vector<1x4x32xbf16>
    tpu.vector_store %arg6[%662, %c0_175, %c0_176], %665 {strides = array<i32>} : memref<16x4x32xbf16, #tpu.memory_space<vmem>>, vector<1x4x32xbf16>,
    %666 = arith.truncf %655 : vector<4x32xf32> to vector<4x32xbf16>
    %667 = arith.index_cast %586 : i32 to index
    %c0_177 = arith.constant 0 : index
    %c0_178 = arith.constant 0 : index
    %668 = vector.load %arg7[%667, %c0_177, %c0_178] : memref<16x4x32xbf16, #tpu.memory_space<vmem>>, vector<1x4x32xbf16>
    %669 = vector.shape_cast %668 : vector<1x4x32xbf16> to vector<4x32xbf16>
    %670 = vector.shape_cast %666 : vector<4x32xbf16> to vector<1x4x32xbf16>
    tpu.vector_store %arg7[%667, %c0_177, %c0_178], %670 {strides = array<i32>} : memref<16x4x32xbf16, #tpu.memory_space<vmem>>, vector<1x4x32xbf16>,
    %671 = vector.extract_strided_slice %587 {offsets = [0, 0], sizes = [4, 32], strides = [1, 1]} : vector<4x64xf32> to vector<4x32xf32>
    %672 = vector.broadcast %598 : vector<4x1xf32> to vector<4x32xf32>
    %673 = arith.mulf %672, %671 : vector<4x32xf32>
    %674 = arith.addf %631, %673 : vector<4x32xf32>
    %675 = vector.extract_strided_slice %587 {offsets = [0, 32], sizes = [4, 32], strides = [1, 1]} : vector<4x64xf32> to vector<4x32xf32>
    %676 = vector.broadcast %600 : vector<4x1xf32> to vector<4x32xf32>
    %677 = arith.mulf %676, %675 : vector<4x32xf32>
    %678 = arith.addf %655, %677 : vector<4x32xf32>
    %679 = tpu.concatenate %674, %678 in 1 : vector<4x32xf32>, vector<4x32xf32> -> vector<4x64xf32>
    %c0_179 = arith.constant 0 : index
    %c0_180 = arith.constant 0 : index
    %680 = vector.load %arg8[%c0_179, %c0_180] : memref<4x64xf32, #tpu.memory_space<vmem>>, vector<4x64xf32>
    tpu.vector_store %arg8[%c0_179, %c0_180], %679 {strides = array<i32>} : memref<4x64xf32, #tpu.memory_space<vmem>>, vector<4x64xf32>,
    %681 = tpu.concatenate %636, %660 in 1 : vector<4x32xf32>, vector<4x32xf32> -> vector<4x64xf32>
    %c0_181 = arith.constant 0 : index
    %c0_182 = arith.constant 0 : index
    %682 = vector.load %arg9[%c0_181, %c0_182] : memref<4x64xf32, #tpu.memory_space<vmem>>, vector<4x64xf32>
    tpu.vector_store %arg9[%c0_181, %c0_182], %681 {strides = array<i32>} : memref<4x64xf32, #tpu.memory_space<vmem>>, vector<4x64xf32>,
    %c7_i32 = arith.constant 7 : i32
    %c15_i32_183 = arith.constant 15 : i32
    %683 = arith.subi %c15_i32_183, %c7_i32 : i32
    %c0_184 = arith.constant 0 : index
    %c0_185 = arith.constant 0 : index
    %684 = vector.load %arg8[%c0_184, %c0_185] : memref<4x64xf32, #tpu.memory_space<vmem>>, vector<4x64xf32>
    %c0_186 = arith.constant 0 : index
    %c0_187 = arith.constant 0 : index
    %685 = vector.load %arg9[%c0_186, %c0_187] : memref<4x64xf32, #tpu.memory_space<vmem>>, vector<4x64xf32>
    %686 = arith.truncf %684 : vector<4x64xf32> to vector<4x64xbf16>
    %cst_188 = arith.constant dense<0.000000e+00> : vector<4x256xf32>
    %687 = tpu.matmul %686, %3, %cst_188 {dimension_numbers = #tpu.dot_dimension_numbers<[1], [0], [0], [1], [0, 0, 1, 1], [], []>} : vector<4x64xbf16>, vector<64x256xbf16>, vector<4x256xf32> -> vector<4x256xf32>
    %688 = arith.index_cast %c7_i32 : i32 to index
    %c0_189 = arith.constant 0 : index
    %c0_190 = arith.constant 0 : index
    %689 = vector.load %arg3[%688, %c0_189, %c0_190] : memref<16x4x1xf32, #tpu.memory_space<vmem>>, vector<1x4x1xf32>
    %690 = vector.shape_cast %689 : vector<1x4x1xf32> to vector<4x1xf32>
    %691 = arith.index_cast %683 : i32 to index
    %c0_191 = arith.constant 0 : index
    %c0_192 = arith.constant 0 : index
    %692 = vector.load %arg4[%691, %c0_191, %c0_192] : memref<16x4x1xf32, #tpu.memory_space<vmem>>, vector<1x4x1xf32>
    %693 = vector.shape_cast %692 : vector<1x4x1xf32> to vector<4x1xf32>
    %cst_193 = arith.constant 1.000000e+00 : f32
    %694 = vector.broadcast %cst_193 : f32 to vector<4x1xf32>
    %695 = arith.subf %694, %690 : vector<4x1xf32>
    %cst_194 = arith.constant 1.000000e+00 : f32
    %696 = vector.broadcast %cst_194 : f32 to vector<4x1xf32>
    %697 = arith.subf %696, %693 : vector<4x1xf32>
    %698 = arith.index_cast %c7_i32 : i32 to index
    %c0_195 = arith.constant 0 : index
    %c0_196 = arith.constant 0 : index
    %699 = vector.load %arg1[%698, %c0_195, %c0_196] : memref<16x4x128xbf16, #tpu.memory_space<vmem>>, vector<1x4x128xbf16>
    %700 = vector.shape_cast %699 : vector<1x4x128xbf16> to vector<4x128xbf16>
    %701 = arith.extf %700 : vector<4x128xbf16> to vector<4x128xf32>
    %702 = vector.extract_strided_slice %687 {offsets = [0, 0], sizes = [4, 128], strides = [1, 1]} : vector<4x256xf32> to vector<4x128xf32>
    %703 = arith.addf %701, %702 : vector<4x128xf32>
    %704 = arith.index_cast %683 : i32 to index
    %c0_197 = arith.constant 0 : index
    %c0_198 = arith.constant 0 : index
    %705 = vector.load %arg2[%704, %c0_197, %c0_198] : memref<16x4x128xbf16, #tpu.memory_space<vmem>>, vector<1x4x128xbf16>
    %706 = vector.shape_cast %705 : vector<1x4x128xbf16> to vector<4x128xbf16>
    %707 = arith.extf %706 : vector<4x128xbf16> to vector<4x128xf32>
    %708 = vector.extract_strided_slice %687 {offsets = [0, 128], sizes = [4, 128], strides = [1, 1]} : vector<4x256xf32> to vector<4x128xf32>
    %709 = arith.addf %707, %708 : vector<4x128xf32>
    %710 = vector.extract_strided_slice %685 {offsets = [0, 0], sizes = [4, 32], strides = [1, 1]} : vector<4x64xf32> to vector<4x32xf32>
    %711 = vector.extract_strided_slice %703 {offsets = [0, 0], sizes = [4, 96], strides = [1, 1]} : vector<4x128xf32> to vector<4x96xf32>
    %712 = arith.negf %711 : vector<4x96xf32>
    %713 = math.exp %712 : vector<4x96xf32>
    %cst_199 = arith.constant 1.000000e+00 : f32
    %714 = vector.broadcast %cst_199 : f32 to vector<4x96xf32>
    %715 = arith.addf %714, %713 : vector<4x96xf32>
    %716 = arith.divf %714, %715 : vector<4x96xf32>
    %717 = vector.extract_strided_slice %703 {offsets = [0, 96], sizes = [4, 32], strides = [1, 1]} : vector<4x128xf32> to vector<4x32xf32>
    %718 = math.tanh %717 : vector<4x32xf32>
    %719 = vector.extract_strided_slice %716 {offsets = [0, 0], sizes = [4, 32], strides = [1, 1]} : vector<4x96xf32> to vector<4x32xf32>
    %720 = vector.extract_strided_slice %716 {offsets = [0, 32], sizes = [4, 32], strides = [1, 1]} : vector<4x96xf32> to vector<4x32xf32>
    %721 = vector.extract_strided_slice %716 {offsets = [0, 64], sizes = [4, 32], strides = [1, 1]} : vector<4x96xf32> to vector<4x32xf32>
    %722 = arith.mulf %720, %710 : vector<4x32xf32>
    %723 = arith.mulf %719, %718 : vector<4x32xf32>
    %724 = arith.addf %722, %723 : vector<4x32xf32>
    %725 = math.tanh %724 : vector<4x32xf32>
    %726 = arith.mulf %721, %725 : vector<4x32xf32>
    %727 = vector.broadcast %690 : vector<4x1xf32> to vector<4x32xf32>
    %728 = arith.mulf %727, %726 : vector<4x32xf32>
    %729 = vector.broadcast %690 : vector<4x1xf32> to vector<4x32xf32>
    %730 = arith.mulf %729, %724 : vector<4x32xf32>
    %731 = vector.broadcast %695 : vector<4x1xf32> to vector<4x32xf32>
    %732 = arith.mulf %731, %710 : vector<4x32xf32>
    %733 = arith.addf %730, %732 : vector<4x32xf32>
    %734 = vector.extract_strided_slice %685 {offsets = [0, 32], sizes = [4, 32], strides = [1, 1]} : vector<4x64xf32> to vector<4x32xf32>
    %735 = vector.extract_strided_slice %709 {offsets = [0, 0], sizes = [4, 96], strides = [1, 1]} : vector<4x128xf32> to vector<4x96xf32>
    %736 = arith.negf %735 : vector<4x96xf32>
    %737 = math.exp %736 : vector<4x96xf32>
    %cst_200 = arith.constant 1.000000e+00 : f32
    %738 = vector.broadcast %cst_200 : f32 to vector<4x96xf32>
    %739 = arith.addf %738, %737 : vector<4x96xf32>
    %740 = arith.divf %738, %739 : vector<4x96xf32>
    %741 = vector.extract_strided_slice %709 {offsets = [0, 96], sizes = [4, 32], strides = [1, 1]} : vector<4x128xf32> to vector<4x32xf32>
    %742 = math.tanh %741 : vector<4x32xf32>
    %743 = vector.extract_strided_slice %740 {offsets = [0, 0], sizes = [4, 32], strides = [1, 1]} : vector<4x96xf32> to vector<4x32xf32>
    %744 = vector.extract_strided_slice %740 {offsets = [0, 32], sizes = [4, 32], strides = [1, 1]} : vector<4x96xf32> to vector<4x32xf32>
    %745 = vector.extract_strided_slice %740 {offsets = [0, 64], sizes = [4, 32], strides = [1, 1]} : vector<4x96xf32> to vector<4x32xf32>
    %746 = arith.mulf %744, %734 : vector<4x32xf32>
    %747 = arith.mulf %743, %742 : vector<4x32xf32>
    %748 = arith.addf %746, %747 : vector<4x32xf32>
    %749 = math.tanh %748 : vector<4x32xf32>
    %750 = arith.mulf %745, %749 : vector<4x32xf32>
    %751 = vector.broadcast %693 : vector<4x1xf32> to vector<4x32xf32>
    %752 = arith.mulf %751, %750 : vector<4x32xf32>
    %753 = vector.broadcast %693 : vector<4x1xf32> to vector<4x32xf32>
    %754 = arith.mulf %753, %748 : vector<4x32xf32>
    %755 = vector.broadcast %697 : vector<4x1xf32> to vector<4x32xf32>
    %756 = arith.mulf %755, %734 : vector<4x32xf32>
    %757 = arith.addf %754, %756 : vector<4x32xf32>
    %758 = arith.truncf %728 : vector<4x32xf32> to vector<4x32xbf16>
    %759 = arith.index_cast %c7_i32 : i32 to index
    %c0_201 = arith.constant 0 : index
    %c0_202 = arith.constant 0 : index
    %760 = vector.load %arg6[%759, %c0_201, %c0_202] : memref<16x4x32xbf16, #tpu.memory_space<vmem>>, vector<1x4x32xbf16>
    %761 = vector.shape_cast %760 : vector<1x4x32xbf16> to vector<4x32xbf16>
    %762 = vector.shape_cast %758 : vector<4x32xbf16> to vector<1x4x32xbf16>
    tpu.vector_store %arg6[%759, %c0_201, %c0_202], %762 {strides = array<i32>} : memref<16x4x32xbf16, #tpu.memory_space<vmem>>, vector<1x4x32xbf16>,
    %763 = arith.truncf %752 : vector<4x32xf32> to vector<4x32xbf16>
    %764 = arith.index_cast %683 : i32 to index
    %c0_203 = arith.constant 0 : index
    %c0_204 = arith.constant 0 : index
    %765 = vector.load %arg7[%764, %c0_203, %c0_204] : memref<16x4x32xbf16, #tpu.memory_space<vmem>>, vector<1x4x32xbf16>
    %766 = vector.shape_cast %765 : vector<1x4x32xbf16> to vector<4x32xbf16>
    %767 = vector.shape_cast %763 : vector<4x32xbf16> to vector<1x4x32xbf16>
    tpu.vector_store %arg7[%764, %c0_203, %c0_204], %767 {strides = array<i32>} : memref<16x4x32xbf16, #tpu.memory_space<vmem>>, vector<1x4x32xbf16>,
    %768 = vector.extract_strided_slice %684 {offsets = [0, 0], sizes = [4, 32], strides = [1, 1]} : vector<4x64xf32> to vector<4x32xf32>
    %769 = vector.broadcast %695 : vector<4x1xf32> to vector<4x32xf32>
    %770 = arith.mulf %769, %768 : vector<4x32xf32>
    %771 = arith.addf %728, %770 : vector<4x32xf32>
    %772 = vector.extract_strided_slice %684 {offsets = [0, 32], sizes = [4, 32], strides = [1, 1]} : vector<4x64xf32> to vector<4x32xf32>
    %773 = vector.broadcast %697 : vector<4x1xf32> to vector<4x32xf32>
    %774 = arith.mulf %773, %772 : vector<4x32xf32>
    %775 = arith.addf %752, %774 : vector<4x32xf32>
    %776 = tpu.concatenate %771, %775 in 1 : vector<4x32xf32>, vector<4x32xf32> -> vector<4x64xf32>
    %c0_205 = arith.constant 0 : index
    %c0_206 = arith.constant 0 : index
    %777 = vector.load %arg8[%c0_205, %c0_206] : memref<4x64xf32, #tpu.memory_space<vmem>>, vector<4x64xf32>
    tpu.vector_store %arg8[%c0_205, %c0_206], %776 {strides = array<i32>} : memref<4x64xf32, #tpu.memory_space<vmem>>, vector<4x64xf32>,
    %778 = tpu.concatenate %733, %757 in 1 : vector<4x32xf32>, vector<4x32xf32> -> vector<4x64xf32>
    %c0_207 = arith.constant 0 : index
    %c0_208 = arith.constant 0 : index
    %779 = vector.load %arg9[%c0_207, %c0_208] : memref<4x64xf32, #tpu.memory_space<vmem>>, vector<4x64xf32>
    tpu.vector_store %arg9[%c0_207, %c0_208], %778 {strides = array<i32>} : memref<4x64xf32, #tpu.memory_space<vmem>>, vector<4x64xf32>,
    %c8_i32 = arith.constant 8 : i32
    %c15_i32_209 = arith.constant 15 : i32
    %780 = arith.subi %c15_i32_209, %c8_i32 : i32
    %c0_210 = arith.constant 0 : index
    %c0_211 = arith.constant 0 : index
    %781 = vector.load %arg8[%c0_210, %c0_211] : memref<4x64xf32, #tpu.memory_space<vmem>>, vector<4x64xf32>
    %c0_212 = arith.constant 0 : index
    %c0_213 = arith.constant 0 : index
    %782 = vector.load %arg9[%c0_212, %c0_213] : memref<4x64xf32, #tpu.memory_space<vmem>>, vector<4x64xf32>
    %783 = arith.truncf %781 : vector<4x64xf32> to vector<4x64xbf16>
    %cst_214 = arith.constant dense<0.000000e+00> : vector<4x256xf32>
    %784 = tpu.matmul %783, %3, %cst_214 {dimension_numbers = #tpu.dot_dimension_numbers<[1], [0], [0], [1], [0, 0, 1, 1], [], []>} : vector<4x64xbf16>, vector<64x256xbf16>, vector<4x256xf32> -> vector<4x256xf32>
    %785 = arith.index_cast %c8_i32 : i32 to index
    %c0_215 = arith.constant 0 : index
    %c0_216 = arith.constant 0 : index
    %786 = vector.load %arg3[%785, %c0_215, %c0_216] : memref<16x4x1xf32, #tpu.memory_space<vmem>>, vector<1x4x1xf32>
    %787 = vector.shape_cast %786 : vector<1x4x1xf32> to vector<4x1xf32>
    %788 = arith.index_cast %780 : i32 to index
    %c0_217 = arith.constant 0 : index
    %c0_218 = arith.constant 0 : index
    %789 = vector.load %arg4[%788, %c0_217, %c0_218] : memref<16x4x1xf32, #tpu.memory_space<vmem>>, vector<1x4x1xf32>
    %790 = vector.shape_cast %789 : vector<1x4x1xf32> to vector<4x1xf32>
    %cst_219 = arith.constant 1.000000e+00 : f32
    %791 = vector.broadcast %cst_219 : f32 to vector<4x1xf32>
    %792 = arith.subf %791, %787 : vector<4x1xf32>
    %cst_220 = arith.constant 1.000000e+00 : f32
    %793 = vector.broadcast %cst_220 : f32 to vector<4x1xf32>
    %794 = arith.subf %793, %790 : vector<4x1xf32>
    %795 = arith.index_cast %c8_i32 : i32 to index
    %c0_221 = arith.constant 0 : index
    %c0_222 = arith.constant 0 : index
    %796 = vector.load %arg1[%795, %c0_221, %c0_222] : memref<16x4x128xbf16, #tpu.memory_space<vmem>>, vector<1x4x128xbf16>
    %797 = vector.shape_cast %796 : vector<1x4x128xbf16> to vector<4x128xbf16>
    %798 = arith.extf %797 : vector<4x128xbf16> to vector<4x128xf32>
    %799 = vector.extract_strided_slice %784 {offsets = [0, 0], sizes = [4, 128], strides = [1, 1]} : vector<4x256xf32> to vector<4x128xf32>
    %800 = arith.addf %798, %799 : vector<4x128xf32>
    %801 = arith.index_cast %780 : i32 to index
    %c0_223 = arith.constant 0 : index
    %c0_224 = arith.constant 0 : index
    %802 = vector.load %arg2[%801, %c0_223, %c0_224] : memref<16x4x128xbf16, #tpu.memory_space<vmem>>, vector<1x4x128xbf16>
    %803 = vector.shape_cast %802 : vector<1x4x128xbf16> to vector<4x128xbf16>
    %804 = arith.extf %803 : vector<4x128xbf16> to vector<4x128xf32>
    %805 = vector.extract_strided_slice %784 {offsets = [0, 128], sizes = [4, 128], strides = [1, 1]} : vector<4x256xf32> to vector<4x128xf32>
    %806 = arith.addf %804, %805 : vector<4x128xf32>
    %807 = vector.extract_strided_slice %782 {offsets = [0, 0], sizes = [4, 32], strides = [1, 1]} : vector<4x64xf32> to vector<4x32xf32>
    %808 = vector.extract_strided_slice %800 {offsets = [0, 0], sizes = [4, 96], strides = [1, 1]} : vector<4x128xf32> to vector<4x96xf32>
    %809 = arith.negf %808 : vector<4x96xf32>
    %810 = math.exp %809 : vector<4x96xf32>
    %cst_225 = arith.constant 1.000000e+00 : f32
    %811 = vector.broadcast %cst_225 : f32 to vector<4x96xf32>
    %812 = arith.addf %811, %810 : vector<4x96xf32>
    %813 = arith.divf %811, %812 : vector<4x96xf32>
    %814 = vector.extract_strided_slice %800 {offsets = [0, 96], sizes = [4, 32], strides = [1, 1]} : vector<4x128xf32> to vector<4x32xf32>
    %815 = math.tanh %814 : vector<4x32xf32>
    %816 = vector.extract_strided_slice %813 {offsets = [0, 0], sizes = [4, 32], strides = [1, 1]} : vector<4x96xf32> to vector<4x32xf32>
    %817 = vector.extract_strided_slice %813 {offsets = [0, 32], sizes = [4, 32], strides = [1, 1]} : vector<4x96xf32> to vector<4x32xf32>
    %818 = vector.extract_strided_slice %813 {offsets = [0, 64], sizes = [4, 32], strides = [1, 1]} : vector<4x96xf32> to vector<4x32xf32>
    %819 = arith.mulf %817, %807 : vector<4x32xf32>
    %820 = arith.mulf %816, %815 : vector<4x32xf32>
    %821 = arith.addf %819, %820 : vector<4x32xf32>
    %822 = math.tanh %821 : vector<4x32xf32>
    %823 = arith.mulf %818, %822 : vector<4x32xf32>
    %824 = vector.broadcast %787 : vector<4x1xf32> to vector<4x32xf32>
    %825 = arith.mulf %824, %823 : vector<4x32xf32>
    %826 = vector.broadcast %787 : vector<4x1xf32> to vector<4x32xf32>
    %827 = arith.mulf %826, %821 : vector<4x32xf32>
    %828 = vector.broadcast %792 : vector<4x1xf32> to vector<4x32xf32>
    %829 = arith.mulf %828, %807 : vector<4x32xf32>
    %830 = arith.addf %827, %829 : vector<4x32xf32>
    %831 = vector.extract_strided_slice %782 {offsets = [0, 32], sizes = [4, 32], strides = [1, 1]} : vector<4x64xf32> to vector<4x32xf32>
    %832 = vector.extract_strided_slice %806 {offsets = [0, 0], sizes = [4, 96], strides = [1, 1]} : vector<4x128xf32> to vector<4x96xf32>
    %833 = arith.negf %832 : vector<4x96xf32>
    %834 = math.exp %833 : vector<4x96xf32>
    %cst_226 = arith.constant 1.000000e+00 : f32
    %835 = vector.broadcast %cst_226 : f32 to vector<4x96xf32>
    %836 = arith.addf %835, %834 : vector<4x96xf32>
    %837 = arith.divf %835, %836 : vector<4x96xf32>
    %838 = vector.extract_strided_slice %806 {offsets = [0, 96], sizes = [4, 32], strides = [1, 1]} : vector<4x128xf32> to vector<4x32xf32>
    %839 = math.tanh %838 : vector<4x32xf32>
    %840 = vector.extract_strided_slice %837 {offsets = [0, 0], sizes = [4, 32], strides = [1, 1]} : vector<4x96xf32> to vector<4x32xf32>
    %841 = vector.extract_strided_slice %837 {offsets = [0, 32], sizes = [4, 32], strides = [1, 1]} : vector<4x96xf32> to vector<4x32xf32>
    %842 = vector.extract_strided_slice %837 {offsets = [0, 64], sizes = [4, 32], strides = [1, 1]} : vector<4x96xf32> to vector<4x32xf32>
    %843 = arith.mulf %841, %831 : vector<4x32xf32>
    %844 = arith.mulf %840, %839 : vector<4x32xf32>
    %845 = arith.addf %843, %844 : vector<4x32xf32>
    %846 = math.tanh %845 : vector<4x32xf32>
    %847 = arith.mulf %842, %846 : vector<4x32xf32>
    %848 = vector.broadcast %790 : vector<4x1xf32> to vector<4x32xf32>
    %849 = arith.mulf %848, %847 : vector<4x32xf32>
    %850 = vector.broadcast %790 : vector<4x1xf32> to vector<4x32xf32>
    %851 = arith.mulf %850, %845 : vector<4x32xf32>
    %852 = vector.broadcast %794 : vector<4x1xf32> to vector<4x32xf32>
    %853 = arith.mulf %852, %831 : vector<4x32xf32>
    %854 = arith.addf %851, %853 : vector<4x32xf32>
    %855 = arith.truncf %825 : vector<4x32xf32> to vector<4x32xbf16>
    %856 = arith.index_cast %c8_i32 : i32 to index
    %c0_227 = arith.constant 0 : index
    %c0_228 = arith.constant 0 : index
    %857 = vector.load %arg6[%856, %c0_227, %c0_228] : memref<16x4x32xbf16, #tpu.memory_space<vmem>>, vector<1x4x32xbf16>
    %858 = vector.shape_cast %857 : vector<1x4x32xbf16> to vector<4x32xbf16>
    %859 = vector.shape_cast %855 : vector<4x32xbf16> to vector<1x4x32xbf16>
    tpu.vector_store %arg6[%856, %c0_227, %c0_228], %859 {strides = array<i32>} : memref<16x4x32xbf16, #tpu.memory_space<vmem>>, vector<1x4x32xbf16>,
    %860 = arith.truncf %849 : vector<4x32xf32> to vector<4x32xbf16>
    %861 = arith.index_cast %780 : i32 to index
    %c0_229 = arith.constant 0 : index
    %c0_230 = arith.constant 0 : index
    %862 = vector.load %arg7[%861, %c0_229, %c0_230] : memref<16x4x32xbf16, #tpu.memory_space<vmem>>, vector<1x4x32xbf16>
    %863 = vector.shape_cast %862 : vector<1x4x32xbf16> to vector<4x32xbf16>
    %864 = vector.shape_cast %860 : vector<4x32xbf16> to vector<1x4x32xbf16>
    tpu.vector_store %arg7[%861, %c0_229, %c0_230], %864 {strides = array<i32>} : memref<16x4x32xbf16, #tpu.memory_space<vmem>>, vector<1x4x32xbf16>,
    %865 = vector.extract_strided_slice %781 {offsets = [0, 0], sizes = [4, 32], strides = [1, 1]} : vector<4x64xf32> to vector<4x32xf32>
    %866 = vector.broadcast %792 : vector<4x1xf32> to vector<4x32xf32>
    %867 = arith.mulf %866, %865 : vector<4x32xf32>
    %868 = arith.addf %825, %867 : vector<4x32xf32>
    %869 = vector.extract_strided_slice %781 {offsets = [0, 32], sizes = [4, 32], strides = [1, 1]} : vector<4x64xf32> to vector<4x32xf32>
    %870 = vector.broadcast %794 : vector<4x1xf32> to vector<4x32xf32>
    %871 = arith.mulf %870, %869 : vector<4x32xf32>
    %872 = arith.addf %849, %871 : vector<4x32xf32>
    %873 = tpu.concatenate %868, %872 in 1 : vector<4x32xf32>, vector<4x32xf32> -> vector<4x64xf32>
    %c0_231 = arith.constant 0 : index
    %c0_232 = arith.constant 0 : index
    %874 = vector.load %arg8[%c0_231, %c0_232] : memref<4x64xf32, #tpu.memory_space<vmem>>, vector<4x64xf32>
    tpu.vector_store %arg8[%c0_231, %c0_232], %873 {strides = array<i32>} : memref<4x64xf32, #tpu.memory_space<vmem>>, vector<4x64xf32>,
    %875 = tpu.concatenate %830, %854 in 1 : vector<4x32xf32>, vector<4x32xf32> -> vector<4x64xf32>
    %c0_233 = arith.constant 0 : index
    %c0_234 = arith.constant 0 : index
    %876 = vector.load %arg9[%c0_233, %c0_234] : memref<4x64xf32, #tpu.memory_space<vmem>>, vector<4x64xf32>
    tpu.vector_store %arg9[%c0_233, %c0_234], %875 {strides = array<i32>} : memref<4x64xf32, #tpu.memory_space<vmem>>, vector<4x64xf32>,
    %c9_i32 = arith.constant 9 : i32
    %c15_i32_235 = arith.constant 15 : i32
    %877 = arith.subi %c15_i32_235, %c9_i32 : i32
    %c0_236 = arith.constant 0 : index
    %c0_237 = arith.constant 0 : index
    %878 = vector.load %arg8[%c0_236, %c0_237] : memref<4x64xf32, #tpu.memory_space<vmem>>, vector<4x64xf32>
    %c0_238 = arith.constant 0 : index
    %c0_239 = arith.constant 0 : index
    %879 = vector.load %arg9[%c0_238, %c0_239] : memref<4x64xf32, #tpu.memory_space<vmem>>, vector<4x64xf32>
    %880 = arith.truncf %878 : vector<4x64xf32> to vector<4x64xbf16>
    %cst_240 = arith.constant dense<0.000000e+00> : vector<4x256xf32>
    %881 = tpu.matmul %880, %3, %cst_240 {dimension_numbers = #tpu.dot_dimension_numbers<[1], [0], [0], [1], [0, 0, 1, 1], [], []>} : vector<4x64xbf16>, vector<64x256xbf16>, vector<4x256xf32> -> vector<4x256xf32>
    %882 = arith.index_cast %c9_i32 : i32 to index
    %c0_241 = arith.constant 0 : index
    %c0_242 = arith.constant 0 : index
    %883 = vector.load %arg3[%882, %c0_241, %c0_242] : memref<16x4x1xf32, #tpu.memory_space<vmem>>, vector<1x4x1xf32>
    %884 = vector.shape_cast %883 : vector<1x4x1xf32> to vector<4x1xf32>
    %885 = arith.index_cast %877 : i32 to index
    %c0_243 = arith.constant 0 : index
    %c0_244 = arith.constant 0 : index
    %886 = vector.load %arg4[%885, %c0_243, %c0_244] : memref<16x4x1xf32, #tpu.memory_space<vmem>>, vector<1x4x1xf32>
    %887 = vector.shape_cast %886 : vector<1x4x1xf32> to vector<4x1xf32>
    %cst_245 = arith.constant 1.000000e+00 : f32
    %888 = vector.broadcast %cst_245 : f32 to vector<4x1xf32>
    %889 = arith.subf %888, %884 : vector<4x1xf32>
    %cst_246 = arith.constant 1.000000e+00 : f32
    %890 = vector.broadcast %cst_246 : f32 to vector<4x1xf32>
    %891 = arith.subf %890, %887 : vector<4x1xf32>
    %892 = arith.index_cast %c9_i32 : i32 to index
    %c0_247 = arith.constant 0 : index
    %c0_248 = arith.constant 0 : index
    %893 = vector.load %arg1[%892, %c0_247, %c0_248] : memref<16x4x128xbf16, #tpu.memory_space<vmem>>, vector<1x4x128xbf16>
    %894 = vector.shape_cast %893 : vector<1x4x128xbf16> to vector<4x128xbf16>
    %895 = arith.extf %894 : vector<4x128xbf16> to vector<4x128xf32>
    %896 = vector.extract_strided_slice %881 {offsets = [0, 0], sizes = [4, 128], strides = [1, 1]} : vector<4x256xf32> to vector<4x128xf32>
    %897 = arith.addf %895, %896 : vector<4x128xf32>
    %898 = arith.index_cast %877 : i32 to index
    %c0_249 = arith.constant 0 : index
    %c0_250 = arith.constant 0 : index
    %899 = vector.load %arg2[%898, %c0_249, %c0_250] : memref<16x4x128xbf16, #tpu.memory_space<vmem>>, vector<1x4x128xbf16>
    %900 = vector.shape_cast %899 : vector<1x4x128xbf16> to vector<4x128xbf16>
    %901 = arith.extf %900 : vector<4x128xbf16> to vector<4x128xf32>
    %902 = vector.extract_strided_slice %881 {offsets = [0, 128], sizes = [4, 128], strides = [1, 1]} : vector<4x256xf32> to vector<4x128xf32>
    %903 = arith.addf %901, %902 : vector<4x128xf32>
    %904 = vector.extract_strided_slice %879 {offsets = [0, 0], sizes = [4, 32], strides = [1, 1]} : vector<4x64xf32> to vector<4x32xf32>
    %905 = vector.extract_strided_slice %897 {offsets = [0, 0], sizes = [4, 96], strides = [1, 1]} : vector<4x128xf32> to vector<4x96xf32>
    %906 = arith.negf %905 : vector<4x96xf32>
    %907 = math.exp %906 : vector<4x96xf32>
    %cst_251 = arith.constant 1.000000e+00 : f32
    %908 = vector.broadcast %cst_251 : f32 to vector<4x96xf32>
    %909 = arith.addf %908, %907 : vector<4x96xf32>
    %910 = arith.divf %908, %909 : vector<4x96xf32>
    %911 = vector.extract_strided_slice %897 {offsets = [0, 96], sizes = [4, 32], strides = [1, 1]} : vector<4x128xf32> to vector<4x32xf32>
    %912 = math.tanh %911 : vector<4x32xf32>
    %913 = vector.extract_strided_slice %910 {offsets = [0, 0], sizes = [4, 32], strides = [1, 1]} : vector<4x96xf32> to vector<4x32xf32>
    %914 = vector.extract_strided_slice %910 {offsets = [0, 32], sizes = [4, 32], strides = [1, 1]} : vector<4x96xf32> to vector<4x32xf32>
    %915 = vector.extract_strided_slice %910 {offsets = [0, 64], sizes = [4, 32], strides = [1, 1]} : vector<4x96xf32> to vector<4x32xf32>
    %916 = arith.mulf %914, %904 : vector<4x32xf32>
    %917 = arith.mulf %913, %912 : vector<4x32xf32>
    %918 = arith.addf %916, %917 : vector<4x32xf32>
    %919 = math.tanh %918 : vector<4x32xf32>
    %920 = arith.mulf %915, %919 : vector<4x32xf32>
    %921 = vector.broadcast %884 : vector<4x1xf32> to vector<4x32xf32>
    %922 = arith.mulf %921, %920 : vector<4x32xf32>
    %923 = vector.broadcast %884 : vector<4x1xf32> to vector<4x32xf32>
    %924 = arith.mulf %923, %918 : vector<4x32xf32>
    %925 = vector.broadcast %889 : vector<4x1xf32> to vector<4x32xf32>
    %926 = arith.mulf %925, %904 : vector<4x32xf32>
    %927 = arith.addf %924, %926 : vector<4x32xf32>
    %928 = vector.extract_strided_slice %879 {offsets = [0, 32], sizes = [4, 32], strides = [1, 1]} : vector<4x64xf32> to vector<4x32xf32>
    %929 = vector.extract_strided_slice %903 {offsets = [0, 0], sizes = [4, 96], strides = [1, 1]} : vector<4x128xf32> to vector<4x96xf32>
    %930 = arith.negf %929 : vector<4x96xf32>
    %931 = math.exp %930 : vector<4x96xf32>
    %cst_252 = arith.constant 1.000000e+00 : f32
    %932 = vector.broadcast %cst_252 : f32 to vector<4x96xf32>
    %933 = arith.addf %932, %931 : vector<4x96xf32>
    %934 = arith.divf %932, %933 : vector<4x96xf32>
    %935 = vector.extract_strided_slice %903 {offsets = [0, 96], sizes = [4, 32], strides = [1, 1]} : vector<4x128xf32> to vector<4x32xf32>
    %936 = math.tanh %935 : vector<4x32xf32>
    %937 = vector.extract_strided_slice %934 {offsets = [0, 0], sizes = [4, 32], strides = [1, 1]} : vector<4x96xf32> to vector<4x32xf32>
    %938 = vector.extract_strided_slice %934 {offsets = [0, 32], sizes = [4, 32], strides = [1, 1]} : vector<4x96xf32> to vector<4x32xf32>
    %939 = vector.extract_strided_slice %934 {offsets = [0, 64], sizes = [4, 32], strides = [1, 1]} : vector<4x96xf32> to vector<4x32xf32>
    %940 = arith.mulf %938, %928 : vector<4x32xf32>
    %941 = arith.mulf %937, %936 : vector<4x32xf32>
    %942 = arith.addf %940, %941 : vector<4x32xf32>
    %943 = math.tanh %942 : vector<4x32xf32>
    %944 = arith.mulf %939, %943 : vector<4x32xf32>
    %945 = vector.broadcast %887 : vector<4x1xf32> to vector<4x32xf32>
    %946 = arith.mulf %945, %944 : vector<4x32xf32>
    %947 = vector.broadcast %887 : vector<4x1xf32> to vector<4x32xf32>
    %948 = arith.mulf %947, %942 : vector<4x32xf32>
    %949 = vector.broadcast %891 : vector<4x1xf32> to vector<4x32xf32>
    %950 = arith.mulf %949, %928 : vector<4x32xf32>
    %951 = arith.addf %948, %950 : vector<4x32xf32>
    %952 = arith.truncf %922 : vector<4x32xf32> to vector<4x32xbf16>
    %953 = arith.index_cast %c9_i32 : i32 to index
    %c0_253 = arith.constant 0 : index
    %c0_254 = arith.constant 0 : index
    %954 = vector.load %arg6[%953, %c0_253, %c0_254] : memref<16x4x32xbf16, #tpu.memory_space<vmem>>, vector<1x4x32xbf16>
    %955 = vector.shape_cast %954 : vector<1x4x32xbf16> to vector<4x32xbf16>
    %956 = vector.shape_cast %952 : vector<4x32xbf16> to vector<1x4x32xbf16>
    tpu.vector_store %arg6[%953, %c0_253, %c0_254], %956 {strides = array<i32>} : memref<16x4x32xbf16, #tpu.memory_space<vmem>>, vector<1x4x32xbf16>,
    %957 = arith.truncf %946 : vector<4x32xf32> to vector<4x32xbf16>
    %958 = arith.index_cast %877 : i32 to index
    %c0_255 = arith.constant 0 : index
    %c0_256 = arith.constant 0 : index
    %959 = vector.load %arg7[%958, %c0_255, %c0_256] : memref<16x4x32xbf16, #tpu.memory_space<vmem>>, vector<1x4x32xbf16>
    %960 = vector.shape_cast %959 : vector<1x4x32xbf16> to vector<4x32xbf16>
    %961 = vector.shape_cast %957 : vector<4x32xbf16> to vector<1x4x32xbf16>
    tpu.vector_store %arg7[%958, %c0_255, %c0_256], %961 {strides = array<i32>} : memref<16x4x32xbf16, #tpu.memory_space<vmem>>, vector<1x4x32xbf16>,
    %962 = vector.extract_strided_slice %878 {offsets = [0, 0], sizes = [4, 32], strides = [1, 1]} : vector<4x64xf32> to vector<4x32xf32>
    %963 = vector.broadcast %889 : vector<4x1xf32> to vector<4x32xf32>
    %964 = arith.mulf %963, %962 : vector<4x32xf32>
    %965 = arith.addf %922, %964 : vector<4x32xf32>
    %966 = vector.extract_strided_slice %878 {offsets = [0, 32], sizes = [4, 32], strides = [1, 1]} : vector<4x64xf32> to vector<4x32xf32>
    %967 = vector.broadcast %891 : vector<4x1xf32> to vector<4x32xf32>
    %968 = arith.mulf %967, %966 : vector<4x32xf32>
    %969 = arith.addf %946, %968 : vector<4x32xf32>
    %970 = tpu.concatenate %965, %969 in 1 : vector<4x32xf32>, vector<4x32xf32> -> vector<4x64xf32>
    %c0_257 = arith.constant 0 : index
    %c0_258 = arith.constant 0 : index
    %971 = vector.load %arg8[%c0_257, %c0_258] : memref<4x64xf32, #tpu.memory_space<vmem>>, vector<4x64xf32>
    tpu.vector_store %arg8[%c0_257, %c0_258], %970 {strides = array<i32>} : memref<4x64xf32, #tpu.memory_space<vmem>>, vector<4x64xf32>,
    %972 = tpu.concatenate %927, %951 in 1 : vector<4x32xf32>, vector<4x32xf32> -> vector<4x64xf32>
    %c0_259 = arith.constant 0 : index
    %c0_260 = arith.constant 0 : index
    %973 = vector.load %arg9[%c0_259, %c0_260] : memref<4x64xf32, #tpu.memory_space<vmem>>, vector<4x64xf32>
    tpu.vector_store %arg9[%c0_259, %c0_260], %972 {strides = array<i32>} : memref<4x64xf32, #tpu.memory_space<vmem>>, vector<4x64xf32>,
    %c10_i32 = arith.constant 10 : i32
    %c15_i32_261 = arith.constant 15 : i32
    %974 = arith.subi %c15_i32_261, %c10_i32 : i32
    %c0_262 = arith.constant 0 : index
    %c0_263 = arith.constant 0 : index
    %975 = vector.load %arg8[%c0_262, %c0_263] : memref<4x64xf32, #tpu.memory_space<vmem>>, vector<4x64xf32>
    %c0_264 = arith.constant 0 : index
    %c0_265 = arith.constant 0 : index
    %976 = vector.load %arg9[%c0_264, %c0_265] : memref<4x64xf32, #tpu.memory_space<vmem>>, vector<4x64xf32>
    %977 = arith.truncf %975 : vector<4x64xf32> to vector<4x64xbf16>
    %cst_266 = arith.constant dense<0.000000e+00> : vector<4x256xf32>
    %978 = tpu.matmul %977, %3, %cst_266 {dimension_numbers = #tpu.dot_dimension_numbers<[1], [0], [0], [1], [0, 0, 1, 1], [], []>} : vector<4x64xbf16>, vector<64x256xbf16>, vector<4x256xf32> -> vector<4x256xf32>
    %979 = arith.index_cast %c10_i32 : i32 to index
    %c0_267 = arith.constant 0 : index
    %c0_268 = arith.constant 0 : index
    %980 = vector.load %arg3[%979, %c0_267, %c0_268] : memref<16x4x1xf32, #tpu.memory_space<vmem>>, vector<1x4x1xf32>
    %981 = vector.shape_cast %980 : vector<1x4x1xf32> to vector<4x1xf32>
    %982 = arith.index_cast %974 : i32 to index
    %c0_269 = arith.constant 0 : index
    %c0_270 = arith.constant 0 : index
    %983 = vector.load %arg4[%982, %c0_269, %c0_270] : memref<16x4x1xf32, #tpu.memory_space<vmem>>, vector<1x4x1xf32>
    %984 = vector.shape_cast %983 : vector<1x4x1xf32> to vector<4x1xf32>
    %cst_271 = arith.constant 1.000000e+00 : f32
    %985 = vector.broadcast %cst_271 : f32 to vector<4x1xf32>
    %986 = arith.subf %985, %981 : vector<4x1xf32>
    %cst_272 = arith.constant 1.000000e+00 : f32
    %987 = vector.broadcast %cst_272 : f32 to vector<4x1xf32>
    %988 = arith.subf %987, %984 : vector<4x1xf32>
    %989 = arith.index_cast %c10_i32 : i32 to index
    %c0_273 = arith.constant 0 : index
    %c0_274 = arith.constant 0 : index
    %990 = vector.load %arg1[%989, %c0_273, %c0_274] : memref<16x4x128xbf16, #tpu.memory_space<vmem>>, vector<1x4x128xbf16>
    %991 = vector.shape_cast %990 : vector<1x4x128xbf16> to vector<4x128xbf16>
    %992 = arith.extf %991 : vector<4x128xbf16> to vector<4x128xf32>
    %993 = vector.extract_strided_slice %978 {offsets = [0, 0], sizes = [4, 128], strides = [1, 1]} : vector<4x256xf32> to vector<4x128xf32>
    %994 = arith.addf %992, %993 : vector<4x128xf32>
    %995 = arith.index_cast %974 : i32 to index
    %c0_275 = arith.constant 0 : index
    %c0_276 = arith.constant 0 : index
    %996 = vector.load %arg2[%995, %c0_275, %c0_276] : memref<16x4x128xbf16, #tpu.memory_space<vmem>>, vector<1x4x128xbf16>
    %997 = vector.shape_cast %996 : vector<1x4x128xbf16> to vector<4x128xbf16>
    %998 = arith.extf %997 : vector<4x128xbf16> to vector<4x128xf32>
    %999 = vector.extract_strided_slice %978 {offsets = [0, 128], sizes = [4, 128], strides = [1, 1]} : vector<4x256xf32> to vector<4x128xf32>
    %1000 = arith.addf %998, %999 : vector<4x128xf32>
    %1001 = vector.extract_strided_slice %976 {offsets = [0, 0], sizes = [4, 32], strides = [1, 1]} : vector<4x64xf32> to vector<4x32xf32>
    %1002 = vector.extract_strided_slice %994 {offsets = [0, 0], sizes = [4, 96], strides = [1, 1]} : vector<4x128xf32> to vector<4x96xf32>
    %1003 = arith.negf %1002 : vector<4x96xf32>
    %1004 = math.exp %1003 : vector<4x96xf32>
    %cst_277 = arith.constant 1.000000e+00 : f32
    %1005 = vector.broadcast %cst_277 : f32 to vector<4x96xf32>
    %1006 = arith.addf %1005, %1004 : vector<4x96xf32>
    %1007 = arith.divf %1005, %1006 : vector<4x96xf32>
    %1008 = vector.extract_strided_slice %994 {offsets = [0, 96], sizes = [4, 32], strides = [1, 1]} : vector<4x128xf32> to vector<4x32xf32>
    %1009 = math.tanh %1008 : vector<4x32xf32>
    %1010 = vector.extract_strided_slice %1007 {offsets = [0, 0], sizes = [4, 32], strides = [1, 1]} : vector<4x96xf32> to vector<4x32xf32>
    %1011 = vector.extract_strided_slice %1007 {offsets = [0, 32], sizes = [4, 32], strides = [1, 1]} : vector<4x96xf32> to vector<4x32xf32>
    %1012 = vector.extract_strided_slice %1007 {offsets = [0, 64], sizes = [4, 32], strides = [1, 1]} : vector<4x96xf32> to vector<4x32xf32>
    %1013 = arith.mulf %1011, %1001 : vector<4x32xf32>
    %1014 = arith.mulf %1010, %1009 : vector<4x32xf32>
    %1015 = arith.addf %1013, %1014 : vector<4x32xf32>
    %1016 = math.tanh %1015 : vector<4x32xf32>
    %1017 = arith.mulf %1012, %1016 : vector<4x32xf32>
    %1018 = vector.broadcast %981 : vector<4x1xf32> to vector<4x32xf32>
    %1019 = arith.mulf %1018, %1017 : vector<4x32xf32>
    %1020 = vector.broadcast %981 : vector<4x1xf32> to vector<4x32xf32>
    %1021 = arith.mulf %1020, %1015 : vector<4x32xf32>
    %1022 = vector.broadcast %986 : vector<4x1xf32> to vector<4x32xf32>
    %1023 = arith.mulf %1022, %1001 : vector<4x32xf32>
    %1024 = arith.addf %1021, %1023 : vector<4x32xf32>
    %1025 = vector.extract_strided_slice %976 {offsets = [0, 32], sizes = [4, 32], strides = [1, 1]} : vector<4x64xf32> to vector<4x32xf32>
    %1026 = vector.extract_strided_slice %1000 {offsets = [0, 0], sizes = [4, 96], strides = [1, 1]} : vector<4x128xf32> to vector<4x96xf32>
    %1027 = arith.negf %1026 : vector<4x96xf32>
    %1028 = math.exp %1027 : vector<4x96xf32>
    %cst_278 = arith.constant 1.000000e+00 : f32
    %1029 = vector.broadcast %cst_278 : f32 to vector<4x96xf32>
    %1030 = arith.addf %1029, %1028 : vector<4x96xf32>
    %1031 = arith.divf %1029, %1030 : vector<4x96xf32>
    %1032 = vector.extract_strided_slice %1000 {offsets = [0, 96], sizes = [4, 32], strides = [1, 1]} : vector<4x128xf32> to vector<4x32xf32>
    %1033 = math.tanh %1032 : vector<4x32xf32>
    %1034 = vector.extract_strided_slice %1031 {offsets = [0, 0], sizes = [4, 32], strides = [1, 1]} : vector<4x96xf32> to vector<4x32xf32>
    %1035 = vector.extract_strided_slice %1031 {offsets = [0, 32], sizes = [4, 32], strides = [1, 1]} : vector<4x96xf32> to vector<4x32xf32>
    %1036 = vector.extract_strided_slice %1031 {offsets = [0, 64], sizes = [4, 32], strides = [1, 1]} : vector<4x96xf32> to vector<4x32xf32>
    %1037 = arith.mulf %1035, %1025 : vector<4x32xf32>
    %1038 = arith.mulf %1034, %1033 : vector<4x32xf32>
    %1039 = arith.addf %1037, %1038 : vector<4x32xf32>
    %1040 = math.tanh %1039 : vector<4x32xf32>
    %1041 = arith.mulf %1036, %1040 : vector<4x32xf32>
    %1042 = vector.broadcast %984 : vector<4x1xf32> to vector<4x32xf32>
    %1043 = arith.mulf %1042, %1041 : vector<4x32xf32>
    %1044 = vector.broadcast %984 : vector<4x1xf32> to vector<4x32xf32>
    %1045 = arith.mulf %1044, %1039 : vector<4x32xf32>
    %1046 = vector.broadcast %988 : vector<4x1xf32> to vector<4x32xf32>
    %1047 = arith.mulf %1046, %1025 : vector<4x32xf32>
    %1048 = arith.addf %1045, %1047 : vector<4x32xf32>
    %1049 = arith.truncf %1019 : vector<4x32xf32> to vector<4x32xbf16>
    %1050 = arith.index_cast %c10_i32 : i32 to index
    %c0_279 = arith.constant 0 : index
    %c0_280 = arith.constant 0 : index
    %1051 = vector.load %arg6[%1050, %c0_279, %c0_280] : memref<16x4x32xbf16, #tpu.memory_space<vmem>>, vector<1x4x32xbf16>
    %1052 = vector.shape_cast %1051 : vector<1x4x32xbf16> to vector<4x32xbf16>
    %1053 = vector.shape_cast %1049 : vector<4x32xbf16> to vector<1x4x32xbf16>
    tpu.vector_store %arg6[%1050, %c0_279, %c0_280], %1053 {strides = array<i32>} : memref<16x4x32xbf16, #tpu.memory_space<vmem>>, vector<1x4x32xbf16>,
    %1054 = arith.truncf %1043 : vector<4x32xf32> to vector<4x32xbf16>
    %1055 = arith.index_cast %974 : i32 to index
    %c0_281 = arith.constant 0 : index
    %c0_282 = arith.constant 0 : index
    %1056 = vector.load %arg7[%1055, %c0_281, %c0_282] : memref<16x4x32xbf16, #tpu.memory_space<vmem>>, vector<1x4x32xbf16>
    %1057 = vector.shape_cast %1056 : vector<1x4x32xbf16> to vector<4x32xbf16>
    %1058 = vector.shape_cast %1054 : vector<4x32xbf16> to vector<1x4x32xbf16>
    tpu.vector_store %arg7[%1055, %c0_281, %c0_282], %1058 {strides = array<i32>} : memref<16x4x32xbf16, #tpu.memory_space<vmem>>, vector<1x4x32xbf16>,
    %1059 = vector.extract_strided_slice %975 {offsets = [0, 0], sizes = [4, 32], strides = [1, 1]} : vector<4x64xf32> to vector<4x32xf32>
    %1060 = vector.broadcast %986 : vector<4x1xf32> to vector<4x32xf32>
    %1061 = arith.mulf %1060, %1059 : vector<4x32xf32>
    %1062 = arith.addf %1019, %1061 : vector<4x32xf32>
    %1063 = vector.extract_strided_slice %975 {offsets = [0, 32], sizes = [4, 32], strides = [1, 1]} : vector<4x64xf32> to vector<4x32xf32>
    %1064 = vector.broadcast %988 : vector<4x1xf32> to vector<4x32xf32>
    %1065 = arith.mulf %1064, %1063 : vector<4x32xf32>
    %1066 = arith.addf %1043, %1065 : vector<4x32xf32>
    %1067 = tpu.concatenate %1062, %1066 in 1 : vector<4x32xf32>, vector<4x32xf32> -> vector<4x64xf32>
    %c0_283 = arith.constant 0 : index
    %c0_284 = arith.constant 0 : index
    %1068 = vector.load %arg8[%c0_283, %c0_284] : memref<4x64xf32, #tpu.memory_space<vmem>>, vector<4x64xf32>
    tpu.vector_store %arg8[%c0_283, %c0_284], %1067 {strides = array<i32>} : memref<4x64xf32, #tpu.memory_space<vmem>>, vector<4x64xf32>,
    %1069 = tpu.concatenate %1024, %1048 in 1 : vector<4x32xf32>, vector<4x32xf32> -> vector<4x64xf32>
    %c0_285 = arith.constant 0 : index
    %c0_286 = arith.constant 0 : index
    %1070 = vector.load %arg9[%c0_285, %c0_286] : memref<4x64xf32, #tpu.memory_space<vmem>>, vector<4x64xf32>
    tpu.vector_store %arg9[%c0_285, %c0_286], %1069 {strides = array<i32>} : memref<4x64xf32, #tpu.memory_space<vmem>>, vector<4x64xf32>,
    %c11_i32 = arith.constant 11 : i32
    %c15_i32_287 = arith.constant 15 : i32
    %1071 = arith.subi %c15_i32_287, %c11_i32 : i32
    %c0_288 = arith.constant 0 : index
    %c0_289 = arith.constant 0 : index
    %1072 = vector.load %arg8[%c0_288, %c0_289] : memref<4x64xf32, #tpu.memory_space<vmem>>, vector<4x64xf32>
    %c0_290 = arith.constant 0 : index
    %c0_291 = arith.constant 0 : index
    %1073 = vector.load %arg9[%c0_290, %c0_291] : memref<4x64xf32, #tpu.memory_space<vmem>>, vector<4x64xf32>
    %1074 = arith.truncf %1072 : vector<4x64xf32> to vector<4x64xbf16>
    %cst_292 = arith.constant dense<0.000000e+00> : vector<4x256xf32>
    %1075 = tpu.matmul %1074, %3, %cst_292 {dimension_numbers = #tpu.dot_dimension_numbers<[1], [0], [0], [1], [0, 0, 1, 1], [], []>} : vector<4x64xbf16>, vector<64x256xbf16>, vector<4x256xf32> -> vector<4x256xf32>
    %1076 = arith.index_cast %c11_i32 : i32 to index
    %c0_293 = arith.constant 0 : index
    %c0_294 = arith.constant 0 : index
    %1077 = vector.load %arg3[%1076, %c0_293, %c0_294] : memref<16x4x1xf32, #tpu.memory_space<vmem>>, vector<1x4x1xf32>
    %1078 = vector.shape_cast %1077 : vector<1x4x1xf32> to vector<4x1xf32>
    %1079 = arith.index_cast %1071 : i32 to index
    %c0_295 = arith.constant 0 : index
    %c0_296 = arith.constant 0 : index
    %1080 = vector.load %arg4[%1079, %c0_295, %c0_296] : memref<16x4x1xf32, #tpu.memory_space<vmem>>, vector<1x4x1xf32>
    %1081 = vector.shape_cast %1080 : vector<1x4x1xf32> to vector<4x1xf32>
    %cst_297 = arith.constant 1.000000e+00 : f32
    %1082 = vector.broadcast %cst_297 : f32 to vector<4x1xf32>
    %1083 = arith.subf %1082, %1078 : vector<4x1xf32>
    %cst_298 = arith.constant 1.000000e+00 : f32
    %1084 = vector.broadcast %cst_298 : f32 to vector<4x1xf32>
    %1085 = arith.subf %1084, %1081 : vector<4x1xf32>
    %1086 = arith.index_cast %c11_i32 : i32 to index
    %c0_299 = arith.constant 0 : index
    %c0_300 = arith.constant 0 : index
    %1087 = vector.load %arg1[%1086, %c0_299, %c0_300] : memref<16x4x128xbf16, #tpu.memory_space<vmem>>, vector<1x4x128xbf16>
    %1088 = vector.shape_cast %1087 : vector<1x4x128xbf16> to vector<4x128xbf16>
    %1089 = arith.extf %1088 : vector<4x128xbf16> to vector<4x128xf32>
    %1090 = vector.extract_strided_slice %1075 {offsets = [0, 0], sizes = [4, 128], strides = [1, 1]} : vector<4x256xf32> to vector<4x128xf32>
    %1091 = arith.addf %1089, %1090 : vector<4x128xf32>
    %1092 = arith.index_cast %1071 : i32 to index
    %c0_301 = arith.constant 0 : index
    %c0_302 = arith.constant 0 : index
    %1093 = vector.load %arg2[%1092, %c0_301, %c0_302] : memref<16x4x128xbf16, #tpu.memory_space<vmem>>, vector<1x4x128xbf16>
    %1094 = vector.shape_cast %1093 : vector<1x4x128xbf16> to vector<4x128xbf16>
    %1095 = arith.extf %1094 : vector<4x128xbf16> to vector<4x128xf32>
    %1096 = vector.extract_strided_slice %1075 {offsets = [0, 128], sizes = [4, 128], strides = [1, 1]} : vector<4x256xf32> to vector<4x128xf32>
    %1097 = arith.addf %1095, %1096 : vector<4x128xf32>
    %1098 = vector.extract_strided_slice %1073 {offsets = [0, 0], sizes = [4, 32], strides = [1, 1]} : vector<4x64xf32> to vector<4x32xf32>
    %1099 = vector.extract_strided_slice %1091 {offsets = [0, 0], sizes = [4, 96], strides = [1, 1]} : vector<4x128xf32> to vector<4x96xf32>
    %1100 = arith.negf %1099 : vector<4x96xf32>
    %1101 = math.exp %1100 : vector<4x96xf32>
    %cst_303 = arith.constant 1.000000e+00 : f32
    %1102 = vector.broadcast %cst_303 : f32 to vector<4x96xf32>
    %1103 = arith.addf %1102, %1101 : vector<4x96xf32>
    %1104 = arith.divf %1102, %1103 : vector<4x96xf32>
    %1105 = vector.extract_strided_slice %1091 {offsets = [0, 96], sizes = [4, 32], strides = [1, 1]} : vector<4x128xf32> to vector<4x32xf32>
    %1106 = math.tanh %1105 : vector<4x32xf32>
    %1107 = vector.extract_strided_slice %1104 {offsets = [0, 0], sizes = [4, 32], strides = [1, 1]} : vector<4x96xf32> to vector<4x32xf32>
    %1108 = vector.extract_strided_slice %1104 {offsets = [0, 32], sizes = [4, 32], strides = [1, 1]} : vector<4x96xf32> to vector<4x32xf32>
    %1109 = vector.extract_strided_slice %1104 {offsets = [0, 64], sizes = [4, 32], strides = [1, 1]} : vector<4x96xf32> to vector<4x32xf32>
    %1110 = arith.mulf %1108, %1098 : vector<4x32xf32>
    %1111 = arith.mulf %1107, %1106 : vector<4x32xf32>
    %1112 = arith.addf %1110, %1111 : vector<4x32xf32>
    %1113 = math.tanh %1112 : vector<4x32xf32>
    %1114 = arith.mulf %1109, %1113 : vector<4x32xf32>
    %1115 = vector.broadcast %1078 : vector<4x1xf32> to vector<4x32xf32>
    %1116 = arith.mulf %1115, %1114 : vector<4x32xf32>
    %1117 = vector.broadcast %1078 : vector<4x1xf32> to vector<4x32xf32>
    %1118 = arith.mulf %1117, %1112 : vector<4x32xf32>
    %1119 = vector.broadcast %1083 : vector<4x1xf32> to vector<4x32xf32>
    %1120 = arith.mulf %1119, %1098 : vector<4x32xf32>
    %1121 = arith.addf %1118, %1120 : vector<4x32xf32>
    %1122 = vector.extract_strided_slice %1073 {offsets = [0, 32], sizes = [4, 32], strides = [1, 1]} : vector<4x64xf32> to vector<4x32xf32>
    %1123 = vector.extract_strided_slice %1097 {offsets = [0, 0], sizes = [4, 96], strides = [1, 1]} : vector<4x128xf32> to vector<4x96xf32>
    %1124 = arith.negf %1123 : vector<4x96xf32>
    %1125 = math.exp %1124 : vector<4x96xf32>
    %cst_304 = arith.constant 1.000000e+00 : f32
    %1126 = vector.broadcast %cst_304 : f32 to vector<4x96xf32>
    %1127 = arith.addf %1126, %1125 : vector<4x96xf32>
    %1128 = arith.divf %1126, %1127 : vector<4x96xf32>
    %1129 = vector.extract_strided_slice %1097 {offsets = [0, 96], sizes = [4, 32], strides = [1, 1]} : vector<4x128xf32> to vector<4x32xf32>
    %1130 = math.tanh %1129 : vector<4x32xf32>
    %1131 = vector.extract_strided_slice %1128 {offsets = [0, 0], sizes = [4, 32], strides = [1, 1]} : vector<4x96xf32> to vector<4x32xf32>
    %1132 = vector.extract_strided_slice %1128 {offsets = [0, 32], sizes = [4, 32], strides = [1, 1]} : vector<4x96xf32> to vector<4x32xf32>
    %1133 = vector.extract_strided_slice %1128 {offsets = [0, 64], sizes = [4, 32], strides = [1, 1]} : vector<4x96xf32> to vector<4x32xf32>
    %1134 = arith.mulf %1132, %1122 : vector<4x32xf32>
    %1135 = arith.mulf %1131, %1130 : vector<4x32xf32>
    %1136 = arith.addf %1134, %1135 : vector<4x32xf32>
    %1137 = math.tanh %1136 : vector<4x32xf32>
    %1138 = arith.mulf %1133, %1137 : vector<4x32xf32>
    %1139 = vector.broadcast %1081 : vector<4x1xf32> to vector<4x32xf32>
    %1140 = arith.mulf %1139, %1138 : vector<4x32xf32>
    %1141 = vector.broadcast %1081 : vector<4x1xf32> to vector<4x32xf32>
    %1142 = arith.mulf %1141, %1136 : vector<4x32xf32>
    %1143 = vector.broadcast %1085 : vector<4x1xf32> to vector<4x32xf32>
    %1144 = arith.mulf %1143, %1122 : vector<4x32xf32>
    %1145 = arith.addf %1142, %1144 : vector<4x32xf32>
    %1146 = arith.truncf %1116 : vector<4x32xf32> to vector<4x32xbf16>
    %1147 = arith.index_cast %c11_i32 : i32 to index
    %c0_305 = arith.constant 0 : index
    %c0_306 = arith.constant 0 : index
    %1148 = vector.load %arg6[%1147, %c0_305, %c0_306] : memref<16x4x32xbf16, #tpu.memory_space<vmem>>, vector<1x4x32xbf16>
    %1149 = vector.shape_cast %1148 : vector<1x4x32xbf16> to vector<4x32xbf16>
    %1150 = vector.shape_cast %1146 : vector<4x32xbf16> to vector<1x4x32xbf16>
    tpu.vector_store %arg6[%1147, %c0_305, %c0_306], %1150 {strides = array<i32>} : memref<16x4x32xbf16, #tpu.memory_space<vmem>>, vector<1x4x32xbf16>,
    %1151 = arith.truncf %1140 : vector<4x32xf32> to vector<4x32xbf16>
    %1152 = arith.index_cast %1071 : i32 to index
    %c0_307 = arith.constant 0 : index
    %c0_308 = arith.constant 0 : index
    %1153 = vector.load %arg7[%1152, %c0_307, %c0_308] : memref<16x4x32xbf16, #tpu.memory_space<vmem>>, vector<1x4x32xbf16>
    %1154 = vector.shape_cast %1153 : vector<1x4x32xbf16> to vector<4x32xbf16>
    %1155 = vector.shape_cast %1151 : vector<4x32xbf16> to vector<1x4x32xbf16>
    tpu.vector_store %arg7[%1152, %c0_307, %c0_308], %1155 {strides = array<i32>} : memref<16x4x32xbf16, #tpu.memory_space<vmem>>, vector<1x4x32xbf16>,
    %1156 = vector.extract_strided_slice %1072 {offsets = [0, 0], sizes = [4, 32], strides = [1, 1]} : vector<4x64xf32> to vector<4x32xf32>
    %1157 = vector.broadcast %1083 : vector<4x1xf32> to vector<4x32xf32>
    %1158 = arith.mulf %1157, %1156 : vector<4x32xf32>
    %1159 = arith.addf %1116, %1158 : vector<4x32xf32>
    %1160 = vector.extract_strided_slice %1072 {offsets = [0, 32], sizes = [4, 32], strides = [1, 1]} : vector<4x64xf32> to vector<4x32xf32>
    %1161 = vector.broadcast %1085 : vector<4x1xf32> to vector<4x32xf32>
    %1162 = arith.mulf %1161, %1160 : vector<4x32xf32>
    %1163 = arith.addf %1140, %1162 : vector<4x32xf32>
    %1164 = tpu.concatenate %1159, %1163 in 1 : vector<4x32xf32>, vector<4x32xf32> -> vector<4x64xf32>
    %c0_309 = arith.constant 0 : index
    %c0_310 = arith.constant 0 : index
    %1165 = vector.load %arg8[%c0_309, %c0_310] : memref<4x64xf32, #tpu.memory_space<vmem>>, vector<4x64xf32>
    tpu.vector_store %arg8[%c0_309, %c0_310], %1164 {strides = array<i32>} : memref<4x64xf32, #tpu.memory_space<vmem>>, vector<4x64xf32>,
    %1166 = tpu.concatenate %1121, %1145 in 1 : vector<4x32xf32>, vector<4x32xf32> -> vector<4x64xf32>
    %c0_311 = arith.constant 0 : index
    %c0_312 = arith.constant 0 : index
    %1167 = vector.load %arg9[%c0_311, %c0_312] : memref<4x64xf32, #tpu.memory_space<vmem>>, vector<4x64xf32>
    tpu.vector_store %arg9[%c0_311, %c0_312], %1166 {strides = array<i32>} : memref<4x64xf32, #tpu.memory_space<vmem>>, vector<4x64xf32>,
    %c12_i32 = arith.constant 12 : i32
    %c15_i32_313 = arith.constant 15 : i32
    %1168 = arith.subi %c15_i32_313, %c12_i32 : i32
    %c0_314 = arith.constant 0 : index
    %c0_315 = arith.constant 0 : index
    %1169 = vector.load %arg8[%c0_314, %c0_315] : memref<4x64xf32, #tpu.memory_space<vmem>>, vector<4x64xf32>
    %c0_316 = arith.constant 0 : index
    %c0_317 = arith.constant 0 : index
    %1170 = vector.load %arg9[%c0_316, %c0_317] : memref<4x64xf32, #tpu.memory_space<vmem>>, vector<4x64xf32>
    %1171 = arith.truncf %1169 : vector<4x64xf32> to vector<4x64xbf16>
    %cst_318 = arith.constant dense<0.000000e+00> : vector<4x256xf32>
    %1172 = tpu.matmul %1171, %3, %cst_318 {dimension_numbers = #tpu.dot_dimension_numbers<[1], [0], [0], [1], [0, 0, 1, 1], [], []>} : vector<4x64xbf16>, vector<64x256xbf16>, vector<4x256xf32> -> vector<4x256xf32>
    %1173 = arith.index_cast %c12_i32 : i32 to index
    %c0_319 = arith.constant 0 : index
    %c0_320 = arith.constant 0 : index
    %1174 = vector.load %arg3[%1173, %c0_319, %c0_320] : memref<16x4x1xf32, #tpu.memory_space<vmem>>, vector<1x4x1xf32>
    %1175 = vector.shape_cast %1174 : vector<1x4x1xf32> to vector<4x1xf32>
    %1176 = arith.index_cast %1168 : i32 to index
    %c0_321 = arith.constant 0 : index
    %c0_322 = arith.constant 0 : index
    %1177 = vector.load %arg4[%1176, %c0_321, %c0_322] : memref<16x4x1xf32, #tpu.memory_space<vmem>>, vector<1x4x1xf32>
    %1178 = vector.shape_cast %1177 : vector<1x4x1xf32> to vector<4x1xf32>
    %cst_323 = arith.constant 1.000000e+00 : f32
    %1179 = vector.broadcast %cst_323 : f32 to vector<4x1xf32>
    %1180 = arith.subf %1179, %1175 : vector<4x1xf32>
    %cst_324 = arith.constant 1.000000e+00 : f32
    %1181 = vector.broadcast %cst_324 : f32 to vector<4x1xf32>
    %1182 = arith.subf %1181, %1178 : vector<4x1xf32>
    %1183 = arith.index_cast %c12_i32 : i32 to index
    %c0_325 = arith.constant 0 : index
    %c0_326 = arith.constant 0 : index
    %1184 = vector.load %arg1[%1183, %c0_325, %c0_326] : memref<16x4x128xbf16, #tpu.memory_space<vmem>>, vector<1x4x128xbf16>
    %1185 = vector.shape_cast %1184 : vector<1x4x128xbf16> to vector<4x128xbf16>
    %1186 = arith.extf %1185 : vector<4x128xbf16> to vector<4x128xf32>
    %1187 = vector.extract_strided_slice %1172 {offsets = [0, 0], sizes = [4, 128], strides = [1, 1]} : vector<4x256xf32> to vector<4x128xf32>
    %1188 = arith.addf %1186, %1187 : vector<4x128xf32>
    %1189 = arith.index_cast %1168 : i32 to index
    %c0_327 = arith.constant 0 : index
    %c0_328 = arith.constant 0 : index
    %1190 = vector.load %arg2[%1189, %c0_327, %c0_328] : memref<16x4x128xbf16, #tpu.memory_space<vmem>>, vector<1x4x128xbf16>
    %1191 = vector.shape_cast %1190 : vector<1x4x128xbf16> to vector<4x128xbf16>
    %1192 = arith.extf %1191 : vector<4x128xbf16> to vector<4x128xf32>
    %1193 = vector.extract_strided_slice %1172 {offsets = [0, 128], sizes = [4, 128], strides = [1, 1]} : vector<4x256xf32> to vector<4x128xf32>
    %1194 = arith.addf %1192, %1193 : vector<4x128xf32>
    %1195 = vector.extract_strided_slice %1170 {offsets = [0, 0], sizes = [4, 32], strides = [1, 1]} : vector<4x64xf32> to vector<4x32xf32>
    %1196 = vector.extract_strided_slice %1188 {offsets = [0, 0], sizes = [4, 96], strides = [1, 1]} : vector<4x128xf32> to vector<4x96xf32>
    %1197 = arith.negf %1196 : vector<4x96xf32>
    %1198 = math.exp %1197 : vector<4x96xf32>
    %cst_329 = arith.constant 1.000000e+00 : f32
    %1199 = vector.broadcast %cst_329 : f32 to vector<4x96xf32>
    %1200 = arith.addf %1199, %1198 : vector<4x96xf32>
    %1201 = arith.divf %1199, %1200 : vector<4x96xf32>
    %1202 = vector.extract_strided_slice %1188 {offsets = [0, 96], sizes = [4, 32], strides = [1, 1]} : vector<4x128xf32> to vector<4x32xf32>
    %1203 = math.tanh %1202 : vector<4x32xf32>
    %1204 = vector.extract_strided_slice %1201 {offsets = [0, 0], sizes = [4, 32], strides = [1, 1]} : vector<4x96xf32> to vector<4x32xf32>
    %1205 = vector.extract_strided_slice %1201 {offsets = [0, 32], sizes = [4, 32], strides = [1, 1]} : vector<4x96xf32> to vector<4x32xf32>
    %1206 = vector.extract_strided_slice %1201 {offsets = [0, 64], sizes = [4, 32], strides = [1, 1]} : vector<4x96xf32> to vector<4x32xf32>
    %1207 = arith.mulf %1205, %1195 : vector<4x32xf32>
    %1208 = arith.mulf %1204, %1203 : vector<4x32xf32>
    %1209 = arith.addf %1207, %1208 : vector<4x32xf32>
    %1210 = math.tanh %1209 : vector<4x32xf32>
    %1211 = arith.mulf %1206, %1210 : vector<4x32xf32>
    %1212 = vector.broadcast %1175 : vector<4x1xf32> to vector<4x32xf32>
    %1213 = arith.mulf %1212, %1211 : vector<4x32xf32>
    %1214 = vector.broadcast %1175 : vector<4x1xf32> to vector<4x32xf32>
    %1215 = arith.mulf %1214, %1209 : vector<4x32xf32>
    %1216 = vector.broadcast %1180 : vector<4x1xf32> to vector<4x32xf32>
    %1217 = arith.mulf %1216, %1195 : vector<4x32xf32>
    %1218 = arith.addf %1215, %1217 : vector<4x32xf32>
    %1219 = vector.extract_strided_slice %1170 {offsets = [0, 32], sizes = [4, 32], strides = [1, 1]} : vector<4x64xf32> to vector<4x32xf32>
    %1220 = vector.extract_strided_slice %1194 {offsets = [0, 0], sizes = [4, 96], strides = [1, 1]} : vector<4x128xf32> to vector<4x96xf32>
    %1221 = arith.negf %1220 : vector<4x96xf32>
    %1222 = math.exp %1221 : vector<4x96xf32>
    %cst_330 = arith.constant 1.000000e+00 : f32
    %1223 = vector.broadcast %cst_330 : f32 to vector<4x96xf32>
    %1224 = arith.addf %1223, %1222 : vector<4x96xf32>
    %1225 = arith.divf %1223, %1224 : vector<4x96xf32>
    %1226 = vector.extract_strided_slice %1194 {offsets = [0, 96], sizes = [4, 32], strides = [1, 1]} : vector<4x128xf32> to vector<4x32xf32>
    %1227 = math.tanh %1226 : vector<4x32xf32>
    %1228 = vector.extract_strided_slice %1225 {offsets = [0, 0], sizes = [4, 32], strides = [1, 1]} : vector<4x96xf32> to vector<4x32xf32>
    %1229 = vector.extract_strided_slice %1225 {offsets = [0, 32], sizes = [4, 32], strides = [1, 1]} : vector<4x96xf32> to vector<4x32xf32>
    %1230 = vector.extract_strided_slice %1225 {offsets = [0, 64], sizes = [4, 32], strides = [1, 1]} : vector<4x96xf32> to vector<4x32xf32>
    %1231 = arith.mulf %1229, %1219 : vector<4x32xf32>
    %1232 = arith.mulf %1228, %1227 : vector<4x32xf32>
    %1233 = arith.addf %1231, %1232 : vector<4x32xf32>
    %1234 = math.tanh %1233 : vector<4x32xf32>
    %1235 = arith.mulf %1230, %1234 : vector<4x32xf32>
    %1236 = vector.broadcast %1178 : vector<4x1xf32> to vector<4x32xf32>
    %1237 = arith.mulf %1236, %1235 : vector<4x32xf32>
    %1238 = vector.broadcast %1178 : vector<4x1xf32> to vector<4x32xf32>
    %1239 = arith.mulf %1238, %1233 : vector<4x32xf32>
    %1240 = vector.broadcast %1182 : vector<4x1xf32> to vector<4x32xf32>
    %1241 = arith.mulf %1240, %1219 : vector<4x32xf32>
    %1242 = arith.addf %1239, %1241 : vector<4x32xf32>
    %1243 = arith.truncf %1213 : vector<4x32xf32> to vector<4x32xbf16>
    %1244 = arith.index_cast %c12_i32 : i32 to index
    %c0_331 = arith.constant 0 : index
    %c0_332 = arith.constant 0 : index
    %1245 = vector.load %arg6[%1244, %c0_331, %c0_332] : memref<16x4x32xbf16, #tpu.memory_space<vmem>>, vector<1x4x32xbf16>
    %1246 = vector.shape_cast %1245 : vector<1x4x32xbf16> to vector<4x32xbf16>
    %1247 = vector.shape_cast %1243 : vector<4x32xbf16> to vector<1x4x32xbf16>
    tpu.vector_store %arg6[%1244, %c0_331, %c0_332], %1247 {strides = array<i32>} : memref<16x4x32xbf16, #tpu.memory_space<vmem>>, vector<1x4x32xbf16>,
    %1248 = arith.truncf %1237 : vector<4x32xf32> to vector<4x32xbf16>
    %1249 = arith.index_cast %1168 : i32 to index
    %c0_333 = arith.constant 0 : index
    %c0_334 = arith.constant 0 : index
    %1250 = vector.load %arg7[%1249, %c0_333, %c0_334] : memref<16x4x32xbf16, #tpu.memory_space<vmem>>, vector<1x4x32xbf16>
    %1251 = vector.shape_cast %1250 : vector<1x4x32xbf16> to vector<4x32xbf16>
    %1252 = vector.shape_cast %1248 : vector<4x32xbf16> to vector<1x4x32xbf16>
    tpu.vector_store %arg7[%1249, %c0_333, %c0_334], %1252 {strides = array<i32>} : memref<16x4x32xbf16, #tpu.memory_space<vmem>>, vector<1x4x32xbf16>,
    %1253 = vector.extract_strided_slice %1169 {offsets = [0, 0], sizes = [4, 32], strides = [1, 1]} : vector<4x64xf32> to vector<4x32xf32>
    %1254 = vector.broadcast %1180 : vector<4x1xf32> to vector<4x32xf32>
    %1255 = arith.mulf %1254, %1253 : vector<4x32xf32>
    %1256 = arith.addf %1213, %1255 : vector<4x32xf32>
    %1257 = vector.extract_strided_slice %1169 {offsets = [0, 32], sizes = [4, 32], strides = [1, 1]} : vector<4x64xf32> to vector<4x32xf32>
    %1258 = vector.broadcast %1182 : vector<4x1xf32> to vector<4x32xf32>
    %1259 = arith.mulf %1258, %1257 : vector<4x32xf32>
    %1260 = arith.addf %1237, %1259 : vector<4x32xf32>
    %1261 = tpu.concatenate %1256, %1260 in 1 : vector<4x32xf32>, vector<4x32xf32> -> vector<4x64xf32>
    %c0_335 = arith.constant 0 : index
    %c0_336 = arith.constant 0 : index
    %1262 = vector.load %arg8[%c0_335, %c0_336] : memref<4x64xf32, #tpu.memory_space<vmem>>, vector<4x64xf32>
    tpu.vector_store %arg8[%c0_335, %c0_336], %1261 {strides = array<i32>} : memref<4x64xf32, #tpu.memory_space<vmem>>, vector<4x64xf32>,
    %1263 = tpu.concatenate %1218, %1242 in 1 : vector<4x32xf32>, vector<4x32xf32> -> vector<4x64xf32>
    %c0_337 = arith.constant 0 : index
    %c0_338 = arith.constant 0 : index
    %1264 = vector.load %arg9[%c0_337, %c0_338] : memref<4x64xf32, #tpu.memory_space<vmem>>, vector<4x64xf32>
    tpu.vector_store %arg9[%c0_337, %c0_338], %1263 {strides = array<i32>} : memref<4x64xf32, #tpu.memory_space<vmem>>, vector<4x64xf32>,
    %c13_i32 = arith.constant 13 : i32
    %c15_i32_339 = arith.constant 15 : i32
    %1265 = arith.subi %c15_i32_339, %c13_i32 : i32
    %c0_340 = arith.constant 0 : index
    %c0_341 = arith.constant 0 : index
    %1266 = vector.load %arg8[%c0_340, %c0_341] : memref<4x64xf32, #tpu.memory_space<vmem>>, vector<4x64xf32>
    %c0_342 = arith.constant 0 : index
    %c0_343 = arith.constant 0 : index
    %1267 = vector.load %arg9[%c0_342, %c0_343] : memref<4x64xf32, #tpu.memory_space<vmem>>, vector<4x64xf32>
    %1268 = arith.truncf %1266 : vector<4x64xf32> to vector<4x64xbf16>
    %cst_344 = arith.constant dense<0.000000e+00> : vector<4x256xf32>
    %1269 = tpu.matmul %1268, %3, %cst_344 {dimension_numbers = #tpu.dot_dimension_numbers<[1], [0], [0], [1], [0, 0, 1, 1], [], []>} : vector<4x64xbf16>, vector<64x256xbf16>, vector<4x256xf32> -> vector<4x256xf32>
    %1270 = arith.index_cast %c13_i32 : i32 to index
    %c0_345 = arith.constant 0 : index
    %c0_346 = arith.constant 0 : index
    %1271 = vector.load %arg3[%1270, %c0_345, %c0_346] : memref<16x4x1xf32, #tpu.memory_space<vmem>>, vector<1x4x1xf32>
    %1272 = vector.shape_cast %1271 : vector<1x4x1xf32> to vector<4x1xf32>
    %1273 = arith.index_cast %1265 : i32 to index
    %c0_347 = arith.constant 0 : index
    %c0_348 = arith.constant 0 : index
    %1274 = vector.load %arg4[%1273, %c0_347, %c0_348] : memref<16x4x1xf32, #tpu.memory_space<vmem>>, vector<1x4x1xf32>
    %1275 = vector.shape_cast %1274 : vector<1x4x1xf32> to vector<4x1xf32>
    %cst_349 = arith.constant 1.000000e+00 : f32
    %1276 = vector.broadcast %cst_349 : f32 to vector<4x1xf32>
    %1277 = arith.subf %1276, %1272 : vector<4x1xf32>
    %cst_350 = arith.constant 1.000000e+00 : f32
    %1278 = vector.broadcast %cst_350 : f32 to vector<4x1xf32>
    %1279 = arith.subf %1278, %1275 : vector<4x1xf32>
    %1280 = arith.index_cast %c13_i32 : i32 to index
    %c0_351 = arith.constant 0 : index
    %c0_352 = arith.constant 0 : index
    %1281 = vector.load %arg1[%1280, %c0_351, %c0_352] : memref<16x4x128xbf16, #tpu.memory_space<vmem>>, vector<1x4x128xbf16>
    %1282 = vector.shape_cast %1281 : vector<1x4x128xbf16> to vector<4x128xbf16>
    %1283 = arith.extf %1282 : vector<4x128xbf16> to vector<4x128xf32>
    %1284 = vector.extract_strided_slice %1269 {offsets = [0, 0], sizes = [4, 128], strides = [1, 1]} : vector<4x256xf32> to vector<4x128xf32>
    %1285 = arith.addf %1283, %1284 : vector<4x128xf32>
    %1286 = arith.index_cast %1265 : i32 to index
    %c0_353 = arith.constant 0 : index
    %c0_354 = arith.constant 0 : index
    %1287 = vector.load %arg2[%1286, %c0_353, %c0_354] : memref<16x4x128xbf16, #tpu.memory_space<vmem>>, vector<1x4x128xbf16>
    %1288 = vector.shape_cast %1287 : vector<1x4x128xbf16> to vector<4x128xbf16>
    %1289 = arith.extf %1288 : vector<4x128xbf16> to vector<4x128xf32>
    %1290 = vector.extract_strided_slice %1269 {offsets = [0, 128], sizes = [4, 128], strides = [1, 1]} : vector<4x256xf32> to vector<4x128xf32>
    %1291 = arith.addf %1289, %1290 : vector<4x128xf32>
    %1292 = vector.extract_strided_slice %1267 {offsets = [0, 0], sizes = [4, 32], strides = [1, 1]} : vector<4x64xf32> to vector<4x32xf32>
    %1293 = vector.extract_strided_slice %1285 {offsets = [0, 0], sizes = [4, 96], strides = [1, 1]} : vector<4x128xf32> to vector<4x96xf32>
    %1294 = arith.negf %1293 : vector<4x96xf32>
    %1295 = math.exp %1294 : vector<4x96xf32>
    %cst_355 = arith.constant 1.000000e+00 : f32
    %1296 = vector.broadcast %cst_355 : f32 to vector<4x96xf32>
    %1297 = arith.addf %1296, %1295 : vector<4x96xf32>
    %1298 = arith.divf %1296, %1297 : vector<4x96xf32>
    %1299 = vector.extract_strided_slice %1285 {offsets = [0, 96], sizes = [4, 32], strides = [1, 1]} : vector<4x128xf32> to vector<4x32xf32>
    %1300 = math.tanh %1299 : vector<4x32xf32>
    %1301 = vector.extract_strided_slice %1298 {offsets = [0, 0], sizes = [4, 32], strides = [1, 1]} : vector<4x96xf32> to vector<4x32xf32>
    %1302 = vector.extract_strided_slice %1298 {offsets = [0, 32], sizes = [4, 32], strides = [1, 1]} : vector<4x96xf32> to vector<4x32xf32>
    %1303 = vector.extract_strided_slice %1298 {offsets = [0, 64], sizes = [4, 32], strides = [1, 1]} : vector<4x96xf32> to vector<4x32xf32>
    %1304 = arith.mulf %1302, %1292 : vector<4x32xf32>
    %1305 = arith.mulf %1301, %1300 : vector<4x32xf32>
    %1306 = arith.addf %1304, %1305 : vector<4x32xf32>
    %1307 = math.tanh %1306 : vector<4x32xf32>
    %1308 = arith.mulf %1303, %1307 : vector<4x32xf32>
    %1309 = vector.broadcast %1272 : vector<4x1xf32> to vector<4x32xf32>
    %1310 = arith.mulf %1309, %1308 : vector<4x32xf32>
    %1311 = vector.broadcast %1272 : vector<4x1xf32> to vector<4x32xf32>
    %1312 = arith.mulf %1311, %1306 : vector<4x32xf32>
    %1313 = vector.broadcast %1277 : vector<4x1xf32> to vector<4x32xf32>
    %1314 = arith.mulf %1313, %1292 : vector<4x32xf32>
    %1315 = arith.addf %1312, %1314 : vector<4x32xf32>
    %1316 = vector.extract_strided_slice %1267 {offsets = [0, 32], sizes = [4, 32], strides = [1, 1]} : vector<4x64xf32> to vector<4x32xf32>
    %1317 = vector.extract_strided_slice %1291 {offsets = [0, 0], sizes = [4, 96], strides = [1, 1]} : vector<4x128xf32> to vector<4x96xf32>
    %1318 = arith.negf %1317 : vector<4x96xf32>
    %1319 = math.exp %1318 : vector<4x96xf32>
    %cst_356 = arith.constant 1.000000e+00 : f32
    %1320 = vector.broadcast %cst_356 : f32 to vector<4x96xf32>
    %1321 = arith.addf %1320, %1319 : vector<4x96xf32>
    %1322 = arith.divf %1320, %1321 : vector<4x96xf32>
    %1323 = vector.extract_strided_slice %1291 {offsets = [0, 96], sizes = [4, 32], strides = [1, 1]} : vector<4x128xf32> to vector<4x32xf32>
    %1324 = math.tanh %1323 : vector<4x32xf32>
    %1325 = vector.extract_strided_slice %1322 {offsets = [0, 0], sizes = [4, 32], strides = [1, 1]} : vector<4x96xf32> to vector<4x32xf32>
    %1326 = vector.extract_strided_slice %1322 {offsets = [0, 32], sizes = [4, 32], strides = [1, 1]} : vector<4x96xf32> to vector<4x32xf32>
    %1327 = vector.extract_strided_slice %1322 {offsets = [0, 64], sizes = [4, 32], strides = [1, 1]} : vector<4x96xf32> to vector<4x32xf32>
    %1328 = arith.mulf %1326, %1316 : vector<4x32xf32>
    %1329 = arith.mulf %1325, %1324 : vector<4x32xf32>
    %1330 = arith.addf %1328, %1329 : vector<4x32xf32>
    %1331 = math.tanh %1330 : vector<4x32xf32>
    %1332 = arith.mulf %1327, %1331 : vector<4x32xf32>
    %1333 = vector.broadcast %1275 : vector<4x1xf32> to vector<4x32xf32>
    %1334 = arith.mulf %1333, %1332 : vector<4x32xf32>
    %1335 = vector.broadcast %1275 : vector<4x1xf32> to vector<4x32xf32>
    %1336 = arith.mulf %1335, %1330 : vector<4x32xf32>
    %1337 = vector.broadcast %1279 : vector<4x1xf32> to vector<4x32xf32>
    %1338 = arith.mulf %1337, %1316 : vector<4x32xf32>
    %1339 = arith.addf %1336, %1338 : vector<4x32xf32>
    %1340 = arith.truncf %1310 : vector<4x32xf32> to vector<4x32xbf16>
    %1341 = arith.index_cast %c13_i32 : i32 to index
    %c0_357 = arith.constant 0 : index
    %c0_358 = arith.constant 0 : index
    %1342 = vector.load %arg6[%1341, %c0_357, %c0_358] : memref<16x4x32xbf16, #tpu.memory_space<vmem>>, vector<1x4x32xbf16>
    %1343 = vector.shape_cast %1342 : vector<1x4x32xbf16> to vector<4x32xbf16>
    %1344 = vector.shape_cast %1340 : vector<4x32xbf16> to vector<1x4x32xbf16>
    tpu.vector_store %arg6[%1341, %c0_357, %c0_358], %1344 {strides = array<i32>} : memref<16x4x32xbf16, #tpu.memory_space<vmem>>, vector<1x4x32xbf16>,
    %1345 = arith.truncf %1334 : vector<4x32xf32> to vector<4x32xbf16>
    %1346 = arith.index_cast %1265 : i32 to index
    %c0_359 = arith.constant 0 : index
    %c0_360 = arith.constant 0 : index
    %1347 = vector.load %arg7[%1346, %c0_359, %c0_360] : memref<16x4x32xbf16, #tpu.memory_space<vmem>>, vector<1x4x32xbf16>
    %1348 = vector.shape_cast %1347 : vector<1x4x32xbf16> to vector<4x32xbf16>
    %1349 = vector.shape_cast %1345 : vector<4x32xbf16> to vector<1x4x32xbf16>
    tpu.vector_store %arg7[%1346, %c0_359, %c0_360], %1349 {strides = array<i32>} : memref<16x4x32xbf16, #tpu.memory_space<vmem>>, vector<1x4x32xbf16>,
    %1350 = vector.extract_strided_slice %1266 {offsets = [0, 0], sizes = [4, 32], strides = [1, 1]} : vector<4x64xf32> to vector<4x32xf32>
    %1351 = vector.broadcast %1277 : vector<4x1xf32> to vector<4x32xf32>
    %1352 = arith.mulf %1351, %1350 : vector<4x32xf32>
    %1353 = arith.addf %1310, %1352 : vector<4x32xf32>
    %1354 = vector.extract_strided_slice %1266 {offsets = [0, 32], sizes = [4, 32], strides = [1, 1]} : vector<4x64xf32> to vector<4x32xf32>
    %1355 = vector.broadcast %1279 : vector<4x1xf32> to vector<4x32xf32>
    %1356 = arith.mulf %1355, %1354 : vector<4x32xf32>
    %1357 = arith.addf %1334, %1356 : vector<4x32xf32>
    %1358 = tpu.concatenate %1353, %1357 in 1 : vector<4x32xf32>, vector<4x32xf32> -> vector<4x64xf32>
    %c0_361 = arith.constant 0 : index
    %c0_362 = arith.constant 0 : index
    %1359 = vector.load %arg8[%c0_361, %c0_362] : memref<4x64xf32, #tpu.memory_space<vmem>>, vector<4x64xf32>
    tpu.vector_store %arg8[%c0_361, %c0_362], %1358 {strides = array<i32>} : memref<4x64xf32, #tpu.memory_space<vmem>>, vector<4x64xf32>,
    %1360 = tpu.concatenate %1315, %1339 in 1 : vector<4x32xf32>, vector<4x32xf32> -> vector<4x64xf32>
    %c0_363 = arith.constant 0 : index
    %c0_364 = arith.constant 0 : index
    %1361 = vector.load %arg9[%c0_363, %c0_364] : memref<4x64xf32, #tpu.memory_space<vmem>>, vector<4x64xf32>
    tpu.vector_store %arg9[%c0_363, %c0_364], %1360 {strides = array<i32>} : memref<4x64xf32, #tpu.memory_space<vmem>>, vector<4x64xf32>,
    %c14_i32 = arith.constant 14 : i32
    %c15_i32_365 = arith.constant 15 : i32
    %1362 = arith.subi %c15_i32_365, %c14_i32 : i32
    %c0_366 = arith.constant 0 : index
    %c0_367 = arith.constant 0 : index
    %1363 = vector.load %arg8[%c0_366, %c0_367] : memref<4x64xf32, #tpu.memory_space<vmem>>, vector<4x64xf32>
    %c0_368 = arith.constant 0 : index
    %c0_369 = arith.constant 0 : index
    %1364 = vector.load %arg9[%c0_368, %c0_369] : memref<4x64xf32, #tpu.memory_space<vmem>>, vector<4x64xf32>
    %1365 = arith.truncf %1363 : vector<4x64xf32> to vector<4x64xbf16>
    %cst_370 = arith.constant dense<0.000000e+00> : vector<4x256xf32>
    %1366 = tpu.matmul %1365, %3, %cst_370 {dimension_numbers = #tpu.dot_dimension_numbers<[1], [0], [0], [1], [0, 0, 1, 1], [], []>} : vector<4x64xbf16>, vector<64x256xbf16>, vector<4x256xf32> -> vector<4x256xf32>
    %1367 = arith.index_cast %c14_i32 : i32 to index
    %c0_371 = arith.constant 0 : index
    %c0_372 = arith.constant 0 : index
    %1368 = vector.load %arg3[%1367, %c0_371, %c0_372] : memref<16x4x1xf32, #tpu.memory_space<vmem>>, vector<1x4x1xf32>
    %1369 = vector.shape_cast %1368 : vector<1x4x1xf32> to vector<4x1xf32>
    %1370 = arith.index_cast %1362 : i32 to index
    %c0_373 = arith.constant 0 : index
    %c0_374 = arith.constant 0 : index
    %1371 = vector.load %arg4[%1370, %c0_373, %c0_374] : memref<16x4x1xf32, #tpu.memory_space<vmem>>, vector<1x4x1xf32>
    %1372 = vector.shape_cast %1371 : vector<1x4x1xf32> to vector<4x1xf32>
    %cst_375 = arith.constant 1.000000e+00 : f32
    %1373 = vector.broadcast %cst_375 : f32 to vector<4x1xf32>
    %1374 = arith.subf %1373, %1369 : vector<4x1xf32>
    %cst_376 = arith.constant 1.000000e+00 : f32
    %1375 = vector.broadcast %cst_376 : f32 to vector<4x1xf32>
    %1376 = arith.subf %1375, %1372 : vector<4x1xf32>
    %1377 = arith.index_cast %c14_i32 : i32 to index
    %c0_377 = arith.constant 0 : index
    %c0_378 = arith.constant 0 : index
    %1378 = vector.load %arg1[%1377, %c0_377, %c0_378] : memref<16x4x128xbf16, #tpu.memory_space<vmem>>, vector<1x4x128xbf16>
    %1379 = vector.shape_cast %1378 : vector<1x4x128xbf16> to vector<4x128xbf16>
    %1380 = arith.extf %1379 : vector<4x128xbf16> to vector<4x128xf32>
    %1381 = vector.extract_strided_slice %1366 {offsets = [0, 0], sizes = [4, 128], strides = [1, 1]} : vector<4x256xf32> to vector<4x128xf32>
    %1382 = arith.addf %1380, %1381 : vector<4x128xf32>
    %1383 = arith.index_cast %1362 : i32 to index
    %c0_379 = arith.constant 0 : index
    %c0_380 = arith.constant 0 : index
    %1384 = vector.load %arg2[%1383, %c0_379, %c0_380] : memref<16x4x128xbf16, #tpu.memory_space<vmem>>, vector<1x4x128xbf16>
    %1385 = vector.shape_cast %1384 : vector<1x4x128xbf16> to vector<4x128xbf16>
    %1386 = arith.extf %1385 : vector<4x128xbf16> to vector<4x128xf32>
    %1387 = vector.extract_strided_slice %1366 {offsets = [0, 128], sizes = [4, 128], strides = [1, 1]} : vector<4x256xf32> to vector<4x128xf32>
    %1388 = arith.addf %1386, %1387 : vector<4x128xf32>
    %1389 = vector.extract_strided_slice %1364 {offsets = [0, 0], sizes = [4, 32], strides = [1, 1]} : vector<4x64xf32> to vector<4x32xf32>
    %1390 = vector.extract_strided_slice %1382 {offsets = [0, 0], sizes = [4, 96], strides = [1, 1]} : vector<4x128xf32> to vector<4x96xf32>
    %1391 = arith.negf %1390 : vector<4x96xf32>
    %1392 = math.exp %1391 : vector<4x96xf32>
    %cst_381 = arith.constant 1.000000e+00 : f32
    %1393 = vector.broadcast %cst_381 : f32 to vector<4x96xf32>
    %1394 = arith.addf %1393, %1392 : vector<4x96xf32>
    %1395 = arith.divf %1393, %1394 : vector<4x96xf32>
    %1396 = vector.extract_strided_slice %1382 {offsets = [0, 96], sizes = [4, 32], strides = [1, 1]} : vector<4x128xf32> to vector<4x32xf32>
    %1397 = math.tanh %1396 : vector<4x32xf32>
    %1398 = vector.extract_strided_slice %1395 {offsets = [0, 0], sizes = [4, 32], strides = [1, 1]} : vector<4x96xf32> to vector<4x32xf32>
    %1399 = vector.extract_strided_slice %1395 {offsets = [0, 32], sizes = [4, 32], strides = [1, 1]} : vector<4x96xf32> to vector<4x32xf32>
    %1400 = vector.extract_strided_slice %1395 {offsets = [0, 64], sizes = [4, 32], strides = [1, 1]} : vector<4x96xf32> to vector<4x32xf32>
    %1401 = arith.mulf %1399, %1389 : vector<4x32xf32>
    %1402 = arith.mulf %1398, %1397 : vector<4x32xf32>
    %1403 = arith.addf %1401, %1402 : vector<4x32xf32>
    %1404 = math.tanh %1403 : vector<4x32xf32>
    %1405 = arith.mulf %1400, %1404 : vector<4x32xf32>
    %1406 = vector.broadcast %1369 : vector<4x1xf32> to vector<4x32xf32>
    %1407 = arith.mulf %1406, %1405 : vector<4x32xf32>
    %1408 = vector.broadcast %1369 : vector<4x1xf32> to vector<4x32xf32>
    %1409 = arith.mulf %1408, %1403 : vector<4x32xf32>
    %1410 = vector.broadcast %1374 : vector<4x1xf32> to vector<4x32xf32>
    %1411 = arith.mulf %1410, %1389 : vector<4x32xf32>
    %1412 = arith.addf %1409, %1411 : vector<4x32xf32>
    %1413 = vector.extract_strided_slice %1364 {offsets = [0, 32], sizes = [4, 32], strides = [1, 1]} : vector<4x64xf32> to vector<4x32xf32>
    %1414 = vector.extract_strided_slice %1388 {offsets = [0, 0], sizes = [4, 96], strides = [1, 1]} : vector<4x128xf32> to vector<4x96xf32>
    %1415 = arith.negf %1414 : vector<4x96xf32>
    %1416 = math.exp %1415 : vector<4x96xf32>
    %cst_382 = arith.constant 1.000000e+00 : f32
    %1417 = vector.broadcast %cst_382 : f32 to vector<4x96xf32>
    %1418 = arith.addf %1417, %1416 : vector<4x96xf32>
    %1419 = arith.divf %1417, %1418 : vector<4x96xf32>
    %1420 = vector.extract_strided_slice %1388 {offsets = [0, 96], sizes = [4, 32], strides = [1, 1]} : vector<4x128xf32> to vector<4x32xf32>
    %1421 = math.tanh %1420 : vector<4x32xf32>
    %1422 = vector.extract_strided_slice %1419 {offsets = [0, 0], sizes = [4, 32], strides = [1, 1]} : vector<4x96xf32> to vector<4x32xf32>
    %1423 = vector.extract_strided_slice %1419 {offsets = [0, 32], sizes = [4, 32], strides = [1, 1]} : vector<4x96xf32> to vector<4x32xf32>
    %1424 = vector.extract_strided_slice %1419 {offsets = [0, 64], sizes = [4, 32], strides = [1, 1]} : vector<4x96xf32> to vector<4x32xf32>
    %1425 = arith.mulf %1423, %1413 : vector<4x32xf32>
    %1426 = arith.mulf %1422, %1421 : vector<4x32xf32>
    %1427 = arith.addf %1425, %1426 : vector<4x32xf32>
    %1428 = math.tanh %1427 : vector<4x32xf32>
    %1429 = arith.mulf %1424, %1428 : vector<4x32xf32>
    %1430 = vector.broadcast %1372 : vector<4x1xf32> to vector<4x32xf32>
    %1431 = arith.mulf %1430, %1429 : vector<4x32xf32>
    %1432 = vector.broadcast %1372 : vector<4x1xf32> to vector<4x32xf32>
    %1433 = arith.mulf %1432, %1427 : vector<4x32xf32>
    %1434 = vector.broadcast %1376 : vector<4x1xf32> to vector<4x32xf32>
    %1435 = arith.mulf %1434, %1413 : vector<4x32xf32>
    %1436 = arith.addf %1433, %1435 : vector<4x32xf32>
    %1437 = arith.truncf %1407 : vector<4x32xf32> to vector<4x32xbf16>
    %1438 = arith.index_cast %c14_i32 : i32 to index
    %c0_383 = arith.constant 0 : index
    %c0_384 = arith.constant 0 : index
    %1439 = vector.load %arg6[%1438, %c0_383, %c0_384] : memref<16x4x32xbf16, #tpu.memory_space<vmem>>, vector<1x4x32xbf16>
    %1440 = vector.shape_cast %1439 : vector<1x4x32xbf16> to vector<4x32xbf16>
    %1441 = vector.shape_cast %1437 : vector<4x32xbf16> to vector<1x4x32xbf16>
    tpu.vector_store %arg6[%1438, %c0_383, %c0_384], %1441 {strides = array<i32>} : memref<16x4x32xbf16, #tpu.memory_space<vmem>>, vector<1x4x32xbf16>,
    %1442 = arith.truncf %1431 : vector<4x32xf32> to vector<4x32xbf16>
    %1443 = arith.index_cast %1362 : i32 to index
    %c0_385 = arith.constant 0 : index
    %c0_386 = arith.constant 0 : index
    %1444 = vector.load %arg7[%1443, %c0_385, %c0_386] : memref<16x4x32xbf16, #tpu.memory_space<vmem>>, vector<1x4x32xbf16>
    %1445 = vector.shape_cast %1444 : vector<1x4x32xbf16> to vector<4x32xbf16>
    %1446 = vector.shape_cast %1442 : vector<4x32xbf16> to vector<1x4x32xbf16>
    tpu.vector_store %arg7[%1443, %c0_385, %c0_386], %1446 {strides = array<i32>} : memref<16x4x32xbf16, #tpu.memory_space<vmem>>, vector<1x4x32xbf16>,
    %1447 = vector.extract_strided_slice %1363 {offsets = [0, 0], sizes = [4, 32], strides = [1, 1]} : vector<4x64xf32> to vector<4x32xf32>
    %1448 = vector.broadcast %1374 : vector<4x1xf32> to vector<4x32xf32>
    %1449 = arith.mulf %1448, %1447 : vector<4x32xf32>
    %1450 = arith.addf %1407, %1449 : vector<4x32xf32>
    %1451 = vector.extract_strided_slice %1363 {offsets = [0, 32], sizes = [4, 32], strides = [1, 1]} : vector<4x64xf32> to vector<4x32xf32>
    %1452 = vector.broadcast %1376 : vector<4x1xf32> to vector<4x32xf32>
    %1453 = arith.mulf %1452, %1451 : vector<4x32xf32>
    %1454 = arith.addf %1431, %1453 : vector<4x32xf32>
    %1455 = tpu.concatenate %1450, %1454 in 1 : vector<4x32xf32>, vector<4x32xf32> -> vector<4x64xf32>
    %c0_387 = arith.constant 0 : index
    %c0_388 = arith.constant 0 : index
    %1456 = vector.load %arg8[%c0_387, %c0_388] : memref<4x64xf32, #tpu.memory_space<vmem>>, vector<4x64xf32>
    tpu.vector_store %arg8[%c0_387, %c0_388], %1455 {strides = array<i32>} : memref<4x64xf32, #tpu.memory_space<vmem>>, vector<4x64xf32>,
    %1457 = tpu.concatenate %1412, %1436 in 1 : vector<4x32xf32>, vector<4x32xf32> -> vector<4x64xf32>
    %c0_389 = arith.constant 0 : index
    %c0_390 = arith.constant 0 : index
    %1458 = vector.load %arg9[%c0_389, %c0_390] : memref<4x64xf32, #tpu.memory_space<vmem>>, vector<4x64xf32>
    tpu.vector_store %arg9[%c0_389, %c0_390], %1457 {strides = array<i32>} : memref<4x64xf32, #tpu.memory_space<vmem>>, vector<4x64xf32>,
    %c15_i32_391 = arith.constant 15 : i32
    %c15_i32_392 = arith.constant 15 : i32
    %1459 = arith.subi %c15_i32_392, %c15_i32_391 : i32
    %c0_393 = arith.constant 0 : index
    %c0_394 = arith.constant 0 : index
    %1460 = vector.load %arg8[%c0_393, %c0_394] : memref<4x64xf32, #tpu.memory_space<vmem>>, vector<4x64xf32>
    %c0_395 = arith.constant 0 : index
    %c0_396 = arith.constant 0 : index
    %1461 = vector.load %arg9[%c0_395, %c0_396] : memref<4x64xf32, #tpu.memory_space<vmem>>, vector<4x64xf32>
    %1462 = arith.truncf %1460 : vector<4x64xf32> to vector<4x64xbf16>
    %cst_397 = arith.constant dense<0.000000e+00> : vector<4x256xf32>
    %1463 = tpu.matmul %1462, %3, %cst_397 {dimension_numbers = #tpu.dot_dimension_numbers<[1], [0], [0], [1], [0, 0, 1, 1], [], []>} : vector<4x64xbf16>, vector<64x256xbf16>, vector<4x256xf32> -> vector<4x256xf32>
    %1464 = arith.index_cast %c15_i32_391 : i32 to index
    %c0_398 = arith.constant 0 : index
    %c0_399 = arith.constant 0 : index
    %1465 = vector.load %arg3[%1464, %c0_398, %c0_399] : memref<16x4x1xf32, #tpu.memory_space<vmem>>, vector<1x4x1xf32>
    %1466 = vector.shape_cast %1465 : vector<1x4x1xf32> to vector<4x1xf32>
    %1467 = arith.index_cast %1459 : i32 to index
    %c0_400 = arith.constant 0 : index
    %c0_401 = arith.constant 0 : index
    %1468 = vector.load %arg4[%1467, %c0_400, %c0_401] : memref<16x4x1xf32, #tpu.memory_space<vmem>>, vector<1x4x1xf32>
    %1469 = vector.shape_cast %1468 : vector<1x4x1xf32> to vector<4x1xf32>
    %cst_402 = arith.constant 1.000000e+00 : f32
    %1470 = vector.broadcast %cst_402 : f32 to vector<4x1xf32>
    %1471 = arith.subf %1470, %1466 : vector<4x1xf32>
    %cst_403 = arith.constant 1.000000e+00 : f32
    %1472 = vector.broadcast %cst_403 : f32 to vector<4x1xf32>
    %1473 = arith.subf %1472, %1469 : vector<4x1xf32>
    %1474 = arith.index_cast %c15_i32_391 : i32 to index
    %c0_404 = arith.constant 0 : index
    %c0_405 = arith.constant 0 : index
    %1475 = vector.load %arg1[%1474, %c0_404, %c0_405] : memref<16x4x128xbf16, #tpu.memory_space<vmem>>, vector<1x4x128xbf16>
    %1476 = vector.shape_cast %1475 : vector<1x4x128xbf16> to vector<4x128xbf16>
    %1477 = arith.extf %1476 : vector<4x128xbf16> to vector<4x128xf32>
    %1478 = vector.extract_strided_slice %1463 {offsets = [0, 0], sizes = [4, 128], strides = [1, 1]} : vector<4x256xf32> to vector<4x128xf32>
    %1479 = arith.addf %1477, %1478 : vector<4x128xf32>
    %1480 = arith.index_cast %1459 : i32 to index
    %c0_406 = arith.constant 0 : index
    %c0_407 = arith.constant 0 : index
    %1481 = vector.load %arg2[%1480, %c0_406, %c0_407] : memref<16x4x128xbf16, #tpu.memory_space<vmem>>, vector<1x4x128xbf16>
    %1482 = vector.shape_cast %1481 : vector<1x4x128xbf16> to vector<4x128xbf16>
    %1483 = arith.extf %1482 : vector<4x128xbf16> to vector<4x128xf32>
    %1484 = vector.extract_strided_slice %1463 {offsets = [0, 128], sizes = [4, 128], strides = [1, 1]} : vector<4x256xf32> to vector<4x128xf32>
    %1485 = arith.addf %1483, %1484 : vector<4x128xf32>
    %1486 = vector.extract_strided_slice %1461 {offsets = [0, 0], sizes = [4, 32], strides = [1, 1]} : vector<4x64xf32> to vector<4x32xf32>
    %1487 = vector.extract_strided_slice %1479 {offsets = [0, 0], sizes = [4, 96], strides = [1, 1]} : vector<4x128xf32> to vector<4x96xf32>
    %1488 = arith.negf %1487 : vector<4x96xf32>
    %1489 = math.exp %1488 : vector<4x96xf32>
    %cst_408 = arith.constant 1.000000e+00 : f32
    %1490 = vector.broadcast %cst_408 : f32 to vector<4x96xf32>
    %1491 = arith.addf %1490, %1489 : vector<4x96xf32>
    %1492 = arith.divf %1490, %1491 : vector<4x96xf32>
    %1493 = vector.extract_strided_slice %1479 {offsets = [0, 96], sizes = [4, 32], strides = [1, 1]} : vector<4x128xf32> to vector<4x32xf32>
    %1494 = math.tanh %1493 : vector<4x32xf32>
    %1495 = vector.extract_strided_slice %1492 {offsets = [0, 0], sizes = [4, 32], strides = [1, 1]} : vector<4x96xf32> to vector<4x32xf32>
    %1496 = vector.extract_strided_slice %1492 {offsets = [0, 32], sizes = [4, 32], strides = [1, 1]} : vector<4x96xf32> to vector<4x32xf32>
    %1497 = vector.extract_strided_slice %1492 {offsets = [0, 64], sizes = [4, 32], strides = [1, 1]} : vector<4x96xf32> to vector<4x32xf32>
    %1498 = arith.mulf %1496, %1486 : vector<4x32xf32>
    %1499 = arith.mulf %1495, %1494 : vector<4x32xf32>
    %1500 = arith.addf %1498, %1499 : vector<4x32xf32>
    %1501 = math.tanh %1500 : vector<4x32xf32>
    %1502 = arith.mulf %1497, %1501 : vector<4x32xf32>
    %1503 = vector.broadcast %1466 : vector<4x1xf32> to vector<4x32xf32>
    %1504 = arith.mulf %1503, %1502 : vector<4x32xf32>
    %1505 = vector.broadcast %1466 : vector<4x1xf32> to vector<4x32xf32>
    %1506 = arith.mulf %1505, %1500 : vector<4x32xf32>
    %1507 = vector.broadcast %1471 : vector<4x1xf32> to vector<4x32xf32>
    %1508 = arith.mulf %1507, %1486 : vector<4x32xf32>
    %1509 = arith.addf %1506, %1508 : vector<4x32xf32>
    %1510 = vector.extract_strided_slice %1461 {offsets = [0, 32], sizes = [4, 32], strides = [1, 1]} : vector<4x64xf32> to vector<4x32xf32>
    %1511 = vector.extract_strided_slice %1485 {offsets = [0, 0], sizes = [4, 96], strides = [1, 1]} : vector<4x128xf32> to vector<4x96xf32>
    %1512 = arith.negf %1511 : vector<4x96xf32>
    %1513 = math.exp %1512 : vector<4x96xf32>
    %cst_409 = arith.constant 1.000000e+00 : f32
    %1514 = vector.broadcast %cst_409 : f32 to vector<4x96xf32>
    %1515 = arith.addf %1514, %1513 : vector<4x96xf32>
    %1516 = arith.divf %1514, %1515 : vector<4x96xf32>
    %1517 = vector.extract_strided_slice %1485 {offsets = [0, 96], sizes = [4, 32], strides = [1, 1]} : vector<4x128xf32> to vector<4x32xf32>
    %1518 = math.tanh %1517 : vector<4x32xf32>
    %1519 = vector.extract_strided_slice %1516 {offsets = [0, 0], sizes = [4, 32], strides = [1, 1]} : vector<4x96xf32> to vector<4x32xf32>
    %1520 = vector.extract_strided_slice %1516 {offsets = [0, 32], sizes = [4, 32], strides = [1, 1]} : vector<4x96xf32> to vector<4x32xf32>
    %1521 = vector.extract_strided_slice %1516 {offsets = [0, 64], sizes = [4, 32], strides = [1, 1]} : vector<4x96xf32> to vector<4x32xf32>
    %1522 = arith.mulf %1520, %1510 : vector<4x32xf32>
    %1523 = arith.mulf %1519, %1518 : vector<4x32xf32>
    %1524 = arith.addf %1522, %1523 : vector<4x32xf32>
    %1525 = math.tanh %1524 : vector<4x32xf32>
    %1526 = arith.mulf %1521, %1525 : vector<4x32xf32>
    %1527 = vector.broadcast %1469 : vector<4x1xf32> to vector<4x32xf32>
    %1528 = arith.mulf %1527, %1526 : vector<4x32xf32>
    %1529 = vector.broadcast %1469 : vector<4x1xf32> to vector<4x32xf32>
    %1530 = arith.mulf %1529, %1524 : vector<4x32xf32>
    %1531 = vector.broadcast %1473 : vector<4x1xf32> to vector<4x32xf32>
    %1532 = arith.mulf %1531, %1510 : vector<4x32xf32>
    %1533 = arith.addf %1530, %1532 : vector<4x32xf32>
    %1534 = arith.truncf %1504 : vector<4x32xf32> to vector<4x32xbf16>
    %1535 = arith.index_cast %c15_i32_391 : i32 to index
    %c0_410 = arith.constant 0 : index
    %c0_411 = arith.constant 0 : index
    %1536 = vector.load %arg6[%1535, %c0_410, %c0_411] : memref<16x4x32xbf16, #tpu.memory_space<vmem>>, vector<1x4x32xbf16>
    %1537 = vector.shape_cast %1536 : vector<1x4x32xbf16> to vector<4x32xbf16>
    %1538 = vector.shape_cast %1534 : vector<4x32xbf16> to vector<1x4x32xbf16>
    tpu.vector_store %arg6[%1535, %c0_410, %c0_411], %1538 {strides = array<i32>} : memref<16x4x32xbf16, #tpu.memory_space<vmem>>, vector<1x4x32xbf16>,
    %1539 = arith.truncf %1528 : vector<4x32xf32> to vector<4x32xbf16>
    %1540 = arith.index_cast %1459 : i32 to index
    %c0_412 = arith.constant 0 : index
    %c0_413 = arith.constant 0 : index
    %1541 = vector.load %arg7[%1540, %c0_412, %c0_413] : memref<16x4x32xbf16, #tpu.memory_space<vmem>>, vector<1x4x32xbf16>
    %1542 = vector.shape_cast %1541 : vector<1x4x32xbf16> to vector<4x32xbf16>
    %1543 = vector.shape_cast %1539 : vector<4x32xbf16> to vector<1x4x32xbf16>
    tpu.vector_store %arg7[%1540, %c0_412, %c0_413], %1543 {strides = array<i32>} : memref<16x4x32xbf16, #tpu.memory_space<vmem>>, vector<1x4x32xbf16>,
    %1544 = vector.extract_strided_slice %1460 {offsets = [0, 0], sizes = [4, 32], strides = [1, 1]} : vector<4x64xf32> to vector<4x32xf32>
    %1545 = vector.broadcast %1471 : vector<4x1xf32> to vector<4x32xf32>
    %1546 = arith.mulf %1545, %1544 : vector<4x32xf32>
    %1547 = arith.addf %1504, %1546 : vector<4x32xf32>
    %1548 = vector.extract_strided_slice %1460 {offsets = [0, 32], sizes = [4, 32], strides = [1, 1]} : vector<4x64xf32> to vector<4x32xf32>
    %1549 = vector.broadcast %1473 : vector<4x1xf32> to vector<4x32xf32>
    %1550 = arith.mulf %1549, %1548 : vector<4x32xf32>
    %1551 = arith.addf %1528, %1550 : vector<4x32xf32>
    %1552 = tpu.concatenate %1547, %1551 in 1 : vector<4x32xf32>, vector<4x32xf32> -> vector<4x64xf32>
    %c0_414 = arith.constant 0 : index
    %c0_415 = arith.constant 0 : index
    %1553 = vector.load %arg8[%c0_414, %c0_415] : memref<4x64xf32, #tpu.memory_space<vmem>>, vector<4x64xf32>
    tpu.vector_store %arg8[%c0_414, %c0_415], %1552 {strides = array<i32>} : memref<4x64xf32, #tpu.memory_space<vmem>>, vector<4x64xf32>,
    %1554 = tpu.concatenate %1509, %1533 in 1 : vector<4x32xf32>, vector<4x32xf32> -> vector<4x64xf32>
    %c0_416 = arith.constant 0 : index
    %c0_417 = arith.constant 0 : index
    %1555 = vector.load %arg9[%c0_416, %c0_417] : memref<4x64xf32, #tpu.memory_space<vmem>>, vector<4x64xf32>
    tpu.vector_store %arg9[%c0_416, %c0_417], %1554 {strides = array<i32>} : memref<4x64xf32, #tpu.memory_space<vmem>>, vector<4x64xf32>,
    %c16_i32 = arith.constant 16 : i32
    return
  }
  func.func @transform_0(%arg0: i32) -> (i32, i32, i32) {
    %c0_i32 = arith.constant 0 : i32
    %c0_i32_0 = arith.constant 0 : i32
    %c0_i32_1 = arith.constant 0 : i32
    return %arg0, %c0_i32, %c0_i32_0 : i32, i32, i32
  }
  func.func @transform_1(%arg0: i32) -> (i32, i32, i32) {
    %c0_i32 = arith.constant 0 : i32
    %0 = arith.subi %c0_i32, %arg0 : i32
    %c0_i32_0 = arith.constant 0 : i32
    %c1_i32 = arith.constant 1 : i32
    %c0_i32_1 = arith.constant 0 : i32
    return %0, %c0_i32_0, %c1_i32 : i32, i32, i32
  }
  func.func @transform_2(%arg0: i32) -> (i32, i32, i32) {
    %c0_i32 = arith.constant 0 : i32
    %c0_i32_0 = arith.constant 0 : i32
    %c0_i32_1 = arith.constant 0 : i32
    return %arg0, %c0_i32, %c0_i32_0 : i32, i32, i32
  }
  func.func @transform_3(%arg0: i32) -> (i32, i32, i32) {
    %c0_i32 = arith.constant 0 : i32
    %0 = arith.subi %c0_i32, %arg0 : i32
    %c0_i32_0 = arith.constant 0 : i32
    %c0_i32_1 = arith.constant 0 : i32
    %c0_i32_2 = arith.constant 0 : i32
    return %0, %c0_i32_0, %c0_i32_1 : i32, i32, i32
  }
  func.func @transform_4(%arg0: i32) -> (i32, i32) {
    %c0_i32 = arith.constant 0 : i32
    %c0_i32_0 = arith.constant 0 : i32
    %c0_i32_1 = arith.constant 0 : i32
    return %c0_i32, %c0_i32_0 : i32, i32
  }
  func.func @transform_5(%arg0: i32) -> (i32, i32, i32) {
    %c0_i32 = arith.constant 0 : i32
    %c0_i32_0 = arith.constant 0 : i32
    %c0_i32_1 = arith.constant 0 : i32
    return %arg0, %c0_i32, %c0_i32_0 : i32, i32, i32
  }
  func.func @transform_6(%arg0: i32) -> (i32, i32, i32) {
    %c0_i32 = arith.constant 0 : i32
    %0 = arith.subi %c0_i32, %arg0 : i32
    %c0_i32_0 = arith.constant 0 : i32
    %c0_i32_1 = arith.constant 0 : i32
    %c0_i32_2 = arith.constant 0 : i32
    return %0, %c0_i32_0, %c0_i32_1 : i32, i32, i32
  }
}

module attributes {stable_mosaic.version = 11 : i64} {
  func.func @_attention_head_kernel(%arg0: i32, %arg1: memref<16x4x32xbf16, #tpu.memory_space<vmem>>, %arg2: memref<16x4x32xbf16, #tpu.memory_space<vmem>>, %arg3: memref<16x4x32xbf16, #tpu.memory_space<vmem>>, %arg4: memref<16x4x32xbf16, #tpu.memory_space<vmem>>, %arg5: memref<16x4x64xf32, #tpu.memory_space<vmem>>, %arg6: memref<16x4xf32, #tpu.memory_space<vmem>>, %arg7: memref<2x192xf32, #tpu.memory_space<vmem>>, %arg8: memref<1x1xf32, #tpu.memory_space<vmem>>, %arg9: memref<1x4xf32, #tpu.memory_space<vmem>>) attributes {dimension_semantics = [#tpu.dimension_semantics<arbitrary>], iteration_bounds = array<i64: 1>, scalar_prefetch = 0 : i64, scratch_operands = 0 : i64, tpu.core_type = #tpu.core_type<tc>, window_params = [{pipeline_mode = #tpu.pipeline_mode<synchronous>, transform_indices = @transform_0, window_bounds = array<i64: 16, 4, 32>}, {pipeline_mode = #tpu.pipeline_mode<synchronous>, transform_indices = @transform_1, window_bounds = array<i64: 16, 4, 32>}, {pipeline_mode = #tpu.pipeline_mode<synchronous>, transform_indices = @transform_2, window_bounds = array<i64: 16, 4, 32>}, {pipeline_mode = #tpu.pipeline_mode<synchronous>, transform_indices = @transform_3, window_bounds = array<i64: 16, 4, 32>}, {pipeline_mode = #tpu.pipeline_mode<synchronous>, transform_indices = @transform_4, window_bounds = array<i64: 16, 4, 64>}, {pipeline_mode = #tpu.pipeline_mode<synchronous>, transform_indices = @transform_5, window_bounds = array<i64: 16, 4>}, {pipeline_mode = #tpu.pipeline_mode<synchronous>, transform_indices = @transform_6, window_bounds = array<i64: 2, 192>}, {pipeline_mode = #tpu.pipeline_mode<synchronous>, transform_indices = @transform_7, window_bounds = array<i64: 1, 1>}, {pipeline_mode = #tpu.pipeline_mode<synchronous>, transform_indices = @transform_8, window_bounds = array<i64: 1, 4>}]} {
    %c0 = arith.constant 0 : index
    %c0_0 = arith.constant 0 : index
    %0 = vector.load %arg7[%c0, %c0_0] : memref<2x192xf32, #tpu.memory_space<vmem>>, vector<2x192xf32>
    %c0_1 = arith.constant 0 : index
    %c0_2 = arith.constant 0 : index
    %c0_3 = arith.constant 0 : index
    %1 = vector.load %arg1[%c0_1, %c0_2, %c0_3] : memref<16x4x32xbf16, #tpu.memory_space<vmem>>, vector<16x4x32xbf16>
    %2 = arith.extf %1 : vector<16x4x32xbf16> to vector<16x4x32xf32>
    %3 = vector.extract_strided_slice %0 {offsets = [0, 0], sizes = [1, 32], strides = [1, 1]} : vector<2x192xf32> to vector<1x32xf32>
    %4 = vector.shape_cast %3 : vector<1x32xf32> to vector<1x1x32xf32>
    %5 = vector.extract_strided_slice %0 {offsets = [1, 0], sizes = [1, 32], strides = [1, 1]} : vector<2x192xf32> to vector<1x32xf32>
    %6 = vector.shape_cast %5 : vector<1x32xf32> to vector<1x1x32xf32>
    %7 = vector.broadcast %4 : vector<1x1x32xf32> to vector<16x4x32xf32>
    %8 = arith.mulf %2, %7 : vector<16x4x32xf32>
    %cst = arith.constant dense<0.000000e+00> : vector<16x4xf32>
    %9 = vector.multi_reduction <add>, %8, %cst [2] : vector<16x4x32xf32> to vector<16x4xf32>
    %10 = vector.broadcast %6 : vector<1x1x32xf32> to vector<16x4x32xf32>
    %11 = arith.mulf %2, %10 : vector<16x4x32xf32>
    %cst_4 = arith.constant dense<0.000000e+00> : vector<16x4xf32>
    %12 = vector.multi_reduction <add>, %11, %cst_4 [2] : vector<16x4x32xf32> to vector<16x4xf32>
    %c0_5 = arith.constant 0 : index
    %c0_6 = arith.constant 0 : index
    %c0_7 = arith.constant 0 : index
    %13 = vector.load %arg2[%c0_5, %c0_6, %c0_7] : memref<16x4x32xbf16, #tpu.memory_space<vmem>>, vector<16x4x32xbf16>
    %14 = arith.extf %13 : vector<16x4x32xbf16> to vector<16x4x32xf32>
    %15 = vector.extract_strided_slice %0 {offsets = [0, 32], sizes = [1, 32], strides = [1, 1]} : vector<2x192xf32> to vector<1x32xf32>
    %16 = vector.shape_cast %15 : vector<1x32xf32> to vector<1x1x32xf32>
    %17 = vector.extract_strided_slice %0 {offsets = [1, 32], sizes = [1, 32], strides = [1, 1]} : vector<2x192xf32> to vector<1x32xf32>
    %18 = vector.shape_cast %17 : vector<1x32xf32> to vector<1x1x32xf32>
    %19 = vector.broadcast %16 : vector<1x1x32xf32> to vector<16x4x32xf32>
    %20 = arith.mulf %14, %19 : vector<16x4x32xf32>
    %cst_8 = arith.constant dense<0.000000e+00> : vector<16x4xf32>
    %21 = vector.multi_reduction <add>, %20, %cst_8 [2] : vector<16x4x32xf32> to vector<16x4xf32>
    %22 = vector.broadcast %18 : vector<1x1x32xf32> to vector<16x4x32xf32>
    %23 = arith.mulf %14, %22 : vector<16x4x32xf32>
    %cst_9 = arith.constant dense<0.000000e+00> : vector<16x4xf32>
    %24 = vector.multi_reduction <add>, %23, %cst_9 [2] : vector<16x4x32xf32> to vector<16x4xf32>
    %25 = arith.addf %9, %21 : vector<16x4xf32>
    %26 = arith.addf %12, %24 : vector<16x4xf32>
    %c0_10 = arith.constant 0 : index
    %c0_11 = arith.constant 0 : index
    %c0_12 = arith.constant 0 : index
    %27 = vector.load %arg3[%c0_10, %c0_11, %c0_12] : memref<16x4x32xbf16, #tpu.memory_space<vmem>>, vector<16x4x32xbf16>
    %28 = arith.extf %27 : vector<16x4x32xbf16> to vector<16x4x32xf32>
    %29 = vector.extract_strided_slice %0 {offsets = [0, 64], sizes = [1, 32], strides = [1, 1]} : vector<2x192xf32> to vector<1x32xf32>
    %30 = vector.shape_cast %29 : vector<1x32xf32> to vector<1x1x32xf32>
    %31 = vector.extract_strided_slice %0 {offsets = [1, 64], sizes = [1, 32], strides = [1, 1]} : vector<2x192xf32> to vector<1x32xf32>
    %32 = vector.shape_cast %31 : vector<1x32xf32> to vector<1x1x32xf32>
    %33 = vector.broadcast %30 : vector<1x1x32xf32> to vector<16x4x32xf32>
    %34 = arith.mulf %28, %33 : vector<16x4x32xf32>
    %cst_13 = arith.constant dense<0.000000e+00> : vector<16x4xf32>
    %35 = vector.multi_reduction <add>, %34, %cst_13 [2] : vector<16x4x32xf32> to vector<16x4xf32>
    %36 = vector.broadcast %32 : vector<1x1x32xf32> to vector<16x4x32xf32>
    %37 = arith.mulf %28, %36 : vector<16x4x32xf32>
    %cst_14 = arith.constant dense<0.000000e+00> : vector<16x4xf32>
    %38 = vector.multi_reduction <add>, %37, %cst_14 [2] : vector<16x4x32xf32> to vector<16x4xf32>
    %39 = arith.addf %25, %35 : vector<16x4xf32>
    %40 = arith.addf %26, %38 : vector<16x4xf32>
    %c0_15 = arith.constant 0 : index
    %c0_16 = arith.constant 0 : index
    %c0_17 = arith.constant 0 : index
    %41 = vector.load %arg4[%c0_15, %c0_16, %c0_17] : memref<16x4x32xbf16, #tpu.memory_space<vmem>>, vector<16x4x32xbf16>
    %42 = arith.extf %41 : vector<16x4x32xbf16> to vector<16x4x32xf32>
    %43 = vector.extract_strided_slice %0 {offsets = [0, 96], sizes = [1, 32], strides = [1, 1]} : vector<2x192xf32> to vector<1x32xf32>
    %44 = vector.shape_cast %43 : vector<1x32xf32> to vector<1x1x32xf32>
    %45 = vector.extract_strided_slice %0 {offsets = [1, 96], sizes = [1, 32], strides = [1, 1]} : vector<2x192xf32> to vector<1x32xf32>
    %46 = vector.shape_cast %45 : vector<1x32xf32> to vector<1x1x32xf32>
    %47 = vector.broadcast %44 : vector<1x1x32xf32> to vector<16x4x32xf32>
    %48 = arith.mulf %42, %47 : vector<16x4x32xf32>
    %cst_18 = arith.constant dense<0.000000e+00> : vector<16x4xf32>
    %49 = vector.multi_reduction <add>, %48, %cst_18 [2] : vector<16x4x32xf32> to vector<16x4xf32>
    %50 = vector.broadcast %46 : vector<1x1x32xf32> to vector<16x4x32xf32>
    %51 = arith.mulf %42, %50 : vector<16x4x32xf32>
    %cst_19 = arith.constant dense<0.000000e+00> : vector<16x4xf32>
    %52 = vector.multi_reduction <add>, %51, %cst_19 [2] : vector<16x4x32xf32> to vector<16x4xf32>
    %53 = arith.addf %39, %49 : vector<16x4xf32>
    %54 = arith.addf %40, %52 : vector<16x4xf32>
    %c0_20 = arith.constant 0 : index
    %c0_21 = arith.constant 0 : index
    %c0_22 = arith.constant 0 : index
    %55 = vector.load %arg5[%c0_20, %c0_21, %c0_22] : memref<16x4x64xf32, #tpu.memory_space<vmem>>, vector<16x4x64xf32>
    %56 = vector.extract_strided_slice %0 {offsets = [0, 128], sizes = [1, 64], strides = [1, 1]} : vector<2x192xf32> to vector<1x64xf32>
    %57 = vector.shape_cast %56 : vector<1x64xf32> to vector<1x1x64xf32>
    %58 = vector.extract_strided_slice %0 {offsets = [1, 128], sizes = [1, 64], strides = [1, 1]} : vector<2x192xf32> to vector<1x64xf32>
    %59 = vector.shape_cast %58 : vector<1x64xf32> to vector<1x1x64xf32>
    %60 = vector.broadcast %57 : vector<1x1x64xf32> to vector<16x4x64xf32>
    %61 = arith.mulf %55, %60 : vector<16x4x64xf32>
    %cst_23 = arith.constant dense<0.000000e+00> : vector<16x4xf32>
    %62 = vector.multi_reduction <add>, %61, %cst_23 [2] : vector<16x4x64xf32> to vector<16x4xf32>
    %63 = vector.broadcast %59 : vector<1x1x64xf32> to vector<16x4x64xf32>
    %64 = arith.mulf %55, %63 : vector<16x4x64xf32>
    %cst_24 = arith.constant dense<0.000000e+00> : vector<16x4xf32>
    %65 = vector.multi_reduction <add>, %64, %cst_24 [2] : vector<16x4x64xf32> to vector<16x4xf32>
    %66 = arith.addf %53, %62 : vector<16x4xf32>
    %67 = arith.addf %54, %65 : vector<16x4xf32>
    %c0_25 = arith.constant 0 : index
    %c0_26 = arith.constant 0 : index
    %68 = vector.load %arg6[%c0_25, %c0_26] : memref<16x4xf32, #tpu.memory_space<vmem>>, vector<16x4xf32>
    %cst_27 = arith.constant 0.000000e+00 : f32
    %69 = vector.broadcast %cst_27 : f32 to vector<16x4xf32>
    %70 = arith.cmpf ogt, %68, %69 : vector<16x4xf32>
    %cst_28 = arith.constant -1.000000e+30 : f32
    %71 = vector.broadcast %cst_28 : f32 to vector<16x4xf32>
    %72 = arith.select %70, %66, %71 : vector<16x4xi1>, vector<16x4xf32>
    %cst_29 = arith.constant dense<0xFF800000> : vector<4xf32>
    %73 = vector.multi_reduction <maximumf>, %72, %cst_29 [0] : vector<16x4xf32> to vector<4xf32>
    %74 = vector.shape_cast %73 : vector<4xf32> to vector<1x4xf32>
    %75 = vector.broadcast %74 : vector<1x4xf32> to vector<16x4xf32>
    %76 = arith.subf %72, %75 : vector<16x4xf32>
    %77 = math.exp %76 : vector<16x4xf32>
    %78 = arith.mulf %77, %68 : vector<16x4xf32>
    %cst_30 = arith.constant dense<0.000000e+00> : vector<4xf32>
    %79 = vector.multi_reduction <add>, %78, %cst_30 [0] : vector<16x4xf32> to vector<4xf32>
    %80 = vector.shape_cast %79 : vector<4xf32> to vector<1x4xf32>
    %cst_31 = arith.constant 9.99999968E-21 : f32
    %81 = vector.broadcast %cst_31 : f32 to vector<1x4xf32>
    %82 = arith.maximumf %80, %81 : vector<1x4xf32>
    %83 = vector.broadcast %82 : vector<1x4xf32> to vector<16x4xf32>
    %84 = arith.divf %78, %83 : vector<16x4xf32>
    %85 = arith.mulf %84, %67 : vector<16x4xf32>
    %cst_32 = arith.constant dense<0.000000e+00> : vector<4xf32>
    %86 = vector.multi_reduction <add>, %85, %cst_32 [0] : vector<16x4xf32> to vector<4xf32>
    %87 = vector.shape_cast %86 : vector<4xf32> to vector<1x4xf32>
    %c0_33 = arith.constant 0 : index
    %c0_34 = arith.constant 0 : index
    %88 = vector.load %arg8[%c0_33, %c0_34] : memref<1x1xf32, #tpu.memory_space<vmem>>, vector<1x1xf32>
    %89 = vector.broadcast %88 : vector<1x1xf32> to vector<1x4xf32>
    %90 = arith.addf %87, %89 : vector<1x4xf32>
    %91 = arith.negf %90 : vector<1x4xf32>
    %92 = math.exp %91 : vector<1x4xf32>
    %cst_35 = arith.constant 1.000000e+00 : f32
    %93 = vector.broadcast %cst_35 : f32 to vector<1x4xf32>
    %94 = arith.addf %93, %92 : vector<1x4xf32>
    %95 = arith.divf %93, %94 : vector<1x4xf32>
    %c0_36 = arith.constant 0 : index
    %c0_37 = arith.constant 0 : index
    %96 = vector.load %arg9[%c0_36, %c0_37] : memref<1x4xf32, #tpu.memory_space<vmem>>, vector<1x4xf32>
    tpu.vector_store %arg9[%c0_36, %c0_37], %95 {strides = array<i32>} : memref<1x4xf32, #tpu.memory_space<vmem>>, vector<1x4xf32>,
    return
  }
  func.func @transform_0(%arg0: i32) -> (i32, i32, i32) {
    %c0_i32 = arith.constant 0 : i32
    %c0_i32_0 = arith.constant 0 : i32
    %c0_i32_1 = arith.constant 0 : i32
    %c0_i32_2 = arith.constant 0 : i32
    return %c0_i32, %c0_i32_0, %c0_i32_1 : i32, i32, i32
  }
  func.func @transform_1(%arg0: i32) -> (i32, i32, i32) {
    %c0_i32 = arith.constant 0 : i32
    %c0_i32_0 = arith.constant 0 : i32
    %c0_i32_1 = arith.constant 0 : i32
    %c0_i32_2 = arith.constant 0 : i32
    return %c0_i32, %c0_i32_0, %c0_i32_1 : i32, i32, i32
  }
  func.func @transform_2(%arg0: i32) -> (i32, i32, i32) {
    %c0_i32 = arith.constant 0 : i32
    %c0_i32_0 = arith.constant 0 : i32
    %c0_i32_1 = arith.constant 0 : i32
    %c0_i32_2 = arith.constant 0 : i32
    return %c0_i32, %c0_i32_0, %c0_i32_1 : i32, i32, i32
  }
  func.func @transform_3(%arg0: i32) -> (i32, i32, i32) {
    %c0_i32 = arith.constant 0 : i32
    %c0_i32_0 = arith.constant 0 : i32
    %c0_i32_1 = arith.constant 0 : i32
    %c0_i32_2 = arith.constant 0 : i32
    return %c0_i32, %c0_i32_0, %c0_i32_1 : i32, i32, i32
  }
  func.func @transform_4(%arg0: i32) -> (i32, i32, i32) {
    %c0_i32 = arith.constant 0 : i32
    %c0_i32_0 = arith.constant 0 : i32
    %c0_i32_1 = arith.constant 0 : i32
    %c0_i32_2 = arith.constant 0 : i32
    return %c0_i32, %c0_i32_0, %c0_i32_1 : i32, i32, i32
  }
  func.func @transform_5(%arg0: i32) -> (i32, i32) {
    %c0_i32 = arith.constant 0 : i32
    %c0_i32_0 = arith.constant 0 : i32
    %c0_i32_1 = arith.constant 0 : i32
    return %c0_i32, %c0_i32_0 : i32, i32
  }
  func.func @transform_6(%arg0: i32) -> (i32, i32) {
    %c0_i32 = arith.constant 0 : i32
    %c0_i32_0 = arith.constant 0 : i32
    %c0_i32_1 = arith.constant 0 : i32
    return %c0_i32, %c0_i32_0 : i32, i32
  }
  func.func @transform_7(%arg0: i32) -> (i32, i32) {
    %c0_i32 = arith.constant 0 : i32
    %c0_i32_0 = arith.constant 0 : i32
    %c0_i32_1 = arith.constant 0 : i32
    return %c0_i32, %c0_i32_0 : i32, i32
  }
  func.func @transform_8(%arg0: i32) -> (i32, i32) {
    %c0_i32 = arith.constant 0 : i32
    %c0_i32_0 = arith.constant 0 : i32
    %c0_i32_1 = arith.constant 0 : i32
    return %c0_i32, %c0_i32_0 : i32, i32
  }
}

</mosaic_0001>

<bundles_post_ra>
// kernel: _lambda_.5
= control target key start
LH: loop header
LB: loop body
LE: loop exit
PB: predicated region body
PF: predicated region fallthrough
CT: control target
= control target key end

     0   :  { %v306_v1 = vmov 0   ;;  %vm103_vm0 = vcmask 523264   ;;  %v33_v13 = vlaneseq  ;;  %s390_s1 = inlined_call_operand.vmem [shape: bf16[64,256], index: 1, kind: input, shape index: {}]   ;;  %s391_s0 = inlined_call_operand.vmem [shape: bf16[64,64], index: 0, kind: input, shape index: {}]   ;;  %s392_s2 = inlined_call_operand.vmem [shape: f32[1,256], index: 2, kind: input, shape index: {}]   ;;  %s393_s3 = inlined_call_operand.vmem [shape: bf16[64,256], index: 3, kind: output, shape index: {}]  }
   0x1   :  { %v290_v0 = vld [vmem:[%s390_s1 + $0x34] ss:$8 sps:$4 sm:$0xff]   ;;  %148 = vmatprep.mubr.bf16.mxu0 %v306_v1  ;;  %168 = vmatprep.mubr.bf16.mxu1 %v306_v1  ;;  %v292_v2 = vld [vmem:[%s390_s1 + $0x30] ss:$8 sps:$4 sm:$0xff]   ;;  %v293_v3 = vld [vmem:[%s390_s1 + $0x24] ss:$8 sps:$4 sm:$0xff]  }
   0x2   :  { %124 = vmatprep.subr.bf16.mxu0 %v290_v0  ;;  %281 = vmatprep.subr.bf16.mxu1 %v290_v0  ;;  %v295_v4 = vld [vmem:[%s390_s1 + $0x20] ss:$8 sps:$4 sm:$0xff]   ;;  %v296_v5 = vld [vmem:[%s390_s1 + $0x14] ss:$8 sps:$4 sm:$0xff]   ;;  %v298_v6 = vld [vmem:[%s390_s1 + $0x10] ss:$8 sps:$4 sm:$0xff]  }
   0x3   :  { %125 = vmatpush1.bf16.msra.mxu0 %v292_v2  ;;  %285 = vmatpush1.bf16.msra.mxu1 %v292_v2  ;;  %v299_v7 = vld [vmem:[%s390_s1 + $0x4] ss:$8 sps:$4 sm:$0xff]   ;;  %v301_v8 = vld [vmem:[%s390_s1] ss:$8 sps:$4 sm:$0xff]   ;;  %v303_v10 = vld [vmem:[%s391_s0 + $0x10] sm:$0xff]   ;;  %v34_v14 = vshrl.u32 %v33_v13, 7 }
   0x4   :  { %126 = vmatprep.subr.bf16.mxu0 %v293_v3  ;;  %282 = vmatprep.subr.bf16.mxu1 %v293_v3  ;;  %v302_v9 = vld [vmem:[%s391_s0] sm:$0xff]   ;;  %v304_v11 = vld [vmem:[%s391_s0 + $0x8] sm:$0xff]   ;;  %v305_v12 = vld [vmem:[%s391_s0 + $0x18] sm:$0xff]  }
   0x5   :  { %v35_v15 = vsub.s32 0, %v34_v14  ;;  %v39_v16 = vsub.s32 1, %v34_v14  ;;  %v31_v17 = vld [vmem:[%s392_s2] sm:$0x3] }
   0x7   :  { %127 = vmatpush1.bf16.msra.mxu0 %v295_v4  ;;  %286 = vmatpush1.bf16.msra.mxu1 %v295_v4  ;;  %v36_v18 = vrot.slane %v31_v17, %v35_v15  ;;  %v40_v19 = vrot.slane %v31_v17, %v39_v16 }
   0x8   :  { %128 = vmatprep.subr.bf16.mxu0 %v296_v5  ;;  %283 = vmatprep.subr.bf16.mxu1 %v296_v5 }
   0xb   :  { %129 = vmatpush1.bf16.msra.mxu0 %v298_v6  ;;  %287 = vmatpush1.bf16.msra.mxu1 %v298_v6 }
   0xc   :  { %130 = vmatprep.subr.bf16.mxu0 %v299_v7  ;;  %284 = vmatprep.subr.bf16.mxu1 %v299_v7 }
   0xf   :  { %131 = vmatpush1.bf16.msra.mxu0 %v301_v8  ;;  %288 = vmatpush1.bf16.msra.mxu1 %v301_v8 }
  0x12   :  { %261 = vmatmul.mubr.msk.bf16.vlgmr.msra.gmra.mxu0 %vm103_vm0, %v302_v9  ;;  %263 = vmatmul.mubr.msk.bf16.vlgmr.msra.gmra.mxu1 %vm103_vm0, %v303_v10 }
  0x13   :  { %158 = vmatprep.mubr.bf16.mxu0 %v306_v1  ;;  %178 = vmatprep.mubr.bf16.mxu1 %v306_v1 }
  0x1a   :  { %262 = vmatmul.mubr.msk.bf16.gmra.mxu0 %vm103_vm0, %v304_v11  ;;  %264 = vmatmul.mubr.msk.bf16.gmra.mxu1 %vm103_vm0, %v305_v12 }
  0xd2   :  { %v150_v20 = vpop.f32.mrf.mxu0  ;;  %v170_v21 = vpop.f32.mrf.mxu1 }
  0xd3   :  { %v151_v24 = vadd.f32 %v150_v20, %v36_v18  ;;  %v171_v25 = vadd.f32 %v170_v21, %v36_v18 }
  0xd4   :  { %v152_v22 = vpop.f32.mrf.mxu0  ;;  %v172_v23 = vpop.f32.mrf.mxu1 }
  0xd5   :  { %v153_v26 = vadd.f32 %v152_v22, %v40_v19  ;;  %v173_v27 = vadd.f32 %v172_v23, %v40_v19 }
  0xd6   :  { %v154_v28 = vpop.f32.mrf.mxu0  ;;  %v174_v29 = vpop.f32.mrf.mxu1 }
  0xd7   :  { %v273_v30 = vpack.c.bf16 %v153_v26, %v151_v24  ;;  %v277_v31 = vpack.c.bf16 %v173_v27, %v171_v25  ;;  %v155_v34 = vadd.f32 %v154_v28, %v36_v18  ;;  %v175_v35 = vadd.f32 %v174_v29, %v36_v18 }
  0xd8   :  { %v156_v32 = vpop.f32.mrf.mxu0  ;;  %v176_v33 = vpop.f32.mrf.mxu1 }
  0xd9   :  { %237 = vst [vmem:[%s393_s3] sm:$0xff] %v273_v30  ;;  %241 = vst [vmem:[%s393_s3 + $0x20] sm:$0xff] %v277_v31  ;;  %v157_v36 = vadd.f32 %v156_v32, %v40_v19  ;;  %v177_v37 = vadd.f32 %v176_v33, %v40_v19 }
  0xda   :  { %v160_v38 = vpop.f32.mrf.mxu0  ;;  %v180_v39 = vpop.f32.mrf.mxu1 }
  0xdb   :  { %v274_v40 = vpack.c.bf16 %v157_v36, %v155_v34  ;;  %v278_v41 = vpack.c.bf16 %v177_v37, %v175_v35  ;;  %v161_v44 = vadd.f32 %v160_v38, %v36_v18  ;;  %v181_v45 = vadd.f32 %v180_v39, %v36_v18 }
  0xdc   :  { %v162_v42 = vpop.f32.mrf.mxu0  ;;  %v182_v43 = vpop.f32.mrf.mxu1 }
  0xdd   :  { %238 = vst [vmem:[%s393_s3 + $0x8] sm:$0xff] %v274_v40  ;;  %242 = vst [vmem:[%s393_s3 + $0x28] sm:$0xff] %v278_v41  ;;  %v163_v46 = vadd.f32 %v162_v42, %v40_v19  ;;  %v183_v47 = vadd.f32 %v182_v43, %v40_v19 }
  0xde   :  { %v164_v48 = vpop.f32.mrf.mxu0  ;;  %v184_v49 = vpop.f32.mrf.mxu1 }
  0xdf   :  { %v275_v50 = vpack.c.bf16 %v163_v46, %v161_v44  ;;  %v279_v51 = vpack.c.bf16 %v183_v47, %v181_v45  ;;  %v165_v54 = vadd.f32 %v164_v48, %v36_v18  ;;  %v185_v55 = vadd.f32 %v184_v49, %v36_v18 }
  0xe0   :  { %v166_v52 = vpop.f32.mrf.mxu0  ;;  %v186_v53 = vpop.f32.mrf.mxu1 }
  0xe1   :  { %239 = vst [vmem:[%s393_s3 + $0x10] sm:$0xff] %v275_v50  ;;  %243 = vst [vmem:[%s393_s3 + $0x30] sm:$0xff] %v279_v51  ;;  %v167_v56 = vadd.f32 %v166_v52, %v40_v19  ;;  %v187_v57 = vadd.f32 %v186_v53, %v40_v19 }
  0xe3   :  { %v276_v58 = vpack.c.bf16 %v167_v56, %v165_v54  ;;  %v280_v59 = vpack.c.bf16 %v187_v57, %v185_v55 }
  0xe5   :  { %240 = vst [vmem:[%s393_s3 + $0x18] sm:$0xff] %v276_v58  ;;  %244 = vst [vmem:[%s393_s3 + $0x38] sm:$0xff] %v280_v59 }

// kernel: _lambda_.7
= control target key start
LH: loop header
LB: loop body
LE: loop exit
PB: predicated region body
PF: predicated region fallthrough
CT: control target
= control target key end

     0   :  { %v445_v1 = vmov 0   ;;  %vm85_vm0 = vcmask 261120   ;;  %v298_v17 = vlaneseq  ;;  %s579_s3 = inlined_call_operand.vmem [shape: bf16[32,256], index: 3, kind: input, shape index: {}]   ;;  %s580_s1 = inlined_call_operand.vmem [shape: bf16[32,256], index: 1, kind: input, shape index: {}]   ;;  %s581_s2 = inlined_call_operand.vmem [shape: bf16[64,32], index: 2, kind: input, shape index: {}]   ;;  %s582_s0 = inlined_call_operand.vmem [shape: bf16[64,32], index: 0, kind: input, shape index: {}]   ;;  %s583_s4 = inlined_call_operand.vmem [shape: f32[1,256], index: 4, kind: input, shape index: {}]   ;;  %s584_s5 = inlined_call_operand.vmem [shape: bf16[64,256], index: 5, kind: output, shape index: {}]  }
   0x1   :  { %v425_v0 = vld [vmem:[%s579_s3 + $0x14] ss:$8 sps:$4 sm:$0xff]   ;;  %130 = vmatprep.mubr.bf16.mxu0 %v445_v1  ;;  %255 = vmatprep.mubr.bf16.mxu1 %v445_v1  ;;  %v429_v3 = vld [vmem:[%s579_s3 + $0x10] ss:$8 sps:$4 sm:$0xff]   ;;  %v431_v5 = vld [vmem:[%s579_s3 + $0x4] ss:$8 sps:$4 sm:$0xff]  }
   0x2   :  { %v427_v2 = vld [vmem:[%s580_s1 + $0x14] ss:$8 sps:$4 sm:$0xff]   ;;  %110 = vmatprep.subr.bf16.mxu0 %v425_v0  ;;  %v430_v4 = vld [vmem:[%s580_s1 + $0x10] ss:$8 sps:$4 sm:$0xff]   ;;  %v433_v6 = vld [vmem:[%s580_s1 + $0x4] ss:$8 sps:$4 sm:$0xff]  }
   0x3   :  { %235 = vmatprep.subr.bf16.mxu1 %v427_v2  ;;  %111 = vmatpush1.bf16.msra.mxu0 %v429_v3  ;;  %v435_v7 = vld [vmem:[%s579_s3] ss:$8 sps:$4 sm:$0xff]   ;;  %v441_v13 = vld [vmem:[%s581_s2 + $0x10] sm:$0xff]   ;;  %v443_v15 = vld [vmem:[%s581_s2 + $0x18] sm:$0xff]   ;;  %v299_v18 = vshrl.u32 %v298_v17, 7 }
   0x4   :  { %236 = vmatpush1.bf16.msra.mxu1 %v430_v4  ;;  %112 = vmatprep.subr.bf16.mxu0 %v431_v5  ;;  %v436_v8 = vld [vmem:[%s580_s1] ss:$8 sps:$4 sm:$0xff]   ;;  %v442_v14 = vld [vmem:[%s582_s0 + $0x10] sm:$0xff]   ;;  %v444_v16 = vld [vmem:[%s582_s0 + $0x18] sm:$0xff]  }
   0x5   :  { %237 = vmatprep.subr.bf16.mxu1 %v433_v6  ;;  %v437_v9 = vld [vmem:[%s581_s2] sm:$0xff]   ;;  %v439_v11 = vld [vmem:[%s581_s2 + $0x8] sm:$0xff]   ;;  %v300_v19 = vsub.s32 0, %v299_v18  ;;  %v304_v20 = vsub.s32 1, %v299_v18 }
   0x6   :  { %v438_v10 = vld [vmem:[%s582_s0] sm:$0xff]   ;;  %v440_v12 = vld [vmem:[%s582_s0 + $0x8] sm:$0xff]  }
   0x7   :  { %113 = vmatpush1.bf16.msra.mxu0 %v435_v7  ;;  %v296_v21 = vld [vmem:[%s583_s4] sm:$0x3] }
   0x8   :  { %238 = vmatpush1.bf16.msra.mxu1 %v436_v8  ;;  %v535_v25 = vrot.slane %v296_v21, %v300_v19  ;;  %v537_v26 = vrot.slane %v296_v21, %v304_v20 }
   0xa   :  { %392 = vmatmul.mubr.msk.bf16.vlgmr.msra.gmra.mxu0 %vm85_vm0, %v437_v9 }
   0xb   :  { %404 = vmatmul.mubr.msk.bf16.vlgmr.msra.gmra.mxu1 %vm85_vm0, %v438_v10  ;;  %140 = vmatprep.mubr.bf16.mxu0 %v445_v1 }
   0xc   :  { %265 = vmatprep.mubr.bf16.mxu1 %v445_v1 }
  0x12   :  { %393 = vmatmul.mubr.msk.bf16.gmra.mxu0 %vm85_vm0, %v439_v11 }
  0x13   :  { %405 = vmatmul.mubr.msk.bf16.gmra.mxu1 %vm85_vm0, %v440_v12  ;;  %150 = vmatprep.mubr.bf16.mxu0 %v445_v1 }
  0x14   :  { %275 = vmatprep.mubr.bf16.mxu1 %v445_v1 }
  0x1a   :  { %394 = vmatmul.mubr.msk.bf16.gmra.mxu0 %vm85_vm0, %v441_v13 }
  0x1b   :  { %406 = vmatmul.mubr.msk.bf16.gmra.mxu1 %vm85_vm0, %v442_v14  ;;  %160 = vmatprep.mubr.bf16.mxu0 %v445_v1 }
  0x1c   :  { %285 = vmatprep.mubr.bf16.mxu1 %v445_v1 }
  0x22   :  { %395 = vmatmul.mubr.msk.bf16.gmra.mxu0 %vm85_vm0, %v443_v15 }
  0x23   :  { %407 = vmatmul.mubr.msk.bf16.gmra.mxu1 %vm85_vm0, %v444_v16 }
  0xca   :  { %v132_v22 = vpop.f32.mrf.mxu0 }
  0xcb   :  { %v257_v23 = vpop.f32.mrf.mxu1 }
  0xcc   :  { %v258_v24 = vadd.f32 %v257_v23, %v132_v22  ;;  %v134_v27 = vpop.f32.mrf.mxu0 }
  0xcd   :  { %v259_v28 = vpop.f32.mrf.mxu1 }
  0xce   :  { %v260_v29 = vadd.f32 %v259_v28, %v134_v27  ;;  %v136_v30 = vpop.f32.mrf.mxu0  ;;  %v308_v32 = vadd.f32 %v535_v25, %v258_v24 }
  0xcf   :  { %v261_v31 = vpop.f32.mrf.mxu1 }
  0xd0   :  { %v309_v33 = vadd.f32 %v537_v26, %v260_v29  ;;  %v262_v34 = vadd.f32 %v261_v31, %v136_v30  ;;  %v138_v35 = vpop.f32.mrf.mxu0 }
  0xd1   :  { %v263_v36 = vpop.f32.mrf.mxu1 }
  0xd2   :  { %v416_v37 = vpack.c.bf16 %v309_v33, %v308_v32  ;;  %v264_v38 = vadd.f32 %v263_v36, %v138_v35  ;;  %v142_v39 = vpop.f32.mrf.mxu0  ;;  %v310_v41 = vadd.f32 %v535_v25, %v262_v34 }
  0xd3   :  { %v267_v40 = vpop.f32.mrf.mxu1 }
  0xd4   :  { %372 = vst [vmem:[%s584_s5] sm:$0xff] %v416_v37  ;;  %v311_v42 = vadd.f32 %v537_v26, %v264_v38  ;;  %v268_v43 = vadd.f32 %v267_v40, %v142_v39  ;;  %v144_v44 = vpop.f32.mrf.mxu0 }
  0xd5   :  { %v269_v45 = vpop.f32.mrf.mxu1 }
  0xd6   :  { %v417_v46 = vpack.c.bf16 %v311_v42, %v310_v41  ;;  %v270_v47 = vadd.f32 %v269_v45, %v144_v44  ;;  %v146_v48 = vpop.f32.mrf.mxu0  ;;  %v312_v50 = vadd.f32 %v535_v25, %v268_v43 }
  0xd7   :  { %v271_v49 = vpop.f32.mrf.mxu1 }
  0xd8   :  { %373 = vst [vmem:[%s584_s5 + $0x8] sm:$0xff] %v417_v46  ;;  %v313_v51 = vadd.f32 %v537_v26, %v270_v47  ;;  %v272_v52 = vadd.f32 %v271_v49, %v146_v48  ;;  %v148_v53 = vpop.f32.mrf.mxu0 }
  0xd9   :  { %v273_v54 = vpop.f32.mrf.mxu1 }
  0xda   :  { %v418_v55 = vpack.c.bf16 %v313_v51, %v312_v50  ;;  %v274_v56 = vadd.f32 %v273_v54, %v148_v53  ;;  %v152_v57 = vpop.f32.mrf.mxu0  ;;  %v314_v59 = vadd.f32 %v535_v25, %v272_v52 }
  0xdb   :  { %v277_v58 = vpop.f32.mrf.mxu1 }
  0xdc   :  { %374 = vst [vmem:[%s584_s5 + $0x10] sm:$0xff] %v418_v55  ;;  %v315_v60 = vadd.f32 %v537_v26, %v274_v56  ;;  %v278_v61 = vadd.f32 %v277_v58, %v152_v57  ;;  %v154_v62 = vpop.f32.mrf.mxu0 }
  0xdd   :  { %v279_v63 = vpop.f32.mrf.mxu1 }
  0xde   :  { %v419_v0 = vpack.c.bf16 %v315_v60, %v314_v59  ;;  %v280_v1 = vadd.f32 %v279_v63, %v154_v62  ;;  %v156_v2 = vpop.f32.mrf.mxu0  ;;  %v316_v4 = vadd.f32 %v535_v25, %v278_v61 }
  0xdf   :  { %v281_v3 = vpop.f32.mrf.mxu1 }
  0xe0   :  { %375 = vst [vmem:[%s584_s5 + $0x18] sm:$0xff] %v419_v0  ;;  %v317_v5 = vadd.f32 %v537_v26, %v280_v1  ;;  %v282_v6 = vadd.f32 %v281_v3, %v156_v2  ;;  %v158_v7 = vpop.f32.mrf.mxu0 }
  0xe1   :  { %v283_v8 = vpop.f32.mrf.mxu1 }
  0xe2   :  { %v420_v9 = vpack.c.bf16 %v317_v5, %v316_v4  ;;  %v284_v10 = vadd.f32 %v283_v8, %v158_v7  ;;  %v162_v11 = vpop.f32.mrf.mxu0  ;;  %v318_v13 = vadd.f32 %v535_v25, %v282_v6 }
  0xe3   :  { %v287_v12 = vpop.f32.mrf.mxu1 }
  0xe4   :  { %376 = vst [vmem:[%s584_s5 + $0x20] sm:$0xff] %v420_v9  ;;  %v319_v14 = vadd.f32 %v537_v26, %v284_v10  ;;  %v288_v15 = vadd.f32 %v287_v12, %v162_v11  ;;  %v164_v16 = vpop.f32.mrf.mxu0 }
  0xe5   :  { %v289_v17 = vpop.f32.mrf.mxu1 }
  0xe6   :  { %v421_v18 = vpack.c.bf16 %v319_v14, %v318_v13  ;;  %v290_v19 = vadd.f32 %v289_v17, %v164_v16  ;;  %v166_v20 = vpop.f32.mrf.mxu0  ;;  %v320_v22 = vadd.f32 %v535_v25, %v288_v15 }
  0xe7   :  { %v291_v21 = vpop.f32.mrf.mxu1 }
  0xe8   :  { %377 = vst [vmem:[%s584_s5 + $0x28] sm:$0xff] %v421_v18  ;;  %v321_v23 = vadd.f32 %v537_v26, %v290_v19  ;;  %v292_v24 = vadd.f32 %v291_v21, %v166_v20  ;;  %v168_v27 = vpop.f32.mrf.mxu0 }
  0xe9   :  { %v293_v28 = vpop.f32.mrf.mxu1 }
  0xea   :  { %v422_v29 = vpack.c.bf16 %v321_v23, %v320_v22  ;;  %v294_v30 = vadd.f32 %v293_v28, %v168_v27  ;;  %v322_v31 = vadd.f32 %v535_v25, %v292_v24 }
  0xec   :  { %378 = vst [vmem:[%s584_s5 + $0x30] sm:$0xff] %v422_v29  ;;  %v323_v32 = vadd.f32 %v537_v26, %v294_v30 }
  0xee   :  { %v423_v33 = vpack.c.bf16 %v323_v32, %v322_v31 }
  0xf0   :  { %379 = vst [vmem:[%s584_s5 + $0x38] sm:$0xff] %v423_v33 }

// kernel: _lambda_.9
= control target key start
LH: loop header
LB: loop body
LE: loop exit
PB: predicated region body
PF: predicated region fallthrough
CT: control target
= control target key end

     0   :  { %s2789_s0 = inlined_call_operand.vmem [shape: bf16[16,4,32], index: 0, kind: input, shape index: {}]   ;;  %s2790_s1 = inlined_call_operand.vmem [shape: bf16[16,4,32], index: 1, kind: input, shape index: {}]   ;;  %s2791_s2 = inlined_call_operand.vmem [shape: bf16[16,4,32], index: 2, kind: input, shape index: {}]   ;;  %s2792_s3 = inlined_call_operand.vmem [shape: bf16[16,4,32], index: 3, kind: input, shape index: {}]   ;;  %s2793_s4 = inlined_call_operand.vmem [shape: f32[16,4,64], index: 4, kind: input, shape index: {}]   ;;  %s2794_s5 = inlined_call_operand.vmem [shape: f32[16,4], index: 5, kind: input, shape index: {}]   ;;  %s2795_s6 = inlined_call_operand.vmem [shape: f32[2,192], index: 6, kind: input, shape index: {}]   ;;  %s2796_s7 = inlined_call_operand.<no memory space> [shape: f32[1,1], index: 7, kind: input, shape index: {}]   ;;  %s2797_s8 = inlined_call_operand.hbm [shape: f32[1,4], index: 8, kind: output, shape index: {}]  }
   0x1   :  { %v13_v0 = vstv %s2796_s7 }
   0x2   :  { %14 = vst [vmem:[#allocation2] sm:$0x1] %v13_v0 }
   0x3   :  { %v65_v1 = vlaneseq  ;;  %v1363_v2 = vld [vmem:[%s2789_s0] sm:$0x3]  ;;  %v1368_v3 = vld [vmem:[%s2789_s0 + $0x2] sm:$0x3] }
   0x4   :  { %v1375_v6 = vld [vmem:[%s2795_s6] sm:$0xf]  ;;  %v49_v7 = vunpack.c.l.bf16 %v1363_v2  ;;  %v50_v10 = vunpack.c.l.bf16 %v1368_v3 }
   0x5   :  { %v1370_v4 = vshrl.u32 %v65_v1, 7  ;;  %v1007_v5 = vand.u32 127, %v65_v1  ;;  %2881 = vst [vmem:[#allocation7_spill] sm:$0xff] %v1375_v6 }
   0x7   :  { %2880 = vst [vmem:[#allocation6_spill] sm:$0xff] %v1370_v4  ;;  %v1379_v8 = vsub.s32 0, %v1370_v4  ;;  %v1382_v9 = vsub.s32 %v1007_v5, %v1370_v4 }
   0x9   :  { %2882 = vst [vmem:[#allocation8_spill] sm:$0xff] %v1379_v8 }
   0xa   :  { %15 = vsyncpa [#allocation4], 0  ;;  %v1388_v11 = vld [vmem:[%s2789_s0 + $0x8] sm:$0x3]  ;;  %v1392_v12 = vrot.slane %v1375_v6, %v1379_v8  ;;  %vm85_vm0 = vcmask 257024   ;;  %v2798_v47 = vsub.s32 1, %v1370_v4 }
   0xb   :  { %v53_v15 = vunpack.c.l.bf16 %v1388_v11  ;;  %v1404_v16 = vld [vmem:[%s2789_s0 + $0xc] sm:$0x3]  ;;  %v1415_v21 = vld [vmem:[%s2789_s0 + $0x10] sm:$0x3]  ;;  %v35_v22 = vld [vmem:[%s2789_s0 + $0x4] sm:$0x3] }
   0xc   :  { %v69_v13 = vmul.f32 %v1392_v12, %v49_v7  ;;  %v70_v14 = vmul.f32 %v1392_v12, %v50_v10  ;;  %v55_v20 = vunpack.c.l.bf16 %v1404_v16  ;;  %v57_v25 = vunpack.c.l.bf16 %v1415_v21  ;;  %v1428_v26 = vld [vmem:[%s2789_s0 + $0x14] sm:$0x3]  ;;  %v1439_v32 = vld [vmem:[%s2789_s0 + $0x18] sm:$0x3]  ;;  %v1445_v34 = vld [vmem:[%s2789_s0 + $0x6] sm:$0x3] }
   0xd   :  { %v73_v19 = vmul.f32 %v1392_v12, %v53_v15  ;;  %v51_v27 = vunpack.c.l.bf16 %v35_v22  ;;  %v59_v30 = vunpack.c.l.bf16 %v1428_v26  ;;  %v52_v35 = vunpack.c.l.bf16 %v1445_v34  ;;  %v1456_v39 = vld [vmem:[%s2789_s0 + $0x1c] sm:$0x3]  ;;  %v1464_v41 = vld [vmem:[%s2789_s0 + $0xa] sm:$0x3]  ;;  %v1480_v49 = vld [vmem:[%s2789_s0 + $0xe] sm:$0x3] }
   0xe   :  { %v86_v17 = vsel %vm85_vm0, %v69_v13, 0.0  ;;  %v89_v18 = vsel %vm85_vm0, %v70_v14, 0.0  ;;  %v75_v24 = vmul.f32 %v1392_v12, %v55_v20  ;;  %v77_v29 = vmul.f32 %v1392_v12, %v57_v25  ;;  %v42_v56 = vld [vmem:[%s2789_s0 + $0x12] sm:$0x3]  ;;  %v44_v62 = vld [vmem:[%s2789_s0 + $0x16] sm:$0x3] }
   0xf   :  { %87 = vadd.xlane.f32.xlu0 %v86_v17  ;;  %v98_v23 = vsel %vm85_vm0, %v73_v19, 0.0  ;;  %v71_v31 = vmul.f32 %v1392_v12, %v51_v27  ;;  %v79_v37 = vmul.f32 %v1392_v12, %v59_v30  ;;  %v61_v38 = vunpack.c.l.bf16 %v1439_v32  ;;  %v48_v22 = vld [vmem:[%s2789_s0 + $0x1e] sm:$0x3]  ;;  %s1309_s27 = smov 32  }
  0x10   :  { %v104_v28 = vsel %vm85_vm0, %v75_v24, 0.0  ;;  %v110_v36 = vsel %vm85_vm0, %v77_v29, 0.0  ;;  %v72_v40 = vmul.f32 %v1392_v12, %v52_v35  ;;  %v54_v43 = vunpack.c.l.bf16 %v1464_v41 }
  0x11   :  { %v92_v33 = vsel %vm85_vm0, %v71_v31, 0.0  ;;  %v116_v44 = vsel %vm85_vm0, %v79_v37, 0.0  ;;  %v81_v45 = vmul.f32 %v1392_v12, %v61_v38  ;;  %v63_v46 = vunpack.c.l.bf16 %v1456_v39 }
  0x12   :  { %93 = vadd.xlane.f32.xlu1 %v92_v33  ;;  %v95_v42 = vsel %vm85_vm0, %v72_v40, 0.0  ;;  %v74_v48 = vmul.f32 %v1392_v12, %v54_v43  ;;  %v56_v51 = vunpack.c.l.bf16 %v1480_v49  ;;  %v1491_v54 = vrot.slane %v1375_v6, %v2798_v47 }
  0x13   :  { %90 = vadd.xlane.f32.xlu0 %v89_v18  ;;  %v122_v52 = vsel %vm85_vm0, %v81_v45, 0.0  ;;  %v83_v53 = vmul.f32 %v1392_v12, %v63_v46  ;;  %v58_v58 = vunpack.c.l.bf16 %v42_v56  ;;  %v60_v0 = vunpack.c.l.bf16 %v44_v62 }
  0x14   :  { %v101_v50 = vsel %vm85_vm0, %v74_v48, 0.0  ;;  %v76_v55 = vmul.f32 %v1392_v12, %v56_v51  ;;  %v138_v60 = vmul.f32 %v1491_v54, %v49_v7  ;;  %v140_v5 = vmul.f32 %v1491_v54, %v51_v27  ;;  %v46_v7 = vld [vmem:[%s2789_s0 + $0x1a] sm:$0x3]  ;;  %s1307_s0 = smov 96  }
  0x15   :  { %v128_v59 = vsel %vm85_vm0, %v83_v53, 0.0  ;;  %v78_v61 = vmul.f32 %v1392_v12, %v58_v58  ;;  %v80_v2 = vmul.f32 %v1392_v12, %v60_v0  ;;  %v62_v14 = vunpack.c.l.bf16 %v46_v7  ;;  %v1620_v7 = vld [vmem:[%s2790_s1 + $0x2] sm:$0x3] }
  0x16   :  { %96 = vadd.xlane.f32.xlu1 %v95_v42  ;;  %v107_v57 = vsel %vm85_vm0, %v76_v55, 0.0  ;;  %v154_v1 = vsel %vm85_vm0, %v138_v60, 0.0  ;;  %v160_v17 = vsel %vm85_vm0, %v140_v5, 0.0  ;;  %v142_v18 = vmul.f32 %v1491_v54, %v53_v15 }
  0x17   :  { %99 = vadd.xlane.f32.xlu0 %v98_v23  ;;  %v113_v63 = vsel %vm85_vm0, %v78_v61, 0.0  ;;  %v119_v13 = vsel %vm85_vm0, %v80_v2, 0.0  ;;  %v82_v19 = vmul.f32 %v1392_v12, %v62_v14  ;;  %v64_v24 = vunpack.c.l.bf16 %v48_v22  ;;  %v1615_v2 = vld [vmem:[%s2790_s1 + $0x1e] sm:$0x3] }
  0x18   :  { %v166_v27 = vsel %vm85_vm0, %v142_v18, 0.0  ;;  %v146_v31 = vmul.f32 %v1491_v54, %v57_v25  ;;  %v139_v33 = vmul.f32 %v1491_v54, %v50_v10  ;;  %v141_v21 = vmul.f32 %v1491_v54, %v52_v35 }
  0x19   :  { %v125_v23 = vsel %vm85_vm0, %v82_v19, 0.0  ;;  %v84_v11 = vmul.f32 %v1392_v12, %v64_v24  ;;  %v150_v10 = vmul.f32 %v1491_v54, %v61_v38  ;;  %v143_v26 = vmul.f32 %v1491_v54, %v54_v43  ;;  %v1629_v19 = vld [vmem:[%s2790_s1 + $0x4] sm:$0x3] }
  0x1a   :  { %102 = vadd.xlane.f32.xlu1 %v101_v50  ;;  %v157_v16 = vsel %vm85_vm0, %v139_v33, 0.0  ;;  %v163_v25 = vsel %vm85_vm0, %v141_v21, 0.0  ;;  %v152_v35 = vmul.f32 %v1491_v54, %v63_v46  ;;  %v145_v37 = vmul.f32 %v1491_v54, %v56_v51  ;;  %v1662_v21 = vld [vmem:[%s2790_s1 + $0x8] sm:$0x3] }
  0x1b   :  { %105 = vadd.xlane.f32.xlu0 %v104_v28  ;;  %v144_v28 = vmul.f32 %v1491_v54, %v55_v20  ;;  %v131_v15 = vsel %vm85_vm0, %v84_v11, 0.0  ;;  %v178_v20 = vsel %vm85_vm0, %v146_v31, 0.0  ;;  %v190_v34 = vsel %vm85_vm0, %v150_v10, 0.0  ;;  %v1651_v31 = vld [vmem:[%s2790_s1 + $0x6] sm:$0x3] }
  0x1c   :  { %v175_v32 = vsel %vm85_vm0, %v145_v37, 0.0  ;;  %v196_v38 = vsel %vm85_vm0, %v152_v35, 0.0  ;;  %v147_v40 = vmul.f32 %v1491_v54, %v58_v58  ;;  %v149_v42 = vmul.f32 %v1491_v54, %v60_v0  ;;  %v1603_v0 = vld [vmem:[%s2790_s1 + $0xc] sm:$0x3]  ;;  %v1682_v37 = vld [vmem:[%s2790_s1 + $0xe] sm:$0x3] }
  0x1d   :  { %v172_v29 = vsel %vm85_vm0, %v144_v28, 0.0  ;;  %v151_v43 = vmul.f32 %v1491_v54, %v62_v14  ;;  %v153_v45 = vmul.f32 %v1491_v54, %v64_v24  ;;  %v2811_v18 = vunpack.c.l.bf16 %v1620_v7 }
  0x1e   :  { %108 = vadd.xlane.f32.xlu1 %v107_v57  ;;  %v181_v41 = vsel %vm85_vm0, %v147_v40, 0.0  ;;  %v187_v39 = vsel %vm85_vm0, %v149_v42, 0.0  ;;  %v2808_v10 = vunpack.c.l.bf16 %v1662_v21  ;;  %v2806_v40 = vunpack.c.l.bf16 %v1682_v37 }
  0x1f   :  { %111 = vadd.xlane.f32.xlu0 %v110_v36  ;;  %v148_v36 = vmul.f32 %v1491_v54, %v59_v30  ;;  %v169_v30 = vsel %vm85_vm0, %v143_v26, 0.0  ;;  %v199_v46 = vsel %vm85_vm0, %v153_v45, 0.0  ;;  %v1672_v26 = vld [vmem:[%s2790_s1 + $0xa] sm:$0x3]  ;;  %vm837_vm1 = vcmask 519168  }
  0x20   :  { %v2814_v35 = vunpack.c.l.bf16 %v1672_v26  ;;  %vm1072_vm2 = vcmask 1041409   ;;  %vm1074_vm3 = vcmask 1042434   ;;  %vm1076_vm4 = vcmask 1043459  }
  0x21   :  { %v184_v3 = vsel %vm85_vm0, %v148_v36, 0.0  ;;  %v2809_v36 = vunpack.c.l.bf16 %v1651_v31  ;;  %vm1078_vm5 = vcmask 1044484   ;;  %vm1080_vm6 = vcmask 1045509  }
  0x22   :  { %114 = vadd.xlane.f32.xlu1 %v113_v63  ;;  %vm1082_vm7 = vcmask 1046534   ;;  %vm1084_vm8 = vcmask 1047559   ;;  %vm1097_vm10 = vcmask 31744   ;;  %vm1252_vm12 = vcmask 24576  }
  0x23   :  { %117 = vadd.xlane.f32.xlu0 %v116_v44  ;;  %v193_v44 = vsel %vm85_vm0, %v151_v43, 0.0 }
  0x26   :  { %120 = vadd.xlane.f32.xlu1 %v119_v13  ;;  %v2807_v13 = vunpack.c.l.bf16 %v1603_v0 }
  0x27   :  { %123 = vadd.xlane.f32.xlu0 %v122_v52 }
  0x2a   :  { %126 = vadd.xlane.f32.xlu1 %v125_v23 }
  0x2b   :  { %129 = vadd.xlane.f32.xlu0 %v128_v59 }
  0x2e   :  { %132 = vadd.xlane.f32.xlu1 %v131_v15 }
  0x2f   :  { %155 = vadd.xlane.f32.xlu0 %v154_v1  ;;  %v1608_v1 = vld [vmem:[%s2790_s1] sm:$0x3] }
  0x30   :  { %v2813_v14 = vunpack.c.l.bf16 %v1608_v1 }
  0x32   :  { %158 = vadd.xlane.f32.xlu1 %v157_v16 }
  0x33   :  { %161 = vadd.xlane.f32.xlu0 %v160_v17  ;;  %v2812_v17 = vunpack.c.l.bf16 %v1615_v2 }
  0x36   :  { %164 = vadd.xlane.f32.xlu1 %v163_v25 }
  0x37   :  { %167 = vadd.xlane.f32.xlu0 %v166_v27  ;;  %v2810_v27 = vunpack.c.l.bf16 %v1629_v19 }
  0x3a   :  { %170 = vadd.xlane.f32.xlu1 %v169_v30 }
  0x3b   :  { %173 = vadd.xlane.f32.xlu0 %v172_v29 }
  0x3e   :  { %176 = vadd.xlane.f32.xlu1 %v175_v32 }
  0x3f   :  { %179 = vadd.xlane.f32.xlu0 %v178_v20 }
  0x42   :  { %182 = vadd.xlane.f32.xlu1 %v181_v41  ;;  %v1692_v41 = vld [vmem:[%s2790_s1 + $0x10] sm:$0x3] }
  0x43   :  { %185 = vadd.xlane.f32.xlu0 %v184_v3  ;;  %v2805_v43 = vunpack.c.l.bf16 %v1692_v41 }
  0x46   :  { %188 = vadd.xlane.f32.xlu1 %v187_v39 }
  0x47   :  { %191 = vadd.xlane.f32.xlu0 %v190_v34 }
  0x4a   :  { %194 = vadd.xlane.f32.xlu1 %v193_v44  ;;  %v1702_v44 = vld [vmem:[%s2790_s1 + $0x12] sm:$0x3] }
  0x4b   :  { %197 = vadd.xlane.f32.xlu0 %v196_v38 }
  0x4e   :  { %200 = vadd.xlane.f32.xlu1 %v199_v46 }
  0x61   :  { %235 = vrot.lane.b32.xlu0 %v1392_v12, %s1307_s0 }
  0x98   :  { %v1570_v48 = vpop.xlane.xlu0 %87 }
  0x9c   :  { %v1572_v49 = vpop.xlane.xlu0 %90 }
  0xa0   :  { %v1574_v50 = vpop.xlane.xlu0 %99 }
  0xa4   :  { %v1576_v51 = vpop.xlane.xlu0 %105 }
  0xa5   :  { %2883 = vst [vmem:[#allocation9_spill] sm:$0xff] %v1576_v51  ;;  %v2164_v51 = vld [vmem:[%s2793_s4 + $0x4] sm:$0xf] }
  0xa6   :  { %2957 = vst [vmem:[#allocation62_spill] sm:$0xff] %v2164_v51 }
  0xa8   :  { %v1578_v52 = vpop.xlane.xlu0 %111 }
  0xac   :  { %v1580_v53 = vpop.xlane.xlu0 %117 }
  0xb0   :  { %v1582_v55 = vpop.xlane.xlu0 %123 }
  0xb4   :  { %v1584_v56 = vpop.xlane.xlu0 %129 }
  0xb8   :  { %v1586_v57 = vpop.xlane.xlu0 %155 }
  0xb9   :  { %2884 = vst [vmem:[#allocation10_spill] sm:$0xff] %v1586_v57 }
  0xbc   :  { %v1588_v58 = vpop.xlane.xlu0 %161 }
  0xbd   :  { %2885 = vst [vmem:[#allocation11_spill] sm:$0xff] %v1588_v58  ;;  %v2905_v58 = vunpack.c.l.bf16 %v1615_v2 }
  0xc0   :  { %v1590_v59 = vpop.xlane.xlu0 %167 }
  0xc1   :  { %2886 = vst [vmem:[#allocation12_spill] sm:$0xff] %v1590_v59 }
  0xc4   :  { %v1592_v60 = vpop.xlane.xlu0 %173 }
  0xc5   :  { %2887 = vst [vmem:[#allocation13_spill] sm:$0xff] %v1592_v60 }
  0xc8   :  { %v1594_v61 = vpop.xlane.xlu0 %179 }
  0xc9   :  { %2888 = vst [vmem:[#allocation14_spill] sm:$0xff] %v1594_v61  ;;  %v2906_v61 = vunpack.c.l.bf16 %v1620_v7  ;;  %v2910_v7 = vunpack.c.l.bf16 %v1603_v0 }
  0xcc   :  { %v1596_v62 = vpop.xlane.xlu0 %185 }
  0xcd   :  { %2889 = vst [vmem:[#allocation15_spill] sm:$0xff] %v1596_v62 }
  0xd0   :  { %v1598_v63 = vpop.xlane.xlu0 %191 }
  0xd1   :  { %2890 = vst [vmem:[#allocation16_spill] sm:$0xff] %v1598_v63 }
  0xd4   :  { %v1610_v5 = vpop.xlane.xlu0 %197 }
  0xd5   :  { %2891 = vst [vmem:[#allocation17_spill] sm:$0xff] %v1610_v5 }
  0xd8   :  { %v1631_v22 = vpop.permute.xlu0 %235 }
  0xd9   :  { %v244_v23 = vmul.f32 %v1631_v22, %v2807_v13  ;;  %v238_v24 = vmul.f32 %v1631_v22, %v2813_v14  ;;  %v253_v15 = vmul.f32 %v1631_v22, %v2812_v17  ;;  %v239_v29 = vmul.f32 %v1631_v22, %v2811_v18 }
  0xda   :  { %v240_v20 = vmul.f32 %v1631_v22, %v2810_v27  ;;  %v241_v3 = vmul.f32 %v1631_v22, %v2809_v36  ;;  %v242_v34 = vmul.f32 %v1631_v22, %v2808_v10  ;;  %v243_v38 = vmul.f32 %v1631_v22, %v2814_v35 }
  0xdb   :  { %v272_v28 = vsel %vm85_vm0, %v244_v23, 0.0  ;;  %v254_v11 = vsel %vm85_vm0, %v238_v24, 0.0  ;;  %v299_v33 = vsel %vm85_vm0, %v253_v15, 0.0  ;;  %v257_v16 = vsel %vm85_vm0, %v239_v29, 0.0  ;;  %v1712_v24 = vld [vmem:[%s2790_s1 + $0x14] sm:$0x3] }
  0xdc   :  { %273 = vadd.xlane.f32.xlu0 %v272_v28  ;;  %255 = vadd.xlane.f32.xlu1 %v254_v11  ;;  %v260_v25 = vsel %vm85_vm0, %v240_v20, 0.0  ;;  %v263_v30 = vsel %vm85_vm0, %v241_v3, 0.0  ;;  %v266_v32 = vsel %vm85_vm0, %v242_v34, 0.0  ;;  %v269_v42 = vsel %vm85_vm0, %v243_v38, 0.0  ;;  %v1722_v29 = vld [vmem:[%s2790_s1 + $0x16] sm:$0x3] }
  0xdd   :  { %v245_v39 = vmul.f32 %v1631_v22, %v2806_v40  ;;  %v246_v46 = vmul.f32 %v1631_v22, %v2805_v43  ;;  %v2804_v23 = vunpack.c.l.bf16 %v1702_v44  ;;  %v2803_v15 = vunpack.c.l.bf16 %v1712_v24 }
  0xde   :  { %v2802_v20 = vunpack.c.l.bf16 %v1722_v29 }
  0xdf   :  { %v275_v45 = vsel %vm85_vm0, %v245_v39, 0.0  ;;  %v278_v28 = vsel %vm85_vm0, %v246_v46, 0.0  ;;  %v247_v11 = vmul.f32 %v1631_v22, %v2804_v23  ;;  %v1754_v46 = vpop.xlane.xlu1 %93 }
  0xe0   :  { %300 = vadd.xlane.f32.xlu0 %v299_v33  ;;  %258 = vadd.xlane.f32.xlu1 %v257_v16  ;;  %v248_v16 = vmul.f32 %v1631_v22, %v2803_v15 }
  0xe1   :  { %v281_v33 = vsel %vm85_vm0, %v247_v11, 0.0 }
  0xe2   :  { %v284_v3 = vsel %vm85_vm0, %v248_v16, 0.0 }
  0xe4   :  { %261 = vadd.xlane.f32.xlu1 %v260_v25  ;;  %v1732_v25 = vld [vmem:[%s2790_s1 + $0x18] sm:$0x3] }
  0xe5   :  { %v2801_v34 = vunpack.c.l.bf16 %v1732_v25 }
  0xe8   :  { %264 = vadd.xlane.f32.xlu1 %v263_v30  ;;  %v249_v30 = vmul.f32 %v1631_v22, %v2802_v20 }
  0xea   :  { %v287_v38 = vsel %vm85_vm0, %v249_v30, 0.0  ;;  %v1765_v30 = vpop.xlane.xlu1 %96 }
  0xec   :  { %267 = vadd.xlane.f32.xlu1 %v266_v32  ;;  %v1742_v32 = vld [vmem:[%s2790_s1 + $0x1a] sm:$0x3] }
  0xed   :  { %v2799_v39 = vunpack.c.l.bf16 %v1742_v32 }
  0xef   :  { %v251_v11 = vmul.f32 %v1631_v22, %v2799_v39 }
  0xf0   :  { %270 = vadd.xlane.f32.xlu1 %v269_v42  ;;  %v250_v42 = vmul.f32 %v1631_v22, %v2801_v34 }
  0xf1   :  { %v293_v16 = vsel %vm85_vm0, %v251_v11, 0.0 }
  0xf4   :  { %276 = vadd.xlane.f32.xlu1 %v275_v45  ;;  %v1752_v45 = vld [vmem:[%s2790_s1 + $0x1c] sm:$0x3]  ;;  %s1308_s1 = smov 64  }
  0xf8   :  { %279 = vadd.xlane.f32.xlu1 %v278_v28  ;;  %v290_v28 = vsel %vm85_vm0, %v250_v42, 0.0  ;;  %v1768_v42 = vpop.xlane.xlu1 %102 }
  0xfc   :  { %282 = vadd.xlane.f32.xlu1 %v281_v33  ;;  %v2800_v33 = vunpack.c.l.bf16 %v1752_v45  ;;  %v1770_v47 = vpop.xlane.xlu1 %108 }
  0xfd   :  { %2892 = vst [vmem:[#allocation18_spill] sm:$0xff] %v1770_v47 }
 0x100   :  { %285 = vadd.xlane.f32.xlu1 %v284_v3  ;;  %v252_v3 = vmul.f32 %v1631_v22, %v2800_v33  ;;  %v1772_v39 = vpop.xlane.xlu1 %114 }
 0x104   :  { %288 = vadd.xlane.f32.xlu1 %v287_v38  ;;  %v296_v38 = vsel %vm85_vm0, %v252_v3, 0.0 }
 0x108   :  { %291 = vadd.xlane.f32.xlu1 %v290_v28  ;;  %v1776_v28 = vpop.xlane.xlu1 %120 }
 0x10c   :  { %294 = vadd.xlane.f32.xlu1 %v293_v16  ;;  %v1778_v11 = vpop.xlane.xlu1 %126 }
 0x110   :  { %297 = vadd.xlane.f32.xlu1 %v296_v38  ;;  %v1780_v22 = vpop.xlane.xlu1 %132 }
 0x111   :  { %2893 = vst [vmem:[#allocation19_spill] sm:$0xff] %v1780_v22 }
 0x114   :  { %v1782_v33 = vpop.xlane.xlu1 %158 }
 0x115   :  { %2894 = vst [vmem:[#allocation20_spill] sm:$0xff] %v1782_v33 }
 0x118   :  { %v1784_v16 = vpop.xlane.xlu1 %164 }
 0x119   :  { %2895 = vst [vmem:[#allocation21_spill] sm:$0xff] %v1784_v16 }
 0x11c   :  { %v1786_v3 = vpop.xlane.xlu1 %170 }
 0x11d   :  { %2896 = vst [vmem:[#allocation22_spill] sm:$0xff] %v1786_v3 }
 0x120   :  { %v1788_v38 = vpop.xlane.xlu1 %176 }
 0x121   :  { %303 = vrot.lane.b32.xlu1 %v1491_v54, %s1307_s0  ;;  %2897 = vst [vmem:[#allocation23_spill] sm:$0xff] %v1788_v38 }
 0x124   :  { %v1790_v34 = vpop.xlane.xlu1 %182 }
 0x125   :  { %2898 = vst [vmem:[#allocation24_spill] sm:$0xff] %v1790_v34 }
 0x128   :  { %v1792_v20 = vpop.xlane.xlu1 %188 }
 0x129   :  { %2899 = vst [vmem:[#allocation25_spill] sm:$0xff] %v1792_v20 }
 0x12c   :  { %v1794_v15 = vpop.xlane.xlu1 %194 }
 0x12d   :  { %2900 = vst [vmem:[#allocation26_spill] sm:$0xff] %v1794_v15  ;;  %v2904_v15 = vunpack.c.l.bf16 %v1608_v1 }
 0x130   :  { %v1796_v23 = vpop.xlane.xlu1 %200 }
 0x131   :  { %2901 = vst [vmem:[#allocation27_spill] sm:$0xff] %v1796_v23  ;;  %v2903_v23 = vunpack.c.l.bf16 %v1672_v26 }
 0x165   :  { %v1798_v43 = vpop.xlane.xlu1 %255 }
 0x169   :  { %v1800_v40 = vpop.xlane.xlu1 %258 }
 0x16d   :  { %v1802_v13 = vpop.xlane.xlu1 %261 }
 0x171   :  { %v1804_v10 = vpop.xlane.xlu1 %264 }
 0x175   :  { %v1806_v36 = vpop.xlane.xlu1 %267 }
 0x179   :  { %v1808_v27 = vpop.xlane.xlu1 %270 }
 0x17d   :  { %v1810_v18 = vpop.xlane.xlu1 %276 }
 0x17e   :  { %2902 = vst [vmem:[#allocation28_spill] sm:$0xff] %v1810_v18 }
 0x181   :  { %v1812_v17 = vpop.xlane.xlu1 %279 }
 0x185   :  { %v1814_v14 = vpop.xlane.xlu1 %282 }
 0x189   :  { %v1816_v35 = vpop.xlane.xlu1 %285 }
 0x18d   :  { %v1818_v38 = vpop.xlane.xlu1 %288 }
 0x191   :  { %v1820_v60 = vpop.xlane.xlu1 %291 }
 0x195   :  { %v1822_v3 = vpop.xlane.xlu1 %294 }
 0x199   :  { %v1824_v59 = vpop.xlane.xlu1 %297 }
 0x19d   :  { %v304_v16 = vpop.permute.xlu1 %303 }
 0x19e   :  { %v311_v5 = vmul.f32 %v304_v16, %v2903_v23  ;;  %v306_v20 = vmul.f32 %v304_v16, %v2904_v15  ;;  %v321_v34 = vmul.f32 %v304_v16, %v2905_v58  ;;  %v307_v33 = vmul.f32 %v304_v16, %v2906_v61 }
 0x19f   :  { %v2907_v23 = vunpack.c.l.bf16 %v1629_v19  ;;  %v2908_v15 = vunpack.c.l.bf16 %v1651_v31  ;;  %v2909_v61 = vunpack.c.l.bf16 %v1662_v21  ;;  %v312_v19 = vmul.f32 %v304_v16, %v2910_v7 }
 0x1a0   :  { %v337_v63 = vsel %vm85_vm0, %v311_v5, 0.0  ;;  %v322_v62 = vsel %vm85_vm0, %v306_v20, 0.0  ;;  %v367_v57 = vsel %vm85_vm0, %v321_v34, 0.0  ;;  %v325_v26 = vsel %vm85_vm0, %v307_v33, 0.0 }
 0x1a1   :  { %338 = vadd.xlane.f32.xlu1 %v337_v63  ;;  %323 = vadd.xlane.f32.xlu0 %v322_v62  ;;  %v308_v1 = vmul.f32 %v304_v16, %v2907_v23  ;;  %v309_v2 = vmul.f32 %v304_v16, %v2908_v15  ;;  %v310_v62 = vmul.f32 %v304_v16, %v2909_v61  ;;  %v2911_v20 = vunpack.c.l.bf16 %v1682_v37 }
 0x1a2   :  { %v2912_v33 = vunpack.c.l.bf16 %v1692_v41  ;;  %v2913_v23 = vunpack.c.l.bf16 %v1702_v44  ;;  %v2916_v61 = vunpack.c.l.bf16 %v1732_v25  ;;  %v1876_v25 = vpop.xlane.xlu0 %273 }
 0x1a3   :  { %v328_v5 = vsel %vm85_vm0, %v308_v1, 0.0  ;;  %v331_v58 = vsel %vm85_vm0, %v309_v2, 0.0  ;;  %v334_v63 = vsel %vm85_vm0, %v310_v62, 0.0  ;;  %v313_v34 = vmul.f32 %v304_v16, %v2911_v20  ;;  %2919 = vst [vmem:[#allocation29_spill] sm:$0xff] %v1876_v25 }
 0x1a4   :  { %v315_v1 = vmul.f32 %v304_v16, %v2913_v23  ;;  %v2915_v2 = vunpack.c.l.bf16 %v1722_v29  ;;  %v318_v62 = vmul.f32 %v304_v16, %v2916_v61  ;;  %v1926_v61 = vld [vmem:[%s2791_s2 + $0x2] sm:$0x3] }
 0x1a5   :  { %368 = vadd.xlane.f32.xlu1 %v367_v57  ;;  %326 = vadd.xlane.f32.xlu0 %v325_v26  ;;  %v340_v57 = vsel %vm85_vm0, %v312_v19, 0.0  ;;  %v343_v31 = vsel %vm85_vm0, %v313_v34, 0.0  ;;  %v314_v26 = vmul.f32 %v304_v16, %v2912_v33  ;;  %v2918_v19 = vunpack.c.l.bf16 %v1752_v45 }
 0x1a6   :  { %v349_v0 = vsel %vm85_vm0, %v315_v1, 0.0  ;;  %v358_v44 = vsel %vm85_vm0, %v318_v62, 0.0  ;;  %v1878_v20 = vpop.xlane.xlu0 %300 }
 0x1a7   :  { %v346_v21 = vsel %vm85_vm0, %v314_v26, 0.0  ;;  %2920 = vst [vmem:[#allocation30_spill] sm:$0xff] %v1878_v20 }
 0x1a9   :  { %329 = vadd.xlane.f32.xlu0 %v328_v5  ;;  %v2914_v5 = vunpack.c.l.bf16 %v1712_v24 }
 0x1ab   :  { %v316_v15 = vmul.f32 %v304_v16, %v2914_v5 }
 0x1ad   :  { %332 = vadd.xlane.f32.xlu0 %v331_v58  ;;  %v352_v37 = vsel %vm85_vm0, %v316_v15, 0.0  ;;  %v317_v58 = vmul.f32 %v304_v16, %v2915_v2  ;;  %v1914_v2 = vld [vmem:[%s2791_s2] sm:$0x3] }
 0x1af   :  { %v355_v41 = vsel %vm85_vm0, %v317_v58, 0.0 }
 0x1b1   :  { %335 = vadd.xlane.f32.xlu0 %v334_v63  ;;  %v2917_v63 = vunpack.c.l.bf16 %v1742_v32 }
 0x1b3   :  { %v319_v7 = vmul.f32 %v304_v16, %v2917_v63 }
 0x1b5   :  { %341 = vadd.xlane.f32.xlu0 %v340_v57  ;;  %v361_v24 = vsel %vm85_vm0, %v319_v7, 0.0  ;;  %v320_v57 = vmul.f32 %v304_v16, %v2918_v19  ;;  %v1940_v19 = vld [vmem:[%s2791_s2 + $0x4] sm:$0x3] }
 0x1b7   :  { %v364_v29 = vsel %vm85_vm0, %v320_v57, 0.0 }
 0x1b9   :  { %344 = vadd.xlane.f32.xlu0 %v343_v31 }
 0x1bd   :  { %347 = vadd.xlane.f32.xlu0 %v346_v21 }
 0x1c1   :  { %350 = vadd.xlane.f32.xlu0 %v349_v0 }
 0x1c5   :  { %353 = vadd.xlane.f32.xlu0 %v352_v37  ;;  %v1909_v37 = vld [vmem:[%s2791_s2 + $0xc] sm:$0x3] }
 0x1c6   :  { %2934 = vst [vmem:[#allocation44_spill] sm:$0xff] %v1909_v37  ;;  %v2815_v62 = vunpack.c.l.bf16 %v1909_v37  ;;  %v2950_v37 = vunpack.c.l.bf16 %v1926_v61 }
 0x1c9   :  { %356 = vadd.xlane.f32.xlu0 %v355_v41  ;;  %v1921_v41 = vld [vmem:[%s2791_s2 + $0x18] sm:$0x3] }
 0x1ca   :  { %2936 = vst [vmem:[#allocation46_spill] sm:$0xff] %v1921_v41 }
 0x1cd   :  { %359 = vadd.xlane.f32.xlu0 %v358_v44  ;;  %v2816_v44 = vunpack.c.l.bf16 %v1914_v2 }
 0x1d1   :  { %362 = vadd.xlane.f32.xlu0 %v361_v24  ;;  %v1935_v24 = vld [vmem:[%s2791_s2 + $0x1a] sm:$0x3] }
 0x1d2   :  { %2937 = vst [vmem:[#allocation47_spill] sm:$0xff] %v1935_v24  ;;  %v2817_v63 = vunpack.c.l.bf16 %v1935_v24 }
 0x1d5   :  { %365 = vadd.xlane.f32.xlu0 %v364_v29 }
 0x1eb   :  { %434 = vrot.lane.b32.xlu0 %v1392_v12, %s1308_s1 }
 0x22a   :  { %v1880_v32 = vpop.xlane.xlu0 %323 }
 0x22b   :  { %2921 = vst [vmem:[#allocation31_spill] sm:$0xff] %v1880_v32 }
 0x22e   :  { %v1882_v34 = vpop.xlane.xlu0 %326 }
 0x22f   :  { %2922 = vst [vmem:[#allocation32_spill] sm:$0xff] %v1882_v34 }
 0x232   :  { %v1884_v31 = vpop.xlane.xlu0 %329 }
 0x233   :  { %2923 = vst [vmem:[#allocation33_spill] sm:$0xff] %v1884_v31 }
 0x236   :  { %v1886_v45 = vpop.xlane.xlu0 %332 }
 0x237   :  { %2924 = vst [vmem:[#allocation34_spill] sm:$0xff] %v1886_v45  ;;  %v2938_v45 = vunpack.c.l.bf16 %v1921_v41 }
 0x23a   :  { %v1888_v16 = vpop.xlane.xlu0 %335 }
 0x23b   :  { %2925 = vst [vmem:[#allocation35_spill] sm:$0xff] %v1888_v16 }
 0x23e   :  { %v1890_v33 = vpop.xlane.xlu0 %341 }
 0x23f   :  { %2926 = vst [vmem:[#allocation36_spill] sm:$0xff] %v1890_v33 }
 0x242   :  { %v1892_v26 = vpop.xlane.xlu0 %344 }
 0x243   :  { %2927 = vst [vmem:[#allocation37_spill] sm:$0xff] %v1892_v26  ;;  %v1968_v26 = vld [vmem:[%s2791_s2 + $0x6] sm:$0x3] }
 0x246   :  { %v1894_v21 = vpop.xlane.xlu0 %347 }
 0x247   :  { %2928 = vst [vmem:[#allocation38_spill] sm:$0xff] %v1894_v21 }
 0x24a   :  { %v1896_v23 = vpop.xlane.xlu0 %350 }
 0x24b   :  { %2929 = vst [vmem:[#allocation39_spill] sm:$0xff] %v1896_v23 }
 0x24e   :  { %v1898_v1 = vpop.xlane.xlu0 %353 }
 0x24f   :  { %2930 = vst [vmem:[#allocation40_spill] sm:$0xff] %v1898_v1 }
 0x252   :  { %v1900_v0 = vpop.xlane.xlu0 %356 }
 0x253   :  { %2931 = vst [vmem:[#allocation41_spill] sm:$0xff] %v1900_v0 }
 0x256   :  { %v1902_v5 = vpop.xlane.xlu0 %359 }
 0x257   :  { %2932 = vst [vmem:[#allocation42_spill] sm:$0xff] %v1902_v5  ;;  %v2941_v5 = vunpack.c.l.bf16 %v1940_v19 }
 0x25a   :  { %v1904_v15 = vpop.xlane.xlu0 %362 }
 0x25b   :  { %2933 = vst [vmem:[#allocation43_spill] sm:$0xff] %v1904_v15  ;;  %v2939_v15 = vunpack.c.l.bf16 %v1926_v61  ;;  %v2124_v61 = vld [vmem:[%s2792_s3] sm:$0x3] }
 0x25c   :  { %2954 = vst [vmem:[#allocation59_spill] sm:$0xff] %v2124_v61 }
 0x25e   :  { %v1916_v58 = vpop.xlane.xlu0 %365 }
 0x25f   :  { %2935 = vst [vmem:[#allocation45_spill] sm:$0xff] %v1916_v58 }
 0x262   :  { %v1942_v57 = vpop.permute.xlu0 %434 }
 0x263   :  { %v443_v29 = vmul.f32 %v1942_v57, %v2815_v62  ;;  %v437_v7 = vmul.f32 %v1942_v57, %v2816_v44  ;;  %v449_v58 = vmul.f32 %v1942_v57, %v2938_v45  ;;  %v438_v62 = vmul.f32 %v1942_v57, %v2939_v15  ;;  %v1963_v44 = vld [vmem:[%s2791_s2 + $0x1c] sm:$0x3] }
 0x264   :  { %2940 = vst [vmem:[#allocation48_spill] sm:$0xff] %v1963_v44  ;;  %v2821_v45 = vunpack.c.l.bf16 %v1968_v26  ;;  %v450_v0 = vmul.f32 %v1942_v57, %v2817_v63  ;;  %v439_v1 = vmul.f32 %v1942_v57, %v2941_v5 }
 0x265   :  { %v471_v33 = vsel %vm85_vm0, %v443_v29, 0.0  ;;  %v453_v16 = vsel %vm85_vm0, %v437_v7, 0.0  ;;  %v2818_v7 = vunpack.c.l.bf16 %v1963_v44  ;;  %v489_v29 = vsel %vm85_vm0, %v449_v58, 0.0 }
 0x266   :  { %472 = vadd.xlane.f32.xlu0 %v471_v33  ;;  %454 = vadd.xlane.f32.xlu1 %v453_v16  ;;  %v456_v15 = vsel %vm85_vm0, %v438_v62, 0.0  ;;  %v1983_v16 = vld [vmem:[%s2791_s2 + $0x8] sm:$0x3]  ;;  %v492_v58 = vsel %vm85_vm0, %v450_v0, 0.0  ;;  %v459_v62 = vsel %vm85_vm0, %v439_v1, 0.0  ;;  %v440_v5 = vmul.f32 %v1942_v57, %v2821_v45 }
 0x267   :  { %2942 = vst [vmem:[#allocation49_spill] sm:$0xff] %v1983_v16  ;;  %v2819_v33 = vunpack.c.l.bf16 %v1983_v16  ;;  %v451_v63 = vmul.f32 %v1942_v57, %v2818_v7 }
 0x268   :  { %v462_v0 = vsel %vm85_vm0, %v440_v5, 0.0 }
 0x269   :  { %v441_v1 = vmul.f32 %v1942_v57, %v2819_v33  ;;  %v2018_v33 = vld [vmem:[%s2791_s2 + $0x10] sm:$0x3] }
 0x26a   :  { %490 = vadd.xlane.f32.xlu0 %v489_v29  ;;  %457 = vadd.xlane.f32.xlu1 %v456_v15  ;;  %v1997_v29 = vld [vmem:[%s2791_s2 + $0xa] sm:$0x3]  ;;  %v495_v15 = vsel %vm85_vm0, %v451_v63, 0.0 }
 0x26b   :  { %2943 = vst [vmem:[#allocation50_spill] sm:$0xff] %v1997_v29  ;;  %v2820_v7 = vunpack.c.l.bf16 %v1997_v29 }
 0x26d   :  { %v442_v63 = vmul.f32 %v1942_v57, %v2820_v7  ;;  %v2028_v7 = vld [vmem:[%s2791_s2 + $0x12] sm:$0x3] }
 0x26e   :  { %493 = vadd.xlane.f32.xlu0 %v492_v58  ;;  %460 = vadd.xlane.f32.xlu1 %v459_v62  ;;  %v2008_v58 = vld [vmem:[%s2791_s2 + $0xe] sm:$0x3]  ;;  %v465_v62 = vsel %vm85_vm0, %v441_v1, 0.0  ;;  %v2823_v1 = vunpack.c.l.bf16 %v2018_v33 }
 0x26f   :  { %2944 = vst [vmem:[#allocation51_spill] sm:$0xff] %v2008_v58  ;;  %v2822_v5 = vunpack.c.l.bf16 %v2008_v58 }
 0x270   :  { %v445_v45 = vmul.f32 %v1942_v57, %v2823_v1  ;;  %v2048_v1 = vld [vmem:[%s2791_s2 + $0x16] sm:$0x3] }
 0x272   :  { %496 = vadd.xlane.f32.xlu0 %v495_v15  ;;  %463 = vadd.xlane.f32.xlu1 %v462_v0  ;;  %v468_v15 = vsel %vm85_vm0, %v442_v63, 0.0  ;;  %v444_v0 = vmul.f32 %v1942_v57, %v2822_v5  ;;  %v2824_v63 = vunpack.c.l.bf16 %v2028_v7  ;;  %v2038_v5 = vld [vmem:[%s2791_s2 + $0x14] sm:$0x3] }
 0x274   :  { %v446_v31 = vmul.f32 %v1942_v57, %v2824_v63 }
 0x276   :  { %466 = vadd.xlane.f32.xlu1 %v465_v62  ;;  %v474_v62 = vsel %vm85_vm0, %v444_v0, 0.0  ;;  %v2825_v0 = vunpack.c.l.bf16 %v2038_v5 }
 0x278   :  { %v447_v23 = vmul.f32 %v1942_v57, %v2825_v0 }
 0x27a   :  { %469 = vadd.xlane.f32.xlu1 %v468_v15  ;;  %v477_v15 = vsel %vm85_vm0, %v445_v45, 0.0  ;;  %v2826_v45 = vunpack.c.l.bf16 %v2048_v1  ;;  %v483_v63 = vsel %vm85_vm0, %v447_v23, 0.0 }
 0x27e   :  { %475 = vadd.xlane.f32.xlu1 %v474_v62  ;;  %v480_v62 = vsel %vm85_vm0, %v446_v31, 0.0  ;;  %v2067_v31 = vld [vmem:[%s2791_s2 + $0x1e] sm:$0x3] }
 0x27f   :  { %2945 = vst [vmem:[#allocation52_spill] sm:$0xff] %v2067_v31 }
 0x282   :  { %478 = vadd.xlane.f32.xlu1 %v477_v15  ;;  %v448_v15 = vmul.f32 %v1942_v57, %v2826_v45 }
 0x284   :  { %v486_v21 = vsel %vm85_vm0, %v448_v15, 0.0  ;;  %v2074_v15 = vpop.xlane.xlu1 %338 }
 0x285   :  { %2946 = vst [vmem:[#allocation53_spill] sm:$0xff] %v2074_v15  ;;  %v2949_v15 = vunpack.c.l.bf16 %v1914_v2 }
 0x286   :  { %481 = vadd.xlane.f32.xlu1 %v480_v62  ;;  %v2828_v62 = vunpack.c.l.bf16 %v2067_v31 }
 0x288   :  { %501 = vrot.lane.b32.xlu0 %v1491_v54, %s1308_s1  ;;  %v452_v23 = vmul.f32 %v1942_v57, %v2828_v62 }
 0x28a   :  { %484 = vadd.xlane.f32.xlu1 %v483_v63  ;;  %v498_v63 = vsel %vm85_vm0, %v452_v23, 0.0 }
 0x28e   :  { %487 = vadd.xlane.f32.xlu1 %v486_v21  ;;  %v2076_v21 = vpop.xlane.xlu1 %368 }
 0x28f   :  { %2947 = vst [vmem:[#allocation54_spill] sm:$0xff] %v2076_v21 }
 0x29f   :  { %632 = vrot.lane.b32.xlu1 %v1392_v12, %s1309_s27 }
 0x2c3   :  { %499 = vadd.xlane.f32.xlu1 %v498_v63 }
 0x2ef   :  { %v2078_v0 = vpop.xlane.xlu0 %472  ;;  %v2080_v12 = vpop.xlane.xlu1 %454 }
 0x2f0   :  { %2948 = vst [vmem:[#allocation55_spill] sm:$0xff] %v2078_v0  ;;  %v2841_v0 = vrot.slane %v1375_v6, 2  ;;  %v2215_v6 = vld [vmem:[%s2792_s3 + $0x6] sm:$0x3] }
 0x2f1   :  { %2964 = vst [vmem:[#allocation67_spill] sm:$0xff] %v2215_v6 }
 0x2f2   :  { %v2159_v25 = vrot.slane %v2841_v0, %v1379_v8  ;;  %v2178_v8 = vld [vmem:[%s2792_s3 + $0x12] sm:$0x3] }
 0x2f3   :  { %v2082_v45 = vpop.xlane.xlu0 %490  ;;  %v2084_v34 = vpop.xlane.xlu1 %457  ;;  %2960 = vst [vmem:[#allocation63_spill] sm:$0xff] %v2178_v8 }
 0x2f7   :  { %v2086_v32 = vpop.xlane.xlu0 %493  ;;  %v2088_v58 = vpop.xlane.xlu1 %460 }
 0x2fb   :  { %v2090_v57 = vpop.xlane.xlu0 %496  ;;  %v2092_v23 = vpop.xlane.xlu1 %463 }
 0x2ff   :  { %v2094_v63 = vpop.permute.xlu0 %501  ;;  %v2096_v62 = vpop.xlane.xlu1 %466 }
 0x300   :  { %v504_v21 = vmul.f32 %v2094_v63, %v2949_v15  ;;  %v505_v31 = vmul.f32 %v2094_v63, %v2950_v37  ;;  %v2119_v37 = vld [vmem:[%s2792_s3 + $0x14] sm:$0x3] }
 0x301   :  { %2953 = vst [vmem:[#allocation58_spill] sm:$0xff] %v2119_v37  ;;  %v2838_v15 = vunpack.c.l.bf16 %v2119_v37 }
 0x302   :  { %v520_v29 = vsel %vm85_vm0, %v504_v21, 0.0  ;;  %v523_v41 = vsel %vm85_vm0, %v505_v31, 0.0  ;;  %v2136_v31 = vld [vmem:[%s2792_s3 + $0x2] sm:$0x3]  ;;  %v2840_v21 = vunpack.c.l.bf16 %v2124_v61 }
 0x303   :  { %521 = vadd.xlane.f32.xlu0 %v520_v29  ;;  %524 = vadd.xlane.f32.xlu1 %v523_v41  ;;  %v2106_v44 = vpop.xlane.xlu1 %469  ;;  %v2131_v29 = vld [vmem:[%s2792_s3 + $0x16] sm:$0x3] }
 0x304   :  { %2951 = vst [vmem:[#allocation56_spill] sm:$0xff] %v2106_v44  ;;  %2955 = vst [vmem:[#allocation60_spill] sm:$0xff] %v2131_v29  ;;  %v2958_v61 = vunpack.c.l.bf16 %v2131_v29  ;;  %v2959_v44 = vunpack.c.l.bf16 %v2136_v31  ;;  %v2201_v29 = vld [vmem:[%s2792_s3 + $0x4] sm:$0x3] }
 0x305   :  { %2963 = vst [vmem:[#allocation66_spill] sm:$0xff] %v2201_v29 }
 0x307   :  { %v2108_v16 = vpop.xlane.xlu1 %475 }
 0x308   :  { %2952 = vst [vmem:[#allocation57_spill] sm:$0xff] %v2108_v16  ;;  %v2146_v16 = vld [vmem:[%s2792_s3 + $0x10] sm:$0x3] }
 0x309   :  { %2956 = vst [vmem:[#allocation61_spill] sm:$0xff] %v2146_v16  ;;  %v2845_v22 = vunpack.c.l.bf16 %v2146_v16 }
 0x30b   :  { %v2110_v4 = vpop.xlane.xlu1 %478 }
 0x30f   :  { %v2112_v24 = vpop.xlane.xlu1 %481 }
 0x313   :  { %v2114_v2 = vpop.xlane.xlu1 %484 }
 0x317   :  { %v2126_v41 = vpop.xlane.xlu1 %487 }
 0x31b   :  { %v2148_v18 = vpop.permute.xlu1 %632 }
 0x31c   :  { %v645_v47 = vmul.f32 %v2148_v18, %v2838_v15  ;;  %v635_v20 = vmul.f32 %v2148_v18, %v2840_v21  ;;  %v646_v21 = vmul.f32 %v2148_v18, %v2958_v61  ;;  %v636_v0 = vmul.f32 %v2148_v18, %v2959_v44 }
 0x31e   :  { %v681_v37 = vsel %vm85_vm0, %v645_v47, 0.0  ;;  %v651_v15 = vsel %vm85_vm0, %v635_v20, 0.0  ;;  %v822_v47 = vmul.f32 %v2159_v25, %v2164_v51  ;;  %v2185_v20 = vld [vmem:[%s2793_s4 + $0x24] sm:$0xf]  ;;  %v684_v61 = vsel %vm85_vm0, %v646_v21, 0.0 }
 0x31f   :  { %682 = vadd.xlane.f32.xlu0 %v681_v37  ;;  %652 = vadd.xlane.f32.xlu1 %v651_v15  ;;  %2961 = vst [vmem:[#allocation64_spill] sm:$0xff] %v2185_v20  ;;  %v654_v44 = vsel %vm85_vm0, %v636_v0, 0.0  ;;  %v643_v37 = vmul.f32 %v2148_v18, %v2845_v22  ;;  %v2848_v15 = vunpack.c.l.bf16 %v2178_v8  ;;  %v2196_v51 = vld [vmem:[%s2792_s3 + $0x18] sm:$0x3]  ;;  %v830_v21 = vmul.f32 %v2159_v25, %v2185_v20  ;;  %v2255_v8 = vld [vmem:[%s2793_s4 + $0x2c] sm:$0xf] }
 0x320   :  { %2962 = vst [vmem:[#allocation65_spill] sm:$0xff] %v2196_v51  ;;  %v841_v0 = vsel %vm837_vm1, %v822_v47, 0.0  ;;  %v2855_v20 = vunpack.c.l.bf16 %v2215_v6  ;;  %2969 = vst [vmem:[#allocation71_spill] sm:$0xff] %v2255_v8 }
 0x321   :  { %v675_v22 = vsel %vm85_vm0, %v643_v37, 0.0  ;;  %v865_v47 = vsel %vm837_vm1, %v830_v21, 0.0  ;;  %v2221_v37 = vld [vmem:[%s2793_s4 + $0x28] sm:$0xf]  ;;  %v2234_v21 = vld [vmem:[%s2792_s3 + $0x1a] sm:$0x3] }
 0x322   :  { %2965 = vst [vmem:[#allocation68_spill] sm:$0xff] %v2221_v37  ;;  %2967 = vst [vmem:[#allocation69_spill] sm:$0xff] %v2234_v21 }
 0x323   :  { %685 = vadd.xlane.f32.xlu0 %v684_v61  ;;  %655 = vadd.xlane.f32.xlu1 %v654_v44  ;;  %v644_v61 = vmul.f32 %v2148_v18, %v2848_v15  ;;  %v2850_v44 = vunpack.c.l.bf16 %v2196_v51 }
 0x325   :  { %v678_v15 = vsel %vm85_vm0, %v644_v61, 0.0  ;;  %v647_v16 = vmul.f32 %v2148_v18, %v2850_v44  ;;  %v831_v61 = vmul.f32 %v2159_v25, %v2221_v37  ;;  %v2241_v44 = vld [vmem:[%s2793_s4] sm:$0xf] }
 0x326   :  { %2968 = vst [vmem:[#allocation70_spill] sm:$0xff] %v2241_v44  ;;  %v821_v37 = vmul.f32 %v2159_v25, %v2241_v44 }
 0x327   :  { %842 = vadd.xlane.f32.xlu0 %v841_v0  ;;  %676 = vadd.xlane.f32.xlu1 %v675_v22  ;;  %v2966_v22 = vunpack.c.l.bf16 %v2201_v29  ;;  %v687_v29 = vsel %vm85_vm0, %v647_v16, 0.0  ;;  %v868_v51 = vsel %vm837_vm1, %v831_v61, 0.0  ;;  %v2260_v16 = vld [vmem:[%s2793_s4 + $0x20] sm:$0xf]  ;;  %v2269_v61 = vld [vmem:[%s2792_s3 + $0x1c] sm:$0x3] }
 0x328   :  { %2970 = vst [vmem:[#allocation72_spill] sm:$0xff] %v2260_v16  ;;  %2971 = vst [vmem:[#allocation73_spill] sm:$0xff] %v2269_v61 }
 0x329   :  { %v637_v0 = vmul.f32 %v2148_v18, %v2966_v22 }
 0x32b   :  { %866 = vadd.xlane.f32.xlu0 %v865_v47  ;;  %679 = vadd.xlane.f32.xlu1 %v678_v15  ;;  %v657_v22 = vsel %vm85_vm0, %v637_v0, 0.0  ;;  %v638_v15 = vmul.f32 %v2148_v18, %v2855_v20  ;;  %v2856_v47 = vunpack.c.l.bf16 %v2234_v21  ;;  %v838_v20 = vsel %vm837_vm1, %v821_v37, 0.0  ;;  %v2289_v37 = vld [vmem:[%s2793_s4 + $0x30] sm:$0xf] }
 0x32c   :  { %2973 = vst [vmem:[#allocation75_spill] sm:$0xff] %v2289_v37 }
 0x32d   :  { %v660_v0 = vsel %vm85_vm0, %v638_v15, 0.0  ;;  %v832_v15 = vmul.f32 %v2159_v25, %v2255_v8 }
 0x32f   :  { %688 = vadd.xlane.f32.xlu0 %v687_v29  ;;  %658 = vadd.xlane.f32.xlu1 %v657_v22  ;;  %v648_v29 = vmul.f32 %v2148_v18, %v2856_v47  ;;  %v2274_v22 = vld [vmem:[%s2792_s3 + $0x8] sm:$0x3]  ;;  %v829_v47 = vmul.f32 %v2159_v25, %v2260_v16  ;;  %v871_v44 = vsel %vm837_vm1, %v832_v15, 0.0  ;;  %v2310_v15 = vld [vmem:[%s2792_s3 + $0xa] sm:$0x3] }
 0x330   :  { %2972 = vst [vmem:[#allocation74_spill] sm:$0xff] %v2274_v22  ;;  %v2862_v21 = vunpack.c.l.bf16 %v2274_v22  ;;  %v2294_v16 = vld [vmem:[%s2793_s4 + $0x8] sm:$0xf]  ;;  %2975 = vst [vmem:[#allocation77_spill] sm:$0xff] %v2310_v15  ;;  %v2868_v22 = vunpack.c.l.bf16 %v2310_v15 }
 0x331   :  { %v862_v6 = vsel %vm837_vm1, %v829_v47, 0.0  ;;  %v2305_v47 = vld [vmem:[%s2792_s3 + $0x1e] sm:$0x3] }
 0x332   :  { %2974 = vst [vmem:[#allocation76_spill] sm:$0xff] %v2305_v47 }
 0x333   :  { %869 = vadd.xlane.f32.xlu0 %v868_v51  ;;  %661 = vadd.xlane.f32.xlu1 %v660_v0  ;;  %v690_v51 = vsel %vm85_vm0, %v648_v29, 0.0  ;;  %v2861_v0 = vunpack.c.l.bf16 %v2269_v61 }
 0x335   :  { %v649_v29 = vmul.f32 %v2148_v18, %v2861_v0  ;;  %v823_v0 = vmul.f32 %v2159_v25, %v2294_v16 }
 0x337   :  { %691 = vadd.xlane.f32.xlu0 %v690_v51  ;;  %839 = vadd.xlane.f32.xlu1 %v838_v20  ;;  %v639_v20 = vmul.f32 %v2148_v18, %v2862_v21  ;;  %v833_v51 = vmul.f32 %v2159_v25, %v2289_v37  ;;  %v693_v21 = vsel %vm85_vm0, %v649_v29, 0.0  ;;  %v844_v8 = vsel %vm837_vm1, %v823_v0, 0.0  ;;  %v2325_v37 = vld [vmem:[%s2793_s4 + $0x34] sm:$0xf]  ;;  %v2330_v29 = vld [vmem:[%s2793_s4 + $0xc] sm:$0xf] }
 0x338   :  { %2976 = vst [vmem:[#allocation78_spill] sm:$0xff] %v2325_v37  ;;  %2977 = vst [vmem:[#allocation79_spill] sm:$0xff] %v2330_v29  ;;  %v2341_v0 = vld [vmem:[%s2792_s3 + $0xc] sm:$0x3] }
 0x339   :  { %v874_v61 = vsel %vm837_vm1, %v833_v51, 0.0  ;;  %2978 = vst [vmem:[#allocation80_spill] sm:$0xff] %v2341_v0  ;;  %v834_v51 = vmul.f32 %v2159_v25, %v2325_v37 }
 0x33b   :  { %872 = vadd.xlane.f32.xlu0 %v871_v44  ;;  %863 = vadd.xlane.f32.xlu1 %v862_v6  ;;  %v663_v6 = vsel %vm85_vm0, %v639_v20, 0.0  ;;  %v2867_v44 = vunpack.c.l.bf16 %v2305_v47  ;;  %v877_v15 = vsel %vm837_vm1, %v834_v51, 0.0  ;;  %v2362_v47 = vld [vmem:[%s2793_s4 + $0x1c] sm:$0xf] }
 0x33c   :  { %2979 = vst [vmem:[#allocation81_spill] sm:$0xff] %v2362_v47 }
 0x33d   :  { %v650_v20 = vmul.f32 %v2148_v18, %v2867_v44  ;;  %v2350_v44 = vld [vmem:[%s2793_s4 + $0x38] sm:$0xf] }
 0x33f   :  { %694 = vadd.xlane.f32.xlu0 %v693_v21  ;;  %664 = vadd.xlane.f32.xlu1 %v663_v6  ;;  %v640_v21 = vmul.f32 %v2148_v18, %v2868_v22  ;;  %v824_v6 = vmul.f32 %v2159_v25, %v2330_v29  ;;  %v696_v22 = vsel %vm85_vm0, %v650_v20, 0.0  ;;  %v835_v29 = vmul.f32 %v2159_v25, %v2350_v44  ;;  %v2367_v20 = vld [vmem:[%s2793_s4 + $0x10] sm:$0xf] }
 0x340   :  { %2980 = vst [vmem:[#allocation82_spill] sm:$0xff] %v2367_v20 }
 0x341   :  { %v847_v37 = vsel %vm837_vm1, %v824_v6, 0.0  ;;  %v880_v51 = vsel %vm837_vm1, %v835_v29, 0.0  ;;  %v828_v6 = vmul.f32 %v2159_v25, %v2362_v47 }
 0x343   :  { %875 = vadd.xlane.f32.xlu0 %v874_v61  ;;  %845 = vadd.xlane.f32.xlu1 %v844_v8  ;;  %v666_v8 = vsel %vm85_vm0, %v640_v21, 0.0  ;;  %v2874_v61 = vunpack.c.l.bf16 %v2341_v0  ;;  %v2375_v21 = vld [vmem:[%s2792_s3 + $0xe] sm:$0x3]  ;;  %v2385_v0 = vld [vmem:[%s2793_s4 + $0x3c] sm:$0xf] }
 0x344   :  { %2981 = vst [vmem:[#allocation83_spill] sm:$0xff] %v2375_v21  ;;  %2982 = vst [vmem:[#allocation84_spill] sm:$0xff] %v2385_v0  ;;  %v836_v47 = vmul.f32 %v2159_v25, %v2385_v0  ;;  %v2983_v0 = vunpack.c.l.bf16 %v2018_v33 }
 0x347   :  { %697 = vadd.xlane.f32.xlu0 %v696_v22  ;;  %667 = vadd.xlane.f32.xlu1 %v666_v8  ;;  %v641_v22 = vmul.f32 %v2148_v18, %v2874_v61  ;;  %v825_v8 = vmul.f32 %v2159_v25, %v2367_v20  ;;  %v859_v61 = vsel %vm837_vm1, %v828_v6, 0.0  ;;  %v2396_v20 = vld [vmem:[%s2793_s4 + $0x14] sm:$0xf] }
 0x348   :  { %v826_v6 = vmul.f32 %v2159_v25, %v2396_v20 }
 0x349   :  { %v850_v29 = vsel %vm837_vm1, %v825_v8, 0.0  ;;  %v2407_v8 = vld [vmem:[%s2793_s4 + $0x18] sm:$0xf] }
 0x34b   :  { %878 = vadd.xlane.f32.xlu0 %v877_v15  ;;  %848 = vadd.xlane.f32.xlu1 %v847_v37  ;;  %v669_v37 = vsel %vm85_vm0, %v641_v22, 0.0  ;;  %v2879_v15 = vunpack.c.l.bf16 %v2375_v21  ;;  %v512_v21 = vmul.f32 %v2094_v63, %v2983_v0  ;;  %v2985_v0 = vunpack.c.l.bf16 %v1940_v19 }
 0x34d   :  { %v642_v22 = vmul.f32 %v2148_v18, %v2879_v15  ;;  %v853_v18 = vsel %vm837_vm1, %v826_v6, 0.0 }
 0x34f   :  { %881 = vadd.xlane.f32.xlu0 %v880_v51  ;;  %670 = vadd.xlane.f32.xlu1 %v669_v37  ;;  %v883_v51 = vsel %vm837_vm1, %v836_v47, 0.0  ;;  %v672_v37 = vsel %vm85_vm0, %v642_v22, 0.0  ;;  %v827_v47 = vmul.f32 %v2159_v25, %v2407_v8 }
 0x351   :  { %v856_v22 = vsel %vm837_vm1, %v827_v47, 0.0 }
 0x353   :  { %860 = vadd.xlane.f32.xlu0 %v859_v61  ;;  %851 = vadd.xlane.f32.xlu1 %v850_v29  ;;  %v544_v61 = vsel %vm85_vm0, %v512_v21, 0.0  ;;  %v2984_v29 = vunpack.c.l.bf16 %v2028_v7  ;;  %v2986_v21 = vunpack.c.l.bf16 %v1968_v26 }
 0x355   :  { %v513_v15 = vmul.f32 %v2094_v63, %v2984_v29  ;;  %v507_v7 = vmul.f32 %v2094_v63, %v2986_v21 }
 0x357   :  { %884 = vadd.xlane.f32.xlu0 %v883_v51  ;;  %673 = vadd.xlane.f32.xlu1 %v672_v37  ;;  %v547_v33 = vsel %vm85_vm0, %v513_v15, 0.0  ;;  %v506_v51 = vmul.f32 %v2094_v63, %v2985_v0  ;;  %v529_v6 = vsel %vm85_vm0, %v507_v7, 0.0  ;;  %v2987_v37 = vunpack.c.l.bf16 %v2048_v1 }
 0x358   :  { %v2988_v15 = vunpack.c.l.bf16 %v2038_v5  ;;  %v371_v5 = vadd.f32 %v1800_v40, %v1572_v49  ;;  %v379_v49 = vadd.f32 %v1814_v14, %v1772_v39  ;;  %v373_v39 = vadd.f32 %v1804_v10, %v1765_v30 }
 0x359   :  { %v526_v25 = vsel %vm85_vm0, %v506_v51, 0.0  ;;  %v381_v51 = vadd.f32 %v1818_v38, %v1776_v28 }
 0x35a   :  { %v514_v26 = vmul.f32 %v2094_v63, %v2988_v15  ;;  %v569_v21 = vadd.f32 %v2084_v34, %v371_v5  ;;  %v577_v38 = vadd.f32 %v2112_v24, %v379_v49  ;;  %v370_v5 = vadd.f32 %v1798_v43, %v1570_v48 }
 0x35b   :  { %545 = vadd.xlane.f32.xlu0 %v544_v61  ;;  %854 = vadd.xlane.f32.xlu1 %v853_v18  ;;  %v515_v18 = vmul.f32 %v2094_v63, %v2987_v37  ;;  %v2440_v61 = vpop.xlane.xlu1 %499  ;;  %v579_v7 = vadd.f32 %v2126_v41, %v381_v51 }
 0x35c   :  { %v550_v47 = vsel %vm85_vm0, %v514_v26, 0.0  ;;  %v372_v26 = vadd.f32 %v1802_v13, %v1754_v46  ;;  %v571_v13 = vadd.f32 %v2092_v23, %v373_v39  ;;  %v384_v23 = vadd.f32 %v1824_v59, %v1584_v56 }
 0x35d   :  { %v553_v19 = vsel %vm85_vm0, %v515_v18, 0.0 }
 0x35f   :  { %548 = vadd.xlane.f32.xlu0 %v547_v33  ;;  %857 = vadd.xlane.f32.xlu1 %v856_v22  ;;  %v380_v22 = vadd.f32 %v1816_v35, %v1580_v53  ;;  %v378_v53 = vadd.f32 %v1812_v17, %v1578_v52  ;;  %v382_v52 = vadd.f32 %v1820_v60, %v1582_v55 }
 0x360   :  { %v383_v60 = vadd.f32 %v1822_v3, %v1778_v11 }
 0x361   :  { %v578_v33 = vadd.f32 %v2114_v2, %v380_v22  ;;  %v576_v18 = vadd.f32 %v2110_v4, %v378_v53  ;;  %v580_v4 = vadd.f32 %v2082_v45, %v382_v52  ;;  %v582_v53 = vadd.f32 %v2090_v57, %v384_v23  ;;  %v2989_v52 = vld [vmem:[#allocation56_spill] sm:$0xff] }
 0x363   :  { %527 = vadd.xlane.f32.xlu0 %v526_v25 }
 0x367   :  { %530 = vadd.xlane.f32.xlu0 %v529_v6 }
 0x36b   :  { %554 = vadd.xlane.f32.xlu0 %v553_v19 }
 0x370   :  { %699 = vrot.lane.b32.xlu1 %v1491_v54, %s1309_s27 }
 0x38c   :  { %v2442_v29 = vpop.xlane.xlu0 %521  ;;  %v2444_v1 = vpop.xlane.xlu1 %524 }
 0x394   :  { %551 = vadd.xlane.f32.xlu1 %v550_v47  ;;  %v570_v47 = vadd.f32 %v2088_v58, %v372_v26  ;;  %v568_v58 = vadd.f32 %v2080_v12, %v370_v5  ;;  %v374_v12 = vadd.f32 %v1806_v36, %v1574_v50 }
 0x3a8   :  { %v683_v0 = vpop.xlane.xlu0 %682  ;;  %v653_v54 = vpop.xlane.xlu1 %652 }
 0x3a9   :  { %v776_v25 = vadd.f32 %v683_v0, %v578_v33 }
 0x3ac   :  { %v686_v6 = vpop.xlane.xlu0 %685  ;;  %v656_v37 = vpop.xlane.xlu1 %655 }
 0x3ad   :  { %v777_v35 = vadd.f32 %v686_v6, %v579_v7  ;;  %v767_v2 = vadd.f32 %v656_v37, %v569_v21  ;;  %v581_v21 = vadd.f32 %v2086_v32, %v383_v60  ;;  %v766_v7 = vadd.f32 %v653_v54, %v568_v58 }
 0x3b0   :  { %v843_v19 = vpop.xlane.xlu0 %842  ;;  %v677_v15 = vpop.xlane.xlu1 %676 }
 0x3b1   :  { %v955_v40 = vadd.f32 %v843_v19, %v767_v2  ;;  %v774_v28 = vadd.f32 %v677_v15, %v576_v18  ;;  %v572_v2 = vadd.f32 %v2096_v62, %v374_v12 }
 0x3b3   :  { %v1015_v48 = vrot.slane %v955_v40, %v1382_v9  ;;  %v1310_v40 = vmov 0  }
 0x3b4   :  { %v867_v34 = vpop.xlane.xlu0 %866  ;;  %v680_v41 = vpop.xlane.xlu1 %679  ;;  %1274 = vset.pattern.permute.xlu0 %v1310_v40  ;;  %v2997_v40 = vld [vmem:[#allocation55_spill] sm:$0xff] }
 0x3b5   :  { %v775_v17 = vadd.f32 %v680_v41, %v577_v38 }
 0x3b7   :  { %v963_v22 = vadd.f32 %v867_v34, %v775_v17  ;;  %v375_v34 = vadd.f32 %v1808_v27, %v1768_v42 }
 0x3b8   :  { %v689_v33 = vpop.xlane.xlu0 %688  ;;  %v659_v14 = vpop.xlane.xlu1 %658 }
 0x3b9   :  { %v778_v24 = vadd.f32 %v689_v33, %v580_v4  ;;  %v768_v0 = vadd.f32 %v659_v14, %v570_v47  ;;  %v1047_v18 = vrot.slane %v963_v22, %v1382_v9  ;;  %v573_v17 = vadd.f32 %v2989_v52, %v375_v34 }
 0x3bc   :  { %v870_v46 = vpop.xlane.xlu0 %869  ;;  %v662_v55 = vpop.xlane.xlu1 %661 }
 0x3bd   :  { %v964_v45 = vadd.f32 %v870_v46, %v776_v25  ;;  %v769_v51 = vadd.f32 %v662_v55, %v571_v13 }
 0x3bf   :  { %v1051_v56 = vrot.slane %v964_v45, %v1382_v9 }
 0x3c0   :  { %v692_v10 = vpop.xlane.xlu0 %691  ;;  %v840_v30 = vpop.xlane.xlu1 %839 }
 0x3c1   :  { %v779_v6 = vadd.f32 %v692_v10, %v581_v21  ;;  %v954_v37 = vadd.f32 %v840_v30, %v766_v7  ;;  %v2990_v7 = vld [vmem:[#allocation19_spill] sm:$0xff]  ;;  %v2991_v10 = vld [vmem:[#allocation30_spill] sm:$0xff] }
 0x3c2   :  { %v385_v30 = vadd.f32 %v2991_v10, %v2990_v7  ;;  %v3004_v10 = vunpack.c.l.bf16 %v2136_v31 }
 0x3c3   :  { %v1011_v43 = vrot.slane %v954_v37, %v1382_v9 }
 0x3c4   :  { %v873_v11 = vpop.xlane.xlu0 %872  ;;  %v864_v3 = vpop.xlane.xlu1 %863 }
 0x3c5   :  { %v1073_v32 = vsel %vm1072_vm2, %v1015_v48, %v1011_v43  ;;  %v965_v54 = vadd.f32 %v873_v11, %v777_v35  ;;  %v962_v25 = vadd.f32 %v864_v3, %v774_v28  ;;  %v2992_v48 = vld [vmem:[#allocation18_spill] sm:$0xff]  ;;  %v2993_v43 = vld [vmem:[#allocation28_spill] sm:$0xff]  ;;  %v583_v11 = vadd.f32 %v2440_v61, %v385_v30 }
 0x3c6   :  { %v377_v23 = vadd.f32 %v2993_v43, %v2992_v48  ;;  %v3005_v48 = vld [vmem:[#allocation6_spill] sm:$0xff] }
 0x3c7   :  { %v1043_v19 = vrot.slane %v962_v25, %v1382_v9  ;;  %v1055_v50 = vrot.slane %v965_v54, %v1382_v9  ;;  %v3006_v43 = vsub.s32 1, %v3005_v48  ;;  %v3027_v48 = vld [vmem:[#allocation68_spill] sm:$0xff] }
 0x3c8   :  { %v695_v59 = vpop.xlane.xlu0 %694  ;;  %v665_v15 = vpop.xlane.xlu1 %664 }
 0x3c9   :  { %v1086_v36 = vsel %vm1072_vm2, %v1047_v18, %v1043_v19  ;;  %v780_v35 = vadd.f32 %v695_v59, %v582_v53  ;;  %v770_v49 = vadd.f32 %v665_v15, %v572_v2  ;;  %v2995_v15 = vld [vmem:[#allocation9_spill] sm:$0xff] }
 0x3ca   :  { %v1087_v62 = vsel %vm1074_vm3, %v1051_v56, %v1086_v36 }
 0x3cb   :  { %v1088_v57 = vsel %vm1076_vm4, %v1055_v50, %v1087_v62  ;;  %v2996_v50 = vld [vmem:[#allocation29_spill] sm:$0xff] }
 0x3cc   :  { %v876_v28 = vpop.xlane.xlu0 %875  ;;  %v846_v38 = vpop.xlane.xlu1 %845  ;;  %v376_v36 = vadd.f32 %v2996_v50, %v2995_v15 }
 0x3cd   :  { %v966_v41 = vadd.f32 %v876_v28, %v778_v24  ;;  %v956_v26 = vadd.f32 %v846_v38, %v768_v0  ;;  %v2521_v38 = vld [vmem:[%s2794_s5 + $0x8] sm:$0xff] }
 0x3ce   :  { %vm989_vm9 = vcmp.gt.f32.partialorder %v2521_v38, 0.0 }
 0x3cf   :  { %v1059_v4 = vrot.slane %v966_v41, %v1382_v9  ;;  %v1019_v47 = vrot.slane %v956_v26, %v1382_v9 }
 0x3d0   :  { %v698_v22 = vpop.xlane.xlu0 %697  ;;  %v668_v33 = vpop.xlane.xlu1 %667 }
 0x3d1   :  { %v1089_v14 = vsel %vm1078_vm5, %v1059_v4, %v1088_v57  ;;  %v1075_v39 = vsel %vm1074_vm3, %v1019_v47, %v1073_v32  ;;  %v771_v5 = vadd.f32 %v668_v33, %v573_v17  ;;  %v2994_v32 = vld [vmem:[#allocation57_spill] sm:$0xff]  ;;  %v781_v25 = vadd.f32 %v698_v22, %v583_v11 }
 0x3d2   :  { %v575_v54 = vadd.f32 %v2994_v32, %v377_v23  ;;  %v2528_v17 = vld [vmem:[%s2794_s5] sm:$0xff]  ;;  %v3007_v23 = vld [vmem:[#allocation7_spill] sm:$0xff]  ;;  %s1311_s5 = smov [#allocation3]  }
 0x3d3   :  { %vm988_vm11 = vcmp.gt.f32.partialorder %v2528_v17, 0.0  ;;  %v3008_v11 = vrot.slane %v3007_v23, 2  ;;  %s1260_s17 = sshll.u32 %s1311_s5, 4  ;;  %s1261_s17 = int_to_ptr.vmem [resolvable:$true] %s1260_s17 }
 0x3d4   :  { %v879_v13 = vpop.xlane.xlu0 %878  ;;  %v849_v46 = vpop.xlane.xlu1 %848  ;;  %s1285_s18 = scalar_lea.vmem %s1261_s17, 16  ;;  %s1289_s19 = scalar_lea.vmem %s1261_s17, 32 }
 0x3d5   :  { %v967_v55 = vadd.f32 %v879_v13, %v779_v6  ;;  %v957_v27 = vadd.f32 %v849_v46, %v769_v51  ;;  %p1286_p0 = scmp.ne.s32.totalorder %s1261_s17, %s1285_s18  ;;  %p1290_p1 = scmp.lt.s32.totalorder %s1261_s17, %s1261_s17 }
 0x3d6   :  { %p1291_p2 = scmp.lt.s32.totalorder %s1289_s19, %s1285_s18 }
 0x3d7   :  { %v1063_v42 = vrot.slane %v967_v55, %v1382_v9  ;;  %v1023_v24 = vrot.slane %v957_v27, %v1382_v9  ;;  %v3000_v55 = vld [vmem:[#allocation59_spill] sm:$0xff] }
 0x3d8   :  { %v882_v0 = vpop.xlane.xlu0 %881  ;;  %v671_v60 = vpop.xlane.xlu1 %670  ;;  %v3001_v27 = vunpack.c.l.bf16 %v3000_v55  ;;  %p1292_p3 = por %p1291_p2, %p1290_p1 }
 0x3d9   :  { %v1090_v58 = vsel %vm1080_vm6, %v1063_v42, %v1089_v14  ;;  %v1077_v45 = vsel %vm1076_vm4, %v1023_v24, %v1075_v39  ;;  %v968_v21 = vadd.f32 %v882_v0, %v780_v35  ;;  %v3002_v0 = vld [vmem:[#allocation47_spill] sm:$0xff] }
 0x3da   :  { %p1293_p4 = pnand %p1292_p3, %p1286_p0 }
 0x3db   :  { %v1067_v37 = vrot.slane %v968_v21, %v1382_v9 }
 0x3dc   :  { %v861_v6 = vpop.xlane.xlu0 %860  ;;  %v852_v51 = vpop.xlane.xlu1 %851 }
 0x3dd   :  { %v1091_v3 = vsel %vm1082_vm7, %v1067_v37, %v1090_v58  ;;  %v958_v12 = vadd.f32 %v852_v51, %v770_v49  ;;  %v574_v49 = vadd.f32 %v2997_v40, %v376_v36 }
 0x3df   :  { %v1027_v53 = vrot.slane %v958_v12, %v1382_v9  ;;  %v772_v28 = vadd.f32 %v671_v60, %v574_v49  ;;  %v3003_v60 = vunpack.c.l.bf16 %v3002_v0 }
 0x3e0   :  { %v885_v2 = vpop.xlane.xlu0 %884  ;;  %v674_v18 = vpop.xlane.xlu1 %673 }
 0x3e1   :  { %v1079_v19 = vsel %vm1078_vm5, %v1027_v53, %v1077_v45  ;;  %v969_v56 = vadd.f32 %v885_v2, %v781_v25  ;;  %v773_v59 = vadd.f32 %v674_v18, %v575_v54  ;;  %v517_v58 = vmul.f32 %v2094_v63, %v3003_v60  ;;  %v3009_v54 = vld [vmem:[#allocation60_spill] sm:$0xff]  ;;  %v3011_v2 = vld [vmem:[#allocation61_spill] sm:$0xff] }
 0x3e2   :  { %v3010_v25 = vunpack.c.l.bf16 %v3009_v54  ;;  %v3012_v18 = vunpack.c.l.bf16 %v3011_v2 }
 0x3e3   :  { %v1071_v61 = vrot.slane %v969_v56, %v1382_v9  ;;  %v961_v41 = vadd.f32 %v861_v6, %v773_v59  ;;  %v559_v12 = vsel %vm85_vm0, %v517_v58, 0.0  ;;  %v3013_v59 = vld [vmem:[#allocation62_spill] sm:$0xff] }
 0x3e4   :  { %v855_v35 = vpop.xlane.xlu1 %854 }
 0x3e5   :  { %v1092_v62 = vsel %vm1084_vm8, %v1071_v61, %v1091_v3  ;;  %v959_v57 = vadd.f32 %v855_v35, %v771_v5  ;;  %v1039_v22 = vrot.slane %v961_v41, %v1382_v9  ;;  %v2998_v5 = vld [vmem:[#allocation58_spill] sm:$0xff]  ;;  %v2558_v3 = vrot.slane %v3008_v11, %v3006_v43  ;;  %v3014_v35 = vld [vmem:[#allocation63_spill] sm:$0xff] }
 0x3e6   :  { %v1096_v14 = vsel %vm989_vm9, %v1092_v62, -1e+30  ;;  %v2999_v13 = vunpack.c.l.bf16 %v2998_v5  ;;  %v3015_v40 = vunpack.c.l.bf16 %v3014_v35  ;;  %v3019_v5 = vld [vmem:[#allocation48_spill] sm:$0xff]  ;;  %v3035_v35 = vld [vmem:[#allocation69_spill] sm:$0xff] }
 0x3e7   :  { %v1031_v34 = vrot.slane %v959_v57, %v1382_v9  ;;  %v1099_v37 = vsel %vm1097_vm10, %v1096_v14, -inf  ;;  %v891_v15 = vmul.f32 %v2558_v3, %v3013_v59  ;;  %v900_v43 = vmul.f32 %v2558_v3, %v3027_v48 }
 0x3e8   :  { %v858_v26 = vpop.xlane.xlu1 %857  ;;  %v892_v48 = vmul.f32 %v2558_v3, %v2294_v16 }
 0x3e9   :  { %v1081_v52 = vsel %vm1080_vm6, %v1031_v34, %v1079_v19  ;;  %v960_v4 = vadd.f32 %v858_v26, %v772_v28  ;;  %v909_v57 = vsel %vm837_vm1, %v891_v15, 0.0  ;;  %v3016_v28 = vld [vmem:[#allocation64_spill] sm:$0xff]  ;;  %v936_v54 = vsel %vm837_vm1, %v900_v43, 0.0  ;;  %v3034_v15 = vld [vmem:[#allocation70_spill] sm:$0xff] }
 0x3ea   :  { %v899_v34 = vmul.f32 %v2558_v3, %v3016_v28 }
 0x3eb   :  { %v1035_v47 = vrot.slane %v960_v4, %v1382_v9 }
 0x3ec   :  { %v2534_v33 = vpop.permute.xlu1 %699 }
 0x3ed   :  { %v1083_v39 = vsel %vm1082_vm7, %v1035_v47, %v1081_v52  ;;  %v712_v46 = vmul.f32 %v2534_v33, %v2999_v13  ;;  %v702_v42 = vmul.f32 %v2534_v33, %v3001_v27  ;;  %v703_v30 = vmul.f32 %v2534_v33, %v3004_v10  ;;  %v3017_v52 = vld [vmem:[#allocation49_spill] sm:$0xff] }
 0x3ee   :  { %v1085_v24 = vsel %vm1084_vm8, %v1039_v22, %v1083_v39  ;;  %v713_v53 = vmul.f32 %v2534_v33, %v3010_v25  ;;  %v710_v19 = vmul.f32 %v2534_v33, %v3012_v18  ;;  %v711_v49 = vmul.f32 %v2534_v33, %v3015_v40 }
 0x3ef   :  { %v1095_v45 = vsel %vm988_vm11, %v1085_v24, -1e+30  ;;  %v748_v21 = vsel %vm85_vm0, %v712_v46, 0.0  ;;  %v718_v7 = vsel %vm85_vm0, %v702_v42, 0.0  ;;  %v721_v31 = vsel %vm85_vm0, %v703_v30, 0.0  ;;  %v3021_v24 = vld [vmem:[#allocation46_spill] sm:$0xff] }
 0x3f0   :  { %v1098_v6 = vsel %vm1097_vm10, %v1095_v45, -inf  ;;  %749 = vadd.xlane.f32.xlu1 %v748_v21  ;;  %719 = vadd.xlane.f32.xlu0 %v718_v7  ;;  %v751_v36 = vsel %vm85_vm0, %v713_v53, 0.0  ;;  %v742_v61 = vsel %vm85_vm0, %v710_v19, 0.0  ;;  %v745_v26 = vsel %vm85_vm0, %v711_v49, 0.0  ;;  %v3023_v30 = vld [vmem:[#allocation65_spill] sm:$0xff]  ;;  %v3030_v53 = vld [vmem:[#allocation52_spill] sm:$0xff] }
 0x3f1   :  { %v1100_v51 = vmax.f32 %v1098_v6, %v1099_v37  ;;  %v3018_v4 = vunpack.c.l.bf16 %v3017_v52  ;;  %v933_v39 = vsel %vm837_vm1, %v899_v34, 0.0  ;;  %v3020_v13 = vunpack.c.l.bf16 %v3019_v5  ;;  %v3032_v19 = vld [vmem:[#allocation67_spill] sm:$0xff]  ;;  %v3038_v52 = vld [vmem:[#allocation72_spill] sm:$0xff] }
 0x3f2   :  { %v3022_v0 = vunpack.c.l.bf16 %v3021_v24  ;;  %v3024_v37 = vunpack.c.l.bf16 %v3023_v30  ;;  %v3031_v2 = vunpack.c.l.bf16 %v3030_v53  ;;  %v3036_v40 = vunpack.c.l.bf16 %v3035_v35  ;;  %v3041_v24 = vld [vmem:[#allocation44_spill] sm:$0xff] }
 0x3f3   :  { %v1101_v32 = vrot.slane %v1100_v51, 4  ;;  %v508_v47 = vmul.f32 %v2094_v63, %v3018_v4  ;;  %v518_v46 = vmul.f32 %v2094_v63, %v3020_v13  ;;  %v898_v4 = vmul.f32 %v2558_v3, %v3038_v52  ;;  %v3055_v52 = vld [vmem:[#allocation80_spill] sm:$0xff] }
 0x3f4   :  { %560 = vadd.xlane.f32.xlu1 %v559_v12  ;;  %722 = vadd.xlane.f32.xlu0 %v721_v31  ;;  %v516_v60 = vmul.f32 %v2094_v63, %v3022_v0  ;;  %v3028_v12 = vld [vmem:[#allocation50_spill] sm:$0xff]  ;;  %v519_v18 = vmul.f32 %v2094_v63, %v3031_v2  ;;  %v715_v49 = vmul.f32 %v2534_v33, %v3036_v40 }
 0x3f5   :  { %v1102_v56 = vmax.f32 %v1100_v51, %v1101_v32  ;;  %v532_v42 = vsel %vm85_vm0, %v508_v47, 0.0  ;;  %v562_v7 = vsel %vm85_vm0, %v518_v46, 0.0  ;;  %v3029_v32 = vunpack.c.l.bf16 %v3028_v12 }
 0x3f6   :  { %v556_v10 = vsel %vm85_vm0, %v516_v60, 0.0  ;;  %v930_v13 = vsel %vm837_vm1, %v898_v4, 0.0  ;;  %v3056_v4 = vunpack.c.l.bf16 %v3055_v52 }
 0x3f7   :  { %v1103_v50 = vrot.slane %v1102_v56, 2  ;;  %v509_v31 = vmul.f32 %v2094_v63, %v3029_v32 }
 0x3f8   :  { %752 = vadd.xlane.f32.xlu1 %v751_v36  ;;  %743 = vadd.xlane.f32.xlu0 %v742_v61  ;;  %v565_v36 = vsel %vm85_vm0, %v519_v18, 0.0 }
 0x3f9   :  { %v1104_v62 = vmax.f32 %v1102_v56, %v1103_v50  ;;  %v535_v25 = vsel %vm85_vm0, %v509_v31, 0.0  ;;  %v3033_v56 = vunpack.c.l.bf16 %v3032_v19  ;;  %v890_v50 = vmul.f32 %v2558_v3, %v3034_v15  ;;  %v3049_v19 = vld [vmem:[#allocation51_spill] sm:$0xff] }
 0x3fa   :  { %v3050_v16 = vunpack.c.l.bf16 %v3049_v19 }
 0x3fb   :  { %v1105_v41 = vrot.slane %v1104_v62, 1  ;;  %v705_v59 = vmul.f32 %v2534_v33, %v3033_v56  ;;  %v906_v34 = vsel %vm837_vm1, %v890_v50, 0.0  ;;  %v904_v50 = vmul.f32 %v2558_v3, %v2350_v44 }
 0x3fc   :  { %910 = vadd.xlane.f32.xlu1 %v909_v57  ;;  %746 = vadd.xlane.f32.xlu0 %v745_v26  ;;  %v511_v56 = vmul.f32 %v2094_v63, %v3050_v16 }
 0x3fd   :  { %v1106_v22 = vmax.f32 %v1104_v62, %v1105_v41  ;;  %v727_v61 = vsel %vm85_vm0, %v705_v59, 0.0  ;;  %v3037_v41 = vld [vmem:[#allocation71_spill] sm:$0xff] }
 0x3fe   :  { %v901_v26 = vmul.f32 %v2558_v3, %v3037_v41 }
 0x3ff   :  { %v1107_v55 = vsub.f32 %v1095_v45, %v1106_v22  ;;  %v1108_v27 = vsub.f32 %v1096_v14, %v1106_v22  ;;  %v714_v45 = vmul.f32 %v2534_v33, %v3024_v37  ;;  %v3025_v14 = vld [vmem:[#allocation66_spill] sm:$0xff] }
 0x400   :  { %934 = vadd.xlane.f32.xlu1 %v933_v39  ;;  %533 = vadd.xlane.f32.xlu0 %v532_v42  ;;  %v3026_v6 = vunpack.c.l.bf16 %v3025_v14  ;;  %v757_v39 = vsel %vm85_vm0, %v715_v49, 0.0  ;;  %v939_v5 = vsel %vm837_vm1, %v901_v26, 0.0  ;;  %v3044_v37 = vld [vmem:[#allocation74_spill] sm:$0xff]  ;;  %v948_v49 = vsel %vm837_vm1, %v904_v50, 0.0  ;;  %v3067_v50 = vld [vmem:[#allocation24_spill] sm:$0xff] }
 0x401   :  { %v1109_v58 = vmul.f32 1.442695, %v1107_v55  ;;  %v1111_v21 = vmul.f32 1.442695, %v1108_v27  ;;  %v754_v23 = vsel %vm85_vm0, %v714_v45, 0.0  ;;  %v3039_v55 = vld [vmem:[#allocation73_spill] sm:$0xff]  ;;  %v3045_v45 = vunpack.c.l.bf16 %v3044_v37 }
 0x402   :  { %v704_v51 = vmul.f32 %v2534_v33, %v3026_v6  ;;  %v3040_v27 = vunpack.c.l.bf16 %v3039_v55 }
 0x403   :  { %1275 = vpow2.f32 %v1109_v58  ;;  %v3043_v58 = vld [vmem:[#allocation75_spill] sm:$0xff]  ;;  %v706_v14 = vmul.f32 %v2534_v33, %v3045_v45 }
 0x404   :  { %1277 = vpow2.f32 %v1111_v21  ;;  %563 = vadd.xlane.f32.xlu1 %v562_v7  ;;  %557 = vadd.xlane.f32.xlu0 %v556_v10  ;;  %v724_v11 = vsel %vm85_vm0, %v704_v51, 0.0  ;;  %v716_v42 = vmul.f32 %v2534_v33, %v3040_v27  ;;  %v902_v21 = vmul.f32 %v2558_v3, %v3043_v58 }
 0x406   :  { %v760_v10 = vsel %vm85_vm0, %v716_v42, 0.0  ;;  %v942_v51 = vsel %vm837_vm1, %v902_v21, 0.0  ;;  %v3058_v42 = vld [vmem:[#allocation83_spill] sm:$0xff]  ;;  %v3060_v21 = vld [vmem:[#allocation81_spill] sm:$0xff] }
 0x408   :  { %755 = vadd.xlane.f32.xlu1 %v754_v23  ;;  %725 = vadd.xlane.f32.xlu0 %v724_v11  ;;  %v730_v23 = vsel %vm85_vm0, %v706_v14, 0.0  ;;  %v3046_v11 = vld [vmem:[#allocation76_spill] sm:$0xff] }
 0x409   :  { %v3047_v12 = vunpack.c.l.bf16 %v3046_v11  ;;  %v3063_v11 = vld [vmem:[#allocation20_spill] sm:$0xff] }
 0x40b   :  { %v717_v32 = vmul.f32 %v2534_v33, %v3047_v12  ;;  %v3064_v12 = vld [vmem:[#allocation32_spill] sm:$0xff] }
 0x40c   :  { %937 = vadd.xlane.f32.xlu1 %v936_v54  ;;  %536 = vadd.xlane.f32.xlu0 %v535_v25  ;;  %v912_v54 = vsel %vm837_vm1, %v892_v48, 0.0  ;;  %v3048_v25 = vld [vmem:[#allocation78_spill] sm:$0xff] }
 0x40d   :  { %v903_v53 = vmul.f32 %v2558_v3, %v3048_v25  ;;  %v763_v18 = vsel %vm85_vm0, %v717_v32, 0.0  ;;  %v387_v32 = vadd.f32 %v3064_v12, %v3063_v11 }
 0x40f   :  { %v945_v15 = vsel %vm837_vm1, %v903_v53, 0.0 }
 0x410   :  { %v1276_v62 = vpop.eup %1275  ;;  %566 = vadd.xlane.f32.xlu1 %v565_v36  ;;  %728 = vadd.xlane.f32.xlu0 %v727_v61  ;;  %v541_v36 = vsel %vm85_vm0, %v511_v56, 0.0  ;;  %v3051_v61 = vld [vmem:[#allocation77_spill] sm:$0xff] }
 0x411   :  { %v1278_v57 = vpop.eup %1277  ;;  %v2621_v28 = vmul.f32 %v1276_v62, %v2528_v17  ;;  %v3052_v35 = vunpack.c.l.bf16 %v3051_v61 }
 0x412   :  { %v1114_v47 = vmul.f32 %v1278_v57, %v2521_v38  ;;  %v3042_v38 = vunpack.c.l.bf16 %v3041_v24  ;;  %v3054_v57 = vld [vmem:[#allocation79_spill] sm:$0xff]  ;;  %v3059_v24 = vunpack.c.l.bf16 %v3058_v42 }
 0x413   :  { %v1115_v22 = vsel %vm1097_vm10, %v2621_v28, 0.0  ;;  %v707_v40 = vmul.f32 %v2534_v33, %v3052_v35 }
 0x414   :  { %758 = vadd.xlane.f32.xlu1 %v757_v39  ;;  %907 = vadd.xlane.f32.xlu0 %v906_v34  ;;  %v1116_v17 = vsel %vm1097_vm10, %v1114_v47, 0.0  ;;  %v510_v0 = vmul.f32 %v2094_v63, %v3042_v38  ;;  %v3053_v63 = vld [vmem:[#allocation84_spill] sm:$0xff]  ;;  %v893_v34 = vmul.f32 %v2558_v3, %v3054_v57  ;;  %v3057_v39 = vld [vmem:[#allocation82_spill] sm:$0xff]  ;;  %v709_v38 = vmul.f32 %v2534_v33, %v3059_v24 }
 0x415   :  { %v1117_v46 = vadd.f32 %v1116_v17, %v1115_v22  ;;  %v905_v62 = vmul.f32 %v2558_v3, %v3053_v63  ;;  %v733_v41 = vsel %vm85_vm0, %v707_v40, 0.0  ;;  %v708_v22 = vmul.f32 %v2534_v33, %v3056_v4 }
 0x416   :  { %v538_v30 = vsel %vm85_vm0, %v510_v0, 0.0  ;;  %v915_v26 = vsel %vm837_vm1, %v893_v34, 0.0  ;;  %v894_v17 = vmul.f32 %v2558_v3, %v3057_v39  ;;  %v895_v0 = vmul.f32 %v2558_v3, %v2396_v20  ;;  %v546_v20 = vpop.xlane.xlu0 %545 }
 0x417   :  { %v1118_v60 = vrot.slane %v1117_v46, 4  ;;  %v951_v44 = vsel %vm837_vm1, %v905_v62, 0.0 }
 0x418   :  { %940 = vadd.xlane.f32.xlu1 %v939_v5  ;;  %931 = vadd.xlane.f32.xlu0 %v930_v13  ;;  %v736_v13 = vsel %vm85_vm0, %v708_v22, 0.0  ;;  %v918_v27 = vsel %vm837_vm1, %v894_v17, 0.0 }
 0x419   :  { %v1119_v7 = vadd.f32 %v1118_v60, %v1117_v46  ;;  %v739_v60 = vsel %vm85_vm0, %v709_v38, 0.0 }
 0x41b   :  { %v1120_v6 = vrot.slane %v1119_v7, 2 }
 0x41c   :  { %761 = vadd.xlane.f32.xlu1 %v760_v10  ;;  %539 = vadd.xlane.f32.xlu0 %v538_v30  ;;  %v1235_v10 = vld [vmem:[#allocation2] sm:$0x1]  ;;  %v549_v30 = vpop.xlane.xlu0 %548 }
 0x41d   :  { %v1121_v43 = vadd.f32 %v1120_v6, %v1119_v7  ;;  %v897_v7 = vmul.f32 %v2558_v3, %v3060_v21  ;;  %v3061_v6 = vld [vmem:[#allocation10_spill] sm:$0xff] }
 0x41f   :  { %v1122_v31 = vrot.slane %v1121_v43, 1  ;;  %v927_v33 = vsel %vm837_vm1, %v897_v7, 0.0 }
 0x420   :  { %943 = vadd.xlane.f32.xlu1 %v942_v51  ;;  %731 = vadd.xlane.f32.xlu0 %v730_v23  ;;  %v528_v37 = vpop.xlane.xlu0 %527  ;;  %v3062_v51 = vld [vmem:[#allocation31_spill] sm:$0xff] }
 0x421   :  { %v1123_v2 = vadd.f32 %v1122_v31, %v1121_v43  ;;  %v386_v48 = vadd.f32 %v3062_v51, %v3061_v6 }
 0x423   :  { %v1124_v59 = vmax.f32 %v1123_v2, 1e-20  ;;  %v584_v43 = vadd.f32 %v2442_v29, %v386_v48  ;;  %v3065_v2 = vld [vmem:[#allocation14_spill] sm:$0xff] }
 0x424   :  { %764 = vadd.xlane.f32.xlu1 %v763_v18  ;;  %913 = vadd.xlane.f32.xlu0 %v912_v54  ;;  %v2702_v45 = vpop.xlane.xlu0 %530  ;;  %v585_v54 = vadd.f32 %v2444_v1, %v387_v32  ;;  %v3066_v18 = vld [vmem:[#allocation38_spill] sm:$0xff]  ;;  %v3073_v32 = vld [vmem:[#allocation16_spill] sm:$0xff] }
 0x425   :  { %1279 = vrcp.f32 %v1124_v59  ;;  %v394_v19 = vadd.f32 %v3066_v18, %v3065_v2 }
 0x427   :  { %v592_v56 = vadd.f32 %v546_v20, %v394_v19  ;;  %v3070_v20 = vld [vmem:[#allocation33_spill] sm:$0xff] }
 0x428   :  { %946 = vadd.xlane.f32.xlu1 %v945_v15  ;;  %542 = vadd.xlane.f32.xlu0 %v541_v36  ;;  %v2704_v14 = vpop.xlane.xlu0 %554  ;;  %v3068_v36 = vld [vmem:[#allocation39_spill] sm:$0xff]  ;;  %v3075_v19 = vld [vmem:[#allocation25_spill] sm:$0xff] }
 0x429   :  { %v395_v29 = vadd.f32 %v3068_v36, %v3067_v50  ;;  %v3078_v50 = vld [vmem:[#allocation43_spill] sm:$0xff] }
 0x42b   :  { %v593_v35 = vadd.f32 %v549_v30, %v395_v29 }
 0x42c   :  { %949 = vadd.xlane.f32.xlu1 %v948_v49  ;;  %734 = vadd.xlane.f32.xlu0 %v733_v41 }
 0x430   :  { %952 = vadd.xlane.f32.xlu1 %v951_v44  ;;  %916 = vadd.xlane.f32.xlu0 %v915_v26 }
 0x432   :  { %v1280_v5 = vpop.eup %1279 }
 0x433   :  { %v2683_v46 = vmul.f32 %v1280_v5, %v1114_v47  ;;  %v2686_v55 = vmul.f32 %v1280_v5, %v2621_v28  ;;  %v921_v47 = vsel %vm837_vm1, %v895_v0, 0.0  ;;  %v896_v28 = vmul.f32 %v2558_v3, %v2407_v8  ;;  %v552_v8 = vpop.xlane.xlu1 %551 }
 0x434   :  { %737 = vadd.xlane.f32.xlu0 %v736_v13 }
 0x435   :  { %v924_v58 = vsel %vm837_vm1, %v896_v28, 0.0 }
 0x438   :  { %919 = vadd.xlane.f32.xlu0 %v918_v27 }
 0x43c   :  { %740 = vadd.xlane.f32.xlu0 %v739_v60 }
 0x440   :  { %922 = vadd.xlane.f32.xlu0 %v921_v47 }
 0x444   :  { %925 = vadd.xlane.f32.xlu0 %v924_v58 }
 0x448   :  { %928 = vadd.xlane.f32.xlu0 %v927_v33 }
 0x45e   :  { %1238 = vperm.xlu0 %1274, %v1235_v10   ;;  %v3069_v10 = vld [vmem:[#allocation11_spill] sm:$0xff] }
 0x45f   :  { %v388_v30 = vadd.f32 %v3070_v20, %v3069_v10  ;;  %v3084_v10 = vld [vmem:[#allocation34_spill] sm:$0xff] }
 0x461   :  { %v586_v48 = vadd.f32 %v528_v37, %v388_v30  ;;  %v3079_v37 = vld [vmem:[#allocation17_spill] sm:$0xff] }
 0x479   :  { %v720_v3 = vpop.xlane.xlu0 %719  ;;  %v750_v23 = vpop.xlane.xlu1 %749 }
 0x47a   :  { %v782_v31 = vadd.f32 %v720_v3, %v584_v43  ;;  %v3071_v43 = vld [vmem:[#allocation15_spill] sm:$0xff]  ;;  %v3072_v3 = vld [vmem:[#allocation40_spill] sm:$0xff] }
 0x47b   :  { %v396_v11 = vadd.f32 %v3072_v3, %v3071_v43 }
 0x47d   :  { %v723_v25 = vpop.xlane.xlu0 %722  ;;  %v561_v53 = vpop.xlane.xlu1 %560 }
 0x47e   :  { %v783_v16 = vadd.f32 %v723_v25, %v585_v54  ;;  %v594_v25 = vadd.f32 %v552_v8, %v396_v11 }
 0x481   :  { %v744_v59 = vpop.xlane.xlu0 %743  ;;  %v753_v15 = vpop.xlane.xlu1 %752 }
 0x482   :  { %v790_v61 = vadd.f32 %v744_v59, %v592_v56  ;;  %v3077_v59 = vld [vmem:[#allocation26_spill] sm:$0xff] }
 0x483   :  { %v399_v36 = vadd.f32 %v3078_v50, %v3077_v59 }
 0x485   :  { %v747_v40 = vpop.xlane.xlu0 %746  ;;  %v911_v49 = vpop.xlane.xlu1 %910 }
 0x486   :  { %v791_v63 = vadd.f32 %v747_v40, %v593_v35  ;;  %v971_v39 = vadd.f32 %v911_v49, %v783_v16  ;;  %v3076_v16 = vld [vmem:[#allocation41_spill] sm:$0xff] }
 0x487   :  { %v397_v56 = vadd.f32 %v3076_v16, %v3075_v19  ;;  %v3080_v40 = vld [vmem:[#allocation45_spill] sm:$0xff] }
 0x488   :  { %v1151_v27 = vrot.slane %v971_v39, %v1382_v9  ;;  %v400_v49 = vadd.f32 %v3080_v40, %v3079_v37 }
 0x489   :  { %v2716_v62 = vpop.xlane.xlu0 %533  ;;  %v935_v1 = vpop.xlane.xlu1 %934 }
 0x48a   :  { %v979_v42 = vadd.f32 %v935_v1, %v791_v63  ;;  %v595_v63 = vadd.f32 %v2704_v14, %v397_v56  ;;  %v597_v1 = vadd.f32 %v561_v53, %v399_v36 }
 0x48c   :  { %v1183_v28 = vrot.slane %v979_v42, %v1382_v9 }
 0x48d   :  { %v558_v57 = vpop.xlane.xlu0 %557  ;;  %v564_v34 = vpop.xlane.xlu1 %563 }
 0x48e   :  { %v598_v42 = vadd.f32 %v564_v34, %v400_v49 }
 0x491   :  { %v726_v41 = vpop.xlane.xlu0 %725  ;;  %v756_v44 = vpop.xlane.xlu1 %755 }
 0x492   :  { %v784_v12 = vadd.f32 %v726_v41, %v586_v48 }
 0x495   :  { %v2718_v26 = vpop.xlane.xlu0 %536  ;;  %v938_v52 = vpop.xlane.xlu1 %937 }
 0x499   :  { %v729_v4 = vpop.xlane.xlu0 %728  ;;  %v567_v22 = vpop.xlane.xlu1 %566 }
 0x49d   :  { %v908_v17 = vpop.xlane.xlu0 %907  ;;  %v759_v5 = vpop.xlane.xlu1 %758 }
 0x49e   :  { %v970_v13 = vadd.f32 %v908_v17, %v782_v31  ;;  %v3074_v31 = vld [vmem:[#allocation42_spill] sm:$0xff] }
 0x49f   :  { %v398_v54 = vadd.f32 %v3074_v31, %v3073_v32 }
 0x4a0   :  { %v1147_v24 = vrot.slane %v970_v13, %v1382_v9 }
 0x4a1   :  { %v932_v38 = vpop.xlane.xlu0 %931  ;;  %v941_v0 = vpop.xlane.xlu1 %940  ;;  %v596_v35 = vadd.f32 %v558_v57, %v398_v54 }
 0x4a2   :  { %v1208_v60 = vsel %vm1072_vm2, %v1151_v27, %v1147_v24  ;;  %v978_v47 = vadd.f32 %v932_v38, %v790_v61  ;;  %v792_v61 = vadd.f32 %v750_v23, %v594_v25  ;;  %v793_v27 = vadd.f32 %v753_v15, %v595_v63  ;;  %v3082_v23 = vld [vmem:[#allocation54_spill] sm:$0xff]  ;;  %v3085_v25 = vld [vmem:[#allocation12_spill] sm:$0xff] }
 0x4a3   :  { %v794_v8 = vadd.f32 %v756_v44, %v596_v35  ;;  %v795_v24 = vadd.f32 %v759_v5, %v597_v1  ;;  %v3087_v63 = vld [vmem:[#allocation22_spill] sm:$0xff]  ;;  %v3088_v1 = vld [vmem:[#allocation53_spill] sm:$0xff] }
 0x4a4   :  { %v1179_v58 = vrot.slane %v978_v47, %v1382_v9  ;;  %v980_v39 = vadd.f32 %v938_v52, %v792_v61  ;;  %v3081_v47 = vld [vmem:[#allocation27_spill] sm:$0xff]  ;;  %v981_v14 = vadd.f32 %v941_v0, %v793_v27 }
 0x4a5   :  { %v2725_v21 = vpop.xlane.xlu0 %539  ;;  %v762_v7 = vpop.xlane.xlu1 %761  ;;  %v401_v57 = vadd.f32 %v3082_v23, %v3081_v47 }
 0x4a6   :  { %v1215_v33 = vsel %vm1072_vm2, %v1183_v28, %v1179_v58  ;;  %v3083_v58 = vld [vmem:[#allocation21_spill] sm:$0xff]  ;;  %v796_v53 = vadd.f32 %v762_v7, %v598_v42  ;;  %v1187_v44 = vrot.slane %v980_v39, %v1382_v9 }
 0x4a7   :  { %v389_v20 = vadd.f32 %v3084_v10, %v3083_v58  ;;  %v599_v34 = vadd.f32 %v567_v22, %v401_v57  ;;  %v3089_v39 = vld [vmem:[#allocation13_spill] sm:$0xff] }
 0x4a9   :  { %v732_v6 = vpop.xlane.xlu0 %731  ;;  %v944_v51 = vpop.xlane.xlu1 %943  ;;  %v587_v15 = vadd.f32 %v2702_v45, %v389_v20 }
 0x4aa   :  { %v982_v28 = vadd.f32 %v944_v51, %v794_v8  ;;  %v1191_v51 = vrot.slane %v981_v14, %v1382_v9 }
 0x4ab   :  { %v785_v3 = vadd.f32 %v729_v4, %v587_v15 }
 0x4ac   :  { %v1195_v43 = vrot.slane %v982_v28, %v1382_v9 }
 0x4ad   :  { %v914_v2 = vpop.xlane.xlu0 %913  ;;  %v765_v18 = vpop.xlane.xlu1 %764 }
 0x4ae   :  { %v972_v29 = vadd.f32 %v914_v2, %v784_v12  ;;  %v797_v11 = vadd.f32 %v765_v18, %v599_v34 }
 0x4b0   :  { %v1155_v41 = vrot.slane %v972_v29, %v1382_v9 }
 0x4b1   :  { %v543_v17 = vpop.xlane.xlu0 %542  ;;  %v947_v13 = vpop.xlane.xlu1 %946 }
 0x4b2   :  { %v1209_v38 = vsel %vm1074_vm3, %v1155_v41, %v1208_v60  ;;  %v983_v30 = vadd.f32 %v947_v13, %v795_v24  ;;  %v1216_v60 = vsel %vm1074_vm3, %v1187_v44, %v1215_v33  ;;  %v3086_v33 = vld [vmem:[#allocation35_spill] sm:$0xff]  ;;  %v391_v41 = vadd.f32 %v3088_v1, %v3087_v63  ;;  %v3090_v13 = vld [vmem:[#allocation36_spill] sm:$0xff] }
 0x4b3   :  { %v1217_v31 = vsel %vm1076_vm4, %v1191_v51, %v1216_v60  ;;  %v390_v2 = vadd.f32 %v3086_v33, %v3085_v25 }
 0x4b4   :  { %v1199_v0 = vrot.slane %v983_v30, %v1382_v9  ;;  %v1218_v22 = vsel %vm1078_vm5, %v1195_v43, %v1217_v31  ;;  %v589_v27 = vadd.f32 %v2718_v26, %v391_v41 }
 0x4b5   :  { %v735_v52 = vpop.xlane.xlu0 %734  ;;  %v950_v48 = vpop.xlane.xlu1 %949  ;;  %v588_v59 = vadd.f32 %v2716_v62, %v390_v2  ;;  %v392_v62 = vadd.f32 %v3090_v13, %v3089_v39 }
 0x4b6   :  { %v984_v5 = vadd.f32 %v950_v48, %v796_v53  ;;  %v1219_v4 = vsel %vm1080_vm6, %v1199_v0, %v1218_v22 }
 0x4b7   :  { %v786_v61 = vadd.f32 %v732_v6, %v588_v59  ;;  %v590_v24 = vadd.f32 %v2725_v21, %v392_v62  ;;  %v3091_v6 = vld [vmem:[#allocation23_spill] sm:$0xff] }
 0x4b8   :  { %v1203_v7 = vrot.slane %v984_v5, %v1382_v9 }
 0x4b9   :  { %v917_v12 = vpop.xlane.xlu0 %916  ;;  %v953_v32 = vpop.xlane.xlu1 %952 }
 0x4ba   :  { %v973_v54 = vadd.f32 %v917_v12, %v785_v3  ;;  %v985_v45 = vadd.f32 %v953_v32, %v797_v11  ;;  %v1220_v16 = vsel %vm1082_vm7, %v1203_v7, %v1219_v4  ;;  %v3093_v7 = vld [vmem:[#allocation8_spill] sm:$0xff] }
 0x4bc   :  { %v1159_v19 = vrot.slane %v973_v54, %v1382_v9  ;;  %v1207_v18 = vrot.slane %v985_v45, %v1382_v9 }
 0x4bd   :  { %v738_v56 = vpop.xlane.xlu0 %737 }
 0x4be   :  { %v1210_v50 = vsel %vm1076_vm4, %v1159_v19, %v1209_v38  ;;  %v1221_v36 = vsel %vm1084_vm8, %v1207_v18, %v1220_v16  ;;  %v3092_v38 = vld [vmem:[#allocation37_spill] sm:$0xff]  ;;  %v788_v23 = vadd.f32 %v738_v56, %v590_v24 }
 0x4bf   :  { %v1225_v29 = vmul.f32 %v1221_v36, %v2683_v46  ;;  %v787_v46 = vadd.f32 %v735_v52, %v589_v27  ;;  %v393_v47 = vadd.f32 %v3092_v38, %v3091_v6 }
 0x4c1   :  { %v920_v35 = vpop.xlane.xlu0 %919  ;;  %v591_v58 = vadd.f32 %v543_v17, %v393_v47  ;;  %v1227_v17 = vsel %vm1097_vm10, %v1225_v29, 0.0 }
 0x4c2   :  { %v974_v37 = vadd.f32 %v920_v35, %v786_v61 }
 0x4c4   :  { %v1163_v40 = vrot.slane %v974_v37, %v1382_v9 }
 0x4c5   :  { %v741_v49 = vpop.xlane.xlu0 %740 }
 0x4c6   :  { %v1211_v8 = vsel %vm1078_vm5, %v1163_v40, %v1210_v50  ;;  %v789_v20 = vadd.f32 %v741_v49, %v591_v58 }
 0x4c9   :  { %v923_v42 = vpop.xlane.xlu0 %922 }
 0x4ca   :  { %v975_v57 = vadd.f32 %v923_v42, %v787_v46 }
 0x4cc   :  { %v1167_v14 = vrot.slane %v975_v57, %v1382_v9 }
 0x4cd   :  { %v926_v28 = vpop.xlane.xlu0 %925 }
 0x4ce   :  { %v976_v10 = vadd.f32 %v926_v28, %v788_v23  ;;  %v1212_v26 = vsel %vm1080_vm6, %v1167_v14, %v1211_v8 }
 0x4d0   :  { %v1171_v53 = vrot.slane %v976_v10, %v1382_v9 }
 0x4d1   :  { %v929_v30 = vpop.xlane.xlu0 %928 }
 0x4d2   :  { %v977_v44 = vadd.f32 %v929_v30, %v789_v20  ;;  %v1213_v52 = vsel %vm1082_vm7, %v1171_v53, %v1212_v26 }
 0x4d4   :  { %v1175_v21 = vrot.slane %v977_v44, %v1382_v9 }
 0x4d6   :  { %v1214_v48 = vsel %vm1084_vm8, %v1175_v21, %v1213_v52 }
 0x4d7   :  { %v1224_v15 = vmul.f32 %v1214_v48, %v2686_v55 }
 0x4d9   :  { %v1226_v34 = vsel %vm1097_vm10, %v1224_v15, 0.0  ;;  %v1239_v51 = vpop.permute.xlu0 %1238 }
 0x4da   :  { %v1228_v5 = vadd.f32 %v1227_v17, %v1226_v34  ;;  %v1244_v12 = vrot.slane %v1239_v51, %v3093_v7 }
 0x4dc   :  { %v1229_v60 = vrot.slane %v1228_v5, 4 }
 0x4de   :  { %v1230_v43 = vadd.f32 %v1229_v60, %v1228_v5 }
 0x4e0   :  { %v1231_v3 = vrot.slane %v1230_v43, 2 }
 0x4e2   :  { %v1232_v11 = vadd.f32 %v1231_v3, %v1230_v43 }
 0x4e4   :  { %v1233_v0 = vrot.slane %v1232_v11, 1 }
 0x4e6   :  { %v1234_v9 = vadd.f32 %v1233_v0, %v1232_v11 }
 0x4e8   :  { %v1245_v32 = vadd.f32 %v1244_v12, %v1234_v9 }
 0x4ea   :  { %v1268_v31 = vmul.f32 -1.442695, %v1245_v32 }
 0x4ec   :  { %1281 = vpow2.f32 %v1268_v31 }
 0x4f9   :  { %v1282_v54 = vpop.eup %1281 }
 0x4fa   :  { %v1249_v45 = vadd.f32 1.0, %v1282_v54 }
 0x4fc   :  { %1283 = vrcp.f32 %v1249_v45 }
 0x509   :  { %v1284_v55 = vpop.eup %1283 }
 0x50a   :  { %1253 = vst.msk [vmem:[#allocation3] sm:$0x1] %vm1252_vm12, %v1284_v55 }
 0x50b   :  { %1296 = shalt.err (!%p1293_p4)
}
 0x50c   :  { %1263 = dma.vmem_to_hbm [thread:$0]  %s1261_s17, 16, %s2797_s8, [#allocation4]  }
 0x50d   :  { %1305 = dma.done.wait [#allocation4], 16  }
 0x50e   :  { %1306 = vsyncadd [#allocation4], 4294967280 }
 0x50f   :  { %1267 = vsyncpa [#allocation4], 1 }

// kernel: _lambda_.6
= control target key start
LH: loop header
LB: loop body
LE: loop exit
PB: predicated region body
PF: predicated region fallthrough
CT: control target
= control target key end

     0   :  { %vm277_vm0 = vcmask 519168   ;;  %v3789_v2 = vmov 0   ;;  %v3790_v4 = vmov 0.0   ;;  %vm331_vm1 = vcmask 523264   ;;  %s3791_s17 = smov 32   ;;  %s3792_s22 = smov 96   ;;  %s4931_s0 = inlined_call_operand.vmem [shape: bf16[16,4,256], index: 0, kind: input, shape index: {}, may-alias: {0,1}]   ;;  %s4932_s1 = inlined_call_operand.vmem [shape: bf16[16,4,256], index: 1, kind: input, shape index: {}, may-alias: {0,1}]   ;;  %s4933_s2 = inlined_call_operand.vmem [shape: f32[16,4,1], index: 2, kind: input, shape index: {}, may-alias: {2,3}]   ;;  %s4934_s3 = inlined_call_operand.vmem [shape: f32[16,4,1], index: 3, kind: input, shape index: {}, may-alias: {2,3}]   ;;  %s4935_s4 = inlined_call_operand.vmem [shape: bf16[64,256], index: 4, kind: input, shape index: {}]   ;;  %s4936_s5 = inlined_call_operand.vmem [shape: bf16[16,4,32], index: 5, kind: output, shape index: {0}]   ;;  %s4937_s6 = inlined_call_operand.vmem [shape: bf16[16,4,32], index: 6, kind: output, shape index: {1}]  }
   0x1   :  { %v3832_v0 = vld [vmem:[%s4935_s4 + $0x34] ss:$8 sps:$4 sm:$0xff]   ;;  %v3837_v1 = vld [vmem:[%s4935_s4 + $0x30] ss:$8 sps:$4 sm:$0xff]   ;;  %367 = vmatprep.mubr.bf16.mxu0 %v3789_v2  ;;  %3503 = vset.pattern.permute.xlu1 %v3789_v2  ;;  %v3845_v3 = vld [vmem:[%s4935_s4 + $0x24] ss:$8 sps:$4 sm:$0xff]  }
   0x2   :  { %343 = vmatprep.subr.bf16.mxu0 %v3832_v0  ;;  %278 = vst.msk [vmem:[#allocation2] sm:$0xf] %vm277_vm0, %v3790_v4  ;;  %279 = vst.msk [vmem:[#allocation3] sm:$0xf] %vm277_vm0, %v3790_v4  ;;  %3504 = vset.pattern.permute.xlu0 %v3789_v2  ;;  %v3854_v5 = vld [vmem:[%s4935_s4 + $0x20] ss:$8 sps:$4 sm:$0xff]  }
   0x3   :  { %344 = vmatpush1.bf16.msra.mxu0 %v3837_v1  ;;  %530 = vmatprep.subr.bf16.mxu1 %v3832_v0  ;;  %v3861_v6 = vld [vmem:[%s4935_s4 + $0x14] ss:$8 sps:$4 sm:$0xff]   ;;  %v30_v7 = vld [vmem:[%s4931_s0] sm:$0x3]  ;;  %v3873_v8 = vld [vmem:[%s4935_s4 + $0x10] ss:$8 sps:$4 sm:$0xff]  }
   0x4   :  { %345 = vmatprep.subr.bf16.mxu0 %v3845_v3  ;;  %531 = vmatpush1.bf16.msra.mxu1 %v3837_v1  ;;  %31 = vst [vmem:[#allocation4] sm:$0x3] %v30_v7  ;;  %v3879_v9 = vld [vmem:[%s4935_s4 + $0x4] ss:$8 sps:$4 sm:$0xff]   ;;  %v3887_v10 = vld [vmem:[%s4935_s4] ss:$8 sps:$4 sm:$0xff]  }
   0x5   :  { %532 = vmatprep.subr.bf16.mxu1 %v3845_v3  ;;  %554 = vmatprep.mubr.bf16.mxu1 %v3789_v2  ;;  %v3381_v13 = vld [vmem:[%s4932_s1 + $0x3e] sm:$0x3]  ;;  %v376_v52 = vld [vmem:[%s4933_s2] sm:$0xf]  ;;  %s3793_s23 = smov 64   ;;  %vm489_vm2 = vcmask 254976  }
   0x6   :  { %170 = vst [vmem:[#allocation5 + $0x1e] sm:$0x3] %v3381_v13  ;;  %v3391_v37 = vld [vmem:[%s4934_s3 + $0x3c] sm:$0xf]  ;;  %v379_v53 = vsub.f32 1.0, %v376_v52  ;;  %vm506_vm3 = vcmask 261120  }
   0x7   :  { %346 = vmatpush1.bf16.msra.mxu0 %v3854_v5  ;;  %v380_v40 = vsub.f32 1.0, %v3391_v37  ;;  %v32_v4 = vld [vmem:[%s4931_s0 + $0x4] sm:$0x3] }
   0x8   :  { %347 = vmatprep.subr.bf16.mxu0 %v3861_v6  ;;  %533 = vmatpush1.bf16.msra.mxu1 %v3854_v5  ;;  %33 = vst [vmem:[#allocation4 + $0x2] sm:$0x3] %v32_v4 }
   0x9   :  { %534 = vmatprep.subr.bf16.mxu1 %v3861_v6  ;;  %v3889_v11 = vld [vmem:[#allocation2] sm:$0xf]  ;;  %v3919_v39 = vld [vmem:[#allocation3] sm:$0xf] }
   0xa   :  { %v290_v12 = vpack.c.bf16 %v3889_v11, %v3889_v11 }
   0xb   :  { %348 = vmatpush1.bf16.msra.mxu0 %v3873_v8  ;;  %v381_v15 = vld [vmem:[#allocation4] sm:$0x3] }
   0xc   :  { %349 = vmatprep.subr.bf16.mxu0 %v3879_v9  ;;  %535 = vmatpush1.bf16.msra.mxu1 %v3873_v8  ;;  %v382_v18 = vunpack.c.l.bf16 %v381_v15 }
   0xd   :  { %536 = vmatprep.subr.bf16.mxu1 %v3879_v9  ;;  %v385_v14 = vld [vmem:[#allocation5 + $0x1e] sm:$0x3] }
   0xe   :  { %v386_v16 = vunpack.c.l.bf16 %v385_v14 }
   0xf   :  { %350 = vmatpush1.bf16.msra.mxu0 %v3887_v10 }
  0x10   :  { %537 = vmatpush1.bf16.msra.mxu1 %v3887_v10  ;;  %717 = vmatprep.subr.bf16.mxu0 %v3832_v0 }
  0x11   :  { %904 = vmatprep.subr.bf16.mxu1 %v3832_v0 }
  0x12   :  { %3390 = vmatmul.mubr.msk.bf16.vlgmr.msra.gmra.mxu0 %vm331_vm1, %v290_v12 }
  0x13   :  { %718 = vmatpush1.bf16.msra.mxu0 %v3837_v1  ;;  %741 = vmatprep.mubr.bf16.mxu0 %v3789_v2 }
  0x14   :  { %719 = vmatprep.subr.bf16.mxu0 %v3845_v3 }
  0x17   :  { %720 = vmatpush1.bf16.msra.mxu0 %v3854_v5 }
  0x18   :  { %721 = vmatprep.subr.bf16.mxu0 %v3861_v6 }
  0x1b   :  { %722 = vmatpush1.bf16.msra.mxu0 %v3873_v8 }
  0x1c   :  { %723 = vmatprep.subr.bf16.mxu0 %v3879_v9 }
  0x1f   :  { %724 = vmatpush1.bf16.msra.mxu0 %v3887_v10 }
  0x20   :  { %1091 = vmatprep.subr.bf16.mxu0 %v3832_v0 }
  0xd2   :  { %v369_v17 = vpop.f32.mrf.mxu0 }
  0xd3   :  { %v383_v22 = vadd.f32 %v382_v18, %v369_v17 }
  0xd4   :  { %v371_v19 = vpop.f32.mrf.mxu0 }
  0xd5   :  { %v387_v20 = vadd.f32 %v386_v16, %v371_v19  ;;  %v3392_v27 = vmul.f32 -1.442695, %v383_v22 }
  0xd6   :  { %v373_v21 = vpop.f32.mrf.mxu0 }
  0xd7   :  { %3517 = vtanh.f32 %v387_v20  ;;  %v3393_v26 = vmul.f32 -1.442695, %v387_v20 }
  0xd8   :  { %v374_v23 = vpop.f32.mrf.mxu0  ;;  %3519 = vtanh.f32 %v383_v22 }
  0xd9   :  { %3521 = vpow2.f32 %v3393_v26  ;;  %v570_v23 = vld [vmem:[#allocation4 + $0x2] sm:$0x3] }
  0xda   :  { %3523 = vpow2.f32 %v3392_v27 }
  0xe4   :  { %v3518_v24 = vpop.eup %3517 }
  0xe5   :  { %447 = vrot.lane.b32.xlu0 %v3518_v24, %s3791_s17  ;;  %v3520_v25 = vpop.eup %3519 }
  0xe6   :  { %v3522_v28 = vpop.eup %3521 }
  0xe7   :  { %v441_v29 = vadd.f32 1.0, %v3522_v28  ;;  %v3524_v30 = vpop.eup %3523 }
  0xe8   :  { %v391_v31 = vadd.f32 1.0, %v3524_v30 }
  0xe9   :  { %401 = vrot.lane.b32.xlu0 %v3520_v25, %s3791_s17  ;;  %3525 = vrcp.f32 %v441_v29  ;;  %v571_v25 = vunpack.c.l.bf16 %v570_v23 }
  0xea   :  { %3527 = vrcp.f32 %v391_v31 }
  0xf6   :  { %v3526_v32 = vpop.eup %3525 }
  0xf7   :  { %v3528_v35 = vpop.eup %3527  ;;  %v445_v41 = vmul.f32 %v3526_v32, %v3919_v39 }
 0x157   :  { %v448_v33 = vpop.permute.xlu0 %447 }
 0x158   :  { %v450_v34 = vmul.f32 %v3526_v32, %v448_v33 }
 0x15a   :  { %452 = vrot.lane.b32.xlu1 %v450_v34, %s3791_s17 }
 0x15b   :  { %v402_v36 = vpop.permute.xlu0 %401 }
 0x15c   :  { %v404_v38 = vmul.f32 %v3528_v35, %v402_v36 }
 0x15e   :  { %396 = vrot.lane.b32.xlu1 %v3919_v39, %s3791_s17  ;;  %406 = vrot.lane.b32.xlu0 %v404_v38, %s3791_s17 }
 0x162   :  { %479 = vperm.xlu1 %3503, %v380_v40  }
 0x166   :  { %464 = vperm.xlu1 %3503, %v3391_v37  }
 0x1cc   :  { %v453_v42 = vpop.permute.xlu1 %452 }
 0x1cd   :  { %v455_v43 = vadd.f32 %v453_v42, %v445_v41 }
 0x1cf   :  { %3529 = vtanh.f32 %v455_v43 }
 0x1d0   :  { %v397_v44 = vpop.permute.xlu1 %396  ;;  %v407_v46 = vpop.permute.xlu0 %406 }
 0x1d1   :  { %v399_v45 = vmul.f32 %v3528_v35, %v397_v44 }
 0x1d3   :  { %v409_v47 = vadd.f32 %v407_v46, %v399_v45 }
 0x1d5   :  { %3531 = vtanh.f32 %v409_v47 }
 0x1dc   :  { %v3530_v48 = vpop.eup %3529 }
 0x1dd   :  { %458 = vrot.lane.b32.xlu0 %v3530_v48, %s3791_s17  ;;  %v480_v49 = vpop.permute.xlu1 %479 }
 0x1de   :  { %v496_v51 = vmul.f32 %v480_v49, %v3889_v11  ;;  %v482_v7 = vmul.f32 %v480_v49, %v3919_v39 }
 0x1e1   :  { %v465_v58 = vpop.permute.xlu1 %464 }
 0x1e2   :  { %v3532_v50 = vpop.eup %3531 }
 0x1e3   :  { %412 = vrot.lane.b32.xlu0 %v3532_v50, %s3791_s17 }
 0x1e7   :  { %498 = vrot.lane.b32.xlu0 %v496_v51, %s3792_s22 }
 0x1eb   :  { %433 = vperm.xlu0 %3504, %v379_v53  }
 0x1ef   :  { %473 = vrot.lane.b32.xlu0 %v455_v43, %s3792_s22 }
 0x24f   :  { %v459_v54 = vpop.permute.xlu0 %458 }
 0x250   :  { %v461_v55 = vmul.f32 %v3526_v32, %v459_v54 }
 0x252   :  { %468 = vrot.lane.b32.xlu1 %v461_v55, %s3793_s23 }
 0x255   :  { %v413_v56 = vpop.permute.xlu0 %412 }
 0x256   :  { %418 = vperm.xlu1 %3503, %v376_v52   ;;  %v415_v57 = vmul.f32 %v3528_v35, %v413_v56 }
 0x259   :  { %v499_v61 = vpop.permute.xlu0 %498 }
 0x25a   :  { %422 = vrot.lane.b32.xlu1 %v415_v57, %s3793_s23 }
 0x266   :  { %v434_v16 = vpop.permute.xlu0 %433 }
 0x267   :  { %v494_v17 = vmul.f32 %v434_v16, %v3889_v11  ;;  %v3380_v11 = vld [vmem:[%s4932_s1 + $0x3a] sm:$0x3]  ;;  %v436_v50 = vmul.f32 %v434_v16, %v3919_v39  ;;  %v3396_v16 = vld [vmem:[%s4933_s2 + $0x4] sm:$0xf] }
 0x268   :  { %168 = vst [vmem:[#allocation5 + $0x1c] sm:$0x3] %v3380_v11 }
 0x26a   :  { %v474_v34 = vpop.permute.xlu0 %473 }
 0x26b   :  { %v476_v37 = vmul.f32 %v474_v34, %v465_v58 }
 0x26f   :  { %v574_v24 = vld [vmem:[#allocation5 + $0x1c] sm:$0x3] }
 0x270   :  { %v575_v26 = vunpack.c.l.bf16 %v574_v24 }
 0x2c4   :  { %v469_v59 = vpop.permute.xlu1 %468 }
 0x2c5   :  { %v471_v60 = vmul.f32 %v469_v59, %v465_v58  ;;  %v3397_v58 = vld [vmem:[%s4934_s3 + $0x38] sm:$0xf] }
 0x2c6   :  { %v568_v39 = vsub.f32 1.0, %v3397_v58 }
 0x2c7   :  { %v491_v62 = vpack.c.bf16 %v471_v60, %v471_v60  ;;  %v501_v63 = vadd.f32 %v499_v61, %v471_v60 }
 0x2c9   :  { %3394 = vst.msk [vmem:[%s4937_s6 + $0x1e] sm:$0x3] %vm489_vm2, %v491_v62  ;;  %503 = vrot.lane.b32.xlu1 %v501_v63, %s3791_s17 }
 0x2cd   :  { %484 = vrot.lane.b32.xlu1 %v482_v7, %s3792_s22 }
 0x2d1   :  { %v419_v12 = vpop.permute.xlu1 %418  ;;  %427 = vrot.lane.b32.xlu1 %v409_v47, %s3792_s22 }
 0x2d5   :  { %v423_v13 = vpop.permute.xlu1 %422 }
 0x2d6   :  { %v425_v14 = vmul.f32 %v423_v13, %v419_v12 }
 0x2d8   :  { %v488_v15 = vpack.c.bf16 %v425_v14, %v425_v14  ;;  %v495_v18 = vadd.f32 %v494_v17, %v425_v14 }
 0x2da   :  { %490 = vst.msk [vmem:[%s4936_s5] sm:$0x3] %vm489_vm2, %v488_v15 }
 0x33b   :  { %v504_v19 = vpop.permute.xlu1 %503 }
 0x33c   :  { %v507_v20 = vsel %vm506_vm3, %v495_v18, %v504_v19  ;;  %v567_v18 = vsub.f32 1.0, %v3396_v16 }
 0x33d   :  { %509 = vst.msk [vmem:[#allocation2] sm:$0xf] %vm277_vm0, %v507_v20 }
 0x33f   :  { %v485_v36 = vpop.permute.xlu1 %484 }
 0x340   :  { %v487_v38 = vadd.f32 %v485_v36, %v476_v37 }
 0x343   :  { %v428_v46 = vpop.permute.xlu1 %427 }
 0x344   :  { %v3953_v21 = vld [vmem:[#allocation2] sm:$0xf]  ;;  %v430_v47 = vmul.f32 %v428_v46, %v419_v12 }
 0x345   :  { %v518_v22 = vpack.c.bf16 %v3953_v21, %v3953_v21 }
 0x346   :  { %v437_v53 = vadd.f32 %v436_v50, %v430_v47 }
 0x347   :  { %3395 = vmatmul.mubr.msk.bf16.vlgmr.msra.gmra.mxu1 %vm331_vm1, %v518_v22 }
 0x348   :  { %905 = vmatpush1.bf16.msra.mxu1 %v3837_v1  ;;  %928 = vmatprep.mubr.bf16.mxu1 %v3789_v2 }
 0x349   :  { %906 = vmatprep.subr.bf16.mxu1 %v3845_v3 }
 0x34c   :  { %907 = vmatpush1.bf16.msra.mxu1 %v3854_v5 }
 0x34d   :  { %908 = vmatprep.subr.bf16.mxu1 %v3861_v6 }
 0x350   :  { %909 = vmatpush1.bf16.msra.mxu1 %v3873_v8 }
 0x351   :  { %910 = vmatprep.subr.bf16.mxu1 %v3879_v9 }
 0x354   :  { %911 = vmatpush1.bf16.msra.mxu1 %v3887_v10 }
 0x355   :  { %1278 = vmatprep.subr.bf16.mxu1 %v3832_v0 }
 0x407   :  { %v556_v27 = vpop.f32.mrf.mxu1 }
 0x408   :  { %v572_v28 = vadd.f32 %v571_v25, %v556_v27 }
 0x409   :  { %v558_v29 = vpop.f32.mrf.mxu1 }
 0x40a   :  { %3533 = vtanh.f32 %v572_v28  ;;  %v576_v30 = vadd.f32 %v575_v26, %v558_v29  ;;  %v3398_v41 = vmul.f32 -1.442695, %v572_v28  ;;  %v34_v29 = vld [vmem:[%s4931_s0 + $0x8] sm:$0x3] }
 0x40b   :  { %v560_v31 = vpop.f32.mrf.mxu1  ;;  %35 = vst [vmem:[#allocation4 + $0x4] sm:$0x3] %v34_v29 }
 0x40c   :  { %3535 = vtanh.f32 %v576_v30  ;;  %v3399_v40 = vmul.f32 -1.442695, %v576_v30 }
 0x40d   :  { %v561_v32 = vpop.f32.mrf.mxu1 }
 0x40e   :  { %3537 = vpow2.f32 %v3399_v40 }
 0x40f   :  { %3539 = vpow2.f32 %v3398_v41 }
 0x417   :  { %v3534_v33 = vpop.eup %3533 }
 0x418   :  { %590 = vrot.lane.b32.xlu1 %v3534_v33, %s3791_s17 }
 0x419   :  { %v3536_v35 = vpop.eup %3535 }
 0x41a   :  { %636 = vrot.lane.b32.xlu0 %v3536_v35, %s3791_s17 }
 0x41b   :  { %v3538_v42 = vpop.eup %3537 }
 0x41c   :  { %v630_v43 = vadd.f32 1.0, %v3538_v42  ;;  %v3540_v44 = vpop.eup %3539 }
 0x41d   :  { %v580_v45 = vadd.f32 1.0, %v3540_v44 }
 0x41e   :  { %511 = vrot.lane.b32.xlu0 %v487_v38, %s3791_s17  ;;  %3541 = vrcp.f32 %v630_v43  ;;  %v757_v43 = vld [vmem:[#allocation4 + $0x4] sm:$0x3] }
 0x41f   :  { %3543 = vrcp.f32 %v580_v45  ;;  %v758_v45 = vunpack.c.l.bf16 %v757_v43 }
 0x42b   :  { %v3542_v48 = vpop.eup %3541 }
 0x42c   :  { %v3544_v54 = vpop.eup %3543 }
 0x48a   :  { %v591_v52 = vpop.permute.xlu1 %590 }
 0x48b   :  { %v593_v56 = vmul.f32 %v3544_v54, %v591_v52 }
 0x48c   :  { %v637_v49 = vpop.permute.xlu0 %636 }
 0x48d   :  { %v639_v51 = vmul.f32 %v3542_v48, %v637_v49 }
 0x48f   :  { %641 = vrot.lane.b32.xlu0 %v639_v51, %s3791_s17 }
 0x490   :  { %v512_v55 = vpop.permute.xlu0 %511 }
 0x491   :  { %v514_v57 = vsel %vm506_vm3, %v437_v53, %v512_v55 }
 0x492   :  { %515 = vst.msk [vmem:[#allocation3] sm:$0xf] %vm277_vm0, %v514_v57 }
 0x493   :  { %595 = vrot.lane.b32.xlu0 %v593_v56, %s3791_s17 }
 0x499   :  { %v3981_v59 = vld [vmem:[#allocation3] sm:$0xf] }
 0x49a   :  { %585 = vrot.lane.b32.xlu1 %v3981_v59, %s3791_s17  ;;  %v634_v60 = vmul.f32 %v3542_v48, %v3981_v59 }
 0x49e   :  { %668 = vperm.xlu1 %3503, %v568_v39  }
 0x4a2   :  { %653 = vperm.xlu1 %3503, %v3397_v58  }
 0x501   :  { %v642_v61 = vpop.permute.xlu0 %641 }
 0x502   :  { %v644_v62 = vadd.f32 %v642_v61, %v634_v60 }
 0x504   :  { %3545 = vtanh.f32 %v644_v62 }
 0x505   :  { %v596_v7 = vpop.permute.xlu0 %595 }
 0x50c   :  { %v586_v63 = vpop.permute.xlu1 %585 }
 0x50d   :  { %v588_v4 = vmul.f32 %v3544_v54, %v586_v63 }
 0x50f   :  { %v598_v12 = vadd.f32 %v596_v7, %v588_v4 }
 0x511   :  { %v3546_v13 = vpop.eup %3545  ;;  %3547 = vtanh.f32 %v598_v12 }
 0x512   :  { %647 = vrot.lane.b32.xlu0 %v3546_v13, %s3791_s17 }
 0x519   :  { %v669_v15 = vpop.permute.xlu1 %668 }
 0x51a   :  { %v685_v17 = vmul.f32 %v669_v15, %v3953_v21  ;;  %v671_v30 = vmul.f32 %v669_v15, %v3981_v59 }
 0x51d   :  { %v654_v23 = vpop.permute.xlu1 %653 }
 0x51e   :  { %v3548_v14 = vpop.eup %3547 }
 0x51f   :  { %601 = vrot.lane.b32.xlu0 %v3548_v14, %s3791_s17 }
 0x523   :  { %687 = vrot.lane.b32.xlu0 %v685_v17, %s3792_s22 }
 0x527   :  { %622 = vperm.xlu0 %3504, %v567_v18  }
 0x584   :  { %v648_v19 = vpop.permute.xlu0 %647 }
 0x585   :  { %v650_v20 = vmul.f32 %v3542_v48, %v648_v19 }
 0x587   :  { %657 = vrot.lane.b32.xlu1 %v650_v20, %s3793_s23 }
 0x58b   :  { %607 = vperm.xlu1 %3503, %v3396_v16  }
 0x591   :  { %v602_v22 = vpop.permute.xlu0 %601 }
 0x592   :  { %v604_v11 = vmul.f32 %v3544_v54, %v602_v22 }
 0x594   :  { %611 = vrot.lane.b32.xlu1 %v604_v11, %s3793_s23 }
 0x595   :  { %v688_v26 = vpop.permute.xlu0 %687 }
 0x598   :  { %662 = vrot.lane.b32.xlu1 %v644_v62, %s3792_s22 }
 0x5a2   :  { %v623_v35 = vpop.permute.xlu0 %622 }
 0x5a3   :  { %v683_v36 = vmul.f32 %v623_v35, %v3953_v21  ;;  %v3379_v21 = vld [vmem:[%s4932_s1 + $0x36] sm:$0x3]  ;;  %v625_v15 = vmul.f32 %v623_v35, %v3981_v59  ;;  %v3403_v35 = vld [vmem:[%s4933_s2 + $0x8] sm:$0xf] }
 0x5a4   :  { %166 = vst [vmem:[#allocation5 + $0x1a] sm:$0x3] %v3379_v21 }
 0x5ab   :  { %v761_v44 = vld [vmem:[#allocation5 + $0x1a] sm:$0x3] }
 0x5ac   :  { %v762_v46 = vunpack.c.l.bf16 %v761_v44 }
 0x5f9   :  { %v658_v24 = vpop.permute.xlu1 %657 }
 0x5fa   :  { %v660_v25 = vmul.f32 %v658_v24, %v654_v23 }
 0x5fc   :  { %v680_v27 = vpack.c.bf16 %v660_v25, %v660_v25  ;;  %v690_v28 = vadd.f32 %v688_v26, %v660_v25 }
 0x5fe   :  { %3401 = vst.msk [vmem:[%s4937_s6 + $0x1c] sm:$0x3] %vm489_vm2, %v680_v27  ;;  %692 = vrot.lane.b32.xlu0 %v690_v28, %s3791_s17 }
 0x602   :  { %673 = vrot.lane.b32.xlu0 %v671_v30, %s3792_s22 }
 0x606   :  { %v608_v31 = vpop.permute.xlu1 %607  ;;  %616 = vrot.lane.b32.xlu0 %v598_v12, %s3792_s22 }
 0x60a   :  { %v612_v32 = vpop.permute.xlu1 %611 }
 0x60b   :  { %v614_v33 = vmul.f32 %v612_v32, %v608_v31 }
 0x60d   :  { %v677_v34 = vpack.c.bf16 %v614_v33, %v614_v33  ;;  %v684_v37 = vadd.f32 %v683_v36, %v614_v33 }
 0x60e   :  { %v663_v54 = vpop.permute.xlu1 %662 }
 0x60f   :  { %3400 = vst.msk [vmem:[%s4936_s5 + $0x2] sm:$0x3] %vm489_vm2, %v677_v34  ;;  %v665_v57 = vmul.f32 %v663_v54, %v654_v23  ;;  %v3404_v23 = vld [vmem:[%s4934_s3 + $0x34] sm:$0xf] }
 0x610   :  { %v755_v59 = vsub.f32 1.0, %v3404_v23 }
 0x670   :  { %v693_v38 = vpop.permute.xlu0 %692 }
 0x671   :  { %v695_v40 = vsel %vm506_vm3, %v684_v37, %v693_v38  ;;  %v754_v37 = vsub.f32 1.0, %v3403_v35 }
 0x672   :  { %696 = vst.msk [vmem:[#allocation2] sm:$0xf] %vm277_vm0, %v695_v40 }
 0x674   :  { %v674_v56 = vpop.permute.xlu0 %673 }
 0x675   :  { %v676_v58 = vadd.f32 %v674_v56, %v665_v57 }
 0x678   :  { %v617_v7 = vpop.permute.xlu0 %616 }
 0x679   :  { %v4014_v41 = vld [vmem:[#allocation2] sm:$0xf]  ;;  %v619_v12 = vmul.f32 %v617_v7, %v608_v31 }
 0x67a   :  { %v705_v42 = vpack.c.bf16 %v4014_v41, %v4014_v41 }
 0x67b   :  { %v626_v18 = vadd.f32 %v625_v15, %v619_v12 }
 0x67c   :  { %3402 = vmatmul.mubr.msk.bf16.vlgmr.msra.gmra.mxu0 %vm331_vm1, %v705_v42 }
 0x67d   :  { %1092 = vmatpush1.bf16.msra.mxu0 %v3837_v1  ;;  %1115 = vmatprep.mubr.bf16.mxu0 %v3789_v2 }
 0x67e   :  { %1093 = vmatprep.subr.bf16.mxu0 %v3845_v3 }
 0x681   :  { %1094 = vmatpush1.bf16.msra.mxu0 %v3854_v5 }
 0x682   :  { %1095 = vmatprep.subr.bf16.mxu0 %v3861_v6 }
 0x685   :  { %1096 = vmatpush1.bf16.msra.mxu0 %v3873_v8 }
 0x686   :  { %1097 = vmatprep.subr.bf16.mxu0 %v3879_v9 }
 0x689   :  { %1098 = vmatpush1.bf16.msra.mxu0 %v3887_v10 }
 0x68a   :  { %1465 = vmatprep.subr.bf16.mxu0 %v3832_v0 }
 0x73c   :  { %v743_v47 = vpop.f32.mrf.mxu0 }
 0x73d   :  { %v759_v48 = vadd.f32 %v758_v45, %v743_v47 }
 0x73e   :  { %v745_v49 = vpop.f32.mrf.mxu0 }
 0x73f   :  { %3549 = vtanh.f32 %v759_v48  ;;  %v763_v50 = vadd.f32 %v762_v46, %v745_v49  ;;  %v3405_v60 = vmul.f32 -1.442695, %v759_v48  ;;  %v36_v49 = vld [vmem:[%s4931_s0 + $0xc] sm:$0x3] }
 0x740   :  { %v747_v51 = vpop.f32.mrf.mxu0  ;;  %37 = vst [vmem:[#allocation4 + $0x6] sm:$0x3] %v36_v49 }
 0x741   :  { %3551 = vtanh.f32 %v763_v50  ;;  %v3406_v39 = vmul.f32 -1.442695, %v763_v50 }
 0x742   :  { %v748_v52 = vpop.f32.mrf.mxu0 }
 0x743   :  { %3553 = vpow2.f32 %v3406_v39 }
 0x744   :  { %3555 = vpow2.f32 %v3405_v60 }
 0x74c   :  { %v3550_v53 = vpop.eup %3549 }
 0x74d   :  { %777 = vrot.lane.b32.xlu0 %v3550_v53, %s3791_s17 }
 0x74e   :  { %v3552_v55 = vpop.eup %3551 }
 0x74f   :  { %823 = vrot.lane.b32.xlu1 %v3552_v55, %s3791_s17 }
 0x750   :  { %v3554_v61 = vpop.eup %3553 }
 0x751   :  { %v817_v62 = vadd.f32 1.0, %v3554_v61  ;;  %v3556_v63 = vpop.eup %3555 }
 0x752   :  { %v767_v4 = vadd.f32 1.0, %v3556_v63 }
 0x753   :  { %698 = vrot.lane.b32.xlu1 %v676_v58, %s3791_s17  ;;  %3557 = vrcp.f32 %v817_v62  ;;  %v944_v62 = vld [vmem:[#allocation4 + $0x6] sm:$0x3] }
 0x754   :  { %3559 = vrcp.f32 %v767_v4  ;;  %v945_v4 = vunpack.c.l.bf16 %v944_v62 }
 0x760   :  { %v3558_v13 = vpop.eup %3557 }
 0x761   :  { %v3560_v19 = vpop.eup %3559 }
 0x7bf   :  { %v778_v17 = vpop.permute.xlu0 %777 }
 0x7c0   :  { %v780_v22 = vmul.f32 %v3560_v19, %v778_v17 }
 0x7c1   :  { %v824_v14 = vpop.permute.xlu1 %823 }
 0x7c2   :  { %v826_v16 = vmul.f32 %v3558_v13, %v824_v14 }
 0x7c4   :  { %828 = vrot.lane.b32.xlu1 %v826_v16, %s3791_s17 }
 0x7c5   :  { %v699_v20 = vpop.permute.xlu1 %698 }
 0x7c6   :  { %v701_v11 = vsel %vm506_vm3, %v626_v18, %v699_v20 }
 0x7c7   :  { %702 = vst.msk [vmem:[#allocation3] sm:$0xf] %vm277_vm0, %v701_v11 }
 0x7c8   :  { %782 = vrot.lane.b32.xlu1 %v780_v22, %s3791_s17 }
 0x7ce   :  { %v4042_v24 = vld [vmem:[#allocation3] sm:$0xf] }
 0x7cf   :  { %772 = vrot.lane.b32.xlu0 %v4042_v24, %s3791_s17  ;;  %v821_v25 = vmul.f32 %v3558_v13, %v4042_v24 }
 0x7d3   :  { %855 = vperm.xlu0 %3504, %v755_v59  }
 0x7d7   :  { %840 = vperm.xlu0 %3504, %v3404_v23  }
 0x836   :  { %v829_v26 = vpop.permute.xlu1 %828 }
 0x837   :  { %v831_v27 = vadd.f32 %v829_v26, %v821_v25 }
 0x839   :  { %3561 = vtanh.f32 %v831_v27 }
 0x83a   :  { %v783_v30 = vpop.permute.xlu1 %782 }
 0x841   :  { %v773_v28 = vpop.permute.xlu0 %772 }
 0x842   :  { %v775_v29 = vmul.f32 %v3560_v19, %v773_v28 }
 0x844   :  { %v785_v31 = vadd.f32 %v783_v30, %v775_v29 }
 0x846   :  { %v3562_v32 = vpop.eup %3561  ;;  %3563 = vtanh.f32 %v785_v31 }
 0x847   :  { %834 = vrot.lane.b32.xlu1 %v3562_v32, %s3791_s17 }
 0x84e   :  { %v856_v34 = vpop.permute.xlu0 %855 }
 0x84f   :  { %v872_v36 = vmul.f32 %v856_v34, %v4014_v41  ;;  %v858_v50 = vmul.f32 %v856_v34, %v4042_v24 }
 0x852   :  { %v841_v43 = vpop.permute.xlu0 %840 }
 0x853   :  { %v3564_v33 = vpop.eup %3563 }
 0x854   :  { %788 = vrot.lane.b32.xlu1 %v3564_v33, %s3791_s17 }
 0x858   :  { %874 = vrot.lane.b32.xlu1 %v872_v36, %s3792_s22 }
 0x85c   :  { %809 = vperm.xlu1 %3503, %v754_v37  }
 0x8b9   :  { %v835_v38 = vpop.permute.xlu1 %834 }
 0x8ba   :  { %v837_v40 = vmul.f32 %v3558_v13, %v835_v38 }
 0x8bc   :  { %844 = vrot.lane.b32.xlu0 %v837_v40, %s3793_s23 }
 0x8c0   :  { %794 = vperm.xlu0 %3504, %v3403_v35  }
 0x8c6   :  { %v789_v42 = vpop.permute.xlu1 %788 }
 0x8c7   :  { %v791_v21 = vmul.f32 %v3560_v19, %v789_v42 }
 0x8c9   :  { %798 = vrot.lane.b32.xlu0 %v791_v21, %s3793_s23  ;;  %v3411_v21 = vld [vmem:[%s4934_s3 + $0x30] sm:$0xf] }
 0x8ca   :  { %v875_v46 = vpop.permute.xlu1 %874 }
 0x8cd   :  { %849 = vrot.lane.b32.xlu0 %v831_v27, %s3792_s22 }
 0x8d7   :  { %v810_v55 = vpop.permute.xlu1 %809 }
 0x8d8   :  { %v870_v56 = vmul.f32 %v810_v55, %v4014_v41  ;;  %v3378_v41 = vld [vmem:[%s4932_s1 + $0x32] sm:$0x3]  ;;  %v812_v33 = vmul.f32 %v810_v55, %v4042_v24  ;;  %v942_v24 = vsub.f32 1.0, %v3411_v21 }
 0x8d9   :  { %164 = vst [vmem:[#allocation5 + $0x18] sm:$0x3] %v3378_v41 }
 0x8e0   :  { %v948_v63 = vld [vmem:[#allocation5 + $0x18] sm:$0x3] }
 0x8e1   :  { %v949_v7 = vunpack.c.l.bf16 %v948_v63 }
 0x92e   :  { %v845_v44 = vpop.permute.xlu0 %844 }
 0x92f   :  { %v847_v45 = vmul.f32 %v845_v44, %v841_v43 }
 0x931   :  { %v867_v47 = vpack.c.bf16 %v847_v45, %v847_v45  ;;  %v877_v48 = vadd.f32 %v875_v46, %v847_v45 }
 0x933   :  { %3408 = vst.msk [vmem:[%s4937_s6 + $0x1a] sm:$0x3] %vm489_vm2, %v867_v47  ;;  %879 = vrot.lane.b32.xlu1 %v877_v48, %s3791_s17 }
 0x937   :  { %860 = vrot.lane.b32.xlu1 %v858_v50, %s3792_s22 }
 0x93b   :  { %803 = vrot.lane.b32.xlu1 %v785_v31, %s3792_s22  ;;  %v795_v51 = vpop.permute.xlu0 %794 }
 0x93f   :  { %v799_v52 = vpop.permute.xlu0 %798 }
 0x940   :  { %v801_v53 = vmul.f32 %v799_v52, %v795_v51 }
 0x942   :  { %v864_v54 = vpack.c.bf16 %v801_v53, %v801_v53  ;;  %v871_v57 = vadd.f32 %v870_v56, %v801_v53 }
 0x943   :  { %v850_v19 = vpop.permute.xlu0 %849 }
 0x944   :  { %3407 = vst.msk [vmem:[%s4936_s5 + $0x4] sm:$0x3] %vm489_vm2, %v864_v54  ;;  %v852_v22 = vmul.f32 %v850_v19, %v841_v43  ;;  %v3410_v54 = vld [vmem:[%s4933_s2 + $0xc] sm:$0xf] }
 0x945   :  { %v941_v56 = vsub.f32 1.0, %v3410_v54 }
 0x9a5   :  { %v880_v58 = vpop.permute.xlu1 %879 }
 0x9a6   :  { %v882_v39 = vsel %vm506_vm3, %v871_v57, %v880_v58 }
 0x9a7   :  { %883 = vst.msk [vmem:[#allocation2] sm:$0xf] %vm277_vm0, %v882_v39 }
 0x9a9   :  { %v861_v20 = vpop.permute.xlu1 %860 }
 0x9aa   :  { %v863_v11 = vadd.f32 %v861_v20, %v852_v22 }
 0x9ad   :  { %v804_v29 = vpop.permute.xlu1 %803 }
 0x9ae   :  { %v4075_v60 = vld [vmem:[#allocation2] sm:$0xf]  ;;  %v806_v30 = vmul.f32 %v804_v29, %v795_v51 }
 0x9af   :  { %v892_v61 = vpack.c.bf16 %v4075_v60, %v4075_v60 }
 0x9b0   :  { %v813_v36 = vadd.f32 %v812_v33, %v806_v30 }
 0x9b1   :  { %3409 = vmatmul.mubr.msk.bf16.vlgmr.msra.gmra.mxu1 %vm331_vm1, %v892_v61 }
 0x9b2   :  { %1279 = vmatpush1.bf16.msra.mxu1 %v3837_v1  ;;  %1302 = vmatprep.mubr.bf16.mxu1 %v3789_v2 }
 0x9b3   :  { %1280 = vmatprep.subr.bf16.mxu1 %v3845_v3 }
 0x9b6   :  { %1281 = vmatpush1.bf16.msra.mxu1 %v3854_v5 }
 0x9b7   :  { %1282 = vmatprep.subr.bf16.mxu1 %v3861_v6 }
 0x9ba   :  { %1283 = vmatpush1.bf16.msra.mxu1 %v3873_v8 }
 0x9bb   :  { %1284 = vmatprep.subr.bf16.mxu1 %v3879_v9 }
 0x9be   :  { %1285 = vmatpush1.bf16.msra.mxu1 %v3887_v10 }
 0x9bf   :  { %1652 = vmatprep.subr.bf16.mxu1 %v3832_v0 }
 0xa71   :  { %v930_v12 = vpop.f32.mrf.mxu1 }
 0xa72   :  { %v946_v13 = vadd.f32 %v945_v4, %v930_v12 }
 0xa73   :  { %v932_v14 = vpop.f32.mrf.mxu1 }
 0xa74   :  { %3565 = vtanh.f32 %v946_v13  ;;  %v950_v15 = vadd.f32 %v949_v7, %v932_v14  ;;  %v3412_v59 = vmul.f32 -1.442695, %v946_v13  ;;  %v38_v13 = vld [vmem:[%s4931_s0 + $0x10] sm:$0x3] }
 0xa75   :  { %v934_v16 = vpop.f32.mrf.mxu1  ;;  %39 = vst [vmem:[#allocation4 + $0x8] sm:$0x3] %v38_v13 }
 0xa76   :  { %3567 = vtanh.f32 %v950_v15  ;;  %v3413_v23 = vmul.f32 -1.442695, %v950_v15 }
 0xa77   :  { %v935_v17 = vpop.f32.mrf.mxu1 }
 0xa78   :  { %3569 = vpow2.f32 %v3413_v23 }
 0xa79   :  { %3571 = vpow2.f32 %v3412_v59 }
 0xa81   :  { %v3566_v18 = vpop.eup %3565 }
 0xa82   :  { %964 = vrot.lane.b32.xlu1 %v3566_v18, %s3791_s17 }
 0xa83   :  { %v3568_v0 = vpop.eup %3567 }
 0xa84   :  { %1010 = vrot.lane.b32.xlu0 %v3568_v0, %s3791_s17 }
 0xa85   :  { %v3570_v25 = vpop.eup %3569 }
 0xa86   :  { %v1004_v26 = vadd.f32 1.0, %v3570_v25  ;;  %v3572_v27 = vpop.eup %3571 }
 0xa87   :  { %v954_v28 = vadd.f32 1.0, %v3572_v27 }
 0xa88   :  { %885 = vrot.lane.b32.xlu0 %v863_v11, %s3791_s17  ;;  %3573 = vrcp.f32 %v1004_v26 }
 0xa89   :  { %3575 = vrcp.f32 %v954_v28 }
 0xa95   :  { %v3574_v31 = vpop.eup %3573 }
 0xa96   :  { %v3576_v37 = vpop.eup %3575 }
 0xaf4   :  { %v965_v35 = vpop.permute.xlu1 %964 }
 0xaf5   :  { %v967_v40 = vmul.f32 %v3576_v37, %v965_v35 }
 0xaf6   :  { %v1011_v32 = vpop.permute.xlu0 %1010 }
 0xaf7   :  { %v1013_v34 = vmul.f32 %v3574_v31, %v1011_v32 }
 0xaf9   :  { %1015 = vrot.lane.b32.xlu0 %v1013_v34, %s3791_s17 }
 0xafa   :  { %v886_v38 = vpop.permute.xlu0 %885 }
 0xafb   :  { %v888_v42 = vsel %vm506_vm3, %v813_v36, %v886_v38 }
 0xafc   :  { %889 = vst.msk [vmem:[#allocation3] sm:$0xf] %vm277_vm0, %v888_v42 }
 0xafd   :  { %969 = vrot.lane.b32.xlu0 %v967_v40, %s3791_s17 }
 0xb03   :  { %v4103_v43 = vld [vmem:[#allocation3] sm:$0xf] }
 0xb04   :  { %959 = vrot.lane.b32.xlu1 %v4103_v43, %s3791_s17  ;;  %v1008_v44 = vmul.f32 %v3574_v31, %v4103_v43 }
 0xb08   :  { %1042 = vperm.xlu1 %3503, %v942_v24  }
 0xb0c   :  { %1027 = vperm.xlu1 %3503, %v3411_v21  }
 0xb6b   :  { %v1016_v45 = vpop.permute.xlu0 %1015 }
 0xb6c   :  { %v1018_v46 = vadd.f32 %v1016_v45, %v1008_v44 }
 0xb6e   :  { %3577 = vtanh.f32 %v1018_v46 }
 0xb6f   :  { %v970_v49 = vpop.permute.xlu0 %969 }
 0xb76   :  { %v960_v47 = vpop.permute.xlu1 %959 }
 0xb77   :  { %v962_v48 = vmul.f32 %v3576_v37, %v960_v47 }
 0xb79   :  { %v972_v50 = vadd.f32 %v970_v49, %v962_v48 }
 0xb7b   :  { %v3578_v51 = vpop.eup %3577  ;;  %3579 = vtanh.f32 %v972_v50 }
 0xb7c   :  { %1021 = vrot.lane.b32.xlu0 %v3578_v51, %s3791_s17 }
 0xb83   :  { %v1043_v53 = vpop.permute.xlu1 %1042 }
 0xb84   :  { %v1059_v55 = vmul.f32 %v1043_v53, %v4075_v60  ;;  %v1045_v14 = vmul.f32 %v1043_v53, %v4103_v43 }
 0xb87   :  { %v1028_v41 = vpop.permute.xlu1 %1027 }
 0xb88   :  { %v3580_v52 = vpop.eup %3579 }
 0xb89   :  { %975 = vrot.lane.b32.xlu0 %v3580_v52, %s3791_s17 }
 0xb8d   :  { %1061 = vrot.lane.b32.xlu0 %v1059_v55, %s3792_s22 }
 0xb91   :  { %996 = vperm.xlu0 %3504, %v941_v56  }
 0xbee   :  { %v1022_v57 = vpop.permute.xlu0 %1021 }
 0xbef   :  { %v1024_v58 = vmul.f32 %v3574_v31, %v1022_v57 }
 0xbf1   :  { %1031 = vrot.lane.b32.xlu1 %v1024_v58, %s3793_s23 }
 0xbf5   :  { %981 = vperm.xlu1 %3503, %v3410_v54   ;;  %v3418_v54 = vld [vmem:[%s4934_s3 + $0x2c] sm:$0xf] }
 0xbfb   :  { %v976_v39 = vpop.permute.xlu0 %975 }
 0xbfc   :  { %v978_v61 = vmul.f32 %v3576_v37, %v976_v39 }
 0xbfe   :  { %985 = vrot.lane.b32.xlu1 %v978_v61, %s3793_s23 }
 0xbff   :  { %v1062_v4 = vpop.permute.xlu0 %1061 }
 0xc02   :  { %1036 = vrot.lane.b32.xlu1 %v1018_v46, %s3792_s22 }
 0xc0c   :  { %v997_v19 = vpop.permute.xlu0 %996 }
 0xc0d   :  { %v1057_v0 = vmul.f32 %v997_v19, %v4075_v60  ;;  %v4152_v60 = vld [vmem:[%s4935_s4 + $0x34] ss:$8 sps:$4 sm:$0xff]   ;;  %v999_v46 = vmul.f32 %v997_v19, %v4103_v43  ;;  %v1129_v43 = vsub.f32 1.0, %v3418_v54 }
 0xc63   :  { %v1032_v62 = vpop.permute.xlu1 %1031 }
 0xc64   :  { %v1034_v63 = vmul.f32 %v1032_v62, %v1028_v41 }
 0xc66   :  { %v1054_v7 = vpack.c.bf16 %v1034_v63, %v1034_v63  ;;  %v1064_v12 = vadd.f32 %v1062_v4, %v1034_v63 }
 0xc68   :  { %3415 = vst.msk [vmem:[%s4937_s6 + $0x18] sm:$0x3] %vm489_vm2, %v1054_v7  ;;  %1066 = vrot.lane.b32.xlu0 %v1064_v12, %s3791_s17  ;;  %v3417_v12 = vld [vmem:[%s4933_s2 + $0x10] sm:$0xf] }
 0xc6c   :  { %1047 = vrot.lane.b32.xlu0 %v1045_v14, %s3792_s22  ;;  %v1128_v14 = vsub.f32 1.0, %v3417_v12 }
 0xc70   :  { %v982_v15 = vpop.permute.xlu1 %981  ;;  %990 = vrot.lane.b32.xlu0 %v972_v50, %s3792_s22 }
 0xc74   :  { %v986_v16 = vpop.permute.xlu1 %985 }
 0xc75   :  { %v988_v17 = vmul.f32 %v986_v16, %v982_v15 }
 0xc77   :  { %v1051_v18 = vpack.c.bf16 %v988_v17, %v988_v17  ;;  %v1058_v20 = vadd.f32 %v1057_v0, %v988_v17 }
 0xc78   :  { %v1037_v30 = vpop.permute.xlu1 %1036 }
 0xc79   :  { %3414 = vst.msk [vmem:[%s4936_s5 + $0x6] sm:$0x3] %vm489_vm2, %v1051_v18  ;;  %v1039_v33 = vmul.f32 %v1037_v30, %v1028_v41 }
 0xcda   :  { %v1067_v22 = vpop.permute.xlu0 %1066 }
 0xcdb   :  { %v1069_v11 = vsel %vm506_vm3, %v1058_v20, %v1067_v22 }
 0xcdc   :  { %1070 = vst.msk [vmem:[#allocation2] sm:$0xf] %vm277_vm0, %v1069_v11 }
 0xcde   :  { %v1048_v32 = vpop.permute.xlu0 %1047 }
 0xcdf   :  { %v1050_v34 = vadd.f32 %v1048_v32, %v1039_v33  ;;  %v4226_v32 = vld [vmem:[%s4935_s4 + $0x20] ss:$8 sps:$4 sm:$0xff]   ;;  %v4232_v33 = vld [vmem:[%s4935_s4 + $0x14] ss:$8 sps:$4 sm:$0xff]  }
 0xce2   :  { %v991_v21 = vpop.permute.xlu0 %990 }
 0xce3   :  { %v4136_v23 = vld [vmem:[#allocation2] sm:$0xf]  ;;  %v993_v24 = vmul.f32 %v991_v21, %v982_v15 }
 0xce4   :  { %v1079_v59 = vpack.c.bf16 %v4136_v23, %v4136_v23 }
 0xce5   :  { %v1000_v49 = vadd.f32 %v999_v46, %v993_v24 }
 0xce6   :  { %3416 = vmatmul.mubr.msk.bf16.vlgmr.msra.gmra.mxu0 %vm331_vm1, %v1079_v59 }
 0xce7   :  { %1466 = vmatpush1.bf16.msra.mxu0 %v3837_v1  ;;  %1489 = vmatprep.mubr.bf16.mxu0 %v3789_v2  ;;  %v3377_v1 = vld [vmem:[%s4932_s1 + $0x2e] sm:$0x3] }
 0xce8   :  { %1467 = vmatprep.subr.bf16.mxu0 %v3845_v3  ;;  %162 = vst [vmem:[#allocation5 + $0x16] sm:$0x3] %v3377_v1  ;;  %v1131_v3 = vld [vmem:[#allocation4 + $0x8] sm:$0x3]  ;;  %v40_v1 = vld [vmem:[%s4931_s0 + $0x14] sm:$0x3] }
 0xce9   :  { %41 = vst [vmem:[#allocation4 + $0xa] sm:$0x3] %v40_v1 }
 0xceb   :  { %1468 = vmatpush1.bf16.msra.mxu0 %v3854_v5 }
 0xcec   :  { %1469 = vmatprep.subr.bf16.mxu0 %v3861_v6  ;;  %v1132_v6 = vunpack.c.l.bf16 %v1131_v3 }
 0xcef   :  { %1470 = vmatpush1.bf16.msra.mxu0 %v3873_v8  ;;  %v1135_v5 = vld [vmem:[#allocation5 + $0x16] sm:$0x3] }
 0xcf0   :  { %1471 = vmatprep.subr.bf16.mxu0 %v3879_v9  ;;  %v1136_v8 = vunpack.c.l.bf16 %v1135_v5 }
 0xcf3   :  { %1472 = vmatpush1.bf16.msra.mxu0 %v3887_v10 }
 0xcf4   :  { %1839 = vmatprep.subr.bf16.mxu0 %v4152_v60 }
 0xda6   :  { %v1117_v25 = vpop.f32.mrf.mxu0 }
 0xda7   :  { %v1133_v9 = vadd.f32 %v1132_v6, %v1117_v25 }
 0xda8   :  { %v1119_v26 = vpop.f32.mrf.mxu0 }
 0xda9   :  { %3581 = vtanh.f32 %v1133_v9  ;;  %v1137_v10 = vadd.f32 %v1136_v8, %v1119_v26  ;;  %v3419_v36 = vmul.f32 -1.442695, %v1133_v9 }
 0xdaa   :  { %v1121_v27 = vpop.f32.mrf.mxu0 }
 0xdab   :  { %3583 = vtanh.f32 %v1137_v10  ;;  %v3420_v35 = vmul.f32 -1.442695, %v1137_v10 }
 0xdac   :  { %v1122_v28 = vpop.f32.mrf.mxu0 }
 0xdad   :  { %3585 = vpow2.f32 %v3420_v35  ;;  %v4244_v35 = vld [vmem:[%s4935_s4 + $0x4] ss:$8 sps:$4 sm:$0xff]  }
 0xdae   :  { %3587 = vpow2.f32 %v3419_v36  ;;  %v4250_v36 = vld [vmem:[%s4935_s4] ss:$8 sps:$4 sm:$0xff]  }
 0xdb6   :  { %v3582_v29 = vpop.eup %3581 }
 0xdb7   :  { %1151 = vrot.lane.b32.xlu0 %v3582_v29, %s3791_s17 }
 0xdb8   :  { %v3584_v31 = vpop.eup %3583 }
 0xdb9   :  { %1197 = vrot.lane.b32.xlu1 %v3584_v31, %s3791_s17  ;;  %v4213_v31 = vld [vmem:[%s4935_s4 + $0x30] ss:$8 sps:$4 sm:$0xff]  }
 0xdba   :  { %v3586_v37 = vpop.eup %3585 }
 0xdbb   :  { %v1191_v38 = vadd.f32 1.0, %v3586_v37  ;;  %v3588_v40 = vpop.eup %3587  ;;  %v3376_v37 = vld [vmem:[%s4932_s1 + $0x2a] sm:$0x3] }
 0xdbc   :  { %v1141_v42 = vadd.f32 1.0, %v3588_v40  ;;  %160 = vst [vmem:[#allocation5 + $0x14] sm:$0x3] %v3376_v37 }
 0xdbd   :  { %1072 = vrot.lane.b32.xlu1 %v1050_v34, %s3791_s17  ;;  %3589 = vrcp.f32 %v1191_v38  ;;  %v4238_v34 = vld [vmem:[%s4935_s4 + $0x10] ss:$8 sps:$4 sm:$0xff]  }
 0xdbe   :  { %3591 = vrcp.f32 %v1141_v42  ;;  %v1318_v38 = vld [vmem:[#allocation4 + $0xa] sm:$0x3] }
 0xdbf   :  { %v1319_v42 = vunpack.c.l.bf16 %v1318_v38 }
 0xdc3   :  { %v1322_v40 = vld [vmem:[#allocation5 + $0x14] sm:$0x3] }
 0xdc4   :  { %v1323_v21 = vunpack.c.l.bf16 %v1322_v40 }
 0xdca   :  { %v3590_v44 = vpop.eup %3589 }
 0xdcb   :  { %v3592_v50 = vpop.eup %3591 }
 0xe29   :  { %v1152_v48 = vpop.permute.xlu0 %1151 }
 0xe2a   :  { %v1154_v52 = vmul.f32 %v3592_v50, %v1152_v48 }
 0xe2b   :  { %v1198_v45 = vpop.permute.xlu1 %1197 }
 0xe2c   :  { %v1200_v47 = vmul.f32 %v3590_v44, %v1198_v45 }
 0xe2e   :  { %1202 = vrot.lane.b32.xlu1 %v1200_v47, %s3791_s17 }
 0xe2f   :  { %v1073_v51 = vpop.permute.xlu1 %1072 }
 0xe30   :  { %v1075_v53 = vsel %vm506_vm3, %v1000_v49, %v1073_v51 }
 0xe31   :  { %1076 = vst.msk [vmem:[#allocation3] sm:$0xf] %vm277_vm0, %v1075_v53 }
 0xe32   :  { %1156 = vrot.lane.b32.xlu1 %v1154_v52, %s3791_s17 }
 0xe38   :  { %v4169_v55 = vld [vmem:[#allocation3] sm:$0xf] }
 0xe39   :  { %1146 = vrot.lane.b32.xlu0 %v4169_v55, %s3791_s17  ;;  %v1195_v56 = vmul.f32 %v3590_v44, %v4169_v55 }
 0xe3d   :  { %1229 = vperm.xlu0 %3504, %v1129_v43  }
 0xe41   :  { %1214 = vperm.xlu0 %3504, %v3418_v54  }
 0xea0   :  { %v1203_v57 = vpop.permute.xlu1 %1202 }
 0xea1   :  { %v1205_v58 = vadd.f32 %v1203_v57, %v1195_v56 }
 0xea3   :  { %3593 = vtanh.f32 %v1205_v58 }
 0xea4   :  { %v1157_v41 = vpop.permute.xlu1 %1156 }
 0xeab   :  { %v1147_v39 = vpop.permute.xlu0 %1146 }
 0xeac   :  { %v1149_v61 = vmul.f32 %v3592_v50, %v1147_v39 }
 0xeae   :  { %v1159_v62 = vadd.f32 %v1157_v41, %v1149_v61 }
 0xeb0   :  { %v3594_v63 = vpop.eup %3593  ;;  %3595 = vtanh.f32 %v1159_v62 }
 0xeb1   :  { %1208 = vrot.lane.b32.xlu1 %v3594_v63, %s3791_s17 }
 0xeb8   :  { %v1230_v7 = vpop.permute.xlu0 %1229 }
 0xeb9   :  { %v1246_v13 = vmul.f32 %v1230_v7, %v4136_v23  ;;  %v1232_v3 = vmul.f32 %v1230_v7, %v4169_v55 }
 0xebc   :  { %v1215_v19 = vpop.permute.xlu0 %1214 }
 0xebd   :  { %v3596_v4 = vpop.eup %3595 }
 0xebe   :  { %1162 = vrot.lane.b32.xlu1 %v3596_v4, %s3791_s17 }
 0xec2   :  { %1248 = vrot.lane.b32.xlu1 %v1246_v13, %s3792_s22 }
 0xec6   :  { %1183 = vperm.xlu1 %3503, %v1128_v14  }
 0xf23   :  { %v1209_v15 = vpop.permute.xlu1 %1208 }
 0xf24   :  { %v1211_v16 = vmul.f32 %v3590_v44, %v1209_v15 }
 0xf26   :  { %1218 = vrot.lane.b32.xlu0 %v1211_v16, %s3793_s23 }
 0xf2a   :  { %1168 = vperm.xlu0 %3504, %v3417_v12  }
 0xf30   :  { %v1163_v17 = vpop.permute.xlu1 %1162 }
 0xf31   :  { %v1165_v18 = vmul.f32 %v3592_v50, %v1163_v17 }
 0xf33   :  { %1172 = vrot.lane.b32.xlu0 %v1165_v18, %s3793_s23 }
 0xf34   :  { %v1249_v22 = vpop.permute.xlu1 %1248 }
 0xf37   :  { %1223 = vrot.lane.b32.xlu0 %v1205_v58, %s3792_s22 }
 0xf41   :  { %v1184_v9 = vpop.permute.xlu1 %1183 }
 0xf42   :  { %v1244_v26 = vmul.f32 %v1184_v9, %v4136_v23  ;;  %v4220_v23 = vld [vmem:[%s4935_s4 + $0x24] ss:$8 sps:$4 sm:$0xff]   ;;  %v1186_v7 = vmul.f32 %v1184_v9, %v4169_v55  ;;  %v3424_v9 = vld [vmem:[%s4933_s2 + $0x14] sm:$0xf] }
 0xf98   :  { %v1219_v0 = vpop.permute.xlu0 %1218 }
 0xf99   :  { %v1221_v20 = vmul.f32 %v1219_v0, %v1215_v19 }
 0xf9b   :  { %v1241_v11 = vpack.c.bf16 %v1221_v20, %v1221_v20  ;;  %v1251_v59 = vadd.f32 %v1249_v22, %v1221_v20 }
 0xf9d   :  { %3422 = vst.msk [vmem:[%s4937_s6 + $0x16] sm:$0x3] %vm489_vm2, %v1241_v11  ;;  %1253 = vrot.lane.b32.xlu1 %v1251_v59, %s3791_s17 }
 0xfa1   :  { %1234 = vrot.lane.b32.xlu1 %v1232_v3, %s3792_s22 }
 0xfa5   :  { %1177 = vrot.lane.b32.xlu1 %v1159_v62, %s3792_s22  ;;  %v4195_v5 = vpop.permute.xlu0 %1168 }
 0xfa9   :  { %v1173_v6 = vpop.permute.xlu0 %1172 }
 0xfaa   :  { %v1175_v8 = vmul.f32 %v1173_v6, %v4195_v5 }
 0xfac   :  { %v1238_v25 = vpack.c.bf16 %v1175_v8, %v1175_v8  ;;  %v1245_v10 = vadd.f32 %v1244_v26, %v1175_v8 }
 0xfad   :  { %v1224_v50 = vpop.permute.xlu0 %1223 }
 0xfae   :  { %3421 = vst.msk [vmem:[%s4936_s5 + $0x8] sm:$0x3] %vm489_vm2, %v1238_v25  ;;  %v1226_v53 = vmul.f32 %v1224_v50, %v1215_v19  ;;  %v3425_v19 = vld [vmem:[%s4934_s3 + $0x28] sm:$0xf] }
 0xfaf   :  { %v1316_v55 = vsub.f32 1.0, %v3425_v19 }
0x100f   :  { %v1254_v27 = vpop.permute.xlu1 %1253 }
0x1010   :  { %v1256_v28 = vsel %vm506_vm3, %v1245_v10, %v1254_v27  ;;  %v1315_v10 = vsub.f32 1.0, %v3424_v9 }
0x1011   :  { %1257 = vst.msk [vmem:[#allocation2] sm:$0xf] %vm277_vm0, %v1256_v28 }
0x1013   :  { %v1235_v52 = vpop.permute.xlu1 %1234 }
0x1014   :  { %v1237_v54 = vadd.f32 %v1235_v52, %v1226_v53 }
0x1017   :  { %v1178_v41 = vpop.permute.xlu1 %1177 }
0x1018   :  { %v4205_v29 = vld [vmem:[#allocation2] sm:$0xf]  ;;  %v1180_v62 = vmul.f32 %v1178_v41, %v4195_v5 }
0x1019   :  { %v1266_v30 = vpack.c.bf16 %v4205_v29, %v4205_v29 }
0x101a   :  { %v1187_v14 = vadd.f32 %v1186_v7, %v1180_v62 }
0x101b   :  { %3423 = vmatmul.mubr.msk.bf16.vlgmr.msra.gmra.mxu1 %vm331_vm1, %v1266_v30 }
0x101c   :  { %1653 = vmatpush1.bf16.msra.mxu1 %v4213_v31  ;;  %1676 = vmatprep.mubr.bf16.mxu1 %v3789_v2 }
0x101d   :  { %1654 = vmatprep.subr.bf16.mxu1 %v4220_v23 }
0x1020   :  { %1655 = vmatpush1.bf16.msra.mxu1 %v4226_v32 }
0x1021   :  { %1656 = vmatprep.subr.bf16.mxu1 %v4232_v33 }
0x1024   :  { %1657 = vmatpush1.bf16.msra.mxu1 %v4238_v34 }
0x1025   :  { %1658 = vmatprep.subr.bf16.mxu1 %v4244_v35 }
0x1028   :  { %1659 = vmatpush1.bf16.msra.mxu1 %v4250_v36 }
0x1029   :  { %2026 = vmatprep.subr.bf16.mxu1 %v4152_v60 }
0x10db   :  { %v1304_v24 = vpop.f32.mrf.mxu1 }
0x10dc   :  { %v1320_v44 = vadd.f32 %v1319_v42, %v1304_v24 }
0x10dd   :  { %v1306_v45 = vpop.f32.mrf.mxu1 }
0x10de   :  { %3597 = vtanh.f32 %v1320_v44  ;;  %v1324_v46 = vadd.f32 %v1323_v21, %v1306_v45  ;;  %v3426_v56 = vmul.f32 -1.442695, %v1320_v44  ;;  %v42_v45 = vld [vmem:[%s4931_s0 + $0x18] sm:$0x3] }
0x10df   :  { %v1308_v47 = vpop.f32.mrf.mxu1  ;;  %43 = vst [vmem:[#allocation4 + $0xc] sm:$0x3] %v42_v45 }
0x10e0   :  { %3599 = vtanh.f32 %v1324_v46  ;;  %v3427_v43 = vmul.f32 -1.442695, %v1324_v46 }
0x10e1   :  { %v1309_v48 = vpop.f32.mrf.mxu1 }
0x10e2   :  { %3601 = vpow2.f32 %v3427_v43 }
0x10e3   :  { %3603 = vpow2.f32 %v3426_v56 }
0x10eb   :  { %v3598_v49 = vpop.eup %3597 }
0x10ec   :  { %1338 = vrot.lane.b32.xlu1 %v3598_v49, %s3791_s17 }
0x10ed   :  { %v3600_v51 = vpop.eup %3599 }
0x10ee   :  { %1384 = vrot.lane.b32.xlu0 %v3600_v51, %s3791_s17 }
0x10ef   :  { %v3602_v57 = vpop.eup %3601 }
0x10f0   :  { %v1378_v58 = vadd.f32 1.0, %v3602_v57  ;;  %v3604_v39 = vpop.eup %3603 }
0x10f1   :  { %v1328_v61 = vadd.f32 1.0, %v3604_v39 }
0x10f2   :  { %1259 = vrot.lane.b32.xlu0 %v1237_v54, %s3791_s17  ;;  %3605 = vrcp.f32 %v1378_v58  ;;  %v1505_v58 = vld [vmem:[#allocation4 + $0xc] sm:$0x3] }
0x10f3   :  { %3607 = vrcp.f32 %v1328_v61  ;;  %v1506_v61 = vunpack.c.l.bf16 %v1505_v58 }
0x10ff   :  { %v3606_v63 = vpop.eup %3605 }
0x1100   :  { %v3608_v15 = vpop.eup %3607 }
0x115e   :  { %v1339_v13 = vpop.permute.xlu1 %1338 }
0x115f   :  { %v1341_v17 = vmul.f32 %v3608_v15, %v1339_v13 }
0x1160   :  { %v1385_v4 = vpop.permute.xlu0 %1384 }
0x1161   :  { %v1387_v12 = vmul.f32 %v3606_v63, %v1385_v4 }
0x1163   :  { %1389 = vrot.lane.b32.xlu0 %v1387_v12, %s3791_s17 }
0x1164   :  { %v1260_v16 = vpop.permute.xlu0 %1259 }
0x1165   :  { %v1262_v18 = vsel %vm506_vm3, %v1187_v14, %v1260_v16 }
0x1166   :  { %1263 = vst.msk [vmem:[#allocation3] sm:$0xf] %vm277_vm0, %v1262_v18 }
0x1167   :  { %1343 = vrot.lane.b32.xlu0 %v1341_v17, %s3791_s17 }
0x116d   :  { %v4269_v0 = vld [vmem:[#allocation3] sm:$0xf] }
0x116e   :  { %1333 = vrot.lane.b32.xlu1 %v4269_v0, %s3791_s17  ;;  %v1382_v20 = vmul.f32 %v3606_v63, %v4269_v0 }
0x1172   :  { %1416 = vperm.xlu1 %3503, %v1316_v55  }
0x1176   :  { %1401 = vperm.xlu1 %3503, %v3425_v19  }
0x11d5   :  { %v1390_v22 = vpop.permute.xlu0 %1389 }
0x11d6   :  { %v1392_v11 = vadd.f32 %v1390_v22, %v1382_v20 }
0x11d8   :  { %3609 = vtanh.f32 %v1392_v11 }
0x11d9   :  { %v1344_v3 = vpop.permute.xlu0 %1343 }
0x11e0   :  { %v1334_v59 = vpop.permute.xlu1 %1333 }
0x11e1   :  { %v1336_v1 = vmul.f32 %v3608_v15, %v1334_v59 }
0x11e3   :  { %v1346_v5 = vadd.f32 %v1344_v3, %v1336_v1 }
0x11e5   :  { %v3610_v6 = vpop.eup %3609  ;;  %3611 = vtanh.f32 %v1346_v5 }
0x11e6   :  { %1395 = vrot.lane.b32.xlu0 %v3610_v6, %s3791_s17 }
0x11ed   :  { %v1417_v25 = vpop.permute.xlu1 %1416 }
0x11ee   :  { %v1433_v26 = vmul.f32 %v1417_v25, %v4205_v29  ;;  %v1419_v46 = vmul.f32 %v1417_v25, %v4269_v0 }
0x11f1   :  { %v1402_v38 = vpop.permute.xlu1 %1401 }
0x11f2   :  { %v3612_v8 = vpop.eup %3611 }
0x11f3   :  { %1349 = vrot.lane.b32.xlu0 %v3612_v8, %s3791_s17 }
0x11f7   :  { %1435 = vrot.lane.b32.xlu0 %v1433_v26, %s3792_s22 }
0x11fb   :  { %1370 = vperm.xlu0 %3504, %v1315_v10  }
0x1258   :  { %v1396_v27 = vpop.permute.xlu0 %1395 }
0x1259   :  { %v1398_v28 = vmul.f32 %v3606_v63, %v1396_v27 }
0x125b   :  { %1405 = vrot.lane.b32.xlu1 %v1398_v28, %s3793_s23 }
0x125f   :  { %1355 = vperm.xlu1 %3503, %v3424_v9  }
0x1265   :  { %v1350_v30 = vpop.permute.xlu0 %1349 }
0x1266   :  { %v1352_v37 = vmul.f32 %v3608_v15, %v1350_v30 }
0x1268   :  { %1359 = vrot.lane.b32.xlu1 %v1352_v37, %s3793_s23 }
0x1269   :  { %v1436_v21 = vpop.permute.xlu0 %1435 }
0x126c   :  { %1410 = vrot.lane.b32.xlu1 %v1392_v11, %s3792_s22 }
0x1276   :  { %v1371_v51 = vpop.permute.xlu0 %1370 }
0x1277   :  { %v1431_v52 = vmul.f32 %v1371_v51, %v4205_v29  ;;  %v3375_v29 = vld [vmem:[%s4932_s1 + $0x26] sm:$0x3]  ;;  %v1373_v25 = vmul.f32 %v1371_v51, %v4269_v0  ;;  %v3431_v51 = vld [vmem:[%s4933_s2 + $0x18] sm:$0xf] }
0x1278   :  { %158 = vst [vmem:[#allocation5 + $0x12] sm:$0x3] %v3375_v29 }
0x127f   :  { %v1509_v39 = vld [vmem:[#allocation5 + $0x12] sm:$0x3] }
0x1280   :  { %v1510_v41 = vunpack.c.l.bf16 %v1509_v39 }
0x12cd   :  { %v1406_v40 = vpop.permute.xlu1 %1405 }
0x12ce   :  { %v1408_v42 = vmul.f32 %v1406_v40, %v1402_v38 }
0x12d0   :  { %v1428_v24 = vpack.c.bf16 %v1408_v42, %v1408_v42  ;;  %v1438_v44 = vadd.f32 %v1436_v21, %v1408_v42 }
0x12d2   :  { %3429 = vst.msk [vmem:[%s4937_s6 + $0x14] sm:$0x3] %vm489_vm2, %v1428_v24  ;;  %1440 = vrot.lane.b32.xlu0 %v1438_v44, %s3791_s17 }
0x12d6   :  { %1421 = vrot.lane.b32.xlu0 %v1419_v46, %s3792_s22 }
0x12da   :  { %v1356_v47 = vpop.permute.xlu1 %1355  ;;  %1364 = vrot.lane.b32.xlu0 %v1346_v5, %s3792_s22 }
0x12de   :  { %v1360_v48 = vpop.permute.xlu1 %1359 }
0x12df   :  { %v1362_v49 = vmul.f32 %v1360_v48, %v1356_v47 }
0x12e1   :  { %v1425_v50 = vpack.c.bf16 %v1362_v49, %v1362_v49  ;;  %v1432_v53 = vadd.f32 %v1431_v52, %v1362_v49 }
0x12e2   :  { %v1411_v15 = vpop.permute.xlu1 %1410 }
0x12e3   :  { %3428 = vst.msk [vmem:[%s4936_s5 + $0xa] sm:$0x3] %vm489_vm2, %v1425_v50  ;;  %v1413_v18 = vmul.f32 %v1411_v15, %v1402_v38  ;;  %v3432_v38 = vld [vmem:[%s4934_s3 + $0x24] sm:$0xf] }
0x12e4   :  { %v1503_v0 = vsub.f32 1.0, %v3432_v38 }
0x1344   :  { %v1441_v54 = vpop.permute.xlu0 %1440 }
0x1345   :  { %v1443_v43 = vsel %vm506_vm3, %v1432_v53, %v1441_v54  ;;  %v1502_v53 = vsub.f32 1.0, %v3431_v51 }
0x1346   :  { %1444 = vst.msk [vmem:[#allocation2] sm:$0xf] %vm277_vm0, %v1443_v43 }
0x1348   :  { %v1422_v17 = vpop.permute.xlu0 %1421 }
0x1349   :  { %v1424_v19 = vadd.f32 %v1422_v17, %v1413_v18 }
0x134c   :  { %v1365_v3 = vpop.permute.xlu0 %1364 }
0x134d   :  { %v4302_v56 = vld [vmem:[#allocation2] sm:$0xf]  ;;  %v1367_v5 = vmul.f32 %v1365_v3, %v1356_v47 }
0x134e   :  { %v1453_v57 = vpack.c.bf16 %v4302_v56, %v4302_v56 }
0x134f   :  { %v1374_v10 = vadd.f32 %v1373_v25, %v1367_v5 }
0x1350   :  { %3430 = vmatmul.mubr.msk.bf16.vlgmr.msra.gmra.mxu0 %vm331_vm1, %v1453_v57 }
0x1351   :  { %1840 = vmatpush1.bf16.msra.mxu0 %v4213_v31  ;;  %1863 = vmatprep.mubr.bf16.mxu0 %v3789_v2 }
0x1352   :  { %1841 = vmatprep.subr.bf16.mxu0 %v4220_v23 }
0x1355   :  { %1842 = vmatpush1.bf16.msra.mxu0 %v4226_v32 }
0x1356   :  { %1843 = vmatprep.subr.bf16.mxu0 %v4232_v33 }
0x1359   :  { %1844 = vmatpush1.bf16.msra.mxu0 %v4238_v34 }
0x135a   :  { %1845 = vmatprep.subr.bf16.mxu0 %v4244_v35 }
0x135d   :  { %1846 = vmatpush1.bf16.msra.mxu0 %v4250_v36 }
0x135e   :  { %2213 = vmatprep.subr.bf16.mxu0 %v4152_v60 }
0x1410   :  { %v1491_v62 = vpop.f32.mrf.mxu0 }
0x1411   :  { %v1507_v63 = vadd.f32 %v1506_v61, %v1491_v62 }
0x1412   :  { %v1493_v4 = vpop.f32.mrf.mxu0 }
0x1413   :  { %3613 = vtanh.f32 %v1507_v63  ;;  %v1511_v7 = vadd.f32 %v1510_v41, %v1493_v4  ;;  %v3433_v20 = vmul.f32 -1.442695, %v1507_v63  ;;  %v44_v4 = vld [vmem:[%s4931_s0 + $0x1c] sm:$0x3] }
0x1414   :  { %v1495_v12 = vpop.f32.mrf.mxu0  ;;  %45 = vst [vmem:[#allocation4 + $0xe] sm:$0x3] %v44_v4 }
0x1415   :  { %3615 = vtanh.f32 %v1511_v7  ;;  %v3434_v55 = vmul.f32 -1.442695, %v1511_v7 }
0x1416   :  { %v1496_v13 = vpop.f32.mrf.mxu0 }
0x1417   :  { %3617 = vpow2.f32 %v3434_v55 }
0x1418   :  { %3619 = vpow2.f32 %v3433_v20 }
0x1420   :  { %v3614_v14 = vpop.eup %3613 }
0x1421   :  { %1525 = vrot.lane.b32.xlu0 %v3614_v14, %s3791_s17 }
0x1422   :  { %v3616_v16 = vpop.eup %3615 }
0x1423   :  { %1571 = vrot.lane.b32.xlu1 %v3616_v16, %s3791_s17 }
0x1424   :  { %v3618_v22 = vpop.eup %3617 }
0x1425   :  { %v1565_v11 = vadd.f32 1.0, %v3618_v22  ;;  %v3620_v59 = vpop.eup %3619 }
0x1426   :  { %v1515_v1 = vadd.f32 1.0, %v3620_v59 }
0x1427   :  { %1446 = vrot.lane.b32.xlu1 %v1424_v19, %s3791_s17  ;;  %3621 = vrcp.f32 %v1565_v11  ;;  %v1692_v11 = vld [vmem:[#allocation4 + $0xe] sm:$0x3] }
0x1428   :  { %3623 = vrcp.f32 %v1515_v1  ;;  %v1693_v1 = vunpack.c.l.bf16 %v1692_v11 }
0x1434   :  { %v3622_v6 = vpop.eup %3621 }
0x1435   :  { %v3624_v27 = vpop.eup %3623 }
0x1493   :  { %v1526_v26 = vpop.permute.xlu0 %1525 }
0x1494   :  { %v1528_v30 = vmul.f32 %v3624_v27, %v1526_v26 }
0x1495   :  { %v1572_v8 = vpop.permute.xlu1 %1571 }
0x1496   :  { %v1574_v9 = vmul.f32 %v3622_v6, %v1572_v8 }
0x1498   :  { %1576 = vrot.lane.b32.xlu1 %v1574_v9, %s3791_s17 }
0x1499   :  { %v1447_v28 = vpop.permute.xlu1 %1446 }
0x149a   :  { %v1449_v37 = vsel %vm506_vm3, %v1374_v10, %v1447_v28 }
0x149b   :  { %1450 = vst.msk [vmem:[#allocation3] sm:$0xf] %vm277_vm0, %v1449_v37 }
0x149c   :  { %1530 = vrot.lane.b32.xlu1 %v1528_v30, %s3791_s17 }
0x14a2   :  { %v4330_v40 = vld [vmem:[#allocation3] sm:$0xf] }
0x14a3   :  { %1520 = vrot.lane.b32.xlu0 %v4330_v40, %s3791_s17  ;;  %v1569_v42 = vmul.f32 %v3622_v6, %v4330_v40 }
0x14a7   :  { %1603 = vperm.xlu0 %3504, %v1503_v0  }
0x14ab   :  { %1588 = vperm.xlu0 %3504, %v3432_v38  }
0x150a   :  { %v1577_v21 = vpop.permute.xlu1 %1576 }
0x150b   :  { %v1579_v24 = vadd.f32 %v1577_v21, %v1569_v42 }
0x150d   :  { %3625 = vtanh.f32 %v1579_v24 }
0x150e   :  { %v1531_v46 = vpop.permute.xlu1 %1530 }
0x1515   :  { %v1521_v44 = vpop.permute.xlu0 %1520 }
0x1516   :  { %v1523_v45 = vmul.f32 %v3624_v27, %v1521_v44 }
0x1518   :  { %v1533_v47 = vadd.f32 %v1531_v46, %v1523_v45 }
0x151a   :  { %v3626_v48 = vpop.eup %3625  ;;  %3627 = vtanh.f32 %v1533_v47 }
0x151b   :  { %1582 = vrot.lane.b32.xlu1 %v3626_v48, %s3791_s17 }
0x1522   :  { %v1604_v50 = vpop.permute.xlu0 %1603 }
0x1523   :  { %v1620_v52 = vmul.f32 %v1604_v50, %v4302_v56  ;;  %v1606_v7 = vmul.f32 %v1604_v50, %v4330_v40 }
0x1526   :  { %v1589_v58 = vpop.permute.xlu0 %1588 }
0x1527   :  { %v3628_v49 = vpop.eup %3627 }
0x1528   :  { %1536 = vrot.lane.b32.xlu1 %v3628_v49, %s3791_s17 }
0x152c   :  { %1622 = vrot.lane.b32.xlu1 %v1620_v52, %s3792_s22 }
0x1530   :  { %1557 = vperm.xlu1 %3503, %v1502_v53  }
0x158d   :  { %v1583_v54 = vpop.permute.xlu1 %1582 }
0x158e   :  { %v1585_v43 = vmul.f32 %v3622_v6, %v1583_v54 }
0x1590   :  { %1592 = vrot.lane.b32.xlu0 %v1585_v43, %s3793_s23 }
0x1594   :  { %1542 = vperm.xlu0 %3504, %v3431_v51  }
0x159a   :  { %v1537_v57 = vpop.permute.xlu1 %1536 }
0x159b   :  { %v1539_v29 = vmul.f32 %v3624_v27, %v1537_v57 }
0x159d   :  { %1546 = vrot.lane.b32.xlu0 %v1539_v29, %s3793_s23 }
0x159e   :  { %v1623_v41 = vpop.permute.xlu1 %1622 }
0x15a1   :  { %1597 = vrot.lane.b32.xlu0 %v1579_v24, %s3792_s22 }
0x15ab   :  { %v1558_v16 = vpop.permute.xlu1 %1557 }
0x15ac   :  { %v1618_v17 = vmul.f32 %v1558_v16, %v4302_v56  ;;  %v3374_v56 = vld [vmem:[%s4932_s1 + $0x22] sm:$0x3]  ;;  %v1560_v50 = vmul.f32 %v1558_v16, %v4330_v40  ;;  %v3438_v16 = vld [vmem:[%s4933_s2 + $0x1c] sm:$0xf] }
0x15ad   :  { %156 = vst [vmem:[#allocation5 + $0x10] sm:$0x3] %v3374_v56 }
0x15b4   :  { %v1696_v59 = vld [vmem:[#allocation5 + $0x10] sm:$0x3] }
0x15b5   :  { %v1697_v3 = vunpack.c.l.bf16 %v1696_v59 }
0x1602   :  { %v1593_v39 = vpop.permute.xlu0 %1592 }
0x1603   :  { %v1595_v61 = vmul.f32 %v1593_v39, %v1589_v58 }
0x1605   :  { %v1615_v62 = vpack.c.bf16 %v1595_v61, %v1595_v61  ;;  %v1625_v63 = vadd.f32 %v1623_v41, %v1595_v61 }
0x1607   :  { %3436 = vst.msk [vmem:[%s4937_s6 + $0x12] sm:$0x3] %vm489_vm2, %v1615_v62  ;;  %1627 = vrot.lane.b32.xlu1 %v1625_v63, %s3791_s17 }
0x160b   :  { %1608 = vrot.lane.b32.xlu1 %v1606_v7, %s3792_s22 }
0x160f   :  { %1551 = vrot.lane.b32.xlu1 %v1533_v47, %s3792_s22  ;;  %v1543_v12 = vpop.permute.xlu0 %1542 }
0x1613   :  { %v1547_v13 = vpop.permute.xlu0 %1546 }
0x1614   :  { %v1549_v14 = vmul.f32 %v1547_v13, %v1543_v12 }
0x1616   :  { %v1612_v15 = vpack.c.bf16 %v1549_v14, %v1549_v14  ;;  %v1619_v18 = vadd.f32 %v1618_v17, %v1549_v14 }
0x1617   :  { %v1598_v27 = vpop.permute.xlu0 %1597 }
0x1618   :  { %3435 = vst.msk [vmem:[%s4936_s5 + $0xc] sm:$0x3] %vm489_vm2, %v1612_v15  ;;  %v1600_v37 = vmul.f32 %v1598_v27, %v1589_v58  ;;  %v3439_v58 = vld [vmem:[%s4934_s3 + $0x20] sm:$0xf] }
0x1619   :  { %v1690_v40 = vsub.f32 1.0, %v3439_v58 }
0x1679   :  { %v1628_v19 = vpop.permute.xlu1 %1627 }
0x167a   :  { %v1630_v55 = vsel %vm506_vm3, %v1619_v18, %v1628_v19  ;;  %v1689_v18 = vsub.f32 1.0, %v3438_v16 }
0x167b   :  { %1631 = vst.msk [vmem:[#allocation2] sm:$0xf] %vm277_vm0, %v1630_v55 }
0x167d   :  { %v1609_v30 = vpop.permute.xlu1 %1608 }
0x167e   :  { %v1611_v38 = vadd.f32 %v1609_v30, %v1600_v37 }
0x1681   :  { %v1552_v46 = vpop.permute.xlu1 %1551 }
0x1682   :  { %v4363_v20 = vld [vmem:[#allocation2] sm:$0xf]  ;;  %v1554_v47 = vmul.f32 %v1552_v46, %v1543_v12 }
0x1683   :  { %v1640_v22 = vpack.c.bf16 %v4363_v20, %v4363_v20 }
0x1684   :  { %v1561_v53 = vadd.f32 %v1560_v50, %v1554_v47 }
0x1685   :  { %3437 = vmatmul.mubr.msk.bf16.vlgmr.msra.gmra.mxu1 %vm331_vm1, %v1640_v22 }
0x1686   :  { %2027 = vmatpush1.bf16.msra.mxu1 %v4213_v31  ;;  %2050 = vmatprep.mubr.bf16.mxu1 %v3789_v2 }
0x1687   :  { %2028 = vmatprep.subr.bf16.mxu1 %v4220_v23 }
0x168a   :  { %2029 = vmatpush1.bf16.msra.mxu1 %v4226_v32 }
0x168b   :  { %2030 = vmatprep.subr.bf16.mxu1 %v4232_v33 }
0x168e   :  { %2031 = vmatpush1.bf16.msra.mxu1 %v4238_v34 }
0x168f   :  { %2032 = vmatprep.subr.bf16.mxu1 %v4244_v35 }
0x1692   :  { %2033 = vmatpush1.bf16.msra.mxu1 %v4250_v36 }
0x1693   :  { %2400 = vmatprep.subr.bf16.mxu1 %v4152_v60 }
0x1745   :  { %v1678_v5 = vpop.f32.mrf.mxu1 }
0x1746   :  { %v1694_v6 = vadd.f32 %v1693_v1, %v1678_v5 }
0x1747   :  { %v1680_v8 = vpop.f32.mrf.mxu1 }
0x1748   :  { %3629 = vtanh.f32 %v1694_v6  ;;  %v1698_v25 = vadd.f32 %v1697_v3, %v1680_v8  ;;  %v3440_v42 = vmul.f32 -1.442695, %v1694_v6  ;;  %v46_v8 = vld [vmem:[%s4931_s0 + $0x20] sm:$0x3] }
0x1749   :  { %v1682_v9 = vpop.f32.mrf.mxu1  ;;  %47 = vst [vmem:[#allocation4 + $0x10] sm:$0x3] %v46_v8 }
0x174a   :  { %3631 = vtanh.f32 %v1698_v25  ;;  %v3441_v0 = vmul.f32 -1.442695, %v1698_v25 }
0x174b   :  { %v1683_v26 = vpop.f32.mrf.mxu1 }
0x174c   :  { %3633 = vpow2.f32 %v3441_v0 }
0x174d   :  { %3635 = vpow2.f32 %v3440_v42 }
0x1755   :  { %v3630_v10 = vpop.eup %3629 }
0x1756   :  { %1712 = vrot.lane.b32.xlu1 %v3630_v10, %s3791_s17 }
0x1757   :  { %v3632_v28 = vpop.eup %3631 }
0x1758   :  { %1758 = vrot.lane.b32.xlu0 %v3632_v28, %s3791_s17 }
0x1759   :  { %v3634_v21 = vpop.eup %3633 }
0x175a   :  { %v1752_v24 = vadd.f32 1.0, %v3634_v21  ;;  %v3636_v44 = vpop.eup %3635 }
0x175b   :  { %v1702_v45 = vadd.f32 1.0, %v3636_v44 }
0x175c   :  { %1633 = vrot.lane.b32.xlu0 %v1611_v38, %s3791_s17  ;;  %3637 = vrcp.f32 %v1752_v24  ;;  %v1879_v24 = vld [vmem:[#allocation4 + $0x10] sm:$0x3] }
0x175d   :  { %3639 = vrcp.f32 %v1702_v45  ;;  %v1880_v45 = vunpack.c.l.bf16 %v1879_v24 }
0x1769   :  { %v3638_v48 = vpop.eup %3637 }
0x176a   :  { %v3640_v54 = vpop.eup %3639 }
0x17c8   :  { %v1713_v52 = vpop.permute.xlu1 %1712 }
0x17c9   :  { %v1715_v57 = vmul.f32 %v3640_v54, %v1713_v52 }
0x17ca   :  { %v1759_v49 = vpop.permute.xlu0 %1758 }
0x17cb   :  { %v1761_v51 = vmul.f32 %v3638_v48, %v1759_v49 }
0x17cd   :  { %1763 = vrot.lane.b32.xlu0 %v1761_v51, %s3791_s17 }
0x17ce   :  { %v1634_v43 = vpop.permute.xlu0 %1633 }
0x17cf   :  { %v1636_v29 = vsel %vm506_vm3, %v1561_v53, %v1634_v43 }
0x17d0   :  { %1637 = vst.msk [vmem:[#allocation3] sm:$0xf] %vm277_vm0, %v1636_v29 }
0x17d1   :  { %1717 = vrot.lane.b32.xlu0 %v1715_v57, %s3791_s17 }
0x17d7   :  { %v4391_v39 = vld [vmem:[#allocation3] sm:$0xf] }
0x17d8   :  { %1707 = vrot.lane.b32.xlu1 %v4391_v39, %s3791_s17  ;;  %v1756_v61 = vmul.f32 %v3638_v48, %v4391_v39 }
0x17dc   :  { %1790 = vperm.xlu1 %3503, %v1690_v40  }
0x17e0   :  { %1775 = vperm.xlu1 %3503, %v3439_v58  }
0x183f   :  { %v1764_v41 = vpop.permute.xlu0 %1763 }
0x1840   :  { %v1766_v62 = vadd.f32 %v1764_v41, %v1756_v61 }
0x1842   :  { %3641 = vtanh.f32 %v1766_v62 }
0x1843   :  { %v1718_v7 = vpop.permute.xlu0 %1717 }
0x184a   :  { %v1708_v63 = vpop.permute.xlu1 %1707 }
0x184b   :  { %v1710_v4 = vmul.f32 %v3640_v54, %v1708_v63 }
0x184d   :  { %v1720_v12 = vadd.f32 %v1718_v7, %v1710_v4 }
0x184f   :  { %v3642_v13 = vpop.eup %3641  ;;  %3643 = vtanh.f32 %v1720_v12 }
0x1850   :  { %1769 = vrot.lane.b32.xlu0 %v3642_v13, %s3791_s17 }
0x1857   :  { %v1791_v15 = vpop.permute.xlu1 %1790 }
0x1858   :  { %v1807_v17 = vmul.f32 %v1791_v15, %v4363_v20  ;;  %v1793_v25 = vmul.f32 %v1791_v15, %v4391_v39 }
0x185b   :  { %v1776_v11 = vpop.permute.xlu1 %1775 }
0x185c   :  { %v3644_v14 = vpop.eup %3643 }
0x185d   :  { %1723 = vrot.lane.b32.xlu0 %v3644_v14, %s3791_s17 }
0x1861   :  { %1809 = vrot.lane.b32.xlu0 %v1807_v17, %s3792_s22 }
0x1865   :  { %1744 = vperm.xlu0 %3504, %v1689_v18  }
0x18c2   :  { %v1770_v19 = vpop.permute.xlu0 %1769 }
0x18c3   :  { %v1772_v55 = vmul.f32 %v3638_v48, %v1770_v19 }
0x18c5   :  { %1779 = vrot.lane.b32.xlu1 %v1772_v55, %s3793_s23 }
0x18c9   :  { %1729 = vperm.xlu1 %3503, %v3438_v16  }
0x18cf   :  { %v1724_v22 = vpop.permute.xlu0 %1723 }
0x18d0   :  { %v1726_v56 = vmul.f32 %v3640_v54, %v1724_v22 }
0x18d2   :  { %1733 = vrot.lane.b32.xlu1 %v1726_v56, %s3793_s23  ;;  %v3446_v56 = vld [vmem:[%s4934_s3 + $0x1c] sm:$0xf] }
0x18d3   :  { %v1810_v3 = vpop.permute.xlu0 %1809 }
0x18d6   :  { %1784 = vrot.lane.b32.xlu1 %v1766_v62, %s3792_s22 }
0x18e0   :  { %v1745_v28 = vpop.permute.xlu0 %1744 }
0x18e1   :  { %v1805_v30 = vmul.f32 %v1745_v28, %v4363_v20  ;;  %v3373_v20 = vld [vmem:[%s4932_s1 + $0x1e] sm:$0x3]  ;;  %v1747_v14 = vmul.f32 %v1745_v28, %v4391_v39  ;;  %v1877_v39 = vsub.f32 1.0, %v3446_v56 }
0x18e2   :  { %154 = vst [vmem:[#allocation5 + $0xe] sm:$0x3] %v3373_v20 }
0x18e9   :  { %v1883_v44 = vld [vmem:[#allocation5 + $0xe] sm:$0x3] }
0x18ea   :  { %v1884_v46 = vunpack.c.l.bf16 %v1883_v44 }
0x1937   :  { %v1780_v59 = vpop.permute.xlu1 %1779 }
0x1938   :  { %v1782_v1 = vmul.f32 %v1780_v59, %v1776_v11 }
0x193a   :  { %v1802_v5 = vpack.c.bf16 %v1782_v1, %v1782_v1  ;;  %v1812_v6 = vadd.f32 %v1810_v3, %v1782_v1 }
0x193c   :  { %3443 = vst.msk [vmem:[%s4937_s6 + $0x10] sm:$0x3] %vm489_vm2, %v1802_v5  ;;  %1814 = vrot.lane.b32.xlu0 %v1812_v6, %s3791_s17 }
0x1940   :  { %1795 = vrot.lane.b32.xlu0 %v1793_v25, %s3792_s22 }
0x1944   :  { %v1730_v9 = vpop.permute.xlu1 %1729  ;;  %1738 = vrot.lane.b32.xlu0 %v1720_v12, %s3792_s22 }
0x1948   :  { %v1734_v26 = vpop.permute.xlu1 %1733 }
0x1949   :  { %v1736_v10 = vmul.f32 %v1734_v26, %v1730_v9 }
0x194b   :  { %v1799_v27 = vpack.c.bf16 %v1736_v10, %v1736_v10  ;;  %v1806_v37 = vadd.f32 %v1805_v30, %v1736_v10 }
0x194c   :  { %v1785_v54 = vpop.permute.xlu1 %1784 }
0x194d   :  { %3442 = vst.msk [vmem:[%s4936_s5 + $0xe] sm:$0x3] %vm489_vm2, %v1799_v27  ;;  %v1787_v57 = vmul.f32 %v1785_v54, %v1776_v11  ;;  %v3445_v27 = vld [vmem:[%s4933_s2 + $0x20] sm:$0xf] }
0x194e   :  { %v1876_v30 = vsub.f32 1.0, %v3445_v27 }
0x19ae   :  { %v1815_v38 = vpop.permute.xlu0 %1814 }
0x19af   :  { %v1817_v0 = vsel %vm506_vm3, %v1806_v37, %v1815_v38 }
0x19b0   :  { %1818 = vst.msk [vmem:[#allocation2] sm:$0xf] %vm277_vm0, %v1817_v0 }
0x19b2   :  { %v1796_v43 = vpop.permute.xlu0 %1795 }
0x19b3   :  { %v1798_v29 = vadd.f32 %v1796_v43, %v1787_v57 }
0x19b6   :  { %v1739_v4 = vpop.permute.xlu0 %1738 }
0x19b7   :  { %v4424_v42 = vld [vmem:[#allocation2] sm:$0xf]  ;;  %v1741_v7 = vmul.f32 %v1739_v4, %v1730_v9 }
0x19b8   :  { %v1827_v21 = vpack.c.bf16 %v4424_v42, %v4424_v42 }
0x19b9   :  { %v1748_v17 = vadd.f32 %v1747_v14, %v1741_v7 }
0x19ba   :  { %3444 = vmatmul.mubr.msk.bf16.vlgmr.msra.gmra.mxu0 %vm331_vm1, %v1827_v21 }
0x19bb   :  { %2214 = vmatpush1.bf16.msra.mxu0 %v4213_v31  ;;  %2237 = vmatprep.mubr.bf16.mxu0 %v3789_v2 }
0x19bc   :  { %2215 = vmatprep.subr.bf16.mxu0 %v4220_v23 }
0x19bf   :  { %2216 = vmatpush1.bf16.msra.mxu0 %v4226_v32 }
0x19c0   :  { %2217 = vmatprep.subr.bf16.mxu0 %v4232_v33 }
0x19c3   :  { %2218 = vmatpush1.bf16.msra.mxu0 %v4238_v34 }
0x19c4   :  { %2219 = vmatprep.subr.bf16.mxu0 %v4244_v35 }
0x19c7   :  { %2220 = vmatpush1.bf16.msra.mxu0 %v4250_v36 }
0x19c8   :  { %2587 = vmatprep.subr.bf16.mxu0 %v4152_v60 }
0x1a7a   :  { %v1865_v47 = vpop.f32.mrf.mxu0 }
0x1a7b   :  { %v1881_v48 = vadd.f32 %v1880_v45, %v1865_v47 }
0x1a7c   :  { %v1867_v49 = vpop.f32.mrf.mxu0 }
0x1a7d   :  { %3645 = vtanh.f32 %v1881_v48  ;;  %v1885_v50 = vadd.f32 %v1884_v46, %v1867_v49  ;;  %v3447_v40 = vmul.f32 -1.442695, %v1881_v48  ;;  %v48_v48 = vld [vmem:[%s4931_s0 + $0x24] sm:$0x3] }
0x1a7e   :  { %v1869_v51 = vpop.f32.mrf.mxu0  ;;  %49 = vst [vmem:[#allocation4 + $0x12] sm:$0x3] %v48_v48 }
0x1a7f   :  { %3647 = vtanh.f32 %v1885_v50  ;;  %v3448_v58 = vmul.f32 -1.442695, %v1885_v50 }
0x1a80   :  { %v1870_v52 = vpop.f32.mrf.mxu0 }
0x1a81   :  { %3649 = vpow2.f32 %v3448_v58 }
0x1a82   :  { %3651 = vpow2.f32 %v3447_v40 }
0x1a8a   :  { %v3646_v53 = vpop.eup %3645 }
0x1a8b   :  { %1899 = vrot.lane.b32.xlu0 %v3646_v53, %s3791_s17 }
0x1a8c   :  { %v3648_v60 = vpop.eup %3647 }
0x1a8d   :  { %1945 = vrot.lane.b32.xlu1 %v3648_v60, %s3791_s17 }
0x1a8e   :  { %v3650_v61 = vpop.eup %3649 }
0x1a8f   :  { %v1939_v41 = vadd.f32 1.0, %v3650_v61  ;;  %v3652_v62 = vpop.eup %3651 }
0x1a90   :  { %v1889_v63 = vadd.f32 1.0, %v3652_v62 }
0x1a91   :  { %1820 = vrot.lane.b32.xlu1 %v1798_v29, %s3791_s17  ;;  %3653 = vrcp.f32 %v1939_v41 }
0x1a92   :  { %3655 = vrcp.f32 %v1889_v63 }
0x1a9e   :  { %v3654_v12 = vpop.eup %3653 }
0x1a9f   :  { %v3656_v18 = vpop.eup %3655 }
0x1afd   :  { %v1900_v16 = vpop.permute.xlu0 %1899 }
0x1afe   :  { %v1902_v55 = vmul.f32 %v3656_v18, %v1900_v16 }
0x1aff   :  { %v1946_v13 = vpop.permute.xlu1 %1945 }
0x1b00   :  { %v1948_v15 = vmul.f32 %v3654_v12, %v1946_v13 }
0x1b02   :  { %1950 = vrot.lane.b32.xlu1 %v1948_v15, %s3791_s17 }
0x1b03   :  { %v1821_v19 = vpop.permute.xlu1 %1820 }
0x1b04   :  { %v1823_v22 = vsel %vm506_vm3, %v1748_v17, %v1821_v19 }
0x1b05   :  { %1824 = vst.msk [vmem:[#allocation3] sm:$0xf] %vm277_vm0, %v1823_v22 }
0x1b06   :  { %1904 = vrot.lane.b32.xlu1 %v1902_v55, %s3791_s17 }
0x1b0c   :  { %v4452_v11 = vld [vmem:[#allocation3] sm:$0xf] }
0x1b0d   :  { %1894 = vrot.lane.b32.xlu0 %v4452_v11, %s3791_s17  ;;  %v1943_v59 = vmul.f32 %v3654_v12, %v4452_v11 }
0x1b11   :  { %1977 = vperm.xlu0 %3504, %v1877_v39  }
0x1b15   :  { %1962 = vperm.xlu0 %3504, %v3446_v56  }
0x1b74   :  { %v1951_v1 = vpop.permute.xlu1 %1950 }
0x1b75   :  { %v1953_v3 = vadd.f32 %v1951_v1, %v1943_v59 }
0x1b77   :  { %3657 = vtanh.f32 %v1953_v3 }
0x1b78   :  { %v1905_v8 = vpop.permute.xlu1 %1904 }
0x1b7f   :  { %v1895_v5 = vpop.permute.xlu0 %1894 }
0x1b80   :  { %v1897_v6 = vmul.f32 %v3656_v18, %v1895_v5 }
0x1b82   :  { %v1907_v25 = vadd.f32 %v1905_v8, %v1897_v6 }
0x1b84   :  { %v3658_v9 = vpop.eup %3657  ;;  %3659 = vtanh.f32 %v1907_v25 }
0x1b85   :  { %1956 = vrot.lane.b32.xlu1 %v3658_v9, %s3791_s17 }
0x1b8c   :  { %v1978_v10 = vpop.permute.xlu0 %1977 }
0x1b8d   :  { %v1994_v28 = vmul.f32 %v1978_v10, %v4424_v42  ;;  %v1980_v49 = vmul.f32 %v1978_v10, %v4452_v11 }
0x1b90   :  { %v1963_v20 = vpop.permute.xlu0 %1962 }
0x1b91   :  { %v3660_v26 = vpop.eup %3659 }
0x1b92   :  { %1910 = vrot.lane.b32.xlu1 %v3660_v26, %s3791_s17 }
0x1b96   :  { %1996 = vrot.lane.b32.xlu1 %v1994_v28, %s3792_s22 }
0x1b9a   :  { %1931 = vperm.xlu1 %3503, %v1876_v30  }
0x1bf7   :  { %v1957_v37 = vpop.permute.xlu1 %1956 }
0x1bf8   :  { %v1959_v38 = vmul.f32 %v3654_v12, %v1957_v37 }
0x1bfa   :  { %1966 = vrot.lane.b32.xlu0 %v1959_v38, %s3793_s23 }
0x1bfe   :  { %1916 = vperm.xlu0 %3504, %v3445_v27   ;;  %v3453_v27 = vld [vmem:[%s4934_s3 + $0x18] sm:$0xf] }
0x1c04   :  { %v1911_v0 = vpop.permute.xlu1 %1910 }
0x1c05   :  { %v1913_v21 = vmul.f32 %v3656_v18, %v1911_v0 }
0x1c07   :  { %1920 = vrot.lane.b32.xlu0 %v1913_v21, %s3793_s23 }
0x1c08   :  { %v1997_v45 = vpop.permute.xlu1 %1996 }
0x1c0b   :  { %1971 = vrot.lane.b32.xlu0 %v1953_v3, %s3792_s22 }
0x1c15   :  { %v1932_v54 = vpop.permute.xlu1 %1931 }
0x1c16   :  { %v1992_v60 = vmul.f32 %v1932_v54, %v4424_v42  ;;  %v4501_v42 = vld [vmem:[%s4935_s4 + $0x34] ss:$8 sps:$4 sm:$0xff]   ;;  %v1934_v3 = vmul.f32 %v1932_v54, %v4452_v11  ;;  %v2064_v11 = vsub.f32 1.0, %v3453_v27 }
0x1c6c   :  { %v1967_v24 = vpop.permute.xlu0 %1966 }
0x1c6d   :  { %v1969_v44 = vmul.f32 %v1967_v24, %v1963_v20 }
0x1c6f   :  { %v1989_v46 = vpack.c.bf16 %v1969_v44, %v1969_v44  ;;  %v1999_v47 = vadd.f32 %v1997_v45, %v1969_v44 }
0x1c71   :  { %3450 = vst.msk [vmem:[%s4937_s6 + $0xe] sm:$0x3] %vm489_vm2, %v1989_v46  ;;  %2001 = vrot.lane.b32.xlu1 %v1999_v47, %s3791_s17  ;;  %v3452_v47 = vld [vmem:[%s4933_s2 + $0x24] sm:$0xf] }
0x1c75   :  { %1982 = vrot.lane.b32.xlu1 %v1980_v49, %s3792_s22  ;;  %v2063_v49 = vsub.f32 1.0, %v3452_v47 }
0x1c79   :  { %1925 = vrot.lane.b32.xlu1 %v1907_v25, %s3792_s22  ;;  %v1917_v50 = vpop.permute.xlu0 %1916 }
0x1c7d   :  { %v1921_v51 = vpop.permute.xlu0 %1920 }
0x1c7e   :  { %v1923_v52 = vmul.f32 %v1921_v51, %v1917_v50 }
0x1c80   :  { %v1986_v53 = vpack.c.bf16 %v1923_v52, %v1923_v52  ;;  %v1993_v43 = vadd.f32 %v1992_v60, %v1923_v52 }
0x1c81   :  { %v1972_v7 = vpop.permute.xlu0 %1971 }
0x1c82   :  { %3449 = vst.msk [vmem:[%s4936_s5 + $0x10] sm:$0x3] %vm489_vm2, %v1986_v53  ;;  %v1974_v14 = vmul.f32 %v1972_v7, %v1963_v20 }
0x1ce3   :  { %v2002_v57 = vpop.permute.xlu1 %2001 }
0x1ce4   :  { %v2004_v29 = vsel %vm506_vm3, %v1993_v43, %v2002_v57 }
0x1ce5   :  { %2005 = vst.msk [vmem:[#allocation2] sm:$0xf] %vm277_vm0, %v2004_v29 }
0x1ce7   :  { %v1983_v13 = vpop.permute.xlu1 %1982 }
0x1ce8   :  { %v1985_v15 = vadd.f32 %v1983_v13, %v1974_v14  ;;  %v4575_v13 = vld [vmem:[%s4935_s4 + $0x20] ss:$8 sps:$4 sm:$0xff]   ;;  %v4581_v14 = vld [vmem:[%s4935_s4 + $0x14] ss:$8 sps:$4 sm:$0xff]  }
0x1ceb   :  { %v1926_v56 = vpop.permute.xlu1 %1925 }
0x1cec   :  { %v4485_v58 = vld [vmem:[#allocation2] sm:$0xf]  ;;  %v1928_v39 = vmul.f32 %v1926_v56, %v1917_v50 }
0x1ced   :  { %v2014_v40 = vpack.c.bf16 %v4485_v58, %v4485_v58 }
0x1cee   :  { %v1935_v8 = vadd.f32 %v1934_v3, %v1928_v39 }
0x1cef   :  { %3451 = vmatmul.mubr.msk.bf16.vlgmr.msra.gmra.mxu1 %vm331_vm1, %v2014_v40 }
0x1cf0   :  { %2401 = vmatpush1.bf16.msra.mxu1 %v4213_v31  ;;  %2424 = vmatprep.mubr.bf16.mxu1 %v3789_v2  ;;  %v3372_v31 = vld [vmem:[%s4932_s1 + $0x1a] sm:$0x3] }
0x1cf1   :  { %2402 = vmatprep.subr.bf16.mxu1 %v4220_v23  ;;  %152 = vst [vmem:[#allocation5 + $0xc] sm:$0x3] %v3372_v31  ;;  %v2066_v23 = vld [vmem:[#allocation4 + $0x12] sm:$0x3]  ;;  %v50_v31 = vld [vmem:[%s4931_s0 + $0x28] sm:$0x3] }
0x1cf2   :  { %51 = vst [vmem:[#allocation4 + $0x14] sm:$0x3] %v50_v31 }
0x1cf4   :  { %2403 = vmatpush1.bf16.msra.mxu1 %v4226_v32 }
0x1cf5   :  { %2404 = vmatprep.subr.bf16.mxu1 %v4232_v33  ;;  %v2067_v33 = vunpack.c.l.bf16 %v2066_v23 }
0x1cf8   :  { %2405 = vmatpush1.bf16.msra.mxu1 %v4238_v34  ;;  %v2070_v32 = vld [vmem:[#allocation5 + $0xc] sm:$0x3] }
0x1cf9   :  { %2406 = vmatprep.subr.bf16.mxu1 %v4244_v35  ;;  %v2071_v34 = vunpack.c.l.bf16 %v2070_v32 }
0x1cfc   :  { %2407 = vmatpush1.bf16.msra.mxu1 %v4250_v36 }
0x1cfd   :  { %2774 = vmatprep.subr.bf16.mxu1 %v4501_v42 }
0x1daf   :  { %v2052_v61 = vpop.f32.mrf.mxu1 }
0x1db0   :  { %v2068_v35 = vadd.f32 %v2067_v33, %v2052_v61 }
0x1db1   :  { %v2054_v41 = vpop.f32.mrf.mxu1 }
0x1db2   :  { %3661 = vtanh.f32 %v2068_v35  ;;  %v2072_v36 = vadd.f32 %v2071_v34, %v2054_v41  ;;  %v3454_v17 = vmul.f32 -1.442695, %v2068_v35 }
0x1db3   :  { %v2056_v62 = vpop.f32.mrf.mxu1 }
0x1db4   :  { %3663 = vtanh.f32 %v2072_v36  ;;  %v3455_v16 = vmul.f32 -1.442695, %v2072_v36 }
0x1db5   :  { %v2057_v63 = vpop.f32.mrf.mxu1 }
0x1db6   :  { %3665 = vpow2.f32 %v3455_v16  ;;  %v4593_v16 = vld [vmem:[%s4935_s4 + $0x4] ss:$8 sps:$4 sm:$0xff]  }
0x1db7   :  { %3667 = vpow2.f32 %v3454_v17  ;;  %v4599_v17 = vld [vmem:[%s4935_s4] ss:$8 sps:$4 sm:$0xff]  }
0x1dbf   :  { %v3662_v4 = vpop.eup %3661 }
0x1dc0   :  { %2086 = vrot.lane.b32.xlu1 %v3662_v4, %s3791_s17 }
0x1dc1   :  { %v3664_v12 = vpop.eup %3663 }
0x1dc2   :  { %2132 = vrot.lane.b32.xlu0 %v3664_v12, %s3791_s17  ;;  %v4562_v12 = vld [vmem:[%s4935_s4 + $0x30] ss:$8 sps:$4 sm:$0xff]  }
0x1dc3   :  { %v3666_v18 = vpop.eup %3665 }
0x1dc4   :  { %v2126_v19 = vadd.f32 1.0, %v3666_v18  ;;  %v3668_v55 = vpop.eup %3667  ;;  %v3371_v18 = vld [vmem:[%s4932_s1 + $0x16] sm:$0x3] }
0x1dc5   :  { %v2076_v22 = vadd.f32 1.0, %v3668_v55  ;;  %150 = vst [vmem:[#allocation5 + $0xa] sm:$0x3] %v3371_v18 }
0x1dc6   :  { %2007 = vrot.lane.b32.xlu0 %v1985_v15, %s3791_s17  ;;  %3669 = vrcp.f32 %v2126_v19  ;;  %v4587_v15 = vld [vmem:[%s4935_s4 + $0x10] ss:$8 sps:$4 sm:$0xff]   ;;  %v2253_v19 = vld [vmem:[#allocation4 + $0x14] sm:$0x3] }
0x1dc7   :  { %3671 = vrcp.f32 %v2076_v22  ;;  %v2254_v22 = vunpack.c.l.bf16 %v2253_v19 }
0x1dcc   :  { %v2257_v55 = vld [vmem:[#allocation5 + $0xa] sm:$0x3] }
0x1dcd   :  { %v2258_v56 = vunpack.c.l.bf16 %v2257_v55 }
0x1dd3   :  { %v3670_v59 = vpop.eup %3669 }
0x1dd4   :  { %v3672_v25 = vpop.eup %3671 }
0x1e32   :  { %v2087_v6 = vpop.permute.xlu1 %2086 }
0x1e33   :  { %v2089_v26 = vmul.f32 %v3672_v25, %v2087_v6 }
0x1e34   :  { %v2133_v1 = vpop.permute.xlu0 %2132 }
0x1e35   :  { %v2135_v5 = vmul.f32 %v3670_v59, %v2133_v1 }
0x1e37   :  { %2137 = vrot.lane.b32.xlu0 %v2135_v5, %s3791_s17 }
0x1e38   :  { %v2008_v9 = vpop.permute.xlu0 %2007 }
0x1e39   :  { %v2010_v10 = vsel %vm506_vm3, %v1935_v8, %v2008_v9 }
0x1e3a   :  { %2011 = vst.msk [vmem:[#allocation3] sm:$0xf] %vm277_vm0, %v2010_v10 }
0x1e3b   :  { %2091 = vrot.lane.b32.xlu0 %v2089_v26, %s3791_s17 }
0x1e41   :  { %v4518_v28 = vld [vmem:[#allocation3] sm:$0xf] }
0x1e42   :  { %2081 = vrot.lane.b32.xlu1 %v4518_v28, %s3791_s17  ;;  %v2130_v30 = vmul.f32 %v3670_v59, %v4518_v28 }
0x1e46   :  { %2164 = vperm.xlu1 %3503, %v2064_v11  }
0x1e4a   :  { %2149 = vperm.xlu1 %3503, %v3453_v27  }
0x1ea9   :  { %v2138_v37 = vpop.permute.xlu0 %2137 }
0x1eaa   :  { %v2140_v38 = vadd.f32 %v2138_v37, %v2130_v30 }
0x1eac   :  { %3673 = vtanh.f32 %v2140_v38 }
0x1ead   :  { %v2092_v20 = vpop.permute.xlu0 %2091 }
0x1eb4   :  { %v2082_v0 = vpop.permute.xlu1 %2081 }
0x1eb5   :  { %v2084_v21 = vmul.f32 %v3672_v25, %v2082_v0 }
0x1eb7   :  { %v2094_v24 = vadd.f32 %v2092_v20, %v2084_v21 }
0x1eb9   :  { %v3674_v44 = vpop.eup %3673  ;;  %3675 = vtanh.f32 %v2094_v24 }
0x1eba   :  { %2143 = vrot.lane.b32.xlu0 %v3674_v44, %s3791_s17 }
0x1ec1   :  { %v2165_v46 = vpop.permute.xlu1 %2164 }
0x1ec2   :  { %v2181_v48 = vmul.f32 %v2165_v46, %v4485_v58  ;;  %v2167_v23 = vmul.f32 %v2165_v46, %v4518_v28 }
0x1ec5   :  { %v2150_v54 = vpop.permute.xlu1 %2149 }
0x1ec6   :  { %v3676_v45 = vpop.eup %3675 }
0x1ec7   :  { %2097 = vrot.lane.b32.xlu0 %v3676_v45, %s3791_s17 }
0x1ecb   :  { %2183 = vrot.lane.b32.xlu0 %v2181_v48, %s3792_s22 }
0x1ecf   :  { %2118 = vperm.xlu0 %3504, %v2063_v49  }
0x1f2c   :  { %v2144_v50 = vpop.permute.xlu0 %2143 }
0x1f2d   :  { %v2146_v51 = vmul.f32 %v3670_v59, %v2144_v50 }
0x1f2f   :  { %2153 = vrot.lane.b32.xlu1 %v2146_v51, %s3793_s23 }
0x1f33   :  { %2103 = vperm.xlu1 %3503, %v3452_v47  }
0x1f39   :  { %v2098_v52 = vpop.permute.xlu0 %2097 }
0x1f3a   :  { %v2100_v53 = vmul.f32 %v3672_v25, %v2098_v52 }
0x1f3c   :  { %2107 = vrot.lane.b32.xlu1 %v2100_v53, %s3793_s23 }
0x1f3d   :  { %v2184_v57 = vpop.permute.xlu0 %2183 }
0x1f40   :  { %2158 = vrot.lane.b32.xlu1 %v2140_v38, %s3792_s22 }
0x1f4a   :  { %v2119_v35 = vpop.permute.xlu0 %2118 }
0x1f4b   :  { %v2179_v41 = vmul.f32 %v2119_v35, %v4485_v58  ;;  %v4569_v58 = vld [vmem:[%s4935_s4 + $0x24] ss:$8 sps:$4 sm:$0xff]   ;;  %v2121_v46 = vmul.f32 %v2119_v35, %v4518_v28  ;;  %v3459_v35 = vld [vmem:[%s4933_s2 + $0x28] sm:$0xf] }
0x1fa1   :  { %v2154_v60 = vpop.permute.xlu1 %2153 }
0x1fa2   :  { %v2156_v43 = vmul.f32 %v2154_v60, %v2150_v54 }
0x1fa4   :  { %v2176_v29 = vpack.c.bf16 %v2156_v43, %v2156_v43  ;;  %v2186_v40 = vadd.f32 %v2184_v57, %v2156_v43 }
0x1fa6   :  { %3457 = vst.msk [vmem:[%s4937_s6 + $0xc] sm:$0x3] %vm489_vm2, %v2176_v29  ;;  %2188 = vrot.lane.b32.xlu0 %v2186_v40, %s3791_s17 }
0x1faa   :  { %2169 = vrot.lane.b32.xlu0 %v2167_v23, %s3792_s22 }
0x1fae   :  { %v4543_v32 = vpop.permute.xlu1 %2103  ;;  %2112 = vrot.lane.b32.xlu0 %v2094_v24, %s3792_s22 }
0x1fb2   :  { %v2108_v33 = vpop.permute.xlu1 %2107 }
0x1fb3   :  { %v2110_v34 = vmul.f32 %v2108_v33, %v4543_v32 }
0x1fb5   :  { %v2173_v61 = vpack.c.bf16 %v2110_v34, %v2110_v34  ;;  %v2180_v36 = vadd.f32 %v2179_v41, %v2110_v34 }
0x1fb6   :  { %v2159_v25 = vpop.permute.xlu1 %2158 }
0x1fb7   :  { %3456 = vst.msk [vmem:[%s4936_s5 + $0x12] sm:$0x3] %vm489_vm2, %v2173_v61  ;;  %v2161_v10 = vmul.f32 %v2159_v25, %v2150_v54  ;;  %v3460_v54 = vld [vmem:[%s4934_s3 + $0x14] sm:$0xf] }
0x1fb8   :  { %v2251_v28 = vsub.f32 1.0, %v3460_v54 }
0x2018   :  { %v2189_v62 = vpop.permute.xlu0 %2188 }
0x2019   :  { %v2191_v63 = vsel %vm506_vm3, %v2180_v36, %v2189_v62  ;;  %v2250_v36 = vsub.f32 1.0, %v3459_v35 }
0x201a   :  { %2192 = vst.msk [vmem:[#allocation2] sm:$0xf] %vm277_vm0, %v2191_v63 }
0x201c   :  { %v2170_v26 = vpop.permute.xlu0 %2169 }
0x201d   :  { %v2172_v27 = vadd.f32 %v2170_v26, %v2161_v10 }
0x2020   :  { %v2113_v20 = vpop.permute.xlu0 %2112 }
0x2021   :  { %v4554_v4 = vld [vmem:[#allocation2] sm:$0xf]  ;;  %v2115_v24 = vmul.f32 %v2113_v20, %v4543_v32 }
0x2022   :  { %v2201_v7 = vpack.c.bf16 %v4554_v4, %v4554_v4 }
0x2023   :  { %v2122_v49 = vadd.f32 %v2121_v46, %v2115_v24 }
0x2024   :  { %3458 = vmatmul.mubr.msk.bf16.vlgmr.msra.gmra.mxu0 %vm331_vm1, %v2201_v7 }
0x2025   :  { %2588 = vmatpush1.bf16.msra.mxu0 %v4562_v12  ;;  %2611 = vmatprep.mubr.bf16.mxu0 %v3789_v2 }
0x2026   :  { %2589 = vmatprep.subr.bf16.mxu0 %v4569_v58 }
0x2029   :  { %2590 = vmatpush1.bf16.msra.mxu0 %v4575_v13 }
0x202a   :  { %2591 = vmatprep.subr.bf16.mxu0 %v4581_v14 }
0x202d   :  { %2592 = vmatpush1.bf16.msra.mxu0 %v4587_v15 }
0x202e   :  { %2593 = vmatprep.subr.bf16.mxu0 %v4593_v16 }
0x2031   :  { %2594 = vmatpush1.bf16.msra.mxu0 %v4599_v17 }
0x2032   :  { %2961 = vmatprep.subr.bf16.mxu0 %v4501_v42 }
0x20e4   :  { %v2239_v39 = vpop.f32.mrf.mxu0 }
0x20e5   :  { %v2255_v59 = vadd.f32 %v2254_v22, %v2239_v39 }
0x20e6   :  { %v2241_v1 = vpop.f32.mrf.mxu0 }
0x20e7   :  { %3677 = vtanh.f32 %v2255_v59  ;;  %v2259_v3 = vadd.f32 %v2258_v56, %v2241_v1  ;;  %v3461_v30 = vmul.f32 -1.442695, %v2255_v59  ;;  %v52_v1 = vld [vmem:[%s4931_s0 + $0x2c] sm:$0x3] }
0x20e8   :  { %v2243_v5 = vpop.f32.mrf.mxu0  ;;  %53 = vst [vmem:[#allocation4 + $0x16] sm:$0x3] %v52_v1 }
0x20e9   :  { %3679 = vtanh.f32 %v2259_v3  ;;  %v3462_v11 = vmul.f32 -1.442695, %v2259_v3 }
0x20ea   :  { %v2244_v6 = vpop.f32.mrf.mxu0 }
0x20eb   :  { %3681 = vpow2.f32 %v3462_v11 }
0x20ec   :  { %3683 = vpow2.f32 %v3461_v30 }
0x20f4   :  { %v3678_v8 = vpop.eup %3677 }
0x20f5   :  { %2273 = vrot.lane.b32.xlu0 %v3678_v8, %s3791_s17 }
0x20f6   :  { %v3680_v9 = vpop.eup %3679 }
0x20f7   :  { %2319 = vrot.lane.b32.xlu1 %v3680_v9, %s3791_s17 }
0x20f8   :  { %v3682_v37 = vpop.eup %3681 }
0x20f9   :  { %v2313_v38 = vadd.f32 1.0, %v3682_v37  ;;  %v3684_v0 = vpop.eup %3683 }
0x20fa   :  { %v2263_v21 = vadd.f32 1.0, %v3684_v0 }
0x20fb   :  { %2194 = vrot.lane.b32.xlu1 %v2172_v27, %s3791_s17  ;;  %3685 = vrcp.f32 %v2313_v38  ;;  %v2440_v38 = vld [vmem:[#allocation4 + $0x16] sm:$0x3] }
0x20fc   :  { %3687 = vrcp.f32 %v2263_v21  ;;  %v2441_v21 = vunpack.c.l.bf16 %v2440_v38 }
0x2108   :  { %v3686_v44 = vpop.eup %3685 }
0x2109   :  { %v3688_v50 = vpop.eup %3687 }
0x2167   :  { %v2274_v48 = vpop.permute.xlu0 %2273 }
0x2168   :  { %v2276_v52 = vmul.f32 %v3688_v50, %v2274_v48 }
0x2169   :  { %v2320_v45 = vpop.permute.xlu1 %2319 }
0x216a   :  { %v2322_v47 = vmul.f32 %v3686_v44, %v2320_v45 }
0x216c   :  { %2324 = vrot.lane.b32.xlu1 %v2322_v47, %s3791_s17 }
0x216d   :  { %v2195_v51 = vpop.permute.xlu1 %2194 }
0x216e   :  { %v2197_v53 = vsel %vm506_vm3, %v2122_v49, %v2195_v51 }
0x216f   :  { %2198 = vst.msk [vmem:[#allocation3] sm:$0xf] %vm277_vm0, %v2197_v53 }
0x2170   :  { %2278 = vrot.lane.b32.xlu1 %v2276_v52, %s3791_s17 }
0x2176   :  { %v4618_v60 = vld [vmem:[#allocation3] sm:$0xf] }
0x2177   :  { %2268 = vrot.lane.b32.xlu0 %v4618_v60, %s3791_s17  ;;  %v2317_v43 = vmul.f32 %v3686_v44, %v4618_v60 }
0x217b   :  { %2351 = vperm.xlu0 %3504, %v2251_v28  }
0x217f   :  { %2336 = vperm.xlu0 %3504, %v3460_v54  }
0x21de   :  { %v2325_v57 = vpop.permute.xlu1 %2324 }
0x21df   :  { %v2327_v29 = vadd.f32 %v2325_v57, %v2317_v43 }
0x21e1   :  { %3689 = vtanh.f32 %v2327_v29 }
0x21e2   :  { %v2279_v23 = vpop.permute.xlu1 %2278 }
0x21e9   :  { %v2269_v40 = vpop.permute.xlu0 %2268 }
0x21ea   :  { %v2271_v31 = vmul.f32 %v3688_v50, %v2269_v40 }
0x21ec   :  { %v2281_v32 = vadd.f32 %v2279_v23, %v2271_v31 }
0x21ee   :  { %v3690_v33 = vpop.eup %3689  ;;  %3691 = vtanh.f32 %v2281_v32 }
0x21ef   :  { %2330 = vrot.lane.b32.xlu1 %v3690_v33, %s3791_s17 }
0x21f6   :  { %v2352_v61 = vpop.permute.xlu0 %2351 }
0x21f7   :  { %v2368_v41 = vmul.f32 %v2352_v61, %v4554_v4  ;;  %v2354_v3 = vmul.f32 %v2352_v61, %v4618_v60 }
0x21fa   :  { %v2337_v19 = vpop.permute.xlu0 %2336 }
0x21fb   :  { %v3692_v34 = vpop.eup %3691 }
0x21fc   :  { %2284 = vrot.lane.b32.xlu1 %v3692_v34, %s3791_s17 }
0x2200   :  { %2370 = vrot.lane.b32.xlu1 %v2368_v41, %s3792_s22 }
0x2204   :  { %2305 = vperm.xlu1 %3503, %v2250_v36  }
0x2261   :  { %v2331_v62 = vpop.permute.xlu1 %2330 }
0x2262   :  { %v2333_v63 = vmul.f32 %v3686_v44, %v2331_v62 }
0x2264   :  { %2340 = vrot.lane.b32.xlu0 %v2333_v63, %s3793_s23 }
0x2268   :  { %2290 = vperm.xlu0 %3504, %v3459_v35  }
0x226e   :  { %v2285_v7 = vpop.permute.xlu1 %2284 }
0x226f   :  { %v2287_v18 = vmul.f32 %v3688_v50, %v2285_v7 }
0x2271   :  { %2294 = vrot.lane.b32.xlu0 %v2287_v18, %s3793_s23  ;;  %v3467_v18 = vld [vmem:[%s4934_s3 + $0x10] sm:$0xf] }
0x2272   :  { %v2371_v56 = vpop.permute.xlu1 %2370 }
0x2275   :  { %2345 = vrot.lane.b32.xlu0 %v2327_v29, %s3792_s22 }
0x227f   :  { %v2306_v9 = vpop.permute.xlu1 %2305 }
0x2280   :  { %v2366_v26 = vmul.f32 %v2306_v9, %v4554_v4  ;;  %v3370_v4 = vld [vmem:[%s4932_s1 + $0x12] sm:$0x3]  ;;  %v2308_v34 = vmul.f32 %v2306_v9, %v4618_v60  ;;  %v2438_v60 = vsub.f32 1.0, %v3467_v18 }
0x2281   :  { %148 = vst [vmem:[#allocation5 + $0x8] sm:$0x3] %v3370_v4 }
0x2288   :  { %v2444_v0 = vld [vmem:[#allocation5 + $0x8] sm:$0x3] }
0x2289   :  { %v2445_v20 = vunpack.c.l.bf16 %v2444_v0 }
0x22d6   :  { %v2341_v55 = vpop.permute.xlu0 %2340 }
0x22d7   :  { %v2343_v22 = vmul.f32 %v2341_v55, %v2337_v19 }
0x22d9   :  { %v2363_v39 = vpack.c.bf16 %v2343_v22, %v2343_v22  ;;  %v2373_v59 = vadd.f32 %v2371_v56, %v2343_v22 }
0x22db   :  { %3464 = vst.msk [vmem:[%s4937_s6 + $0xa] sm:$0x3] %vm489_vm2, %v2363_v39  ;;  %2375 = vrot.lane.b32.xlu1 %v2373_v59, %s3791_s17 }
0x22df   :  { %2356 = vrot.lane.b32.xlu1 %v2354_v3, %s3792_s22 }
0x22e3   :  { %2299 = vrot.lane.b32.xlu1 %v2281_v32, %s3792_s22  ;;  %v2291_v5 = vpop.permute.xlu0 %2290 }
0x22e7   :  { %v2295_v6 = vpop.permute.xlu0 %2294 }
0x22e8   :  { %v2297_v8 = vmul.f32 %v2295_v6, %v2291_v5 }
0x22ea   :  { %v2360_v25 = vpack.c.bf16 %v2297_v8, %v2297_v8  ;;  %v2367_v10 = vadd.f32 %v2366_v26, %v2297_v8 }
0x22eb   :  { %v2346_v50 = vpop.permute.xlu0 %2345 }
0x22ec   :  { %3463 = vst.msk [vmem:[%s4936_s5 + $0x14] sm:$0x3] %vm489_vm2, %v2360_v25  ;;  %v2348_v52 = vmul.f32 %v2346_v50, %v2337_v19  ;;  %v3466_v25 = vld [vmem:[%s4933_s2 + $0x2c] sm:$0xf] }
0x22ed   :  { %v2437_v26 = vsub.f32 1.0, %v3466_v25 }
0x234d   :  { %v2376_v27 = vpop.permute.xlu1 %2375 }
0x234e   :  { %v2378_v11 = vsel %vm506_vm3, %v2367_v10, %v2376_v27 }
0x234f   :  { %2379 = vst.msk [vmem:[#allocation2] sm:$0xf] %vm277_vm0, %v2378_v11 }
0x2351   :  { %v2357_v51 = vpop.permute.xlu1 %2356 }
0x2352   :  { %v2359_v53 = vadd.f32 %v2357_v51, %v2348_v52 }
0x2355   :  { %v2300_v31 = vpop.permute.xlu1 %2299 }
0x2356   :  { %v4651_v30 = vld [vmem:[#allocation2] sm:$0xf]  ;;  %v2302_v23 = vmul.f32 %v2300_v31, %v2291_v5 }
0x2357   :  { %v2388_v37 = vpack.c.bf16 %v4651_v30, %v4651_v30 }
0x2358   :  { %v2309_v41 = vadd.f32 %v2308_v34, %v2302_v23 }
0x2359   :  { %3465 = vmatmul.mubr.msk.bf16.vlgmr.msra.gmra.mxu1 %vm331_vm1, %v2388_v37 }
0x235a   :  { %2775 = vmatpush1.bf16.msra.mxu1 %v4562_v12  ;;  %2798 = vmatprep.mubr.bf16.mxu1 %v3789_v2 }
0x235b   :  { %2776 = vmatprep.subr.bf16.mxu1 %v4569_v58 }
0x235e   :  { %2777 = vmatpush1.bf16.msra.mxu1 %v4575_v13 }
0x235f   :  { %2778 = vmatprep.subr.bf16.mxu1 %v4581_v14 }
0x2362   :  { %2779 = vmatpush1.bf16.msra.mxu1 %v4587_v15 }
0x2363   :  { %2780 = vmatprep.subr.bf16.mxu1 %v4593_v16 }
0x2366   :  { %2781 = vmatpush1.bf16.msra.mxu1 %v4599_v17 }
0x2367   :  { %3148 = vmatprep.subr.bf16.mxu1 %v4501_v42 }
0x2419   :  { %v2426_v24 = vpop.f32.mrf.mxu1 }
0x241a   :  { %v2442_v44 = vadd.f32 %v2441_v21, %v2426_v24 }
0x241b   :  { %v2428_v45 = vpop.f32.mrf.mxu1 }
0x241c   :  { %3693 = vtanh.f32 %v2442_v44  ;;  %v2446_v46 = vadd.f32 %v2445_v20, %v2428_v45  ;;  %v3468_v28 = vmul.f32 -1.442695, %v2442_v44  ;;  %v54_v44 = vld [vmem:[%s4931_s0 + $0x30] sm:$0x3] }
0x241d   :  { %v2430_v47 = vpop.f32.mrf.mxu1  ;;  %55 = vst [vmem:[#allocation4 + $0x18] sm:$0x3] %v54_v44 }
0x241e   :  { %3695 = vtanh.f32 %v2446_v46  ;;  %v3469_v54 = vmul.f32 -1.442695, %v2446_v46 }
0x241f   :  { %v2431_v48 = vpop.f32.mrf.mxu1 }
0x2420   :  { %3697 = vpow2.f32 %v3469_v54 }
0x2421   :  { %3699 = vpow2.f32 %v3468_v28 }
0x2429   :  { %v3694_v49 = vpop.eup %3693 }
0x242a   :  { %2460 = vrot.lane.b32.xlu1 %v3694_v49, %s3791_s17 }
0x242b   :  { %v3696_v42 = vpop.eup %3695 }
0x242c   :  { %2506 = vrot.lane.b32.xlu0 %v3696_v42, %s3791_s17 }
0x242d   :  { %v3698_v43 = vpop.eup %3697 }
0x242e   :  { %v2500_v57 = vadd.f32 1.0, %v3698_v43  ;;  %v3700_v29 = vpop.eup %3699  ;;  %v2627_v43 = vld [vmem:[#allocation4 + $0x18] sm:$0x3] }
0x242f   :  { %v2450_v40 = vadd.f32 1.0, %v3700_v29  ;;  %v2628_v29 = vunpack.c.l.bf16 %v2627_v43 }
0x2430   :  { %2381 = vrot.lane.b32.xlu0 %v2359_v53, %s3791_s17  ;;  %3701 = vrcp.f32 %v2500_v57 }
0x2431   :  { %3703 = vrcp.f32 %v2450_v40 }
0x243d   :  { %v3702_v32 = vpop.eup %3701 }
0x243e   :  { %v3704_v36 = vpop.eup %3703 }
0x249c   :  { %v2461_v35 = vpop.permute.xlu1 %2460 }
0x249d   :  { %v2463_v63 = vmul.f32 %v3704_v36, %v2461_v35 }
0x249e   :  { %v2507_v33 = vpop.permute.xlu0 %2506 }
0x249f   :  { %v2509_v61 = vmul.f32 %v3702_v32, %v2507_v33 }
0x24a1   :  { %2511 = vrot.lane.b32.xlu0 %v2509_v61, %s3791_s17 }
0x24a2   :  { %v2382_v62 = vpop.permute.xlu0 %2381 }
0x24a3   :  { %v2384_v7 = vsel %vm506_vm3, %v2309_v41, %v2382_v62 }
0x24a4   :  { %2385 = vst.msk [vmem:[#allocation3] sm:$0xf] %vm277_vm0, %v2384_v7 }
0x24a5   :  { %2465 = vrot.lane.b32.xlu0 %v2463_v63, %s3791_s17 }
0x24ab   :  { %v4679_v19 = vld [vmem:[#allocation3] sm:$0xf] }
0x24ac   :  { %2455 = vrot.lane.b32.xlu1 %v4679_v19, %s3791_s17  ;;  %v2504_v55 = vmul.f32 %v3702_v32, %v4679_v19 }
0x24b0   :  { %2538 = vperm.xlu1 %3503, %v2438_v60  }
0x24b4   :  { %2523 = vperm.xlu1 %3503, %v3467_v18  }
0x2513   :  { %v2512_v22 = vpop.permute.xlu0 %2511 }
0x2514   :  { %v2514_v56 = vadd.f32 %v2512_v22, %v2504_v55 }
0x2516   :  { %3705 = vtanh.f32 %v2514_v56 }
0x2517   :  { %v2466_v1 = vpop.permute.xlu0 %2465 }
0x251e   :  { %v2456_v39 = vpop.permute.xlu1 %2455 }
0x251f   :  { %v2458_v59 = vmul.f32 %v3704_v36, %v2456_v39 }
0x2521   :  { %v2468_v3 = vadd.f32 %v2466_v1, %v2458_v59 }
0x2523   :  { %v3706_v5 = vpop.eup %3705  ;;  %3707 = vtanh.f32 %v2468_v3 }
0x2524   :  { %2517 = vrot.lane.b32.xlu0 %v3706_v5, %s3791_s17 }
0x252b   :  { %v2539_v8 = vpop.permute.xlu1 %2538 }
0x252c   :  { %v2555_v9 = vmul.f32 %v2539_v8, %v4651_v30  ;;  %v2541_v45 = vmul.f32 %v2539_v8, %v4679_v19 }
0x252f   :  { %v2524_v4 = vpop.permute.xlu1 %2523 }
0x2530   :  { %v3708_v6 = vpop.eup %3707 }
0x2531   :  { %2471 = vrot.lane.b32.xlu0 %v3708_v6, %s3791_s17 }
0x2535   :  { %2557 = vrot.lane.b32.xlu0 %v2555_v9, %s3792_s22 }
0x2539   :  { %2492 = vperm.xlu0 %3504, %v2437_v26  }
0x2596   :  { %v2518_v10 = vpop.permute.xlu0 %2517 }
0x2597   :  { %v2520_v27 = vmul.f32 %v3702_v32, %v2518_v10 }
0x2599   :  { %2527 = vrot.lane.b32.xlu1 %v2520_v27, %s3793_s23 }
0x259d   :  { %2477 = vperm.xlu1 %3503, %v3466_v25  }
0x25a3   :  { %v2472_v11 = vpop.permute.xlu0 %2471 }
0x25a4   :  { %v2474_v37 = vmul.f32 %v3704_v36, %v2472_v11 }
0x25a6   :  { %2481 = vrot.lane.b32.xlu1 %v2474_v37, %s3793_s23  ;;  %v3474_v37 = vld [vmem:[%s4934_s3 + $0xc] sm:$0xf] }
0x25a7   :  { %v2558_v21 = vpop.permute.xlu0 %2557 }
0x25aa   :  { %2532 = vrot.lane.b32.xlu1 %v2514_v56, %s3792_s22 }
0x25b4   :  { %v2493_v50 = vpop.permute.xlu0 %2492 }
0x25b5   :  { %v2553_v42 = vmul.f32 %v2493_v50, %v4651_v30  ;;  %v3369_v30 = vld [vmem:[%s4932_s1 + $0xe] sm:$0x3]  ;;  %v2495_v6 = vmul.f32 %v2493_v50, %v4679_v19  ;;  %v2625_v19 = vsub.f32 1.0, %v3474_v37 }
0x25b6   :  { %146 = vst [vmem:[#allocation5 + $0x6] sm:$0x3] %v3369_v30 }
0x25bd   :  { %v2631_v57 = vld [vmem:[#allocation5 + $0x6] sm:$0x3] }
0x25be   :  { %v2632_v40 = vunpack.c.l.bf16 %v2631_v57 }
0x260b   :  { %v2528_v38 = vpop.permute.xlu1 %2527 }
0x260c   :  { %v2530_v0 = vmul.f32 %v2528_v38, %v2524_v4 }
0x260e   :  { %v2550_v20 = vpack.c.bf16 %v2530_v0, %v2530_v0  ;;  %v2560_v24 = vadd.f32 %v2558_v21, %v2530_v0 }
0x2610   :  { %3471 = vst.msk [vmem:[%s4937_s6 + $0x8] sm:$0x3] %vm489_vm2, %v2550_v20  ;;  %2562 = vrot.lane.b32.xlu0 %v2560_v24, %s3791_s17 }
0x2614   :  { %2543 = vrot.lane.b32.xlu0 %v2541_v45, %s3792_s22 }
0x2618   :  { %v2478_v46 = vpop.permute.xlu1 %2477  ;;  %2486 = vrot.lane.b32.xlu0 %v2468_v3, %s3792_s22 }
0x261c   :  { %v2482_v47 = vpop.permute.xlu1 %2481 }
0x261d   :  { %v2484_v48 = vmul.f32 %v2482_v47, %v2478_v46 }
0x261f   :  { %v2547_v49 = vpack.c.bf16 %v2484_v48, %v2484_v48  ;;  %v2554_v51 = vadd.f32 %v2553_v42, %v2484_v48 }
0x2620   :  { %v2533_v41 = vpop.permute.xlu1 %2532 }
0x2621   :  { %3470 = vst.msk [vmem:[%s4936_s5 + $0x16] sm:$0x3] %vm489_vm2, %v2547_v49  ;;  %v2535_v63 = vmul.f32 %v2533_v41, %v2524_v4  ;;  %v3473_v49 = vld [vmem:[%s4933_s2 + $0x30] sm:$0xf] }
0x2622   :  { %v2624_v42 = vsub.f32 1.0, %v3473_v49 }
0x2682   :  { %v2563_v52 = vpop.permute.xlu0 %2562 }
0x2683   :  { %v2565_v53 = vsel %vm506_vm3, %v2554_v51, %v2563_v52 }
0x2684   :  { %2566 = vst.msk [vmem:[#allocation2] sm:$0xf] %vm277_vm0, %v2565_v53 }
0x2686   :  { %v2544_v62 = vpop.permute.xlu0 %2543 }
0x2687   :  { %v2546_v7 = vadd.f32 %v2544_v62, %v2535_v63 }
0x268a   :  { %v2487_v59 = vpop.permute.xlu0 %2486 }
0x268b   :  { %v4712_v54 = vld [vmem:[#allocation2] sm:$0xf]  ;;  %v2489_v1 = vmul.f32 %v2487_v59, %v2478_v46 }
0x268c   :  { %v2575_v28 = vpack.c.bf16 %v4712_v54, %v4712_v54 }
0x268d   :  { %v2496_v9 = vadd.f32 %v2495_v6, %v2489_v1 }
0x268e   :  { %3472 = vmatmul.mubr.msk.bf16.vlgmr.msra.gmra.mxu0 %vm331_vm1, %v2575_v28 }
0x268f   :  { %2962 = vmatpush1.bf16.msra.mxu0 %v4562_v12  ;;  %2985 = vmatprep.mubr.bf16.mxu0 %v3789_v2 }
0x2690   :  { %2963 = vmatprep.subr.bf16.mxu0 %v4569_v58 }
0x2693   :  { %2964 = vmatpush1.bf16.msra.mxu0 %v4575_v13 }
0x2694   :  { %2965 = vmatprep.subr.bf16.mxu0 %v4581_v14 }
0x2697   :  { %2966 = vmatpush1.bf16.msra.mxu0 %v4587_v15 }
0x2698   :  { %2967 = vmatprep.subr.bf16.mxu0 %v4593_v16 }
0x269b   :  { %2968 = vmatpush1.bf16.msra.mxu0 %v4599_v17 }
0x274e   :  { %v2613_v31 = vpop.f32.mrf.mxu0 }
0x274f   :  { %v2629_v23 = vadd.f32 %v2628_v29, %v2613_v31 }
0x2750   :  { %v2615_v32 = vpop.f32.mrf.mxu0 }
0x2751   :  { %3709 = vtanh.f32 %v2629_v23  ;;  %v2633_v33 = vadd.f32 %v2632_v40, %v2615_v32  ;;  %v3475_v60 = vmul.f32 -1.442695, %v2629_v23  ;;  %v56_v23 = vld [vmem:[%s4931_s0 + $0x34] sm:$0x3] }
0x2752   :  { %v2617_v34 = vpop.f32.mrf.mxu0  ;;  %57 = vst [vmem:[#allocation4 + $0x1a] sm:$0x3] %v56_v23 }
0x2753   :  { %3711 = vtanh.f32 %v2633_v33  ;;  %v3476_v18 = vmul.f32 -1.442695, %v2633_v33 }
0x2754   :  { %v2618_v61 = vpop.f32.mrf.mxu0 }
0x2755   :  { %3713 = vpow2.f32 %v3476_v18 }
0x2756   :  { %3715 = vpow2.f32 %v3475_v60 }
0x275e   :  { %v3710_v35 = vpop.eup %3709 }
0x275f   :  { %2647 = vrot.lane.b32.xlu0 %v3710_v35, %s3791_s17 }
0x2760   :  { %v3712_v36 = vpop.eup %3711 }
0x2761   :  { %2693 = vrot.lane.b32.xlu1 %v3712_v36, %s3791_s17 }
0x2762   :  { %v3714_v55 = vpop.eup %3713 }
0x2763   :  { %v2687_v22 = vadd.f32 1.0, %v3714_v55  ;;  %v3716_v56 = vpop.eup %3715 }
0x2764   :  { %v2637_v39 = vadd.f32 1.0, %v3716_v56 }
0x2765   :  { %2568 = vrot.lane.b32.xlu1 %v2546_v7, %s3791_s17  ;;  %3717 = vrcp.f32 %v2687_v22 }
0x2766   :  { %3719 = vrcp.f32 %v2637_v39 }
0x2772   :  { %v3718_v3 = vpop.eup %3717 }
0x2773   :  { %v3720_v26 = vpop.eup %3719 }
0x27d1   :  { %v2648_v25 = vpop.permute.xlu0 %2647 }
0x27d2   :  { %v2650_v27 = vmul.f32 %v3720_v26, %v2648_v25 }
0x27d3   :  { %v2694_v5 = vpop.permute.xlu1 %2693 }
0x27d4   :  { %v2696_v8 = vmul.f32 %v3718_v3, %v2694_v5 }
0x27d6   :  { %2698 = vrot.lane.b32.xlu1 %v2696_v8, %s3791_s17 }
0x27d7   :  { %v2569_v10 = vpop.permute.xlu1 %2568 }
0x27d8   :  { %v2571_v11 = vsel %vm506_vm3, %v2496_v9, %v2569_v10 }
0x27d9   :  { %2572 = vst.msk [vmem:[#allocation3] sm:$0xf] %vm277_vm0, %v2571_v11 }
0x27da   :  { %2652 = vrot.lane.b32.xlu1 %v2650_v27, %s3791_s17 }
0x27e0   :  { %v4739_v4 = vld [vmem:[#allocation3] sm:$0xf] }
0x27e1   :  { %2642 = vrot.lane.b32.xlu0 %v4739_v4, %s3791_s17  ;;  %v2691_v38 = vmul.f32 %v3718_v3, %v4739_v4 }
0x27e5   :  { %2725 = vperm.xlu0 %3504, %v2625_v19  }
0x27e9   :  { %2710 = vperm.xlu0 %3504, %v3474_v37  }
0x2848   :  { %v2699_v0 = vpop.permute.xlu1 %2698 }
0x2849   :  { %v2701_v21 = vadd.f32 %v2699_v0, %v2691_v38 }
0x284b   :  { %3721 = vtanh.f32 %v2701_v21 }
0x284c   :  { %v2653_v44 = vpop.permute.xlu1 %2652 }
0x2853   :  { %v2643_v20 = vpop.permute.xlu0 %2642 }
0x2854   :  { %v2645_v24 = vmul.f32 %v3720_v26, %v2643_v20 }
0x2856   :  { %v2655_v45 = vadd.f32 %v2653_v44, %v2645_v24 }
0x2858   :  { %v3722_v46 = vpop.eup %3721  ;;  %3723 = vtanh.f32 %v2655_v45 }
0x2859   :  { %2704 = vrot.lane.b32.xlu1 %v3722_v46, %s3791_s17 }
0x2860   :  { %v2726_v48 = vpop.permute.xlu0 %2725 }
0x2861   :  { %v2742_v50 = vmul.f32 %v2726_v48, %v4712_v54  ;;  %v2728_v32 = vmul.f32 %v2726_v48, %v4739_v4 }
0x2864   :  { %v2711_v30 = vpop.permute.xlu0 %2710 }
0x2865   :  { %v3724_v47 = vpop.eup %3723 }
0x2866   :  { %2658 = vrot.lane.b32.xlu1 %v3724_v47, %s3791_s17  ;;  %v3481_v47 = vld [vmem:[%s4934_s3 + $0x8] sm:$0xf] }
0x286a   :  { %2744 = vrot.lane.b32.xlu1 %v2742_v50, %s3792_s22 }
0x286e   :  { %2679 = vperm.xlu1 %3503, %v2624_v42  }
0x28cb   :  { %v2705_v51 = vpop.permute.xlu1 %2704 }
0x28cc   :  { %v2707_v52 = vmul.f32 %v3718_v3, %v2705_v51 }
0x28ce   :  { %2714 = vrot.lane.b32.xlu0 %v2707_v52, %s3793_s23 }
0x28d2   :  { %2664 = vperm.xlu0 %3504, %v3473_v49  }
0x28d8   :  { %v2659_v53 = vpop.permute.xlu1 %2658 }
0x28d9   :  { %v2661_v28 = vmul.f32 %v3720_v26, %v2659_v53 }
0x28db   :  { %2668 = vrot.lane.b32.xlu0 %v2661_v28, %s3793_s23 }
0x28dc   :  { %v2745_v29 = vpop.permute.xlu1 %2744 }
0x28df   :  { %2719 = vrot.lane.b32.xlu0 %v2701_v21, %s3792_s22 }
0x28e9   :  { %v2680_v41 = vpop.permute.xlu1 %2679 }
0x28ea   :  { %v2740_v36 = vmul.f32 %v2680_v41, %v4712_v54  ;;  %v3368_v54 = vld [vmem:[%s4932_s1 + $0xa] sm:$0x3]  ;;  %v2682_v38 = vmul.f32 %v2680_v41, %v4739_v4  ;;  %v2812_v4 = vsub.f32 1.0, %v3481_v47 }
0x28eb   :  { %144 = vst [vmem:[#allocation5 + $0x4] sm:$0x3] %v3368_v54 }
0x28f2   :  { %v2818_v55 = vld [vmem:[#allocation5 + $0x4] sm:$0x3] }
0x28f3   :  { %v2819_v22 = vunpack.c.l.bf16 %v2818_v55 }
0x2940   :  { %v2715_v43 = vpop.permute.xlu0 %2714 }
0x2941   :  { %v2717_v57 = vmul.f32 %v2715_v43, %v2711_v30 }
0x2943   :  { %v2737_v40 = vpack.c.bf16 %v2717_v57, %v2717_v57  ;;  %v2747_v31 = vadd.f32 %v2745_v29, %v2717_v57  ;;  %v3480_v29 = vld [vmem:[%s4933_s2 + $0x34] sm:$0xf] }
0x2945   :  { %3478 = vst.msk [vmem:[%s4937_s6 + $0x6] sm:$0x3] %vm489_vm2, %v2737_v40  ;;  %2749 = vrot.lane.b32.xlu1 %v2747_v31, %s3791_s17  ;;  %v2811_v31 = vsub.f32 1.0, %v3480_v29 }
0x2949   :  { %2730 = vrot.lane.b32.xlu1 %v2728_v32, %s3792_s22 }
0x294d   :  { %2673 = vrot.lane.b32.xlu1 %v2655_v45, %s3792_s22  ;;  %v2665_v33 = vpop.permute.xlu0 %2664 }
0x2951   :  { %v2669_v34 = vpop.permute.xlu0 %2668 }
0x2952   :  { %v2671_v61 = vmul.f32 %v2669_v34, %v2665_v33 }
0x2954   :  { %v2734_v35 = vpack.c.bf16 %v2671_v61, %v2671_v61  ;;  %v2741_v62 = vadd.f32 %v2740_v36, %v2671_v61 }
0x2955   :  { %v2720_v59 = vpop.permute.xlu0 %2719 }
0x2956   :  { %3477 = vst.msk [vmem:[%s4936_s5 + $0x18] sm:$0x3] %vm489_vm2, %v2734_v35  ;;  %v2722_v3 = vmul.f32 %v2720_v59, %v2711_v30 }
0x29b7   :  { %v2750_v63 = vpop.permute.xlu1 %2749 }
0x29b8   :  { %v2752_v7 = vsel %vm506_vm3, %v2741_v62, %v2750_v63 }
0x29b9   :  { %2753 = vst.msk [vmem:[#allocation2] sm:$0xf] %vm277_vm0, %v2752_v7  ;;  %v58_v7 = vld [vmem:[%s4931_s0 + $0x38] sm:$0x3] }
0x29ba   :  { %59 = vst [vmem:[#allocation4 + $0x1c] sm:$0x3] %v58_v7 }
0x29bb   :  { %v2731_v1 = vpop.permute.xlu1 %2730 }
0x29bc   :  { %v2733_v5 = vadd.f32 %v2731_v1, %v2722_v3 }
0x29bf   :  { %v2674_v27 = vpop.permute.xlu1 %2673 }
0x29c0   :  { %v4772_v18 = vld [vmem:[#allocation2] sm:$0xf]  ;;  %v2676_v11 = vmul.f32 %v2674_v27, %v2665_v33 }
0x29c1   :  { %v2762_v60 = vpack.c.bf16 %v4772_v18, %v4772_v18  ;;  %v3001_v59 = vld [vmem:[#allocation4 + $0x1c] sm:$0x3] }
0x29c2   :  { %v2683_v20 = vadd.f32 %v2682_v38, %v2676_v11 }
0x29c3   :  { %3479 = vmatmul.mubr.msk.bf16.vlgmr.msra.gmra.mxu1 %vm331_vm1, %v2762_v60 }
0x29c4   :  { %3149 = vmatpush1.bf16.msra.mxu1 %v4562_v12  ;;  %3172 = vmatprep.mubr.bf16.mxu1 %v3789_v2  ;;  %v2814_v12 = vld [vmem:[#allocation4 + $0x1a] sm:$0x3] }
0x29c5   :  { %3150 = vmatprep.subr.bf16.mxu1 %v4569_v58  ;;  %v2815_v2 = vunpack.c.l.bf16 %v2814_v12 }
0x29c8   :  { %3151 = vmatpush1.bf16.msra.mxu1 %v4575_v13 }
0x29c9   :  { %3152 = vmatprep.subr.bf16.mxu1 %v4581_v14 }
0x29cc   :  { %3153 = vmatpush1.bf16.msra.mxu1 %v4587_v15 }
0x29cd   :  { %3154 = vmatprep.subr.bf16.mxu1 %v4593_v16 }
0x29d0   :  { %3155 = vmatpush1.bf16.msra.mxu1 %v4599_v17 }
0x2a83   :  { %v2800_v58 = vpop.f32.mrf.mxu1 }
0x2a84   :  { %v2816_v56 = vadd.f32 %v2815_v2, %v2800_v58 }
0x2a85   :  { %v2802_v13 = vpop.f32.mrf.mxu1 }
0x2a86   :  { %3725 = vtanh.f32 %v2816_v56  ;;  %v2820_v14 = vadd.f32 %v2819_v22, %v2802_v13  ;;  %v3482_v8 = vmul.f32 -1.442695, %v2816_v56 }
0x2a87   :  { %v2804_v39 = vpop.f32.mrf.mxu1 }
0x2a88   :  { %3727 = vtanh.f32 %v2820_v14  ;;  %v3483_v6 = vmul.f32 -1.442695, %v2820_v14 }
0x2a89   :  { %v2805_v15 = vpop.f32.mrf.mxu1 }
0x2a8a   :  { %3729 = vpow2.f32 %v3483_v6 }
0x2a8b   :  { %3731 = vpow2.f32 %v3482_v8 }
0x2a93   :  { %v3726_v16 = vpop.eup %3725 }
0x2a94   :  { %2834 = vrot.lane.b32.xlu1 %v3726_v16, %s3791_s17  ;;  %v3367_v16 = vld [vmem:[%s4932_s1 + $0x6] sm:$0x3] }
0x2a95   :  { %v3728_v17 = vpop.eup %3727  ;;  %142 = vst [vmem:[#allocation5 + $0x2] sm:$0x3] %v3367_v16 }
0x2a96   :  { %2880 = vrot.lane.b32.xlu0 %v3728_v17, %s3791_s17  ;;  %v3002_v17 = vunpack.c.l.bf16 %v3001_v59 }
0x2a97   :  { %v3730_v25 = vpop.eup %3729 }
0x2a98   :  { %v2874_v9 = vadd.f32 1.0, %v3730_v25  ;;  %v3732_v26 = vpop.eup %3731 }
0x2a99   :  { %v2824_v10 = vadd.f32 1.0, %v3732_v26 }
0x2a9a   :  { %2755 = vrot.lane.b32.xlu0 %v2733_v5, %s3791_s17  ;;  %3733 = vrcp.f32 %v2874_v9 }
0x2a9b   :  { %3735 = vrcp.f32 %v2824_v10 }
0x2aa7   :  { %v3734_v37 = vpop.eup %3733 }
0x2aa8   :  { %v3736_v24 = vpop.eup %3735 }
0x2b06   :  { %v2835_v21 = vpop.permute.xlu1 %2834 }
0x2b07   :  { %v2837_v45 = vmul.f32 %v3736_v24, %v2835_v21 }
0x2b08   :  { %v2881_v19 = vpop.permute.xlu0 %2880 }
0x2b09   :  { %v2883_v0 = vmul.f32 %v3734_v37, %v2881_v19 }
0x2b0b   :  { %2885 = vrot.lane.b32.xlu0 %v2883_v0, %s3791_s17 }
0x2b0c   :  { %v2756_v44 = vpop.permute.xlu0 %2755 }
0x2b0d   :  { %v2758_v46 = vsel %vm506_vm3, %v2683_v20, %v2756_v44 }
0x2b0e   :  { %2759 = vst.msk [vmem:[#allocation3] sm:$0xf] %vm277_vm0, %v2758_v46 }
0x2b0f   :  { %2839 = vrot.lane.b32.xlu0 %v2837_v45, %s3791_s17 }
0x2b15   :  { %v4799_v48 = vld [vmem:[#allocation3] sm:$0xf] }
0x2b16   :  { %2829 = vrot.lane.b32.xlu1 %v4799_v48, %s3791_s17  ;;  %v2878_v49 = vmul.f32 %v3734_v37, %v4799_v48 }
0x2b1a   :  { %2912 = vperm.xlu1 %3503, %v2812_v4  }
0x2b1e   :  { %2897 = vperm.xlu1 %3503, %v3481_v47  }
0x2b7d   :  { %v2886_v50 = vpop.permute.xlu0 %2885 }
0x2b7e   :  { %v2888_v42 = vadd.f32 %v2886_v50, %v2878_v49 }
0x2b80   :  { %3737 = vtanh.f32 %v2888_v42 }
0x2b81   :  { %v2840_v53 = vpop.permute.xlu0 %2839 }
0x2b88   :  { %v2830_v51 = vpop.permute.xlu1 %2829 }
0x2b89   :  { %v2832_v52 = vmul.f32 %v3736_v24, %v2830_v51 }
0x2b8b   :  { %v2842_v28 = vadd.f32 %v2840_v53, %v2832_v52 }
0x2b8d   :  { %v3738_v30 = vpop.eup %3737  ;;  %3739 = vtanh.f32 %v2842_v28 }
0x2b8e   :  { %2891 = vrot.lane.b32.xlu0 %v3738_v30, %s3791_s17 }
0x2b95   :  { %v2913_v57 = vpop.permute.xlu1 %2912 }
0x2b96   :  { %v2929_v40 = vmul.f32 %v2913_v57, %v4772_v18  ;;  %v2915_v60 = vmul.f32 %v2913_v57, %v4799_v48 }
0x2b99   :  { %v2898_v61 = vpop.permute.xlu1 %2897 }
0x2b9a   :  { %v3740_v43 = vpop.eup %3739 }
0x2b9b   :  { %2845 = vrot.lane.b32.xlu0 %v3740_v43, %s3791_s17  ;;  %v3488_v43 = vld [vmem:[%s4934_s3 + $0x4] sm:$0xf] }
0x2b9f   :  { %2931 = vrot.lane.b32.xlu0 %v2929_v40, %s3792_s22 }
0x2ba3   :  { %2866 = vperm.xlu0 %3504, %v2811_v31  }
0x2c00   :  { %v2892_v23 = vpop.permute.xlu0 %2891 }
0x2c01   :  { %v2894_v32 = vmul.f32 %v3734_v37, %v2892_v23 }
0x2c03   :  { %2901 = vrot.lane.b32.xlu1 %v2894_v32, %s3793_s23 }
0x2c07   :  { %2851 = vperm.xlu1 %3503, %v3480_v29  }
0x2c0d   :  { %v2846_v33 = vpop.permute.xlu0 %2845 }
0x2c0e   :  { %v2848_v34 = vmul.f32 %v3736_v24, %v2846_v33 }
0x2c10   :  { %2855 = vrot.lane.b32.xlu1 %v2848_v34, %s3793_s23 }
0x2c11   :  { %v2932_v36 = vpop.permute.xlu0 %2931 }
0x2c14   :  { %2906 = vrot.lane.b32.xlu1 %v2888_v42, %s3792_s22 }
0x2c1e   :  { %v2867_v22 = vpop.permute.xlu0 %2866 }
0x2c1f   :  { %v2927_v58 = vmul.f32 %v2867_v22, %v4772_v18  ;;  %v3005_v18 = vld [vmem:[#allocation5 + $0x2] sm:$0x3]  ;;  %v2869_v49 = vmul.f32 %v2867_v22, %v4799_v48  ;;  %v2999_v48 = vsub.f32 1.0, %v3488_v43 }
0x2c20   :  { %v3006_v1 = vunpack.c.l.bf16 %v3005_v18 }
0x2c75   :  { %v2902_v35 = vpop.permute.xlu1 %2901 }
0x2c76   :  { %v2904_v41 = vmul.f32 %v2902_v35, %v2898_v61 }
0x2c78   :  { %v2924_v62 = vpack.c.bf16 %v2904_v41, %v2904_v41  ;;  %v2934_v63 = vadd.f32 %v2932_v36, %v2904_v41  ;;  %v3487_v36 = vld [vmem:[%s4933_s2 + $0x38] sm:$0xf] }
0x2c7a   :  { %3485 = vst.msk [vmem:[%s4937_s6 + $0x4] sm:$0x3] %vm489_vm2, %v2924_v62  ;;  %2936 = vrot.lane.b32.xlu0 %v2934_v63, %s3791_s17  ;;  %v2998_v63 = vsub.f32 1.0, %v3487_v36 }
0x2c7e   :  { %2917 = vrot.lane.b32.xlu0 %v2915_v60, %s3792_s22 }
0x2c82   :  { %v2852_v54 = vpop.permute.xlu1 %2851  ;;  %2860 = vrot.lane.b32.xlu0 %v2842_v28, %s3792_s22 }
0x2c86   :  { %v2856_v12 = vpop.permute.xlu1 %2855 }
0x2c87   :  { %v2858_v55 = vmul.f32 %v2856_v12, %v2852_v54 }
0x2c89   :  { %v2921_v2 = vpack.c.bf16 %v2858_v55, %v2858_v55  ;;  %v2928_v56 = vadd.f32 %v2927_v58, %v2858_v55 }
0x2c8a   :  { %v2907_v10 = vpop.permute.xlu1 %2906 }
0x2c8b   :  { %3484 = vst.msk [vmem:[%s4936_s5 + $0x1a] sm:$0x3] %vm489_vm2, %v2921_v2  ;;  %v2909_v37 = vmul.f32 %v2907_v10, %v2898_v61 }
0x2cec   :  { %v2937_v13 = vpop.permute.xlu0 %2936 }
0x2ced   :  { %v2939_v14 = vsel %vm506_vm3, %v2928_v56, %v2937_v13 }
0x2cee   :  { %2940 = vst.msk [vmem:[#allocation2] sm:$0xf] %vm277_vm0, %v2939_v14  ;;  %v60_v14 = vld [vmem:[%s4931_s0 + $0x3c] sm:$0x3] }
0x2cef   :  { %61 = vst [vmem:[#allocation4 + $0x1e] sm:$0x3] %v60_v14 }
0x2cf0   :  { %v2918_v11 = vpop.permute.xlu0 %2917 }
0x2cf1   :  { %v2920_v19 = vadd.f32 %v2918_v11, %v2909_v37 }
0x2cf4   :  { %v2861_v45 = vpop.permute.xlu0 %2860 }
0x2cf5   :  { %v4832_v39 = vld [vmem:[#allocation2] sm:$0xf]  ;;  %v2863_v46 = vmul.f32 %v2861_v45, %v2852_v54 }
0x2cf6   :  { %v2949_v15 = vpack.c.bf16 %v4832_v39, %v4832_v39  ;;  %v3187_v10 = vld [vmem:[#allocation4 + $0x1e] sm:$0x3] }
0x2cf7   :  { %v2870_v51 = vadd.f32 %v2869_v49, %v2863_v46 }
0x2cf8   :  { %3486 = vmatmul.mubr.msk.bf16.vlgmr.msra.gmra.mxu0 %vm331_vm1, %v2949_v15 }
0x2db8   :  { %v2987_v3 = vpop.f32.mrf.mxu0 }
0x2db9   :  { %v3003_v5 = vadd.f32 %v3002_v17, %v2987_v3 }
0x2dba   :  { %v2989_v6 = vpop.f32.mrf.mxu0 }
0x2dbb   :  { %3741 = vtanh.f32 %v3003_v5  ;;  %v3007_v8 = vadd.f32 %v3006_v1, %v2989_v6  ;;  %v3489_v0 = vmul.f32 -1.442695, %v3003_v5 }
0x2dbc   :  { %v2991_v25 = vpop.f32.mrf.mxu0 }
0x2dbd   :  { %3743 = vtanh.f32 %v3007_v8  ;;  %v3490_v38 = vmul.f32 -1.442695, %v3007_v8 }
0x2dbe   :  { %v2992_v9 = vpop.f32.mrf.mxu0 }
0x2dbf   :  { %3745 = vpow2.f32 %v3490_v38 }
0x2dc0   :  { %3747 = vpow2.f32 %v3489_v0 }
0x2dc8   :  { %v3742_v26 = vpop.eup %3741 }
0x2dc9   :  { %3021 = vrot.lane.b32.xlu0 %v3742_v26, %s3791_s17  ;;  %v3366_v26 = vld [vmem:[%s4932_s1 + $0x2] sm:$0x3] }
0x2dca   :  { %v3744_v27 = vpop.eup %3743  ;;  %140 = vst [vmem:[#allocation5] sm:$0x3] %v3366_v26 }
0x2dcb   :  { %3067 = vrot.lane.b32.xlu1 %v3744_v27, %s3791_s17  ;;  %v3188_v27 = vunpack.c.l.bf16 %v3187_v10 }
0x2dcc   :  { %v3746_v21 = vpop.eup %3745 }
0x2dcd   :  { %v3061_v20 = vadd.f32 1.0, %v3746_v21  ;;  %v3748_v24 = vpop.eup %3747 }
0x2dce   :  { %v3011_v44 = vadd.f32 1.0, %v3748_v24 }
0x2dcf   :  { %2942 = vrot.lane.b32.xlu1 %v2920_v19, %s3791_s17  ;;  %3749 = vrcp.f32 %v3061_v20 }
0x2dd0   :  { %3751 = vrcp.f32 %v3011_v44 }
0x2ddc   :  { %v3750_v47 = vpop.eup %3749 }
0x2ddd   :  { %v3752_v52 = vpop.eup %3751 }
0x2e3b   :  { %v3022_v42 = vpop.permute.xlu0 %3021 }
0x2e3c   :  { %v3024_v28 = vmul.f32 %v3752_v52, %v3022_v42 }
0x2e3d   :  { %v3068_v4 = vpop.permute.xlu1 %3067 }
0x2e3e   :  { %v3070_v50 = vmul.f32 %v3750_v47, %v3068_v4 }
0x2e40   :  { %3072 = vrot.lane.b32.xlu1 %v3070_v50, %s3791_s17 }
0x2e41   :  { %v2943_v53 = vpop.permute.xlu1 %2942 }
0x2e42   :  { %v2945_v30 = vsel %vm506_vm3, %v2870_v51, %v2943_v53 }
0x2e43   :  { %2946 = vst.msk [vmem:[#allocation3] sm:$0xf] %vm277_vm0, %v2945_v30 }
0x2e44   :  { %3026 = vrot.lane.b32.xlu1 %v3024_v28, %s3791_s17 }
0x2e4a   :  { %v4851_v57 = vld [vmem:[#allocation3] sm:$0xf] }
0x2e4b   :  { %3016 = vrot.lane.b32.xlu0 %v4851_v57, %s3791_s17  ;;  %v3065_v29 = vmul.f32 %v3750_v47, %v4851_v57 }
0x2e4f   :  { %3099 = vperm.xlu0 %3504, %v2999_v48  }
0x2e53   :  { %3084 = vperm.xlu0 %3504, %v3488_v43  }
0x2eb2   :  { %v3073_v40 = vpop.permute.xlu1 %3072 }
0x2eb3   :  { %v3075_v31 = vadd.f32 %v3073_v40, %v3065_v29 }
0x2eb5   :  { %3753 = vtanh.f32 %v3075_v31 }
0x2eb6   :  { %v3027_v33 = vpop.permute.xlu1 %3026 }
0x2ebd   :  { %v3017_v23 = vpop.permute.xlu0 %3016 }
0x2ebe   :  { %v3019_v32 = vmul.f32 %v3752_v52, %v3017_v23 }
0x2ec0   :  { %v3029_v34 = vadd.f32 %v3027_v33, %v3019_v32 }
0x2ec2   :  { %v3754_v61 = vpop.eup %3753  ;;  %3755 = vtanh.f32 %v3029_v34 }
0x2ec3   :  { %3078 = vrot.lane.b32.xlu1 %v3754_v61, %s3791_s17 }
0x2eca   :  { %v3100_v41 = vpop.permute.xlu0 %3099 }
0x2ecb   :  { %v3116_v62 = vmul.f32 %v3100_v41, %v4832_v39  ;;  %v3102_v15 = vmul.f32 %v3100_v41, %v4851_v57 }
0x2ece   :  { %v3085_v55 = vpop.permute.xlu0 %3084 }
0x2ecf   :  { %v3756_v35 = vpop.eup %3755 }
0x2ed0   :  { %3032 = vrot.lane.b32.xlu1 %v3756_v35, %s3791_s17  ;;  %v3183_v35 = vld [vmem:[%s4934_s3] sm:$0xf] }
0x2ed4   :  { %3118 = vrot.lane.b32.xlu1 %v3116_v62, %s3792_s22 }
0x2ed8   :  { %3053 = vperm.xlu1 %3503, %v2998_v63  }
0x2f35   :  { %v3079_v7 = vpop.permute.xlu1 %3078 }
0x2f36   :  { %v3081_v60 = vmul.f32 %v3750_v47, %v3079_v7 }
0x2f38   :  { %3088 = vrot.lane.b32.xlu0 %v3081_v60, %s3793_s23 }
0x2f3c   :  { %3038 = vperm.xlu0 %3504, %v3487_v36  }
0x2f42   :  { %v3033_v54 = vpop.permute.xlu1 %3032 }
0x2f43   :  { %v3035_v12 = vmul.f32 %v3752_v52, %v3033_v54 }
0x2f45   :  { %3042 = vrot.lane.b32.xlu0 %v3035_v12, %s3793_s23 }
0x2f46   :  { %v3119_v58 = vpop.permute.xlu1 %3118 }
0x2f49   :  { %3093 = vrot.lane.b32.xlu0 %v3075_v31, %s3792_s22 }
0x2f53   :  { %v3054_v1 = vpop.permute.xlu1 %3053 }
0x2f54   :  { %v3114_v3 = vmul.f32 %v3054_v1, %v4832_v39  ;;  %v3190_v39 = vld [vmem:[#allocation5] sm:$0x3]  ;;  %v3056_v29 = vmul.f32 %v3054_v1, %v4851_v57  ;;  %v3185_v57 = vsub.f32 1.0, %v3183_v35 }
0x2f55   :  { %v3191_v11 = vunpack.c.l.bf16 %v3190_v39 }
0x2faa   :  { %v3089_v2 = vpop.permute.xlu0 %3088 }
0x2fab   :  { %v3091_v22 = vmul.f32 %v3089_v2, %v3085_v55 }
0x2fad   :  { %v3111_v56 = vpack.c.bf16 %v3091_v22, %v3091_v22  ;;  %v3121_v13 = vadd.f32 %v3119_v58, %v3091_v22  ;;  %v3494_v58 = vld [vmem:[%s4933_s2 + $0x3c] sm:$0xf] }
0x2faf   :  { %3492 = vst.msk [vmem:[%s4937_s6 + $0x2] sm:$0x3] %vm489_vm2, %v3111_v56  ;;  %3123 = vrot.lane.b32.xlu1 %v3121_v13, %s3791_s17  ;;  %v3184_v13 = vsub.f32 1.0, %v3494_v58 }
0x2fb3   :  { %3104 = vrot.lane.b32.xlu1 %v3102_v15, %s3792_s22 }
0x2fb7   :  { %3047 = vrot.lane.b32.xlu1 %v3029_v34, %s3792_s22  ;;  %v3039_v16 = vpop.permute.xlu0 %3038 }
0x2fbb   :  { %v3043_v59 = vpop.permute.xlu0 %3042 }
0x2fbc   :  { %v3045_v18 = vmul.f32 %v3043_v59, %v3039_v16 }
0x2fbe   :  { %v3108_v17 = vpack.c.bf16 %v3045_v18, %v3045_v18  ;;  %v3115_v5 = vadd.f32 %v3114_v3, %v3045_v18 }
0x2fbf   :  { %v3094_v44 = vpop.permute.xlu0 %3093 }
0x2fc0   :  { %3491 = vst.msk [vmem:[%s4936_s5 + $0x1c] sm:$0x3] %vm489_vm2, %v3108_v17  ;;  %v3096_v47 = vmul.f32 %v3094_v44, %v3085_v55 }
0x3021   :  { %v3124_v6 = vpop.permute.xlu1 %3123 }
0x3022   :  { %v3126_v8 = vsel %vm506_vm3, %v3115_v5, %v3124_v6 }
0x3023   :  { %3127 = vst.msk [vmem:[#allocation2] sm:$0xf] %vm277_vm0, %v3126_v8 }
0x3025   :  { %v3105_v46 = vpop.permute.xlu1 %3104 }
0x3026   :  { %v3107_v4 = vadd.f32 %v3105_v46, %v3096_v47 }
0x3029   :  { %v3048_v28 = vpop.permute.xlu1 %3047 }
0x302a   :  { %v4884_v25 = vld [vmem:[#allocation2] sm:$0xf]  ;;  %v3050_v30 = vmul.f32 %v3048_v28, %v3039_v16 }
0x302b   :  { %v3136_v9 = vpack.c.bf16 %v4884_v25, %v4884_v25 }
0x302c   :  { %v3057_v23 = vadd.f32 %v3056_v29, %v3050_v30 }
0x302d   :  { %3493 = vmatmul.mubr.msk.bf16.vlgmr.msra.gmra.mxu1 %vm331_vm1, %v3136_v9 }
0x30ed   :  { %v3174_v37 = vpop.f32.mrf.mxu1 }
0x30ee   :  { %v3189_v19 = vadd.f32 %v3188_v27, %v3174_v37 }
0x30ef   :  { %v3176_v38 = vpop.f32.mrf.mxu1 }
0x30f0   :  { %3757 = vtanh.f32 %v3189_v19  ;;  %v3192_v0 = vadd.f32 %v3191_v11, %v3176_v38  ;;  %v3495_v50 = vmul.f32 -1.442695, %v3189_v19 }
0x30f1   :  { %v3178_v21 = vpop.f32.mrf.mxu1 }
0x30f2   :  { %3759 = vtanh.f32 %v3192_v0  ;;  %v3496_v49 = vmul.f32 -1.442695, %v3192_v0 }
0x30f3   :  { %v3179_v20 = vpop.f32.mrf.mxu1 }
0x30f4   :  { %3761 = vpow2.f32 %v3496_v49 }
0x30f5   :  { %3763 = vpow2.f32 %v3495_v50 }
0x30fd   :  { %v3758_v24 = vpop.eup %3757 }
0x30fe   :  { %3206 = vrot.lane.b32.xlu1 %v3758_v24, %s3791_s17 }
0x30ff   :  { %v3760_v45 = vpop.eup %3759 }
0x3100   :  { %3252 = vrot.lane.b32.xlu0 %v3760_v45, %s3791_s17 }
0x3101   :  { %v3762_v42 = vpop.eup %3761 }
0x3102   :  { %v3246_v51 = vadd.f32 1.0, %v3762_v42  ;;  %v3764_v52 = vpop.eup %3763 }
0x3103   :  { %v3196_v53 = vadd.f32 1.0, %v3764_v52 }
0x3104   :  { %3129 = vrot.lane.b32.xlu0 %v3107_v4, %s3791_s17  ;;  %3765 = vrcp.f32 %v3246_v51 }
0x3105   :  { %3767 = vrcp.f32 %v3196_v53 }
0x3111   :  { %v3766_v43 = vpop.eup %3765 }
0x3112   :  { %v3768_v32 = vpop.eup %3767 }
0x3170   :  { %v3207_v31 = vpop.permute.xlu1 %3206 }
0x3171   :  { %v3209_v34 = vmul.f32 %v3768_v32, %v3207_v31 }
0x3172   :  { %v3253_v48 = vpop.permute.xlu0 %3252 }
0x3173   :  { %v3255_v40 = vmul.f32 %v3766_v43, %v3253_v48 }
0x3175   :  { %3257 = vrot.lane.b32.xlu0 %v3255_v40, %s3791_s17 }
0x3176   :  { %v3130_v33 = vpop.permute.xlu0 %3129 }
0x3177   :  { %v3132_v61 = vsel %vm506_vm3, %v3057_v23, %v3130_v33 }
0x3178   :  { %3133 = vst.msk [vmem:[#allocation3] sm:$0xf] %vm277_vm0, %v3132_v61 }
0x3179   :  { %3211 = vrot.lane.b32.xlu0 %v3209_v34, %s3791_s17 }
0x317f   :  { %v3135_v41 = vld [vmem:[#allocation3] sm:$0xf] }
0x3180   :  { %3201 = vrot.lane.b32.xlu1 %v3135_v41, %s3791_s17  ;;  %v3250_v36 = vmul.f32 %v3766_v43, %v3135_v41 }
0x3184   :  { %3284 = vperm.xlu1 %3503, %v3185_v57  }
0x3188   :  { %3269 = vperm.xlu1 %3503, %v3183_v35  }
0x31e7   :  { %v3258_v62 = vpop.permute.xlu0 %3257 }
0x31e8   :  { %v3260_v63 = vadd.f32 %v3258_v62, %v3250_v36 }
0x31ea   :  { %3769 = vtanh.f32 %v3260_v63 }
0x31eb   :  { %v3212_v54 = vpop.permute.xlu0 %3211 }
0x31f2   :  { %v3202_v7 = vpop.permute.xlu1 %3201 }
0x31f3   :  { %v3204_v60 = vmul.f32 %v3768_v32, %v3202_v7 }
0x31f5   :  { %v3214_v12 = vadd.f32 %v3212_v54, %v3204_v60 }
0x31f7   :  { %v3770_v55 = vpop.eup %3769  ;;  %3771 = vtanh.f32 %v3214_v12 }
0x31f8   :  { %3263 = vrot.lane.b32.xlu0 %v3770_v55, %s3791_s17 }
0x31ff   :  { %v3285_v22 = vpop.permute.xlu1 %3284 }
0x3200   :  { %v3300_v56 = vmul.f32 %v3285_v22, %v4884_v25  ;;  %v3287_v16 = vmul.f32 %v3285_v22, %v3135_v41 }
0x3203   :  { %v3270_v17 = vpop.permute.xlu1 %3269 }
0x3204   :  { %v3772_v2 = vpop.eup %3771 }
0x3205   :  { %3217 = vrot.lane.b32.xlu0 %v3772_v2, %s3791_s17 }
0x3209   :  { %3278 = vrot.lane.b32.xlu0 %v3260_v63, %s3792_s22 }
0x320d   :  { %3302 = vrot.lane.b32.xlu0 %v3300_v56, %s3792_s22 }
0x3211   :  { %3238 = vperm.xlu0 %3504, %v3184_v13  }
0x3215   :  { %3232 = vrot.lane.b32.xlu0 %v3214_v12, %s3792_s22 }
0x326a   :  { %v3264_v14 = vpop.permute.xlu0 %3263 }
0x326b   :  { %v3266_v15 = vmul.f32 %v3766_v43, %v3264_v14 }
0x326d   :  { %3273 = vrot.lane.b32.xlu1 %v3266_v15, %s3793_s23 }
0x3271   :  { %3289 = vrot.lane.b32.xlu1 %v3287_v16, %s3792_s22 }
0x3275   :  { %3223 = vperm.xlu1 %3503, %v3494_v58  }
0x3277   :  { %v3218_v59 = vpop.permute.xlu0 %3217 }
0x3278   :  { %v3220_v18 = vmul.f32 %v3768_v32, %v3218_v59 }
0x327a   :  { %3227 = vrot.lane.b32.xlu1 %v3220_v18, %s3793_s23 }
0x327b   :  { %v3279_v1 = vpop.permute.xlu0 %3278 }
0x327c   :  { %v3281_v8 = vmul.f32 %v3279_v1, %v3270_v17 }
0x327f   :  { %v3303_v6 = vpop.permute.xlu0 %3302 }
0x328c   :  { %v3239_v38 = vpop.permute.xlu0 %3238 }
0x328d   :  { %v3298_v21 = vmul.f32 %v3239_v38, %v4884_v25  ;;  %v3241_v24 = vmul.f32 %v3239_v38, %v3135_v41 }
0x3290   :  { %v3233_v0 = vpop.permute.xlu0 %3232 }
0x32df   :  { %v3274_v3 = vpop.permute.xlu1 %3273 }
0x32e0   :  { %v3276_v5 = vmul.f32 %v3274_v3, %v3270_v17 }
0x32e2   :  { %v3296_v9 = vpack.c.bf16 %v3276_v5, %v3276_v5  ;;  %v3305_v26 = vadd.f32 %v3303_v6, %v3276_v5 }
0x32e3   :  { %v3290_v10 = vpop.permute.xlu1 %3289 }
0x32e4   :  { %3297 = vst.msk [vmem:[%s4937_s6] sm:$0x3] %vm489_vm2, %v3296_v9  ;;  %v3292_v39 = vadd.f32 %v3290_v10, %v3281_v8  ;;  %3307 = vrot.lane.b32.xlu1 %v3305_v26, %s3791_s17 }
0x32e6   :  { %3313 = vrot.lane.b32.xlu0 %v3292_v39, %s3791_s17 }
0x32f0   :  { %v3224_v27 = vpop.permute.xlu1 %3223 }
0x32f1   :  { %v3235_v20 = vmul.f32 %v3233_v0, %v3224_v27 }
0x32f3   :  { %v3242_v46 = vadd.f32 %v3241_v24, %v3235_v20 }
0x32f4   :  { %v3228_v11 = vpop.permute.xlu1 %3227 }
0x32f5   :  { %v3230_v37 = vmul.f32 %v3228_v11, %v3224_v27 }
0x32f7   :  { %v3293_v19 = vpack.c.bf16 %v3230_v37, %v3230_v37  ;;  %v3299_v44 = vadd.f32 %v3298_v21, %v3230_v37 }
0x32f9   :  { %3497 = vst.msk [vmem:[%s4936_s5 + $0x1e] sm:$0x3] %vm489_vm2, %v3293_v19 }
0x3356   :  { %v3308_v45 = vpop.permute.xlu1 %3307 }
0x3357   :  { %v3310_v47 = vsel %vm506_vm3, %v3299_v44, %v3308_v45 }
0x3358   :  { %3311 = vst.msk [vmem:[#allocation2] sm:$0xf] %vm277_vm0, %v3310_v47  ;;  %v3314_v4 = vpop.permute.xlu0 %3313 }
0x3359   :  { %v3316_v49 = vsel %vm506_vm3, %v3242_v46, %v3314_v4 }
0x335a   :  { %3317 = vst.msk [vmem:[#allocation3] sm:$0xf] %vm277_vm0, %v3316_v49 }

</bundles_post_ra>
